<compile_context>
chip_gen: v6e
topology: v6e:2x2x1
jax: 0.10.0
libtpu: 0.0.40
codegen_flags: <defaults>
</compile_context>

<pallas_src>
import functools

import jax
import jax.numpy as jnp
from jax.experimental import pallas as pl
from jax.experimental.pallas import tpu as pltpu

VMEM_LIMIT = 32 * 1024 * 1024


# ----------------------------------------------------------------------------
# helpers
# ----------------------------------------------------------------------------
def _round_up(x, m):
    return -(-x // m) * m


def _row_tile(m, pref):
    """(tile, padded_dim) for a sublane-major (second-to-last) dimension."""
    if m <= pref:
        pm = _round_up(m, 8)
        return pm, pm
    for c in (pref, pref // 2, 128):
        if c >= 128 and m % c == 0:
            return c, m
    return 128, _round_up(m, 128)


def _col_tile(n, pref):
    """(tile, padded_dim) for a lane-major (last) dimension."""
    if n < 128:
        return n, n          # full-dim block: legal, avoids pad + slice copies
    for c in (pref, 128):
        if n % c == 0:
            return c, n
    return 128, _round_up(n, 128)


# ----------------------------------------------------------------------------
# Pallas kernels
# ----------------------------------------------------------------------------
def _matmul_kernel(a_ref, b_ref, o_ref):
    o_ref[...] = jnp.dot(a_ref[...], b_ref[...],
                         preferred_element_type=jnp.float32)


def pallas_matmul(a, b):
    """(M,K) @ (K,N) -> (M,N) f32.  bf16 MXU operands, single full-K block."""
    M, K = a.shape
    K2, N = b.shape
    assert K == K2
    a = a.astype(jnp.bfloat16)
    b = b.astype(jnp.bfloat16)
    tm, pm = _row_tile(M, 256)
    tn, pn = _col_tile(N, 256)
    if pm != M:
        a = jnp.pad(a, ((0, pm - M), (0, 0)))
    if pn != N:
        b = jnp.pad(b, ((0, 0), (0, pn - N)))
    out = pl.pallas_call(
        _matmul_kernel,
        out_shape=jax.ShapeDtypeStruct((pm, pn), jnp.float32),
        grid_spec=pltpu.PrefetchScalarGridSpec(
            num_scalar_prefetch=0,
            grid=(pm // tm, pn // tn),
            in_specs=[pl.BlockSpec((tm, K), lambda i, j: (i, 0)),
                      pl.BlockSpec((K, tn), lambda i, j: (0, j))],
            out_specs=pl.BlockSpec((tm, tn), lambda i, j: (i, j))),
        compiler_params=pltpu.CompilerParams(
            dimension_semantics=("parallel", "parallel"),
            vmem_limit_bytes=VMEM_LIMIT),
        cost_estimate=pl.CostEstimate(
            flops=2 * pm * pn * K, transcendentals=0,
            bytes_accessed=(pm * K + K * pn) * 2 + pm * pn * 4),
    )(a, b)
    if pm != M or pn != N:
        out = out[:M, :N]
    return out


def _conv3x3_s1_kernel(x_ref, w_ref, o_ref, *, tap_offsets, cin, rows):
    # x_ref: (Hp*Wp, Cin) one padded image flattened; w_ref: (9*Cin, Cout) bf16.
    # Accumulate 9 shifted 1x1 matmuls (f32 accumulation on the MXU).
    acc = None
    for t, off in enumerate(tap_offsets):
        a = x_ref[pl.ds(off, rows), :].astype(jnp.bfloat16)
        w = w_ref[pl.ds(t * cin, cin), :]
        d = jnp.dot(a, w, preferred_element_type=jnp.float32)
        acc = d if acc is None else acc + d
    o_ref[...] = acc


def conv3x3_s1(x_nhwc, w_oihw):
    """3x3 / stride 1 / padding 1 conv without im2col materialization."""
    N, H, W, Cin = x_nhwc.shape
    Cout = w_oihw.shape[0]
    OH, OW = H, W
    Hp, Wp = H + 3, W + 2         # 1 top + 2 bottom rows, 1 left + 1 right col
    rows = OH * Wp                # Wp columns computed per row; extras discarded
    xp = jnp.pad(x_nhwc, ((0, 0), (1, 2), (1, 1), (0, 0)))
    xflat = xp.reshape(N, Hp * Wp, Cin)
    wm = jnp.transpose(w_oihw, (2, 3, 1, 0)).reshape(9 * Cin, Cout)
    wm = wm.astype(jnp.bfloat16)
    tap_offsets = tuple(kh * Wp + kw for kh in range(3) for kw in range(3))
    out = pl.pallas_call(
        functools.partial(_conv3x3_s1_kernel, tap_offsets=tap_offsets,
                          cin=Cin, rows=rows),
        out_shape=jax.ShapeDtypeStruct((N, rows, Cout), jnp.float32),
        grid_spec=pltpu.PrefetchScalarGridSpec(
            num_scalar_prefetch=0,
            grid=(N,),
            in_specs=[pl.BlockSpec((None, Hp * Wp, Cin), lambda n: (n, 0, 0)),
                      pl.BlockSpec((9 * Cin, Cout), lambda n: (0, 0))],
            out_specs=pl.BlockSpec((None, rows, Cout), lambda n: (n, 0, 0))),
        compiler_params=pltpu.CompilerParams(
            dimension_semantics=("parallel",),
            vmem_limit_bytes=VMEM_LIMIT),
        cost_estimate=pl.CostEstimate(
            flops=2 * N * rows * 9 * Cin * Cout, transcendentals=0,
            bytes_accessed=N * (Hp * Wp * Cin * 4 + rows * Cout * 4)
            + 9 * Cin * Cout * 2),
    )(xflat, wm)
    return out.reshape(N, OH, Wp, Cout)[:, :, :OW, :]


def _bn_stats_kernel(x_ref, s_ref):
    @pl.when(pl.program_id(0) == 0)
    def _():
        s_ref[...] = jnp.zeros_like(s_ref)

    x = x_ref[...]
    s_ref[0:1, :] += jnp.sum(x, axis=0, keepdims=True)
    s_ref[1:2, :] += jnp.sum(x * x, axis=0, keepdims=True)


def _bn_norm_kernel(x_ref, *rest, count, use_res, relu):
    if use_res:
        res_ref, s_ref, g_ref, b_ref, o_ref = rest
    else:
        s_ref, g_ref, b_ref, o_ref = rest
    s = s_ref[...]
    inv = 1.0 / count
    mean = s[0:1, :] * inv
    var = s[1:2, :] * inv - mean * mean      # biased batch variance
    scale = g_ref[...] * jax.lax.rsqrt(var + 1e-5)
    shift = b_ref[...] - mean * scale
    y = x_ref[...] * scale + shift
    if use_res:
        y = y + res_ref[...]
    if relu:
        y = jnp.maximum(y, 0.0)
    o_ref[...] = y


def bn_act_2d(x2d, gamma, beta, residual2d=None, relu=True):
    """BatchNorm2d (training-mode batch stats) + optional residual + ReLU,
    as two row-tiled Pallas passes over the (M, C) activation."""
    M, C = x2d.shape
    use_res = residual2d is not None
    tm, pm = _row_tile(M, 512)
    if pm != M:
        x2d = jnp.pad(x2d, ((0, pm - M), (0, 0)))
        if use_res:
            residual2d = jnp.pad(residual2d, ((0, pm - M), (0, 0)))
    mt = pm // tm
    row_spec = pl.BlockSpec((tm, C), lambda i: (i, 0))
    vec_spec = pl.BlockSpec((1, C), lambda i: (0, 0))
    stats_spec = pl.BlockSpec((2, C), lambda i: (0, 0))

    stats = pl.pallas_call(
        _bn_stats_kernel,
        out_shape=jax.ShapeDtypeStruct((2, C), jnp.float32),
        grid_spec=pltpu.PrefetchScalarGridSpec(
            num_scalar_prefetch=0, grid=(mt,),
            in_specs=[row_spec], out_specs=stats_spec),
        compiler_params=pltpu.CompilerParams(
            dimension_semantics=("arbitrary",), vmem_limit_bytes=VMEM_LIMIT),
    )(x2d)

    inputs = [x2d] + ([residual2d] if use_res else []) + \
             [stats, gamma.reshape(1, C), beta.reshape(1, C)]
    in_specs = [row_spec] + ([row_spec] if use_res else []) + \
               [stats_spec, vec_spec, vec_spec]
    out = pl.pallas_call(
        functools.partial(_bn_norm_kernel, count=float(M),
                          use_res=use_res, relu=relu),
        out_shape=jax.ShapeDtypeStruct((pm, C), jnp.float32),
        grid_spec=pltpu.PrefetchScalarGridSpec(
            num_scalar_prefetch=0, grid=(mt,),
            in_specs=in_specs, out_specs=row_spec),
        compiler_params=pltpu.CompilerParams(
            dimension_semantics=("parallel",), vmem_limit_bytes=VMEM_LIMIT),
    )(*inputs)
    return out[:M] if pm != M else out


def _maxpool_kernel(*refs):
    o_ref = refs[-1]
    acc = refs[0][...]
    for r in refs[1:-1]:
        acc = jnp.maximum(acc, r[...])
    o_ref[...] = acc


# ----------------------------------------------------------------------------
# Layer wrappers
# ----------------------------------------------------------------------------
def conv1x1(x_nhwc, w_oihw, stride=1):
    if stride != 1:
        x_nhwc = x_nhwc[:, ::stride, ::stride, :]
    N, H, W, C = x_nhwc.shape
    Cout = w_oihw.shape[0]
    a = x_nhwc.reshape(N * H * W, C).astype(jnp.bfloat16)
    wm = jnp.transpose(w_oihw.reshape(Cout, C)).astype(jnp.bfloat16)
    return pallas_matmul(a, wm).reshape(N, H, W, Cout)


def conv2d_im2col(x_nhwc, w_oihw, stride=1, padding=0):
    """General conv via im2col (only the 7x7 stem and the 3x3/stride-2 conv)."""
    N, H, W, C = x_nhwc.shape
    Cout, Cin, KH, KW = w_oihw.shape
    OH = (H + 2 * padding - KH) // stride + 1
    OW = (W + 2 * padding - KW) // stride + 1
    xp = jnp.pad(x_nhwc, ((0, 0), (padding, padding), (padding, padding),
                          (0, 0))).astype(jnp.bfloat16)
    cols = [xp[:, kh:kh + stride * OH:stride, kw:kw + stride * OW:stride, :]
            for kh in range(KH) for kw in range(KW)]
    a = jnp.concatenate(cols, axis=-1).reshape(N * OH * OW, KH * KW * Cin)
    wm = jnp.transpose(w_oihw, (2, 3, 1, 0)).reshape(KH * KW * Cin, Cout)
    return pallas_matmul(a, wm.astype(jnp.bfloat16)).reshape(N, OH, OW, Cout)


def bn_act(x_nhwc, gamma, beta, residual_nhwc=None, relu=True):
    N, H, W, C = x_nhwc.shape
    x2 = x_nhwc.reshape(N * H * W, C)
    r2 = None if residual_nhwc is None else residual_nhwc.reshape(N * H * W, C)
    return bn_act_2d(x2, gamma, beta, r2, relu).reshape(N, H, W, C)


def maxpool_3x3_s2_p1(x_nhwc):
    N, H, W, C = x_nhwc.shape
    k, s, p = 3, 2, 1
    OH = (H + 2 * p - k) // s + 1
    OW = (W + 2 * p - k) // s + 1
    # zero padding is equivalent to -inf padding because the input is post-ReLU
    xp = jnp.pad(x_nhwc, ((0, 0), (p, p), (p, p), (0, 0)))
    M = N * OH * OW
    views = [xp[:, kh:kh + s * OH:s, kw:kw + s * OW:s, :].reshape(M, C)
             for kh in range(k) for kw in range(k)]
    tm, pm = _row_tile(M, 512)
    if pm != M:
        views = [jnp.pad(v, ((0, pm - M), (0, 0))) for v in views]
    row_spec = pl.BlockSpec((tm, C), lambda i: (i, 0))
    out = pl.pallas_call(
        _maxpool_kernel,
        out_shape=jax.ShapeDtypeStruct((pm, C), jnp.float32),
        grid_spec=pltpu.PrefetchScalarGridSpec(
            num_scalar_prefetch=0, grid=(pm // tm,),
            in_specs=[row_spec] * (k * k), out_specs=row_spec),
        compiler_params=pltpu.CompilerParams(
            dimension_semantics=("parallel",), vmem_limit_bytes=VMEM_LIMIT),
    )(*views)
    out = out[:M] if pm != M else out
    return out.reshape(N, OH, OW, C)


def bottleneck(x, p, stride, has_down):
    identity = x
    out = conv1x1(x, p["w1"])
    out = bn_act(out, p["g1"], p["b1"], relu=True)
    if stride == 1:
        out = conv3x3_s1(out, p["w2"])
    else:
        out = conv2d_im2col(out, p["w2"], stride=stride, padding=1)
    out = bn_act(out, p["g2"], p["b2"], relu=True)
    out = conv1x1(out, p["w3"])
    if has_down:
        identity = conv1x1(x, p["wd"], stride=stride)
        identity = bn_act(identity, p["gd"], p["bd"], relu=False)
    out = bn_act(out, p["g3"], p["b3"], residual_nhwc=identity, relu=True)
    return out


# ----------------------------------------------------------------------------
# Parameters (deterministic synthetic init; shapes from the module __init__)
# ----------------------------------------------------------------------------
def init_params(key):
    keys = iter(jax.random.split(key, 256))

    def conv_w(cout, cin, kh, kw):
        fan_in = cin * kh * kw
        return jax.random.normal(next(keys), (cout, cin, kh, kw),
                                 jnp.float32) / jnp.sqrt(float(fan_in))

    def bn_p(c):
        g = 1.0 + 0.1 * jax.random.normal(next(keys), (c,), jnp.float32)
        b = 0.1 * jax.random.normal(next(keys), (c,), jnp.float32)
        return g, b

    def block_params(in_c, width, out_c, has_down):
        p = {"w1": conv_w(width, in_c, 1, 1),
             "w2": conv_w(width, width, 3, 3),
             "w3": conv_w(out_c, width, 1, 1)}
        p["g1"], p["b1"] = bn_p(width)
        p["g2"], p["b2"] = bn_p(width)
        p["g3"], p["b3"] = bn_p(out_c)
        if has_down:
            p["wd"] = conv_w(out_c, in_c, 1, 1)
            p["gd"], p["bd"] = bn_p(out_c)
        return p

    params = {"stem_w": conv_w(64, 3, 7, 7)}
    params["stem_g"], params["stem_b"] = bn_p(64)
    # layer1: Bottleneck(64->64->256) x 3, stride 1, downsample on block 0
    params["layer1"] = [block_params(64, 64, 256, True),
                        block_params(256, 64, 256, False),
                        block_params(256, 64, 256, False)]
    # layer2: Bottleneck(->128->512) x 4, stride 2 on block 0 (+downsample)
    params["layer2"] = [block_params(256, 128, 512, True)] + \
                       [block_params(512, 128, 512, False) for _ in range(3)]
    return params


# ----------------------------------------------------------------------------
# Forward (mirrors ResNetShard1.forward; RPC/RRef/device-move glue dropped)
# ----------------------------------------------------------------------------
def resnet_shard1_forward(x_nchw, params):
    x = jnp.transpose(x_nchw, (0, 2, 3, 1))                       # NCHW -> NHWC
    x = conv2d_im2col(x, params["stem_w"], stride=2, padding=3)   # cov2d
    x = bn_act(x, params["stem_g"], params["stem_b"], relu=True)  # BN + ReLU
    x = maxpool_3x3_s2_p1(x)                                      # maxpool
    for i, bp in enumerate(params["layer1"]):                     # make_layer1
        x = bottleneck(x, bp, stride=1, has_down=(i == 0))
    for i, bp in enumerate(params["layer2"]):                     # make_layer2
        x = bottleneck(x, bp, stride=(2 if i == 0 else 1), has_down=(i == 0))
    return jnp.transpose(x, (0, 3, 1, 2))                         # back to NCHW
    # TODO(synk): BatchNorm running_mean/var buffer updates (training-time
    # bookkeeping, not part of the returned activation) are not modelled.


if __name__ == "__main__":
    key = jax.random.PRNGKey(0)
    k_x, k_p = jax.random.split(key)
    x = jax.random.normal(k_x, (2, 3, 32, 32), jnp.float32)       # NCHW input
    params = init_params(k_p)

    fwd = jax.jit(resnet_shard1_forward)
    out = fwd(x, params)
    jax.block_until_ready(out)

    assert out.shape == (2, 512, 4, 4), out.shape
    assert out.dtype == jnp.float32
    assert bool(jnp.all(jnp.isfinite(out)))
    print("KERNEL_OK")
</pallas_src>

<mosaic_0001>
module attributes {stable_mosaic.version = 11 : i64} {
  func.func @_matmul_kernel(%arg0: i32, %arg1: i32, %arg2: memref<256x147xbf16, #tpu.memory_space<vmem>>, %arg3: memref<147x64xbf16, #tpu.memory_space<vmem>>, %arg4: memref<256x64xf32, #tpu.memory_space<vmem>>) attributes {dimension_semantics = [#tpu.dimension_semantics<parallel>, #tpu.dimension_semantics<parallel>], iteration_bounds = array<i64: 2, 1>, scalar_prefetch = 0 : i64, scratch_operands = 0 : i64, tpu.core_type = #tpu.core_type<tc>, window_params = [{transform_indices = @transform_0, window_bounds = array<i64: 256, 147>}, {transform_indices = @transform_1, window_bounds = array<i64: 147, 64>}, {transform_indices = @transform_2, window_bounds = array<i64: 256, 64>}]} {
    %c0 = arith.constant 0 : index
    %c0_0 = arith.constant 0 : index
    %0 = vector.load %arg2[%c0, %c0_0] : memref<256x147xbf16, #tpu.memory_space<vmem>>, vector<256x147xbf16>
    %c0_1 = arith.constant 0 : index
    %c0_2 = arith.constant 0 : index
    %1 = vector.load %arg3[%c0_1, %c0_2] : memref<147x64xbf16, #tpu.memory_space<vmem>>, vector<147x64xbf16>
    %cst = arith.constant dense<0.000000e+00> : vector<256x64xf32>
    %2 = tpu.matmul %0, %1, %cst {dimension_numbers = #tpu.dot_dimension_numbers<[1], [0], [0], [1], [0, 0, 1, 1], [], []>} : vector<256x147xbf16>, vector<147x64xbf16>, vector<256x64xf32> -> vector<256x64xf32>
    %c0_3 = arith.constant 0 : index
    %c0_4 = arith.constant 0 : index
    %3 = vector.load %arg4[%c0_3, %c0_4] : memref<256x64xf32, #tpu.memory_space<vmem>>, vector<256x64xf32>
    tpu.vector_store %arg4[%c0_3, %c0_4], %2 {strides = array<i32>} : memref<256x64xf32, #tpu.memory_space<vmem>>, vector<256x64xf32>,
    return
  }
  func.func @transform_0(%arg0: i32, %arg1: i32) -> (i32, i32) {
    %c0_i32 = arith.constant 0 : i32
    %c0_i32_0 = arith.constant 0 : i32
    return %arg0, %c0_i32 : i32, i32
  }
  func.func @transform_1(%arg0: i32, %arg1: i32) -> (i32, i32) {
    %c0_i32 = arith.constant 0 : i32
    %c0_i32_0 = arith.constant 0 : i32
    return %c0_i32, %arg1 : i32, i32
  }
  func.func @transform_2(%arg0: i32, %arg1: i32) -> (i32, i32) {
    %c0_i32 = arith.constant 0 : i32
    return %arg0, %arg1 : i32, i32
  }
}

module attributes {stable_mosaic.version = 11 : i64} {
  func.func @_bn_stats_kernel(%arg0: i32, %arg1: memref<512x64xf32, #tpu.memory_space<vmem>>, %arg2: memref<2x64xf32, #tpu.memory_space<vmem>>) attributes {dimension_semantics = [#tpu.dimension_semantics<arbitrary>], iteration_bounds = array<i64: 1>, scalar_prefetch = 0 : i64, scratch_operands = 0 : i64, tpu.core_type = #tpu.core_type<tc>, window_params = [{transform_indices = @transform_0, window_bounds = array<i64: 512, 64>}, {pipeline_mode = #tpu.pipeline_mode<synchronous>, transform_indices = @transform_1, window_bounds = array<i64: 2, 64>}]} {
    %c0_i32 = arith.constant 0 : i32
    %0 = arith.cmpi eq, %arg0, %c0_i32 : i32
    %1 = arith.extui %0 : i1 to i32
    %c0_i32_0 = arith.constant 0 : i32
    %2 = arith.cmpi ne, %1, %c0_i32_0 : i32
    scf.if %2 {
      %cst_10 = arith.constant 0.000000e+00 : f32
      %15 = vector.broadcast %cst_10 : f32 to vector<2x64xf32>
      %c0_11 = arith.constant 0 : index
      %c0_12 = arith.constant 0 : index
      %16 = vector.load %arg2[%c0_11, %c0_12] : memref<2x64xf32, #tpu.memory_space<vmem>>, vector<2x64xf32>
      tpu.vector_store %arg2[%c0_11, %c0_12], %15 {strides = array<i32>} : memref<2x64xf32, #tpu.memory_space<vmem>>, vector<2x64xf32>,
    } else {
    }
    %c0 = arith.constant 0 : index
    %c0_1 = arith.constant 0 : index
    %3 = vector.load %arg1[%c0, %c0_1] : memref<512x64xf32, #tpu.memory_space<vmem>>, vector<512x64xf32>
    %c0_2 = arith.constant 0 : index
    %c0_3 = arith.constant 0 : index
    %4 = vector.load %arg2[%c0_2, %c0_3] : memref<2x64xf32, #tpu.memory_space<vmem>>, vector<1x64xf32>
    %cst = arith.constant dense<0.000000e+00> : vector<64xf32>
    %5 = vector.multi_reduction <add>, %3, %cst [0] : vector<512x64xf32> to vector<64xf32>
    %6 = vector.shape_cast %5 : vector<64xf32> to vector<1x64xf32>
    %7 = arith.addf %4, %6 : vector<1x64xf32>
    %c0_4 = arith.constant 0 : index
    %c0_5 = arith.constant 0 : index
    %8 = vector.load %arg2[%c0_4, %c0_5] : memref<2x64xf32, #tpu.memory_space<vmem>>, vector<1x64xf32>
    tpu.vector_store %arg2[%c0_4, %c0_5], %7 {strides = array<i32>} : memref<2x64xf32, #tpu.memory_space<vmem>>, vector<1x64xf32>,
    %c1 = arith.constant 1 : index
    %c0_6 = arith.constant 0 : index
    %9 = vector.load %arg2[%c1, %c0_6] : memref<2x64xf32, #tpu.memory_space<vmem>>, vector<1x64xf32>
    %10 = arith.mulf %3, %3 : vector<512x64xf32>
    %cst_7 = arith.constant dense<0.000000e+00> : vector<64xf32>
    %11 = vector.multi_reduction <add>, %10, %cst_7 [0] : vector<512x64xf32> to vector<64xf32>
    %12 = vector.shape_cast %11 : vector<64xf32> to vector<1x64xf32>
    %13 = arith.addf %9, %12 : vector<1x64xf32>
    %c1_8 = arith.constant 1 : index
    %c0_9 = arith.constant 0 : index
    %14 = vector.load %arg2[%c1_8, %c0_9] : memref<2x64xf32, #tpu.memory_space<vmem>>, vector<1x64xf32>
    tpu.vector_store %arg2[%c1_8, %c0_9], %13 {strides = array<i32>} : memref<2x64xf32, #tpu.memory_space<vmem>>, vector<1x64xf32>,
    return
  }
  func.func @transform_0(%arg0: i32) -> (i32, i32) {
    %c0_i32 = arith.constant 0 : i32
    %c0_i32_0 = arith.constant 0 : i32
    return %arg0, %c0_i32 : i32, i32
  }
  func.func @transform_1(%arg0: i32) -> (i32, i32) {
    %c0_i32 = arith.constant 0 : i32
    %c0_i32_0 = arith.constant 0 : i32
    %c0_i32_1 = arith.constant 0 : i32
    return %c0_i32, %c0_i32_0 : i32, i32
  }
}

module attributes {stable_mosaic.version = 11 : i64} {
  func.func @_bn_norm_kernel(%arg0: i32, %arg1: memref<512x64xf32, #tpu.memory_space<vmem>>, %arg2: memref<2x64xf32, #tpu.memory_space<vmem>>, %arg3: memref<1x64xf32, #tpu.memory_space<vmem>>, %arg4: memref<1x64xf32, #tpu.memory_space<vmem>>, %arg5: memref<512x64xf32, #tpu.memory_space<vmem>>) attributes {dimension_semantics = [#tpu.dimension_semantics<parallel>], iteration_bounds = array<i64: 1>, scalar_prefetch = 0 : i64, scratch_operands = 0 : i64, tpu.core_type = #tpu.core_type<tc>, window_params = [{transform_indices = @transform_0, window_bounds = array<i64: 512, 64>}, {pipeline_mode = #tpu.pipeline_mode<synchronous>, transform_indices = @transform_1, window_bounds = array<i64: 2, 64>}, {pipeline_mode = #tpu.pipeline_mode<synchronous>, transform_indices = @transform_2, window_bounds = array<i64: 1, 64>}, {pipeline_mode = #tpu.pipeline_mode<synchronous>, transform_indices = @transform_3, window_bounds = array<i64: 1, 64>}, {transform_indices = @transform_4, window_bounds = array<i64: 512, 64>}]} {
    %c0 = arith.constant 0 : index
    %c0_0 = arith.constant 0 : index
    %0 = vector.load %arg2[%c0, %c0_0] : memref<2x64xf32, #tpu.memory_space<vmem>>, vector<2x64xf32>
    %1 = vector.extract_strided_slice %0 {offsets = [0, 0], sizes = [1, 64], strides = [1, 1]} : vector<2x64xf32> to vector<1x64xf32>
    %cst = arith.constant 0.001953125 : f32
    %2 = vector.broadcast %cst : f32 to vector<1x64xf32>
    %3 = arith.mulf %1, %2 : vector<1x64xf32>
    %4 = vector.extract_strided_slice %0 {offsets = [1, 0], sizes = [1, 64], strides = [1, 1]} : vector<2x64xf32> to vector<1x64xf32>
    %cst_1 = arith.constant 0.001953125 : f32
    %5 = vector.broadcast %cst_1 : f32 to vector<1x64xf32>
    %6 = arith.mulf %4, %5 : vector<1x64xf32>
    %7 = arith.mulf %3, %3 : vector<1x64xf32>
    %8 = arith.subf %6, %7 : vector<1x64xf32>
    %c0_2 = arith.constant 0 : index
    %c0_3 = arith.constant 0 : index
    %9 = vector.load %arg3[%c0_2, %c0_3] : memref<1x64xf32, #tpu.memory_space<vmem>>, vector<1x64xf32>
    %cst_4 = arith.constant 9.99999974E-6 : f32
    %10 = vector.broadcast %cst_4 : f32 to vector<1x64xf32>
    %11 = arith.addf %8, %10 : vector<1x64xf32>
    %12 = math.rsqrt %11 : vector<1x64xf32>
    %13 = arith.mulf %9, %12 : vector<1x64xf32>
    %c0_5 = arith.constant 0 : index
    %c0_6 = arith.constant 0 : index
    %14 = vector.load %arg4[%c0_5, %c0_6] : memref<1x64xf32, #tpu.memory_space<vmem>>, vector<1x64xf32>
    %15 = arith.mulf %3, %13 : vector<1x64xf32>
    %16 = arith.subf %14, %15 : vector<1x64xf32>
    %c0_7 = arith.constant 0 : index
    %c0_8 = arith.constant 0 : index
    %17 = vector.load %arg1[%c0_7, %c0_8] : memref<512x64xf32, #tpu.memory_space<vmem>>, vector<512x64xf32>
    %18 = vector.broadcast %13 : vector<1x64xf32> to vector<512x64xf32>
    %19 = arith.mulf %17, %18 : vector<512x64xf32>
    %20 = vector.broadcast %16 : vector<1x64xf32> to vector<512x64xf32>
    %21 = arith.addf %19, %20 : vector<512x64xf32>
    %cst_9 = arith.constant 0.000000e+00 : f32
    %22 = vector.broadcast %cst_9 : f32 to vector<512x64xf32>
    %23 = arith.maximumf %21, %22 : vector<512x64xf32>
    %c0_10 = arith.constant 0 : index
    %c0_11 = arith.constant 0 : index
    %24 = vector.load %arg5[%c0_10, %c0_11] : memref<512x64xf32, #tpu.memory_space<vmem>>, vector<512x64xf32>
    tpu.vector_store %arg5[%c0_10, %c0_11], %23 {strides = array<i32>} : memref<512x64xf32, #tpu.memory_space<vmem>>, vector<512x64xf32>,
    return
  }
  func.func @transform_0(%arg0: i32) -> (i32, i32) {
    %c0_i32 = arith.constant 0 : i32
    %c0_i32_0 = arith.constant 0 : i32
    return %arg0, %c0_i32 : i32, i32
  }
  func.func @transform_1(%arg0: i32) -> (i32, i32) {
    %c0_i32 = arith.constant 0 : i32
    %c0_i32_0 = arith.constant 0 : i32
    %c0_i32_1 = arith.constant 0 : i32
    return %c0_i32, %c0_i32_0 : i32, i32
  }
  func.func @transform_2(%arg0: i32) -> (i32, i32) {
    %c0_i32 = arith.constant 0 : i32
    %c0_i32_0 = arith.constant 0 : i32
    %c0_i32_1 = arith.constant 0 : i32
    return %c0_i32, %c0_i32_0 : i32, i32
  }
  func.func @transform_3(%arg0: i32) -> (i32, i32) {
    %c0_i32 = arith.constant 0 : i32
    %c0_i32_0 = arith.constant 0 : i32
    %c0_i32_1 = arith.constant 0 : i32
    return %c0_i32, %c0_i32_0 : i32, i32
  }
  func.func @transform_4(%arg0: i32) -> (i32, i32) {
    %c0_i32 = arith.constant 0 : i32
    %c0_i32_0 = arith.constant 0 : i32
    return %arg0, %c0_i32 : i32, i32
  }
}

module attributes {stable_mosaic.version = 11 : i64} {
  func.func @_maxpool_kernel(%arg0: i32, %arg1: memref<128x64xf32, #tpu.memory_space<vmem>>, %arg2: memref<128x64xf32, #tpu.memory_space<vmem>>, %arg3: memref<128x64xf32, #tpu.memory_space<vmem>>, %arg4: memref<128x64xf32, #tpu.memory_space<vmem>>, %arg5: memref<128x64xf32, #tpu.memory_space<vmem>>, %arg6: memref<128x64xf32, #tpu.memory_space<vmem>>, %arg7: memref<128x64xf32, #tpu.memory_space<vmem>>, %arg8: memref<128x64xf32, #tpu.memory_space<vmem>>, %arg9: memref<128x64xf32, #tpu.memory_space<vmem>>, %arg10: memref<128x64xf32, #tpu.memory_space<vmem>>) attributes {dimension_semantics = [#tpu.dimension_semantics<parallel>], iteration_bounds = array<i64: 1>, scalar_prefetch = 0 : i64, scratch_operands = 0 : i64, tpu.core_type = #tpu.core_type<tc>, window_params = [{transform_indices = @transform_0, window_bounds = array<i64: 128, 64>}, {transform_indices = @transform_1, window_bounds = array<i64: 128, 64>}, {transform_indices = @transform_2, window_bounds = array<i64: 128, 64>}, {transform_indices = @transform_3, window_bounds = array<i64: 128, 64>}, {transform_indices = @transform_4, window_bounds = array<i64: 128, 64>}, {transform_indices = @transform_5, window_bounds = array<i64: 128, 64>}, {transform_indices = @transform_6, window_bounds = array<i64: 128, 64>}, {transform_indices = @transform_7, window_bounds = array<i64: 128, 64>}, {transform_indices = @transform_8, window_bounds = array<i64: 128, 64>}, {transform_indices = @transform_9, window_bounds = array<i64: 128, 64>}]} {
    %c0 = arith.constant 0 : index
    %c0_0 = arith.constant 0 : index
    %0 = vector.load %arg1[%c0, %c0_0] : memref<128x64xf32, #tpu.memory_space<vmem>>, vector<128x64xf32>
    %c0_1 = arith.constant 0 : index
    %c0_2 = arith.constant 0 : index
    %1 = vector.load %arg2[%c0_1, %c0_2] : memref<128x64xf32, #tpu.memory_space<vmem>>, vector<128x64xf32>
    %2 = arith.maximumf %0, %1 : vector<128x64xf32>
    %c0_3 = arith.constant 0 : index
    %c0_4 = arith.constant 0 : index
    %3 = vector.load %arg3[%c0_3, %c0_4] : memref<128x64xf32, #tpu.memory_space<vmem>>, vector<128x64xf32>
    %4 = arith.maximumf %2, %3 : vector<128x64xf32>
    %c0_5 = arith.constant 0 : index
    %c0_6 = arith.constant 0 : index
    %5 = vector.load %arg4[%c0_5, %c0_6] : memref<128x64xf32, #tpu.memory_space<vmem>>, vector<128x64xf32>
    %6 = arith.maximumf %4, %5 : vector<128x64xf32>
    %c0_7 = arith.constant 0 : index
    %c0_8 = arith.constant 0 : index
    %7 = vector.load %arg5[%c0_7, %c0_8] : memref<128x64xf32, #tpu.memory_space<vmem>>, vector<128x64xf32>
    %8 = arith.maximumf %6, %7 : vector<128x64xf32>
    %c0_9 = arith.constant 0 : index
    %c0_10 = arith.constant 0 : index
    %9 = vector.load %arg6[%c0_9, %c0_10] : memref<128x64xf32, #tpu.memory_space<vmem>>, vector<128x64xf32>
    %10 = arith.maximumf %8, %9 : vector<128x64xf32>
    %c0_11 = arith.constant 0 : index
    %c0_12 = arith.constant 0 : index
    %11 = vector.load %arg7[%c0_11, %c0_12] : memref<128x64xf32, #tpu.memory_space<vmem>>, vector<128x64xf32>
    %12 = arith.maximumf %10, %11 : vector<128x64xf32>
    %c0_13 = arith.constant 0 : index
    %c0_14 = arith.constant 0 : index
    %13 = vector.load %arg8[%c0_13, %c0_14] : memref<128x64xf32, #tpu.memory_space<vmem>>, vector<128x64xf32>
    %14 = arith.maximumf %12, %13 : vector<128x64xf32>
    %c0_15 = arith.constant 0 : index
    %c0_16 = arith.constant 0 : index
    %15 = vector.load %arg9[%c0_15, %c0_16] : memref<128x64xf32, #tpu.memory_space<vmem>>, vector<128x64xf32>
    %16 = arith.maximumf %14, %15 : vector<128x64xf32>
    %c0_17 = arith.constant 0 : index
    %c0_18 = arith.constant 0 : index
    %17 = vector.load %arg10[%c0_17, %c0_18] : memref<128x64xf32, #tpu.memory_space<vmem>>, vector<128x64xf32>
    tpu.vector_store %arg10[%c0_17, %c0_18], %16 {strides = array<i32>} : memref<128x64xf32, #tpu.memory_space<vmem>>, vector<128x64xf32>,
    return
  }
  func.func @transform_0(%arg0: i32) -> (i32, i32) {
    %c0_i32 = arith.constant 0 : i32
    %c0_i32_0 = arith.constant 0 : i32
    return %arg0, %c0_i32 : i32, i32
  }
  func.func @transform_1(%arg0: i32) -> (i32, i32) {
    %c0_i32 = arith.constant 0 : i32
    %c0_i32_0 = arith.constant 0 : i32
    return %arg0, %c0_i32 : i32, i32
  }
  func.func @transform_2(%arg0: i32) -> (i32, i32) {
    %c0_i32 = arith.constant 0 : i32
    %c0_i32_0 = arith.constant 0 : i32
    return %arg0, %c0_i32 : i32, i32
  }
  func.func @transform_3(%arg0: i32) -> (i32, i32) {
    %c0_i32 = arith.constant 0 : i32
    %c0_i32_0 = arith.constant 0 : i32
    return %arg0, %c0_i32 : i32, i32
  }
  func.func @transform_4(%arg0: i32) -> (i32, i32) {
    %c0_i32 = arith.constant 0 : i32
    %c0_i32_0 = arith.constant 0 : i32
    return %arg0, %c0_i32 : i32, i32
  }
  func.func @transform_5(%arg0: i32) -> (i32, i32) {
    %c0_i32 = arith.constant 0 : i32
    %c0_i32_0 = arith.constant 0 : i32
    return %arg0, %c0_i32 : i32, i32
  }
  func.func @transform_6(%arg0: i32) -> (i32, i32) {
    %c0_i32 = arith.constant 0 : i32
    %c0_i32_0 = arith.constant 0 : i32
    return %arg0, %c0_i32 : i32, i32
  }
  func.func @transform_7(%arg0: i32) -> (i32, i32) {
    %c0_i32 = arith.constant 0 : i32
    %c0_i32_0 = arith.constant 0 : i32
    return %arg0, %c0_i32 : i32, i32
  }
  func.func @transform_8(%arg0: i32) -> (i32, i32) {
    %c0_i32 = arith.constant 0 : i32
    %c0_i32_0 = arith.constant 0 : i32
    return %arg0, %c0_i32 : i32, i32
  }
  func.func @transform_9(%arg0: i32) -> (i32, i32) {
    %c0_i32 = arith.constant 0 : i32
    %c0_i32_0 = arith.constant 0 : i32
    return %arg0, %c0_i32 : i32, i32
  }
}

module attributes {stable_mosaic.version = 11 : i64} {
  func.func @_matmul_kernel(%arg0: i32, %arg1: i32, %arg2: memref<128x64xbf16, #tpu.memory_space<vmem>>, %arg3: memref<64x256xbf16, #tpu.memory_space<vmem>>, %arg4: memref<128x256xf32, #tpu.memory_space<vmem>>) attributes {dimension_semantics = [#tpu.dimension_semantics<parallel>, #tpu.dimension_semantics<parallel>], iteration_bounds = array<i64: 1, 1>, scalar_prefetch = 0 : i64, scratch_operands = 0 : i64, tpu.core_type = #tpu.core_type<tc>, window_params = [{transform_indices = @transform_0, window_bounds = array<i64: 128, 64>}, {transform_indices = @transform_1, window_bounds = array<i64: 64, 256>}, {transform_indices = @transform_2, window_bounds = array<i64: 128, 256>}]} {
    %c0 = arith.constant 0 : index
    %c0_0 = arith.constant 0 : index
    %0 = vector.load %arg2[%c0, %c0_0] : memref<128x64xbf16, #tpu.memory_space<vmem>>, vector<128x64xbf16>
    %c0_1 = arith.constant 0 : index
    %c0_2 = arith.constant 0 : index
    %1 = vector.load %arg3[%c0_1, %c0_2] : memref<64x256xbf16, #tpu.memory_space<vmem>>, vector<64x256xbf16>
    %cst = arith.constant dense<0.000000e+00> : vector<128x256xf32>
    %2 = tpu.matmul %0, %1, %cst {dimension_numbers = #tpu.dot_dimension_numbers<[1], [0], [0], [1], [0, 0, 1, 1], [], []>} : vector<128x64xbf16>, vector<64x256xbf16>, vector<128x256xf32> -> vector<128x256xf32>
    %c0_3 = arith.constant 0 : index
    %c0_4 = arith.constant 0 : index
    %3 = vector.load %arg4[%c0_3, %c0_4] : memref<128x256xf32, #tpu.memory_space<vmem>>, vector<128x256xf32>
    tpu.vector_store %arg4[%c0_3, %c0_4], %2 {strides = array<i32>} : memref<128x256xf32, #tpu.memory_space<vmem>>, vector<128x256xf32>,
    return
  }
  func.func @transform_0(%arg0: i32, %arg1: i32) -> (i32, i32) {
    %c0_i32 = arith.constant 0 : i32
    %c0_i32_0 = arith.constant 0 : i32
    return %arg0, %c0_i32 : i32, i32
  }
  func.func @transform_1(%arg0: i32, %arg1: i32) -> (i32, i32) {
    %c0_i32 = arith.constant 0 : i32
    %c0_i32_0 = arith.constant 0 : i32
    return %c0_i32, %arg1 : i32, i32
  }
  func.func @transform_2(%arg0: i32, %arg1: i32) -> (i32, i32) {
    %c0_i32 = arith.constant 0 : i32
    return %arg0, %arg1 : i32, i32
  }
}

module attributes {stable_mosaic.version = 11 : i64} {
  func.func @_bn_norm_kernel(%arg0: i32, %arg1: memref<128x256xf32, #tpu.memory_space<vmem>>, %arg2: memref<2x256xf32, #tpu.memory_space<vmem>>, %arg3: memref<1x256xf32, #tpu.memory_space<vmem>>, %arg4: memref<1x256xf32, #tpu.memory_space<vmem>>, %arg5: memref<128x256xf32, #tpu.memory_space<vmem>>) attributes {dimension_semantics = [#tpu.dimension_semantics<parallel>], iteration_bounds = array<i64: 1>, scalar_prefetch = 0 : i64, scratch_operands = 0 : i64, tpu.core_type = #tpu.core_type<tc>, window_params = [{transform_indices = @transform_0, window_bounds = array<i64: 128, 256>}, {pipeline_mode = #tpu.pipeline_mode<synchronous>, transform_indices = @transform_1, window_bounds = array<i64: 2, 256>}, {pipeline_mode = #tpu.pipeline_mode<synchronous>, transform_indices = @transform_2, window_bounds = array<i64: 1, 256>}, {pipeline_mode = #tpu.pipeline_mode<synchronous>, transform_indices = @transform_3, window_bounds = array<i64: 1, 256>}, {transform_indices = @transform_4, window_bounds = array<i64: 128, 256>}]} {
    %c0 = arith.constant 0 : index
    %c0_0 = arith.constant 0 : index
    %0 = vector.load %arg2[%c0, %c0_0] : memref<2x256xf32, #tpu.memory_space<vmem>>, vector<2x256xf32>
    %1 = vector.extract_strided_slice %0 {offsets = [0, 0], sizes = [1, 256], strides = [1, 1]} : vector<2x256xf32> to vector<1x256xf32>
    %cst = arith.constant 7.812500e-03 : f32
    %2 = vector.broadcast %cst : f32 to vector<1x256xf32>
    %3 = arith.mulf %1, %2 : vector<1x256xf32>
    %4 = vector.extract_strided_slice %0 {offsets = [1, 0], sizes = [1, 256], strides = [1, 1]} : vector<2x256xf32> to vector<1x256xf32>
    %cst_1 = arith.constant 7.812500e-03 : f32
    %5 = vector.broadcast %cst_1 : f32 to vector<1x256xf32>
    %6 = arith.mulf %4, %5 : vector<1x256xf32>
    %7 = arith.mulf %3, %3 : vector<1x256xf32>
    %8 = arith.subf %6, %7 : vector<1x256xf32>
    %c0_2 = arith.constant 0 : index
    %c0_3 = arith.constant 0 : index
    %9 = vector.load %arg3[%c0_2, %c0_3] : memref<1x256xf32, #tpu.memory_space<vmem>>, vector<1x256xf32>
    %cst_4 = arith.constant 9.99999974E-6 : f32
    %10 = vector.broadcast %cst_4 : f32 to vector<1x256xf32>
    %11 = arith.addf %8, %10 : vector<1x256xf32>
    %12 = math.rsqrt %11 : vector<1x256xf32>
    %13 = arith.mulf %9, %12 : vector<1x256xf32>
    %c0_5 = arith.constant 0 : index
    %c0_6 = arith.constant 0 : index
    %14 = vector.load %arg4[%c0_5, %c0_6] : memref<1x256xf32, #tpu.memory_space<vmem>>, vector<1x256xf32>
    %15 = arith.mulf %3, %13 : vector<1x256xf32>
    %16 = arith.subf %14, %15 : vector<1x256xf32>
    %c0_7 = arith.constant 0 : index
    %c0_8 = arith.constant 0 : index
    %17 = vector.load %arg1[%c0_7, %c0_8] : memref<128x256xf32, #tpu.memory_space<vmem>>, vector<128x256xf32>
    %18 = vector.broadcast %13 : vector<1x256xf32> to vector<128x256xf32>
    %19 = arith.mulf %17, %18 : vector<128x256xf32>
    %20 = vector.broadcast %16 : vector<1x256xf32> to vector<128x256xf32>
    %21 = arith.addf %19, %20 : vector<128x256xf32>
    %c0_9 = arith.constant 0 : index
    %c0_10 = arith.constant 0 : index
    %22 = vector.load %arg5[%c0_9, %c0_10] : memref<128x256xf32, #tpu.memory_space<vmem>>, vector<128x256xf32>
    tpu.vector_store %arg5[%c0_9, %c0_10], %21 {strides = array<i32>} : memref<128x256xf32, #tpu.memory_space<vmem>>, vector<128x256xf32>,
    return
  }
  func.func @transform_0(%arg0: i32) -> (i32, i32) {
    %c0_i32 = arith.constant 0 : i32
    %c0_i32_0 = arith.constant 0 : i32
    return %arg0, %c0_i32 : i32, i32
  }
  func.func @transform_1(%arg0: i32) -> (i32, i32) {
    %c0_i32 = arith.constant 0 : i32
    %c0_i32_0 = arith.constant 0 : i32
    %c0_i32_1 = arith.constant 0 : i32
    return %c0_i32, %c0_i32_0 : i32, i32
  }
  func.func @transform_2(%arg0: i32) -> (i32, i32) {
    %c0_i32 = arith.constant 0 : i32
    %c0_i32_0 = arith.constant 0 : i32
    %c0_i32_1 = arith.constant 0 : i32
    return %c0_i32, %c0_i32_0 : i32, i32
  }
  func.func @transform_3(%arg0: i32) -> (i32, i32) {
    %c0_i32 = arith.constant 0 : i32
    %c0_i32_0 = arith.constant 0 : i32
    %c0_i32_1 = arith.constant 0 : i32
    return %c0_i32, %c0_i32_0 : i32, i32
  }
  func.func @transform_4(%arg0: i32) -> (i32, i32) {
    %c0_i32 = arith.constant 0 : i32
    %c0_i32_0 = arith.constant 0 : i32
    return %arg0, %c0_i32 : i32, i32
  }
}

module attributes {stable_mosaic.version = 11 : i64} {
  func.func @_bn_stats_kernel(%arg0: i32, %arg1: memref<128x256xf32, #tpu.memory_space<vmem>>, %arg2: memref<2x256xf32, #tpu.memory_space<vmem>>) attributes {dimension_semantics = [#tpu.dimension_semantics<arbitrary>], iteration_bounds = array<i64: 1>, scalar_prefetch = 0 : i64, scratch_operands = 0 : i64, tpu.core_type = #tpu.core_type<tc>, window_params = [{transform_indices = @transform_0, window_bounds = array<i64: 128, 256>}, {pipeline_mode = #tpu.pipeline_mode<synchronous>, transform_indices = @transform_1, window_bounds = array<i64: 2, 256>}]} {
    %c0_i32 = arith.constant 0 : i32
    %0 = arith.cmpi eq, %arg0, %c0_i32 : i32
    %1 = arith.extui %0 : i1 to i32
    %c0_i32_0 = arith.constant 0 : i32
    %2 = arith.cmpi ne, %1, %c0_i32_0 : i32
    scf.if %2 {
      %cst_10 = arith.constant 0.000000e+00 : f32
      %15 = vector.broadcast %cst_10 : f32 to vector<2x256xf32>
      %c0_11 = arith.constant 0 : index
      %c0_12 = arith.constant 0 : index
      %16 = vector.load %arg2[%c0_11, %c0_12] : memref<2x256xf32, #tpu.memory_space<vmem>>, vector<2x256xf32>
      tpu.vector_store %arg2[%c0_11, %c0_12], %15 {strides = array<i32>} : memref<2x256xf32, #tpu.memory_space<vmem>>, vector<2x256xf32>,
    } else {
    }
    %c0 = arith.constant 0 : index
    %c0_1 = arith.constant 0 : index
    %3 = vector.load %arg1[%c0, %c0_1] : memref<128x256xf32, #tpu.memory_space<vmem>>, vector<128x256xf32>
    %c0_2 = arith.constant 0 : index
    %c0_3 = arith.constant 0 : index
    %4 = vector.load %arg2[%c0_2, %c0_3] : memref<2x256xf32, #tpu.memory_space<vmem>>, vector<1x256xf32>
    %cst = arith.constant dense<0.000000e+00> : vector<256xf32>
    %5 = vector.multi_reduction <add>, %3, %cst [0] : vector<128x256xf32> to vector<256xf32>
    %6 = vector.shape_cast %5 : vector<256xf32> to vector<1x256xf32>
    %7 = arith.addf %4, %6 : vector<1x256xf32>
    %c0_4 = arith.constant 0 : index
    %c0_5 = arith.constant 0 : index
    %8 = vector.load %arg2[%c0_4, %c0_5] : memref<2x256xf32, #tpu.memory_space<vmem>>, vector<1x256xf32>
    tpu.vector_store %arg2[%c0_4, %c0_5], %7 {strides = array<i32>} : memref<2x256xf32, #tpu.memory_space<vmem>>, vector<1x256xf32>,
    %c1 = arith.constant 1 : index
    %c0_6 = arith.constant 0 : index
    %9 = vector.load %arg2[%c1, %c0_6] : memref<2x256xf32, #tpu.memory_space<vmem>>, vector<1x256xf32>
    %10 = arith.mulf %3, %3 : vector<128x256xf32>
    %cst_7 = arith.constant dense<0.000000e+00> : vector<256xf32>
    %11 = vector.multi_reduction <add>, %10, %cst_7 [0] : vector<128x256xf32> to vector<256xf32>
    %12 = vector.shape_cast %11 : vector<256xf32> to vector<1x256xf32>
    %13 = arith.addf %9, %12 : vector<1x256xf32>
    %c1_8 = arith.constant 1 : index
    %c0_9 = arith.constant 0 : index
    %14 = vector.load %arg2[%c1_8, %c0_9] : memref<2x256xf32, #tpu.memory_space<vmem>>, vector<1x256xf32>
    tpu.vector_store %arg2[%c1_8, %c0_9], %13 {strides = array<i32>} : memref<2x256xf32, #tpu.memory_space<vmem>>, vector<1x256xf32>,
    return
  }
  func.func @transform_0(%arg0: i32) -> (i32, i32) {
    %c0_i32 = arith.constant 0 : i32
    %c0_i32_0 = arith.constant 0 : i32
    return %arg0, %c0_i32 : i32, i32
  }
  func.func @transform_1(%arg0: i32) -> (i32, i32) {
    %c0_i32 = arith.constant 0 : i32
    %c0_i32_0 = arith.constant 0 : i32
    %c0_i32_1 = arith.constant 0 : i32
    return %c0_i32, %c0_i32_0 : i32, i32
  }
}

module attributes {stable_mosaic.version = 11 : i64} {
  func.func @_matmul_kernel(%arg0: i32, %arg1: i32, %arg2: memref<128x64xbf16, #tpu.memory_space<vmem>>, %arg3: memref<64x64xbf16, #tpu.memory_space<vmem>>, %arg4: memref<128x64xf32, #tpu.memory_space<vmem>>) attributes {dimension_semantics = [#tpu.dimension_semantics<parallel>, #tpu.dimension_semantics<parallel>], iteration_bounds = array<i64: 1, 1>, scalar_prefetch = 0 : i64, scratch_operands = 0 : i64, tpu.core_type = #tpu.core_type<tc>, window_params = [{transform_indices = @transform_0, window_bounds = array<i64: 128, 64>}, {transform_indices = @transform_1, window_bounds = array<i64: 64, 64>}, {transform_indices = @transform_2, window_bounds = array<i64: 128, 64>}]} {
    %c0 = arith.constant 0 : index
    %c0_0 = arith.constant 0 : index
    %0 = vector.load %arg2[%c0, %c0_0] : memref<128x64xbf16, #tpu.memory_space<vmem>>, vector<128x64xbf16>
    %c0_1 = arith.constant 0 : index
    %c0_2 = arith.constant 0 : index
    %1 = vector.load %arg3[%c0_1, %c0_2] : memref<64x64xbf16, #tpu.memory_space<vmem>>, vector<64x64xbf16>
    %cst = arith.constant dense<0.000000e+00> : vector<128x64xf32>
    %2 = tpu.matmul %0, %1, %cst {dimension_numbers = #tpu.dot_dimension_numbers<[1], [0], [0], [1], [0, 0, 1, 1], [], []>} : vector<128x64xbf16>, vector<64x64xbf16>, vector<128x64xf32> -> vector<128x64xf32>
    %c0_3 = arith.constant 0 : index
    %c0_4 = arith.constant 0 : index
    %3 = vector.load %arg4[%c0_3, %c0_4] : memref<128x64xf32, #tpu.memory_space<vmem>>, vector<128x64xf32>
    tpu.vector_store %arg4[%c0_3, %c0_4], %2 {strides = array<i32>} : memref<128x64xf32, #tpu.memory_space<vmem>>, vector<128x64xf32>,
    return
  }
  func.func @transform_0(%arg0: i32, %arg1: i32) -> (i32, i32) {
    %c0_i32 = arith.constant 0 : i32
    %c0_i32_0 = arith.constant 0 : i32
    return %arg0, %c0_i32 : i32, i32
  }
  func.func @transform_1(%arg0: i32, %arg1: i32) -> (i32, i32) {
    %c0_i32 = arith.constant 0 : i32
    %c0_i32_0 = arith.constant 0 : i32
    return %c0_i32, %arg1 : i32, i32
  }
  func.func @transform_2(%arg0: i32, %arg1: i32) -> (i32, i32) {
    %c0_i32 = arith.constant 0 : i32
    return %arg0, %arg1 : i32, i32
  }
}

module attributes {stable_mosaic.version = 11 : i64} {
  func.func @_bn_stats_kernel(%arg0: i32, %arg1: memref<128x64xf32, #tpu.memory_space<vmem>>, %arg2: memref<2x64xf32, #tpu.memory_space<vmem>>) attributes {dimension_semantics = [#tpu.dimension_semantics<arbitrary>], iteration_bounds = array<i64: 1>, scalar_prefetch = 0 : i64, scratch_operands = 0 : i64, tpu.core_type = #tpu.core_type<tc>, window_params = [{transform_indices = @transform_0, window_bounds = array<i64: 128, 64>}, {pipeline_mode = #tpu.pipeline_mode<synchronous>, transform_indices = @transform_1, window_bounds = array<i64: 2, 64>}]} {
    %c0_i32 = arith.constant 0 : i32
    %0 = arith.cmpi eq, %arg0, %c0_i32 : i32
    %1 = arith.extui %0 : i1 to i32
    %c0_i32_0 = arith.constant 0 : i32
    %2 = arith.cmpi ne, %1, %c0_i32_0 : i32
    scf.if %2 {
      %cst_10 = arith.constant 0.000000e+00 : f32
      %15 = vector.broadcast %cst_10 : f32 to vector<2x64xf32>
      %c0_11 = arith.constant 0 : index
      %c0_12 = arith.constant 0 : index
      %16 = vector.load %arg2[%c0_11, %c0_12] : memref<2x64xf32, #tpu.memory_space<vmem>>, vector<2x64xf32>
      tpu.vector_store %arg2[%c0_11, %c0_12], %15 {strides = array<i32>} : memref<2x64xf32, #tpu.memory_space<vmem>>, vector<2x64xf32>,
    } else {
    }
    %c0 = arith.constant 0 : index
    %c0_1 = arith.constant 0 : index
    %3 = vector.load %arg1[%c0, %c0_1] : memref<128x64xf32, #tpu.memory_space<vmem>>, vector<128x64xf32>
    %c0_2 = arith.constant 0 : index
    %c0_3 = arith.constant 0 : index
    %4 = vector.load %arg2[%c0_2, %c0_3] : memref<2x64xf32, #tpu.memory_space<vmem>>, vector<1x64xf32>
    %cst = arith.constant dense<0.000000e+00> : vector<64xf32>
    %5 = vector.multi_reduction <add>, %3, %cst [0] : vector<128x64xf32> to vector<64xf32>
    %6 = vector.shape_cast %5 : vector<64xf32> to vector<1x64xf32>
    %7 = arith.addf %4, %6 : vector<1x64xf32>
    %c0_4 = arith.constant 0 : index
    %c0_5 = arith.constant 0 : index
    %8 = vector.load %arg2[%c0_4, %c0_5] : memref<2x64xf32, #tpu.memory_space<vmem>>, vector<1x64xf32>
    tpu.vector_store %arg2[%c0_4, %c0_5], %7 {strides = array<i32>} : memref<2x64xf32, #tpu.memory_space<vmem>>, vector<1x64xf32>,
    %c1 = arith.constant 1 : index
    %c0_6 = arith.constant 0 : index
    %9 = vector.load %arg2[%c1, %c0_6] : memref<2x64xf32, #tpu.memory_space<vmem>>, vector<1x64xf32>
    %10 = arith.mulf %3, %3 : vector<128x64xf32>
    %cst_7 = arith.constant dense<0.000000e+00> : vector<64xf32>
    %11 = vector.multi_reduction <add>, %10, %cst_7 [0] : vector<128x64xf32> to vector<64xf32>
    %12 = vector.shape_cast %11 : vector<64xf32> to vector<1x64xf32>
    %13 = arith.addf %9, %12 : vector<1x64xf32>
    %c1_8 = arith.constant 1 : index
    %c0_9 = arith.constant 0 : index
    %14 = vector.load %arg2[%c1_8, %c0_9] : memref<2x64xf32, #tpu.memory_space<vmem>>, vector<1x64xf32>
    tpu.vector_store %arg2[%c1_8, %c0_9], %13 {strides = array<i32>} : memref<2x64xf32, #tpu.memory_space<vmem>>, vector<1x64xf32>,
    return
  }
  func.func @transform_0(%arg0: i32) -> (i32, i32) {
    %c0_i32 = arith.constant 0 : i32
    %c0_i32_0 = arith.constant 0 : i32
    return %arg0, %c0_i32 : i32, i32
  }
  func.func @transform_1(%arg0: i32) -> (i32, i32) {
    %c0_i32 = arith.constant 0 : i32
    %c0_i32_0 = arith.constant 0 : i32
    %c0_i32_1 = arith.constant 0 : i32
    return %c0_i32, %c0_i32_0 : i32, i32
  }
}

module attributes {stable_mosaic.version = 11 : i64} {
  func.func @_bn_norm_kernel(%arg0: i32, %arg1: memref<128x64xf32, #tpu.memory_space<vmem>>, %arg2: memref<2x64xf32, #tpu.memory_space<vmem>>, %arg3: memref<1x64xf32, #tpu.memory_space<vmem>>, %arg4: memref<1x64xf32, #tpu.memory_space<vmem>>, %arg5: memref<128x64xf32, #tpu.memory_space<vmem>>) attributes {dimension_semantics = [#tpu.dimension_semantics<parallel>], iteration_bounds = array<i64: 1>, scalar_prefetch = 0 : i64, scratch_operands = 0 : i64, tpu.core_type = #tpu.core_type<tc>, window_params = [{transform_indices = @transform_0, window_bounds = array<i64: 128, 64>}, {pipeline_mode = #tpu.pipeline_mode<synchronous>, transform_indices = @transform_1, window_bounds = array<i64: 2, 64>}, {pipeline_mode = #tpu.pipeline_mode<synchronous>, transform_indices = @transform_2, window_bounds = array<i64: 1, 64>}, {pipeline_mode = #tpu.pipeline_mode<synchronous>, transform_indices = @transform_3, window_bounds = array<i64: 1, 64>}, {transform_indices = @transform_4, window_bounds = array<i64: 128, 64>}]} {
    %c0 = arith.constant 0 : index
    %c0_0 = arith.constant 0 : index
    %0 = vector.load %arg2[%c0, %c0_0] : memref<2x64xf32, #tpu.memory_space<vmem>>, vector<2x64xf32>
    %1 = vector.extract_strided_slice %0 {offsets = [0, 0], sizes = [1, 64], strides = [1, 1]} : vector<2x64xf32> to vector<1x64xf32>
    %cst = arith.constant 7.812500e-03 : f32
    %2 = vector.broadcast %cst : f32 to vector<1x64xf32>
    %3 = arith.mulf %1, %2 : vector<1x64xf32>
    %4 = vector.extract_strided_slice %0 {offsets = [1, 0], sizes = [1, 64], strides = [1, 1]} : vector<2x64xf32> to vector<1x64xf32>
    %cst_1 = arith.constant 7.812500e-03 : f32
    %5 = vector.broadcast %cst_1 : f32 to vector<1x64xf32>
    %6 = arith.mulf %4, %5 : vector<1x64xf32>
    %7 = arith.mulf %3, %3 : vector<1x64xf32>
    %8 = arith.subf %6, %7 : vector<1x64xf32>
    %c0_2 = arith.constant 0 : index
    %c0_3 = arith.constant 0 : index
    %9 = vector.load %arg3[%c0_2, %c0_3] : memref<1x64xf32, #tpu.memory_space<vmem>>, vector<1x64xf32>
    %cst_4 = arith.constant 9.99999974E-6 : f32
    %10 = vector.broadcast %cst_4 : f32 to vector<1x64xf32>
    %11 = arith.addf %8, %10 : vector<1x64xf32>
    %12 = math.rsqrt %11 : vector<1x64xf32>
    %13 = arith.mulf %9, %12 : vector<1x64xf32>
    %c0_5 = arith.constant 0 : index
    %c0_6 = arith.constant 0 : index
    %14 = vector.load %arg4[%c0_5, %c0_6] : memref<1x64xf32, #tpu.memory_space<vmem>>, vector<1x64xf32>
    %15 = arith.mulf %3, %13 : vector<1x64xf32>
    %16 = arith.subf %14, %15 : vector<1x64xf32>
    %c0_7 = arith.constant 0 : index
    %c0_8 = arith.constant 0 : index
    %17 = vector.load %arg1[%c0_7, %c0_8] : memref<128x64xf32, #tpu.memory_space<vmem>>, vector<128x64xf32>
    %18 = vector.broadcast %13 : vector<1x64xf32> to vector<128x64xf32>
    %19 = arith.mulf %17, %18 : vector<128x64xf32>
    %20 = vector.broadcast %16 : vector<1x64xf32> to vector<128x64xf32>
    %21 = arith.addf %19, %20 : vector<128x64xf32>
    %cst_9 = arith.constant 0.000000e+00 : f32
    %22 = vector.broadcast %cst_9 : f32 to vector<128x64xf32>
    %23 = arith.maximumf %21, %22 : vector<128x64xf32>
    %c0_10 = arith.constant 0 : index
    %c0_11 = arith.constant 0 : index
    %24 = vector.load %arg5[%c0_10, %c0_11] : memref<128x64xf32, #tpu.memory_space<vmem>>, vector<128x64xf32>
    tpu.vector_store %arg5[%c0_10, %c0_11], %23 {strides = array<i32>} : memref<128x64xf32, #tpu.memory_space<vmem>>, vector<128x64xf32>,
    return
  }
  func.func @transform_0(%arg0: i32) -> (i32, i32) {
    %c0_i32 = arith.constant 0 : i32
    %c0_i32_0 = arith.constant 0 : i32
    return %arg0, %c0_i32 : i32, i32
  }
  func.func @transform_1(%arg0: i32) -> (i32, i32) {
    %c0_i32 = arith.constant 0 : i32
    %c0_i32_0 = arith.constant 0 : i32
    %c0_i32_1 = arith.constant 0 : i32
    return %c0_i32, %c0_i32_0 : i32, i32
  }
  func.func @transform_2(%arg0: i32) -> (i32, i32) {
    %c0_i32 = arith.constant 0 : i32
    %c0_i32_0 = arith.constant 0 : i32
    %c0_i32_1 = arith.constant 0 : i32
    return %c0_i32, %c0_i32_0 : i32, i32
  }
  func.func @transform_3(%arg0: i32) -> (i32, i32) {
    %c0_i32 = arith.constant 0 : i32
    %c0_i32_0 = arith.constant 0 : i32
    %c0_i32_1 = arith.constant 0 : i32
    return %c0_i32, %c0_i32_0 : i32, i32
  }
  func.func @transform_4(%arg0: i32) -> (i32, i32) {
    %c0_i32 = arith.constant 0 : i32
    %c0_i32_0 = arith.constant 0 : i32
    return %arg0, %c0_i32 : i32, i32
  }
}

module attributes {stable_mosaic.version = 11 : i64} {
  func.func @_conv3x3_s1_kernel(%arg0: i32, %arg1: memref<1x110x64xf32, #tpu.memory_space<vmem>>, %arg2: memref<576x64xbf16, #tpu.memory_space<vmem>>, %arg3: memref<1x80x64xf32, #tpu.memory_space<vmem>>) attributes {dimension_semantics = [#tpu.dimension_semantics<parallel>], iteration_bounds = array<i64: 2>, scalar_prefetch = 0 : i64, scratch_operands = 0 : i64, tpu.core_type = #tpu.core_type<tc>, window_params = [{transform_indices = @transform_0, window_bounds = array<i64: 1, 110, 64>}, {pipeline_mode = #tpu.pipeline_mode<synchronous>, transform_indices = @transform_1, window_bounds = array<i64: 576, 64>}, {transform_indices = @transform_2, window_bounds = array<i64: 1, 80, 64>}]} {
    %c0 = arith.constant 0 : index
    %c0_0 = arith.constant 0 : index
    %c0_1 = arith.constant 0 : index
    %0 = vector.load %arg1[%c0, %c0_0, %c0_1] : memref<1x110x64xf32, #tpu.memory_space<vmem>>, vector<1x80x64xf32>
    %1 = vector.shape_cast %0 : vector<1x80x64xf32> to vector<80x64xf32>
    %2 = arith.truncf %1 : vector<80x64xf32> to vector<80x64xbf16>
    %c0_2 = arith.constant 0 : index
    %c0_3 = arith.constant 0 : index
    %3 = vector.load %arg2[%c0_2, %c0_3] : memref<576x64xbf16, #tpu.memory_space<vmem>>, vector<64x64xbf16>
    %cst = arith.constant dense<0.000000e+00> : vector<80x64xf32>
    %4 = tpu.matmul %2, %3, %cst {dimension_numbers = #tpu.dot_dimension_numbers<[1], [0], [0], [1], [0, 0, 1, 1], [], []>} : vector<80x64xbf16>, vector<64x64xbf16>, vector<80x64xf32> -> vector<80x64xf32>
    %c0_4 = arith.constant 0 : index
    %c1 = arith.constant 1 : index
    %c0_5 = arith.constant 0 : index
    %5 = vector.load %arg1[%c0_4, %c1, %c0_5] : memref<1x110x64xf32, #tpu.memory_space<vmem>>, vector<1x80x64xf32>
    %6 = vector.shape_cast %5 : vector<1x80x64xf32> to vector<80x64xf32>
    %7 = arith.truncf %6 : vector<80x64xf32> to vector<80x64xbf16>
    %c64 = arith.constant 64 : index
    %c0_6 = arith.constant 0 : index
    %8 = vector.load %arg2[%c64, %c0_6] : memref<576x64xbf16, #tpu.memory_space<vmem>>, vector<64x64xbf16>
    %cst_7 = arith.constant dense<0.000000e+00> : vector<80x64xf32>
    %9 = tpu.matmul %7, %8, %cst_7 {dimension_numbers = #tpu.dot_dimension_numbers<[1], [0], [0], [1], [0, 0, 1, 1], [], []>} : vector<80x64xbf16>, vector<64x64xbf16>, vector<80x64xf32> -> vector<80x64xf32>
    %10 = arith.addf %4, %9 : vector<80x64xf32>
    %c0_8 = arith.constant 0 : index
    %c2 = arith.constant 2 : index
    %c0_9 = arith.constant 0 : index
    %11 = vector.load %arg1[%c0_8, %c2, %c0_9] : memref<1x110x64xf32, #tpu.memory_space<vmem>>, vector<1x80x64xf32>
    %12 = vector.shape_cast %11 : vector<1x80x64xf32> to vector<80x64xf32>
    %13 = arith.truncf %12 : vector<80x64xf32> to vector<80x64xbf16>
    %c128 = arith.constant 128 : index
    %c0_10 = arith.constant 0 : index
    %14 = vector.load %arg2[%c128, %c0_10] : memref<576x64xbf16, #tpu.memory_space<vmem>>, vector<64x64xbf16>
    %cst_11 = arith.constant dense<0.000000e+00> : vector<80x64xf32>
    %15 = tpu.matmul %13, %14, %cst_11 {dimension_numbers = #tpu.dot_dimension_numbers<[1], [0], [0], [1], [0, 0, 1, 1], [], []>} : vector<80x64xbf16>, vector<64x64xbf16>, vector<80x64xf32> -> vector<80x64xf32>
    %16 = arith.addf %10, %15 : vector<80x64xf32>
    %c0_12 = arith.constant 0 : index
    %c10 = arith.constant 10 : index
    %c0_13 = arith.constant 0 : index
    %17 = vector.load %arg1[%c0_12, %c10, %c0_13] : memref<1x110x64xf32, #tpu.memory_space<vmem>>, vector<1x80x64xf32>
    %18 = vector.shape_cast %17 : vector<1x80x64xf32> to vector<80x64xf32>
    %19 = arith.truncf %18 : vector<80x64xf32> to vector<80x64xbf16>
    %c192 = arith.constant 192 : index
    %c0_14 = arith.constant 0 : index
    %20 = vector.load %arg2[%c192, %c0_14] : memref<576x64xbf16, #tpu.memory_space<vmem>>, vector<64x64xbf16>
    %cst_15 = arith.constant dense<0.000000e+00> : vector<80x64xf32>
    %21 = tpu.matmul %19, %20, %cst_15 {dimension_numbers = #tpu.dot_dimension_numbers<[1], [0], [0], [1], [0, 0, 1, 1], [], []>} : vector<80x64xbf16>, vector<64x64xbf16>, vector<80x64xf32> -> vector<80x64xf32>
    %22 = arith.addf %16, %21 : vector<80x64xf32>
    %c0_16 = arith.constant 0 : index
    %c11 = arith.constant 11 : index
    %c0_17 = arith.constant 0 : index
    %23 = vector.load %arg1[%c0_16, %c11, %c0_17] : memref<1x110x64xf32, #tpu.memory_space<vmem>>, vector<1x80x64xf32>
    %24 = vector.shape_cast %23 : vector<1x80x64xf32> to vector<80x64xf32>
    %25 = arith.truncf %24 : vector<80x64xf32> to vector<80x64xbf16>
    %c256 = arith.constant 256 : index
    %c0_18 = arith.constant 0 : index
    %26 = vector.load %arg2[%c256, %c0_18] : memref<576x64xbf16, #tpu.memory_space<vmem>>, vector<64x64xbf16>
    %cst_19 = arith.constant dense<0.000000e+00> : vector<80x64xf32>
    %27 = tpu.matmul %25, %26, %cst_19 {dimension_numbers = #tpu.dot_dimension_numbers<[1], [0], [0], [1], [0, 0, 1, 1], [], []>} : vector<80x64xbf16>, vector<64x64xbf16>, vector<80x64xf32> -> vector<80x64xf32>
    %28 = arith.addf %22, %27 : vector<80x64xf32>
    %c0_20 = arith.constant 0 : index
    %c12 = arith.constant 12 : index
    %c0_21 = arith.constant 0 : index
    %29 = vector.load %arg1[%c0_20, %c12, %c0_21] : memref<1x110x64xf32, #tpu.memory_space<vmem>>, vector<1x80x64xf32>
    %30 = vector.shape_cast %29 : vector<1x80x64xf32> to vector<80x64xf32>
    %31 = arith.truncf %30 : vector<80x64xf32> to vector<80x64xbf16>
    %c320 = arith.constant 320 : index
    %c0_22 = arith.constant 0 : index
    %32 = vector.load %arg2[%c320, %c0_22] : memref<576x64xbf16, #tpu.memory_space<vmem>>, vector<64x64xbf16>
    %cst_23 = arith.constant dense<0.000000e+00> : vector<80x64xf32>
    %33 = tpu.matmul %31, %32, %cst_23 {dimension_numbers = #tpu.dot_dimension_numbers<[1], [0], [0], [1], [0, 0, 1, 1], [], []>} : vector<80x64xbf16>, vector<64x64xbf16>, vector<80x64xf32> -> vector<80x64xf32>
    %34 = arith.addf %28, %33 : vector<80x64xf32>
    %c0_24 = arith.constant 0 : index
    %c20 = arith.constant 20 : index
    %c0_25 = arith.constant 0 : index
    %35 = vector.load %arg1[%c0_24, %c20, %c0_25] : memref<1x110x64xf32, #tpu.memory_space<vmem>>, vector<1x80x64xf32>
    %36 = vector.shape_cast %35 : vector<1x80x64xf32> to vector<80x64xf32>
    %37 = arith.truncf %36 : vector<80x64xf32> to vector<80x64xbf16>
    %c384 = arith.constant 384 : index
    %c0_26 = arith.constant 0 : index
    %38 = vector.load %arg2[%c384, %c0_26] : memref<576x64xbf16, #tpu.memory_space<vmem>>, vector<64x64xbf16>
    %cst_27 = arith.constant dense<0.000000e+00> : vector<80x64xf32>
    %39 = tpu.matmul %37, %38, %cst_27 {dimension_numbers = #tpu.dot_dimension_numbers<[1], [0], [0], [1], [0, 0, 1, 1], [], []>} : vector<80x64xbf16>, vector<64x64xbf16>, vector<80x64xf32> -> vector<80x64xf32>
    %40 = arith.addf %34, %39 : vector<80x64xf32>
    %c0_28 = arith.constant 0 : index
    %c21 = arith.constant 21 : index
    %c0_29 = arith.constant 0 : index
    %41 = vector.load %arg1[%c0_28, %c21, %c0_29] : memref<1x110x64xf32, #tpu.memory_space<vmem>>, vector<1x80x64xf32>
    %42 = vector.shape_cast %41 : vector<1x80x64xf32> to vector<80x64xf32>
    %43 = arith.truncf %42 : vector<80x64xf32> to vector<80x64xbf16>
    %c448 = arith.constant 448 : index
    %c0_30 = arith.constant 0 : index
    %44 = vector.load %arg2[%c448, %c0_30] : memref<576x64xbf16, #tpu.memory_space<vmem>>, vector<64x64xbf16>
    %cst_31 = arith.constant dense<0.000000e+00> : vector<80x64xf32>
    %45 = tpu.matmul %43, %44, %cst_31 {dimension_numbers = #tpu.dot_dimension_numbers<[1], [0], [0], [1], [0, 0, 1, 1], [], []>} : vector<80x64xbf16>, vector<64x64xbf16>, vector<80x64xf32> -> vector<80x64xf32>
    %46 = arith.addf %40, %45 : vector<80x64xf32>
    %c0_32 = arith.constant 0 : index
    %c22 = arith.constant 22 : index
    %c0_33 = arith.constant 0 : index
    %47 = vector.load %arg1[%c0_32, %c22, %c0_33] : memref<1x110x64xf32, #tpu.memory_space<vmem>>, vector<1x80x64xf32>
    %48 = vector.shape_cast %47 : vector<1x80x64xf32> to vector<80x64xf32>
    %49 = arith.truncf %48 : vector<80x64xf32> to vector<80x64xbf16>
    %c512 = arith.constant 512 : index
    %c0_34 = arith.constant 0 : index
    %50 = vector.load %arg2[%c512, %c0_34] : memref<576x64xbf16, #tpu.memory_space<vmem>>, vector<64x64xbf16>
    %cst_35 = arith.constant dense<0.000000e+00> : vector<80x64xf32>
    %51 = tpu.matmul %49, %50, %cst_35 {dimension_numbers = #tpu.dot_dimension_numbers<[1], [0], [0], [1], [0, 0, 1, 1], [], []>} : vector<80x64xbf16>, vector<64x64xbf16>, vector<80x64xf32> -> vector<80x64xf32>
    %52 = arith.addf %46, %51 : vector<80x64xf32>
    %c0_36 = arith.constant 0 : index
    %c0_37 = arith.constant 0 : index
    %c0_38 = arith.constant 0 : index
    %53 = vector.load %arg3[%c0_36, %c0_37, %c0_38] : memref<1x80x64xf32, #tpu.memory_space<vmem>>, vector<1x80x64xf32>
    %54 = vector.shape_cast %53 : vector<1x80x64xf32> to vector<80x64xf32>
    %55 = vector.shape_cast %52 : vector<80x64xf32> to vector<1x80x64xf32>
    tpu.vector_store %arg3[%c0_36, %c0_37, %c0_38], %55 {strides = array<i32>} : memref<1x80x64xf32, #tpu.memory_space<vmem>>, vector<1x80x64xf32>,
    return
  }
  func.func @transform_0(%arg0: i32) -> (i32, i32, i32) {
    %c0_i32 = arith.constant 0 : i32
    %c0_i32_0 = arith.constant 0 : i32
    %c0_i32_1 = arith.constant 0 : i32
    return %arg0, %c0_i32, %c0_i32_0 : i32, i32, i32
  }
  func.func @transform_1(%arg0: i32) -> (i32, i32) {
    %c0_i32 = arith.constant 0 : i32
    %c0_i32_0 = arith.constant 0 : i32
    %c0_i32_1 = arith.constant 0 : i32
    return %c0_i32, %c0_i32_0 : i32, i32
  }
  func.func @transform_2(%arg0: i32) -> (i32, i32, i32) {
    %c0_i32 = arith.constant 0 : i32
    %c0_i32_0 = arith.constant 0 : i32
    %c0_i32_1 = arith.constant 0 : i32
    return %arg0, %c0_i32, %c0_i32_0 : i32, i32, i32
  }
}

module attributes {stable_mosaic.version = 11 : i64} {
  func.func @_bn_norm_kernel(%arg0: i32, %arg1: memref<128x256xf32, #tpu.memory_space<vmem>>, %arg2: memref<128x256xf32, #tpu.memory_space<vmem>>, %arg3: memref<2x256xf32, #tpu.memory_space<vmem>>, %arg4: memref<1x256xf32, #tpu.memory_space<vmem>>, %arg5: memref<1x256xf32, #tpu.memory_space<vmem>>, %arg6: memref<128x256xf32, #tpu.memory_space<vmem>>) attributes {dimension_semantics = [#tpu.dimension_semantics<parallel>], iteration_bounds = array<i64: 1>, scalar_prefetch = 0 : i64, scratch_operands = 0 : i64, tpu.core_type = #tpu.core_type<tc>, window_params = [{transform_indices = @transform_0, window_bounds = array<i64: 128, 256>}, {transform_indices = @transform_1, window_bounds = array<i64: 128, 256>}, {pipeline_mode = #tpu.pipeline_mode<synchronous>, transform_indices = @transform_2, window_bounds = array<i64: 2, 256>}, {pipeline_mode = #tpu.pipeline_mode<synchronous>, transform_indices = @transform_3, window_bounds = array<i64: 1, 256>}, {pipeline_mode = #tpu.pipeline_mode<synchronous>, transform_indices = @transform_4, window_bounds = array<i64: 1, 256>}, {transform_indices = @transform_5, window_bounds = array<i64: 128, 256>}]} {
    %c0 = arith.constant 0 : index
    %c0_0 = arith.constant 0 : index
    %0 = vector.load %arg3[%c0, %c0_0] : memref<2x256xf32, #tpu.memory_space<vmem>>, vector<2x256xf32>
    %1 = vector.extract_strided_slice %0 {offsets = [0, 0], sizes = [1, 256], strides = [1, 1]} : vector<2x256xf32> to vector<1x256xf32>
    %cst = arith.constant 7.812500e-03 : f32
    %2 = vector.broadcast %cst : f32 to vector<1x256xf32>
    %3 = arith.mulf %1, %2 : vector<1x256xf32>
    %4 = vector.extract_strided_slice %0 {offsets = [1, 0], sizes = [1, 256], strides = [1, 1]} : vector<2x256xf32> to vector<1x256xf32>
    %cst_1 = arith.constant 7.812500e-03 : f32
    %5 = vector.broadcast %cst_1 : f32 to vector<1x256xf32>
    %6 = arith.mulf %4, %5 : vector<1x256xf32>
    %7 = arith.mulf %3, %3 : vector<1x256xf32>
    %8 = arith.subf %6, %7 : vector<1x256xf32>
    %c0_2 = arith.constant 0 : index
    %c0_3 = arith.constant 0 : index
    %9 = vector.load %arg4[%c0_2, %c0_3] : memref<1x256xf32, #tpu.memory_space<vmem>>, vector<1x256xf32>
    %cst_4 = arith.constant 9.99999974E-6 : f32
    %10 = vector.broadcast %cst_4 : f32 to vector<1x256xf32>
    %11 = arith.addf %8, %10 : vector<1x256xf32>
    %12 = math.rsqrt %11 : vector<1x256xf32>
    %13 = arith.mulf %9, %12 : vector<1x256xf32>
    %c0_5 = arith.constant 0 : index
    %c0_6 = arith.constant 0 : index
    %14 = vector.load %arg5[%c0_5, %c0_6] : memref<1x256xf32, #tpu.memory_space<vmem>>, vector<1x256xf32>
    %15 = arith.mulf %3, %13 : vector<1x256xf32>
    %16 = arith.subf %14, %15 : vector<1x256xf32>
    %c0_7 = arith.constant 0 : index
    %c0_8 = arith.constant 0 : index
    %17 = vector.load %arg1[%c0_7, %c0_8] : memref<128x256xf32, #tpu.memory_space<vmem>>, vector<128x256xf32>
    %18 = vector.broadcast %13 : vector<1x256xf32> to vector<128x256xf32>
    %19 = arith.mulf %17, %18 : vector<128x256xf32>
    %20 = vector.broadcast %16 : vector<1x256xf32> to vector<128x256xf32>
    %21 = arith.addf %19, %20 : vector<128x256xf32>
    %c0_9 = arith.constant 0 : index
    %c0_10 = arith.constant 0 : index
    %22 = vector.load %arg2[%c0_9, %c0_10] : memref<128x256xf32, #tpu.memory_space<vmem>>, vector<128x256xf32>
    %23 = arith.addf %21, %22 : vector<128x256xf32>
    %cst_11 = arith.constant 0.000000e+00 : f32
    %24 = vector.broadcast %cst_11 : f32 to vector<128x256xf32>
    %25 = arith.maximumf %23, %24 : vector<128x256xf32>
    %c0_12 = arith.constant 0 : index
    %c0_13 = arith.constant 0 : index
    %26 = vector.load %arg6[%c0_12, %c0_13] : memref<128x256xf32, #tpu.memory_space<vmem>>, vector<128x256xf32>
    tpu.vector_store %arg6[%c0_12, %c0_13], %25 {strides = array<i32>} : memref<128x256xf32, #tpu.memory_space<vmem>>, vector<128x256xf32>,
    return
  }
  func.func @transform_0(%arg0: i32) -> (i32, i32) {
    %c0_i32 = arith.constant 0 : i32
    %c0_i32_0 = arith.constant 0 : i32
    return %arg0, %c0_i32 : i32, i32
  }
  func.func @transform_1(%arg0: i32) -> (i32, i32) {
    %c0_i32 = arith.constant 0 : i32
    %c0_i32_0 = arith.constant 0 : i32
    return %arg0, %c0_i32 : i32, i32
  }
  func.func @transform_2(%arg0: i32) -> (i32, i32) {
    %c0_i32 = arith.constant 0 : i32
    %c0_i32_0 = arith.constant 0 : i32
    %c0_i32_1 = arith.constant 0 : i32
    return %c0_i32, %c0_i32_0 : i32, i32
  }
  func.func @transform_3(%arg0: i32) -> (i32, i32) {
    %c0_i32 = arith.constant 0 : i32
    %c0_i32_0 = arith.constant 0 : i32
    %c0_i32_1 = arith.constant 0 : i32
    return %c0_i32, %c0_i32_0 : i32, i32
  }
  func.func @transform_4(%arg0: i32) -> (i32, i32) {
    %c0_i32 = arith.constant 0 : i32
    %c0_i32_0 = arith.constant 0 : i32
    %c0_i32_1 = arith.constant 0 : i32
    return %c0_i32, %c0_i32_0 : i32, i32
  }
  func.func @transform_5(%arg0: i32) -> (i32, i32) {
    %c0_i32 = arith.constant 0 : i32
    %c0_i32_0 = arith.constant 0 : i32
    return %arg0, %c0_i32 : i32, i32
  }
}

module attributes {stable_mosaic.version = 11 : i64} {
  func.func @_matmul_kernel(%arg0: i32, %arg1: i32, %arg2: memref<128x256xbf16, #tpu.memory_space<vmem>>, %arg3: memref<256x64xbf16, #tpu.memory_space<vmem>>, %arg4: memref<128x64xf32, #tpu.memory_space<vmem>>) attributes {dimension_semantics = [#tpu.dimension_semantics<parallel>, #tpu.dimension_semantics<parallel>], iteration_bounds = array<i64: 1, 1>, scalar_prefetch = 0 : i64, scratch_operands = 0 : i64, tpu.core_type = #tpu.core_type<tc>, window_params = [{transform_indices = @transform_0, window_bounds = array<i64: 128, 256>}, {transform_indices = @transform_1, window_bounds = array<i64: 256, 64>}, {transform_indices = @transform_2, window_bounds = array<i64: 128, 64>}]} {
    %c0 = arith.constant 0 : index
    %c0_0 = arith.constant 0 : index
    %0 = vector.load %arg2[%c0, %c0_0] : memref<128x256xbf16, #tpu.memory_space<vmem>>, vector<128x256xbf16>
    %c0_1 = arith.constant 0 : index
    %c0_2 = arith.constant 0 : index
    %1 = vector.load %arg3[%c0_1, %c0_2] : memref<256x64xbf16, #tpu.memory_space<vmem>>, vector<256x64xbf16>
    %cst = arith.constant dense<0.000000e+00> : vector<128x64xf32>
    %2 = tpu.matmul %0, %1, %cst {dimension_numbers = #tpu.dot_dimension_numbers<[1], [0], [0], [1], [0, 0, 1, 1], [], []>} : vector<128x256xbf16>, vector<256x64xbf16>, vector<128x64xf32> -> vector<128x64xf32>
    %c0_3 = arith.constant 0 : index
    %c0_4 = arith.constant 0 : index
    %3 = vector.load %arg4[%c0_3, %c0_4] : memref<128x64xf32, #tpu.memory_space<vmem>>, vector<128x64xf32>
    tpu.vector_store %arg4[%c0_3, %c0_4], %2 {strides = array<i32>} : memref<128x64xf32, #tpu.memory_space<vmem>>, vector<128x64xf32>,
    return
  }
  func.func @transform_0(%arg0: i32, %arg1: i32) -> (i32, i32) {
    %c0_i32 = arith.constant 0 : i32
    %c0_i32_0 = arith.constant 0 : i32
    return %arg0, %c0_i32 : i32, i32
  }
  func.func @transform_1(%arg0: i32, %arg1: i32) -> (i32, i32) {
    %c0_i32 = arith.constant 0 : i32
    %c0_i32_0 = arith.constant 0 : i32
    return %c0_i32, %arg1 : i32, i32
  }
  func.func @transform_2(%arg0: i32, %arg1: i32) -> (i32, i32) {
    %c0_i32 = arith.constant 0 : i32
    return %arg0, %arg1 : i32, i32
  }
}

module attributes {stable_mosaic.version = 11 : i64} {
  func.func @_matmul_kernel(%arg0: i32, %arg1: i32, %arg2: memref<32x256xbf16, #tpu.memory_space<vmem>>, %arg3: memref<256x256xbf16, #tpu.memory_space<vmem>>, %arg4: memref<32x256xf32, #tpu.memory_space<vmem>>) attributes {dimension_semantics = [#tpu.dimension_semantics<parallel>, #tpu.dimension_semantics<parallel>], iteration_bounds = array<i64: 1, 2>, scalar_prefetch = 0 : i64, scratch_operands = 0 : i64, tpu.core_type = #tpu.core_type<tc>, window_params = [{transform_indices = @transform_0, window_bounds = array<i64: 32, 256>}, {transform_indices = @transform_1, window_bounds = array<i64: 256, 256>}, {transform_indices = @transform_2, window_bounds = array<i64: 32, 256>}]} {
    %c0 = arith.constant 0 : index
    %c0_0 = arith.constant 0 : index
    %0 = vector.load %arg2[%c0, %c0_0] : memref<32x256xbf16, #tpu.memory_space<vmem>>, vector<32x256xbf16>
    %c0_1 = arith.constant 0 : index
    %c0_2 = arith.constant 0 : index
    %1 = vector.load %arg3[%c0_1, %c0_2] : memref<256x256xbf16, #tpu.memory_space<vmem>>, vector<256x256xbf16>
    %cst = arith.constant dense<0.000000e+00> : vector<32x256xf32>
    %2 = tpu.matmul %0, %1, %cst {dimension_numbers = #tpu.dot_dimension_numbers<[1], [0], [0], [1], [0, 0, 1, 1], [], []>} : vector<32x256xbf16>, vector<256x256xbf16>, vector<32x256xf32> -> vector<32x256xf32>
    %c0_3 = arith.constant 0 : index
    %c0_4 = arith.constant 0 : index
    %3 = vector.load %arg4[%c0_3, %c0_4] : memref<32x256xf32, #tpu.memory_space<vmem>>, vector<32x256xf32>
    tpu.vector_store %arg4[%c0_3, %c0_4], %2 {strides = array<i32>} : memref<32x256xf32, #tpu.memory_space<vmem>>, vector<32x256xf32>,
    return
  }
  func.func @transform_0(%arg0: i32, %arg1: i32) -> (i32, i32) {
    %c0_i32 = arith.constant 0 : i32
    %c0_i32_0 = arith.constant 0 : i32
    return %arg0, %c0_i32 : i32, i32
  }
  func.func @transform_1(%arg0: i32, %arg1: i32) -> (i32, i32) {
    %c0_i32 = arith.constant 0 : i32
    %c0_i32_0 = arith.constant 0 : i32
    return %c0_i32, %arg1 : i32, i32
  }
  func.func @transform_2(%arg0: i32, %arg1: i32) -> (i32, i32) {
    %c0_i32 = arith.constant 0 : i32
    return %arg0, %arg1 : i32, i32
  }
}

module attributes {stable_mosaic.version = 11 : i64} {
  func.func @_bn_stats_kernel(%arg0: i32, %arg1: memref<32x512xf32, #tpu.memory_space<vmem>>, %arg2: memref<2x512xf32, #tpu.memory_space<vmem>>) attributes {dimension_semantics = [#tpu.dimension_semantics<arbitrary>], iteration_bounds = array<i64: 1>, scalar_prefetch = 0 : i64, scratch_operands = 0 : i64, tpu.core_type = #tpu.core_type<tc>, window_params = [{transform_indices = @transform_0, window_bounds = array<i64: 32, 512>}, {pipeline_mode = #tpu.pipeline_mode<synchronous>, transform_indices = @transform_1, window_bounds = array<i64: 2, 512>}]} {
    %c0_i32 = arith.constant 0 : i32
    %0 = arith.cmpi eq, %arg0, %c0_i32 : i32
    %1 = arith.extui %0 : i1 to i32
    %c0_i32_0 = arith.constant 0 : i32
    %2 = arith.cmpi ne, %1, %c0_i32_0 : i32
    scf.if %2 {
      %cst_10 = arith.constant 0.000000e+00 : f32
      %15 = vector.broadcast %cst_10 : f32 to vector<2x512xf32>
      %c0_11 = arith.constant 0 : index
      %c0_12 = arith.constant 0 : index
      %16 = vector.load %arg2[%c0_11, %c0_12] : memref<2x512xf32, #tpu.memory_space<vmem>>, vector<2x512xf32>
      tpu.vector_store %arg2[%c0_11, %c0_12], %15 {strides = array<i32>} : memref<2x512xf32, #tpu.memory_space<vmem>>, vector<2x512xf32>,
    } else {
    }
    %c0 = arith.constant 0 : index
    %c0_1 = arith.constant 0 : index
    %3 = vector.load %arg1[%c0, %c0_1] : memref<32x512xf32, #tpu.memory_space<vmem>>, vector<32x512xf32>
    %c0_2 = arith.constant 0 : index
    %c0_3 = arith.constant 0 : index
    %4 = vector.load %arg2[%c0_2, %c0_3] : memref<2x512xf32, #tpu.memory_space<vmem>>, vector<1x512xf32>
    %cst = arith.constant dense<0.000000e+00> : vector<512xf32>
    %5 = vector.multi_reduction <add>, %3, %cst [0] : vector<32x512xf32> to vector<512xf32>
    %6 = vector.shape_cast %5 : vector<512xf32> to vector<1x512xf32>
    %7 = arith.addf %4, %6 : vector<1x512xf32>
    %c0_4 = arith.constant 0 : index
    %c0_5 = arith.constant 0 : index
    %8 = vector.load %arg2[%c0_4, %c0_5] : memref<2x512xf32, #tpu.memory_space<vmem>>, vector<1x512xf32>
    tpu.vector_store %arg2[%c0_4, %c0_5], %7 {strides = array<i32>} : memref<2x512xf32, #tpu.memory_space<vmem>>, vector<1x512xf32>,
    %c1 = arith.constant 1 : index
    %c0_6 = arith.constant 0 : index
    %9 = vector.load %arg2[%c1, %c0_6] : memref<2x512xf32, #tpu.memory_space<vmem>>, vector<1x512xf32>
    %10 = arith.mulf %3, %3 : vector<32x512xf32>
    %cst_7 = arith.constant dense<0.000000e+00> : vector<512xf32>
    %11 = vector.multi_reduction <add>, %10, %cst_7 [0] : vector<32x512xf32> to vector<512xf32>
    %12 = vector.shape_cast %11 : vector<512xf32> to vector<1x512xf32>
    %13 = arith.addf %9, %12 : vector<1x512xf32>
    %c1_8 = arith.constant 1 : index
    %c0_9 = arith.constant 0 : index
    %14 = vector.load %arg2[%c1_8, %c0_9] : memref<2x512xf32, #tpu.memory_space<vmem>>, vector<1x512xf32>
    tpu.vector_store %arg2[%c1_8, %c0_9], %13 {strides = array<i32>} : memref<2x512xf32, #tpu.memory_space<vmem>>, vector<1x512xf32>,
    return
  }
  func.func @transform_0(%arg0: i32) -> (i32, i32) {
    %c0_i32 = arith.constant 0 : i32
    %c0_i32_0 = arith.constant 0 : i32
    return %arg0, %c0_i32 : i32, i32
  }
  func.func @transform_1(%arg0: i32) -> (i32, i32) {
    %c0_i32 = arith.constant 0 : i32
    %c0_i32_0 = arith.constant 0 : i32
    %c0_i32_1 = arith.constant 0 : i32
    return %c0_i32, %c0_i32_0 : i32, i32
  }
}

module attributes {stable_mosaic.version = 11 : i64} {
  func.func @_matmul_kernel(%arg0: i32, %arg1: i32, %arg2: memref<128x256xbf16, #tpu.memory_space<vmem>>, %arg3: memref<256x128xbf16, #tpu.memory_space<vmem>>, %arg4: memref<128x128xf32, #tpu.memory_space<vmem>>) attributes {dimension_semantics = [#tpu.dimension_semantics<parallel>, #tpu.dimension_semantics<parallel>], iteration_bounds = array<i64: 1, 1>, scalar_prefetch = 0 : i64, scratch_operands = 0 : i64, tpu.core_type = #tpu.core_type<tc>, window_params = [{transform_indices = @transform_0, window_bounds = array<i64: 128, 256>}, {transform_indices = @transform_1, window_bounds = array<i64: 256, 128>}, {transform_indices = @transform_2, window_bounds = array<i64: 128, 128>}]} {
    %c0 = arith.constant 0 : index
    %c0_0 = arith.constant 0 : index
    %0 = vector.load %arg2[%c0, %c0_0] : memref<128x256xbf16, #tpu.memory_space<vmem>>, vector<128x256xbf16>
    %c0_1 = arith.constant 0 : index
    %c0_2 = arith.constant 0 : index
    %1 = vector.load %arg3[%c0_1, %c0_2] : memref<256x128xbf16, #tpu.memory_space<vmem>>, vector<256x128xbf16>
    %cst = arith.constant dense<0.000000e+00> : vector<128x128xf32>
    %2 = tpu.matmul %0, %1, %cst {dimension_numbers = #tpu.dot_dimension_numbers<[1], [0], [0], [1], [0, 0, 1, 1], [], []>} : vector<128x256xbf16>, vector<256x128xbf16>, vector<128x128xf32> -> vector<128x128xf32>
    %c0_3 = arith.constant 0 : index
    %c0_4 = arith.constant 0 : index
    %3 = vector.load %arg4[%c0_3, %c0_4] : memref<128x128xf32, #tpu.memory_space<vmem>>, vector<128x128xf32>
    tpu.vector_store %arg4[%c0_3, %c0_4], %2 {strides = array<i32>} : memref<128x128xf32, #tpu.memory_space<vmem>>, vector<128x128xf32>,
    return
  }
  func.func @transform_0(%arg0: i32, %arg1: i32) -> (i32, i32) {
    %c0_i32 = arith.constant 0 : i32
    %c0_i32_0 = arith.constant 0 : i32
    return %arg0, %c0_i32 : i32, i32
  }
  func.func @transform_1(%arg0: i32, %arg1: i32) -> (i32, i32) {
    %c0_i32 = arith.constant 0 : i32
    %c0_i32_0 = arith.constant 0 : i32
    return %c0_i32, %arg1 : i32, i32
  }
  func.func @transform_2(%arg0: i32, %arg1: i32) -> (i32, i32) {
    %c0_i32 = arith.constant 0 : i32
    return %arg0, %arg1 : i32, i32
  }
}

module attributes {stable_mosaic.version = 11 : i64} {
  func.func @_bn_norm_kernel(%arg0: i32, %arg1: memref<32x512xf32, #tpu.memory_space<vmem>>, %arg2: memref<2x512xf32, #tpu.memory_space<vmem>>, %arg3: memref<1x512xf32, #tpu.memory_space<vmem>>, %arg4: memref<1x512xf32, #tpu.memory_space<vmem>>, %arg5: memref<32x512xf32, #tpu.memory_space<vmem>>) attributes {dimension_semantics = [#tpu.dimension_semantics<parallel>], iteration_bounds = array<i64: 1>, scalar_prefetch = 0 : i64, scratch_operands = 0 : i64, tpu.core_type = #tpu.core_type<tc>, window_params = [{transform_indices = @transform_0, window_bounds = array<i64: 32, 512>}, {pipeline_mode = #tpu.pipeline_mode<synchronous>, transform_indices = @transform_1, window_bounds = array<i64: 2, 512>}, {pipeline_mode = #tpu.pipeline_mode<synchronous>, transform_indices = @transform_2, window_bounds = array<i64: 1, 512>}, {pipeline_mode = #tpu.pipeline_mode<synchronous>, transform_indices = @transform_3, window_bounds = array<i64: 1, 512>}, {transform_indices = @transform_4, window_bounds = array<i64: 32, 512>}]} {
    %c0 = arith.constant 0 : index
    %c0_0 = arith.constant 0 : index
    %0 = vector.load %arg2[%c0, %c0_0] : memref<2x512xf32, #tpu.memory_space<vmem>>, vector<2x512xf32>
    %1 = vector.extract_strided_slice %0 {offsets = [0, 0], sizes = [1, 512], strides = [1, 1]} : vector<2x512xf32> to vector<1x512xf32>
    %cst = arith.constant 3.125000e-02 : f32
    %2 = vector.broadcast %cst : f32 to vector<1x512xf32>
    %3 = arith.mulf %1, %2 : vector<1x512xf32>
    %4 = vector.extract_strided_slice %0 {offsets = [1, 0], sizes = [1, 512], strides = [1, 1]} : vector<2x512xf32> to vector<1x512xf32>
    %cst_1 = arith.constant 3.125000e-02 : f32
    %5 = vector.broadcast %cst_1 : f32 to vector<1x512xf32>
    %6 = arith.mulf %4, %5 : vector<1x512xf32>
    %7 = arith.mulf %3, %3 : vector<1x512xf32>
    %8 = arith.subf %6, %7 : vector<1x512xf32>
    %c0_2 = arith.constant 0 : index
    %c0_3 = arith.constant 0 : index
    %9 = vector.load %arg3[%c0_2, %c0_3] : memref<1x512xf32, #tpu.memory_space<vmem>>, vector<1x512xf32>
    %cst_4 = arith.constant 9.99999974E-6 : f32
    %10 = vector.broadcast %cst_4 : f32 to vector<1x512xf32>
    %11 = arith.addf %8, %10 : vector<1x512xf32>
    %12 = math.rsqrt %11 : vector<1x512xf32>
    %13 = arith.mulf %9, %12 : vector<1x512xf32>
    %c0_5 = arith.constant 0 : index
    %c0_6 = arith.constant 0 : index
    %14 = vector.load %arg4[%c0_5, %c0_6] : memref<1x512xf32, #tpu.memory_space<vmem>>, vector<1x512xf32>
    %15 = arith.mulf %3, %13 : vector<1x512xf32>
    %16 = arith.subf %14, %15 : vector<1x512xf32>
    %c0_7 = arith.constant 0 : index
    %c0_8 = arith.constant 0 : index
    %17 = vector.load %arg1[%c0_7, %c0_8] : memref<32x512xf32, #tpu.memory_space<vmem>>, vector<32x512xf32>
    %18 = vector.broadcast %13 : vector<1x512xf32> to vector<32x512xf32>
    %19 = arith.mulf %17, %18 : vector<32x512xf32>
    %20 = vector.broadcast %16 : vector<1x512xf32> to vector<32x512xf32>
    %21 = arith.addf %19, %20 : vector<32x512xf32>
    %c0_9 = arith.constant 0 : index
    %c0_10 = arith.constant 0 : index
    %22 = vector.load %arg5[%c0_9, %c0_10] : memref<32x512xf32, #tpu.memory_space<vmem>>, vector<32x512xf32>
    tpu.vector_store %arg5[%c0_9, %c0_10], %21 {strides = array<i32>} : memref<32x512xf32, #tpu.memory_space<vmem>>, vector<32x512xf32>,
    return
  }
  func.func @transform_0(%arg0: i32) -> (i32, i32) {
    %c0_i32 = arith.constant 0 : i32
    %c0_i32_0 = arith.constant 0 : i32
    return %arg0, %c0_i32 : i32, i32
  }
  func.func @transform_1(%arg0: i32) -> (i32, i32) {
    %c0_i32 = arith.constant 0 : i32
    %c0_i32_0 = arith.constant 0 : i32
    %c0_i32_1 = arith.constant 0 : i32
    return %c0_i32, %c0_i32_0 : i32, i32
  }
  func.func @transform_2(%arg0: i32) -> (i32, i32) {
    %c0_i32 = arith.constant 0 : i32
    %c0_i32_0 = arith.constant 0 : i32
    %c0_i32_1 = arith.constant 0 : i32
    return %c0_i32, %c0_i32_0 : i32, i32
  }
  func.func @transform_3(%arg0: i32) -> (i32, i32) {
    %c0_i32 = arith.constant 0 : i32
    %c0_i32_0 = arith.constant 0 : i32
    %c0_i32_1 = arith.constant 0 : i32
    return %c0_i32, %c0_i32_0 : i32, i32
  }
  func.func @transform_4(%arg0: i32) -> (i32, i32) {
    %c0_i32 = arith.constant 0 : i32
    %c0_i32_0 = arith.constant 0 : i32
    return %arg0, %c0_i32 : i32, i32
  }
}

module attributes {stable_mosaic.version = 11 : i64} {
  func.func @_bn_stats_kernel(%arg0: i32, %arg1: memref<128x128xf32, #tpu.memory_space<vmem>>, %arg2: memref<2x128xf32, #tpu.memory_space<vmem>>) attributes {dimension_semantics = [#tpu.dimension_semantics<arbitrary>], iteration_bounds = array<i64: 1>, scalar_prefetch = 0 : i64, scratch_operands = 0 : i64, tpu.core_type = #tpu.core_type<tc>, window_params = [{transform_indices = @transform_0, window_bounds = array<i64: 128, 128>}, {pipeline_mode = #tpu.pipeline_mode<synchronous>, transform_indices = @transform_1, window_bounds = array<i64: 2, 128>}]} {
    %c0_i32 = arith.constant 0 : i32
    %0 = arith.cmpi eq, %arg0, %c0_i32 : i32
    %1 = arith.extui %0 : i1 to i32
    %c0_i32_0 = arith.constant 0 : i32
    %2 = arith.cmpi ne, %1, %c0_i32_0 : i32
    scf.if %2 {
      %cst_10 = arith.constant 0.000000e+00 : f32
      %15 = vector.broadcast %cst_10 : f32 to vector<2x128xf32>
      %c0_11 = arith.constant 0 : index
      %c0_12 = arith.constant 0 : index
      %16 = vector.load %arg2[%c0_11, %c0_12] : memref<2x128xf32, #tpu.memory_space<vmem>>, vector<2x128xf32>
      tpu.vector_store %arg2[%c0_11, %c0_12], %15 {strides = array<i32>} : memref<2x128xf32, #tpu.memory_space<vmem>>, vector<2x128xf32>,
    } else {
    }
    %c0 = arith.constant 0 : index
    %c0_1 = arith.constant 0 : index
    %3 = vector.load %arg1[%c0, %c0_1] : memref<128x128xf32, #tpu.memory_space<vmem>>, vector<128x128xf32>
    %c0_2 = arith.constant 0 : index
    %c0_3 = arith.constant 0 : index
    %4 = vector.load %arg2[%c0_2, %c0_3] : memref<2x128xf32, #tpu.memory_space<vmem>>, vector<1x128xf32>
    %cst = arith.constant dense<0.000000e+00> : vector<128xf32>
    %5 = vector.multi_reduction <add>, %3, %cst [0] : vector<128x128xf32> to vector<128xf32>
    %6 = vector.shape_cast %5 : vector<128xf32> to vector<1x128xf32>
    %7 = arith.addf %4, %6 : vector<1x128xf32>
    %c0_4 = arith.constant 0 : index
    %c0_5 = arith.constant 0 : index
    %8 = vector.load %arg2[%c0_4, %c0_5] : memref<2x128xf32, #tpu.memory_space<vmem>>, vector<1x128xf32>
    tpu.vector_store %arg2[%c0_4, %c0_5], %7 {strides = array<i32>} : memref<2x128xf32, #tpu.memory_space<vmem>>, vector<1x128xf32>,
    %c1 = arith.constant 1 : index
    %c0_6 = arith.constant 0 : index
    %9 = vector.load %arg2[%c1, %c0_6] : memref<2x128xf32, #tpu.memory_space<vmem>>, vector<1x128xf32>
    %10 = arith.mulf %3, %3 : vector<128x128xf32>
    %cst_7 = arith.constant dense<0.000000e+00> : vector<128xf32>
    %11 = vector.multi_reduction <add>, %10, %cst_7 [0] : vector<128x128xf32> to vector<128xf32>
    %12 = vector.shape_cast %11 : vector<128xf32> to vector<1x128xf32>
    %13 = arith.addf %9, %12 : vector<1x128xf32>
    %c1_8 = arith.constant 1 : index
    %c0_9 = arith.constant 0 : index
    %14 = vector.load %arg2[%c1_8, %c0_9] : memref<2x128xf32, #tpu.memory_space<vmem>>, vector<1x128xf32>
    tpu.vector_store %arg2[%c1_8, %c0_9], %13 {strides = array<i32>} : memref<2x128xf32, #tpu.memory_space<vmem>>, vector<1x128xf32>,
    return
  }
  func.func @transform_0(%arg0: i32) -> (i32, i32) {
    %c0_i32 = arith.constant 0 : i32
    %c0_i32_0 = arith.constant 0 : i32
    return %arg0, %c0_i32 : i32, i32
  }
  func.func @transform_1(%arg0: i32) -> (i32, i32) {
    %c0_i32 = arith.constant 0 : i32
    %c0_i32_0 = arith.constant 0 : i32
    %c0_i32_1 = arith.constant 0 : i32
    return %c0_i32, %c0_i32_0 : i32, i32
  }
}

module attributes {stable_mosaic.version = 11 : i64} {
  func.func @_bn_norm_kernel(%arg0: i32, %arg1: memref<128x128xf32, #tpu.memory_space<vmem>>, %arg2: memref<2x128xf32, #tpu.memory_space<vmem>>, %arg3: memref<1x128xf32, #tpu.memory_space<vmem>>, %arg4: memref<1x128xf32, #tpu.memory_space<vmem>>, %arg5: memref<128x128xf32, #tpu.memory_space<vmem>>) attributes {dimension_semantics = [#tpu.dimension_semantics<parallel>], iteration_bounds = array<i64: 1>, scalar_prefetch = 0 : i64, scratch_operands = 0 : i64, tpu.core_type = #tpu.core_type<tc>, window_params = [{transform_indices = @transform_0, window_bounds = array<i64: 128, 128>}, {pipeline_mode = #tpu.pipeline_mode<synchronous>, transform_indices = @transform_1, window_bounds = array<i64: 2, 128>}, {pipeline_mode = #tpu.pipeline_mode<synchronous>, transform_indices = @transform_2, window_bounds = array<i64: 1, 128>}, {pipeline_mode = #tpu.pipeline_mode<synchronous>, transform_indices = @transform_3, window_bounds = array<i64: 1, 128>}, {transform_indices = @transform_4, window_bounds = array<i64: 128, 128>}]} {
    %c0 = arith.constant 0 : index
    %c0_0 = arith.constant 0 : index
    %0 = vector.load %arg2[%c0, %c0_0] : memref<2x128xf32, #tpu.memory_space<vmem>>, vector<2x128xf32>
    %1 = vector.extract_strided_slice %0 {offsets = [0, 0], sizes = [1, 128], strides = [1, 1]} : vector<2x128xf32> to vector<1x128xf32>
    %cst = arith.constant 7.812500e-03 : f32
    %2 = vector.broadcast %cst : f32 to vector<1x128xf32>
    %3 = arith.mulf %1, %2 : vector<1x128xf32>
    %4 = vector.extract_strided_slice %0 {offsets = [1, 0], sizes = [1, 128], strides = [1, 1]} : vector<2x128xf32> to vector<1x128xf32>
    %cst_1 = arith.constant 7.812500e-03 : f32
    %5 = vector.broadcast %cst_1 : f32 to vector<1x128xf32>
    %6 = arith.mulf %4, %5 : vector<1x128xf32>
    %7 = arith.mulf %3, %3 : vector<1x128xf32>
    %8 = arith.subf %6, %7 : vector<1x128xf32>
    %c0_2 = arith.constant 0 : index
    %c0_3 = arith.constant 0 : index
    %9 = vector.load %arg3[%c0_2, %c0_3] : memref<1x128xf32, #tpu.memory_space<vmem>>, vector<1x128xf32>
    %cst_4 = arith.constant 9.99999974E-6 : f32
    %10 = vector.broadcast %cst_4 : f32 to vector<1x128xf32>
    %11 = arith.addf %8, %10 : vector<1x128xf32>
    %12 = math.rsqrt %11 : vector<1x128xf32>
    %13 = arith.mulf %9, %12 : vector<1x128xf32>
    %c0_5 = arith.constant 0 : index
    %c0_6 = arith.constant 0 : index
    %14 = vector.load %arg4[%c0_5, %c0_6] : memref<1x128xf32, #tpu.memory_space<vmem>>, vector<1x128xf32>
    %15 = arith.mulf %3, %13 : vector<1x128xf32>
    %16 = arith.subf %14, %15 : vector<1x128xf32>
    %c0_7 = arith.constant 0 : index
    %c0_8 = arith.constant 0 : index
    %17 = vector.load %arg1[%c0_7, %c0_8] : memref<128x128xf32, #tpu.memory_space<vmem>>, vector<128x128xf32>
    %18 = vector.broadcast %13 : vector<1x128xf32> to vector<128x128xf32>
    %19 = arith.mulf %17, %18 : vector<128x128xf32>
    %20 = vector.broadcast %16 : vector<1x128xf32> to vector<128x128xf32>
    %21 = arith.addf %19, %20 : vector<128x128xf32>
    %cst_9 = arith.constant 0.000000e+00 : f32
    %22 = vector.broadcast %cst_9 : f32 to vector<128x128xf32>
    %23 = arith.maximumf %21, %22 : vector<128x128xf32>
    %c0_10 = arith.constant 0 : index
    %c0_11 = arith.constant 0 : index
    %24 = vector.load %arg5[%c0_10, %c0_11] : memref<128x128xf32, #tpu.memory_space<vmem>>, vector<128x128xf32>
    tpu.vector_store %arg5[%c0_10, %c0_11], %23 {strides = array<i32>} : memref<128x128xf32, #tpu.memory_space<vmem>>, vector<128x128xf32>,
    return
  }
  func.func @transform_0(%arg0: i32) -> (i32, i32) {
    %c0_i32 = arith.constant 0 : i32
    %c0_i32_0 = arith.constant 0 : i32
    return %arg0, %c0_i32 : i32, i32
  }
  func.func @transform_1(%arg0: i32) -> (i32, i32) {
    %c0_i32 = arith.constant 0 : i32
    %c0_i32_0 = arith.constant 0 : i32
    %c0_i32_1 = arith.constant 0 : i32
    return %c0_i32, %c0_i32_0 : i32, i32
  }
  func.func @transform_2(%arg0: i32) -> (i32, i32) {
    %c0_i32 = arith.constant 0 : i32
    %c0_i32_0 = arith.constant 0 : i32
    %c0_i32_1 = arith.constant 0 : i32
    return %c0_i32, %c0_i32_0 : i32, i32
  }
  func.func @transform_3(%arg0: i32) -> (i32, i32) {
    %c0_i32 = arith.constant 0 : i32
    %c0_i32_0 = arith.constant 0 : i32
    %c0_i32_1 = arith.constant 0 : i32
    return %c0_i32, %c0_i32_0 : i32, i32
  }
  func.func @transform_4(%arg0: i32) -> (i32, i32) {
    %c0_i32 = arith.constant 0 : i32
    %c0_i32_0 = arith.constant 0 : i32
    return %arg0, %c0_i32 : i32, i32
  }
}

module attributes {stable_mosaic.version = 11 : i64} {
  func.func @_matmul_kernel(%arg0: i32, %arg1: i32, %arg2: memref<32x1152xbf16, #tpu.memory_space<vmem>>, %arg3: memref<1152x128xbf16, #tpu.memory_space<vmem>>, %arg4: memref<32x128xf32, #tpu.memory_space<vmem>>) attributes {dimension_semantics = [#tpu.dimension_semantics<parallel>, #tpu.dimension_semantics<parallel>], iteration_bounds = array<i64: 1, 1>, scalar_prefetch = 0 : i64, scratch_operands = 0 : i64, tpu.core_type = #tpu.core_type<tc>, window_params = [{transform_indices = @transform_0, window_bounds = array<i64: 32, 1152>}, {transform_indices = @transform_1, window_bounds = array<i64: 1152, 128>}, {transform_indices = @transform_2, window_bounds = array<i64: 32, 128>}]} {
    %c0 = arith.constant 0 : index
    %c0_0 = arith.constant 0 : index
    %0 = vector.load %arg2[%c0, %c0_0] : memref<32x1152xbf16, #tpu.memory_space<vmem>>, vector<32x1152xbf16>
    %c0_1 = arith.constant 0 : index
    %c0_2 = arith.constant 0 : index
    %1 = vector.load %arg3[%c0_1, %c0_2] : memref<1152x128xbf16, #tpu.memory_space<vmem>>, vector<1152x128xbf16>
    %cst = arith.constant dense<0.000000e+00> : vector<32x128xf32>
    %2 = tpu.matmul %0, %1, %cst {dimension_numbers = #tpu.dot_dimension_numbers<[1], [0], [0], [1], [0, 0, 1, 1], [], []>} : vector<32x1152xbf16>, vector<1152x128xbf16>, vector<32x128xf32> -> vector<32x128xf32>
    %c0_3 = arith.constant 0 : index
    %c0_4 = arith.constant 0 : index
    %3 = vector.load %arg4[%c0_3, %c0_4] : memref<32x128xf32, #tpu.memory_space<vmem>>, vector<32x128xf32>
    tpu.vector_store %arg4[%c0_3, %c0_4], %2 {strides = array<i32>} : memref<32x128xf32, #tpu.memory_space<vmem>>, vector<32x128xf32>,
    return
  }
  func.func @transform_0(%arg0: i32, %arg1: i32) -> (i32, i32) {
    %c0_i32 = arith.constant 0 : i32
    %c0_i32_0 = arith.constant 0 : i32
    return %arg0, %c0_i32 : i32, i32
  }
  func.func @transform_1(%arg0: i32, %arg1: i32) -> (i32, i32) {
    %c0_i32 = arith.constant 0 : i32
    %c0_i32_0 = arith.constant 0 : i32
    return %c0_i32, %arg1 : i32, i32
  }
  func.func @transform_2(%arg0: i32, %arg1: i32) -> (i32, i32) {
    %c0_i32 = arith.constant 0 : i32
    return %arg0, %arg1 : i32, i32
  }
}

module attributes {stable_mosaic.version = 11 : i64} {
  func.func @_bn_norm_kernel(%arg0: i32, %arg1: memref<32x128xf32, #tpu.memory_space<vmem>>, %arg2: memref<2x128xf32, #tpu.memory_space<vmem>>, %arg3: memref<1x128xf32, #tpu.memory_space<vmem>>, %arg4: memref<1x128xf32, #tpu.memory_space<vmem>>, %arg5: memref<32x128xf32, #tpu.memory_space<vmem>>) attributes {dimension_semantics = [#tpu.dimension_semantics<parallel>], iteration_bounds = array<i64: 1>, scalar_prefetch = 0 : i64, scratch_operands = 0 : i64, tpu.core_type = #tpu.core_type<tc>, window_params = [{transform_indices = @transform_0, window_bounds = array<i64: 32, 128>}, {pipeline_mode = #tpu.pipeline_mode<synchronous>, transform_indices = @transform_1, window_bounds = array<i64: 2, 128>}, {pipeline_mode = #tpu.pipeline_mode<synchronous>, transform_indices = @transform_2, window_bounds = array<i64: 1, 128>}, {pipeline_mode = #tpu.pipeline_mode<synchronous>, transform_indices = @transform_3, window_bounds = array<i64: 1, 128>}, {transform_indices = @transform_4, window_bounds = array<i64: 32, 128>}]} {
    %c0 = arith.constant 0 : index
    %c0_0 = arith.constant 0 : index
    %0 = vector.load %arg2[%c0, %c0_0] : memref<2x128xf32, #tpu.memory_space<vmem>>, vector<2x128xf32>
    %1 = vector.extract_strided_slice %0 {offsets = [0, 0], sizes = [1, 128], strides = [1, 1]} : vector<2x128xf32> to vector<1x128xf32>
    %cst = arith.constant 3.125000e-02 : f32
    %2 = vector.broadcast %cst : f32 to vector<1x128xf32>
    %3 = arith.mulf %1, %2 : vector<1x128xf32>
    %4 = vector.extract_strided_slice %0 {offsets = [1, 0], sizes = [1, 128], strides = [1, 1]} : vector<2x128xf32> to vector<1x128xf32>
    %cst_1 = arith.constant 3.125000e-02 : f32
    %5 = vector.broadcast %cst_1 : f32 to vector<1x128xf32>
    %6 = arith.mulf %4, %5 : vector<1x128xf32>
    %7 = arith.mulf %3, %3 : vector<1x128xf32>
    %8 = arith.subf %6, %7 : vector<1x128xf32>
    %c0_2 = arith.constant 0 : index
    %c0_3 = arith.constant 0 : index
    %9 = vector.load %arg3[%c0_2, %c0_3] : memref<1x128xf32, #tpu.memory_space<vmem>>, vector<1x128xf32>
    %cst_4 = arith.constant 9.99999974E-6 : f32
    %10 = vector.broadcast %cst_4 : f32 to vector<1x128xf32>
    %11 = arith.addf %8, %10 : vector<1x128xf32>
    %12 = math.rsqrt %11 : vector<1x128xf32>
    %13 = arith.mulf %9, %12 : vector<1x128xf32>
    %c0_5 = arith.constant 0 : index
    %c0_6 = arith.constant 0 : index
    %14 = vector.load %arg4[%c0_5, %c0_6] : memref<1x128xf32, #tpu.memory_space<vmem>>, vector<1x128xf32>
    %15 = arith.mulf %3, %13 : vector<1x128xf32>
    %16 = arith.subf %14, %15 : vector<1x128xf32>
    %c0_7 = arith.constant 0 : index
    %c0_8 = arith.constant 0 : index
    %17 = vector.load %arg1[%c0_7, %c0_8] : memref<32x128xf32, #tpu.memory_space<vmem>>, vector<32x128xf32>
    %18 = vector.broadcast %13 : vector<1x128xf32> to vector<32x128xf32>
    %19 = arith.mulf %17, %18 : vector<32x128xf32>
    %20 = vector.broadcast %16 : vector<1x128xf32> to vector<32x128xf32>
    %21 = arith.addf %19, %20 : vector<32x128xf32>
    %cst_9 = arith.constant 0.000000e+00 : f32
    %22 = vector.broadcast %cst_9 : f32 to vector<32x128xf32>
    %23 = arith.maximumf %21, %22 : vector<32x128xf32>
    %c0_10 = arith.constant 0 : index
    %c0_11 = arith.constant 0 : index
    %24 = vector.load %arg5[%c0_10, %c0_11] : memref<32x128xf32, #tpu.memory_space<vmem>>, vector<32x128xf32>
    tpu.vector_store %arg5[%c0_10, %c0_11], %23 {strides = array<i32>} : memref<32x128xf32, #tpu.memory_space<vmem>>, vector<32x128xf32>,
    return
  }
  func.func @transform_0(%arg0: i32) -> (i32, i32) {
    %c0_i32 = arith.constant 0 : i32
    %c0_i32_0 = arith.constant 0 : i32
    return %arg0, %c0_i32 : i32, i32
  }
  func.func @transform_1(%arg0: i32) -> (i32, i32) {
    %c0_i32 = arith.constant 0 : i32
    %c0_i32_0 = arith.constant 0 : i32
    %c0_i32_1 = arith.constant 0 : i32
    return %c0_i32, %c0_i32_0 : i32, i32
  }
  func.func @transform_2(%arg0: i32) -> (i32, i32) {
    %c0_i32 = arith.constant 0 : i32
    %c0_i32_0 = arith.constant 0 : i32
    %c0_i32_1 = arith.constant 0 : i32
    return %c0_i32, %c0_i32_0 : i32, i32
  }
  func.func @transform_3(%arg0: i32) -> (i32, i32) {
    %c0_i32 = arith.constant 0 : i32
    %c0_i32_0 = arith.constant 0 : i32
    %c0_i32_1 = arith.constant 0 : i32
    return %c0_i32, %c0_i32_0 : i32, i32
  }
  func.func @transform_4(%arg0: i32) -> (i32, i32) {
    %c0_i32 = arith.constant 0 : i32
    %c0_i32_0 = arith.constant 0 : i32
    return %arg0, %c0_i32 : i32, i32
  }
}

module attributes {stable_mosaic.version = 11 : i64} {
  func.func @_bn_stats_kernel(%arg0: i32, %arg1: memref<32x128xf32, #tpu.memory_space<vmem>>, %arg2: memref<2x128xf32, #tpu.memory_space<vmem>>) attributes {dimension_semantics = [#tpu.dimension_semantics<arbitrary>], iteration_bounds = array<i64: 1>, scalar_prefetch = 0 : i64, scratch_operands = 0 : i64, tpu.core_type = #tpu.core_type<tc>, window_params = [{transform_indices = @transform_0, window_bounds = array<i64: 32, 128>}, {pipeline_mode = #tpu.pipeline_mode<synchronous>, transform_indices = @transform_1, window_bounds = array<i64: 2, 128>}]} {
    %c0_i32 = arith.constant 0 : i32
    %0 = arith.cmpi eq, %arg0, %c0_i32 : i32
    %1 = arith.extui %0 : i1 to i32
    %c0_i32_0 = arith.constant 0 : i32
    %2 = arith.cmpi ne, %1, %c0_i32_0 : i32
    scf.if %2 {
      %cst_10 = arith.constant 0.000000e+00 : f32
      %15 = vector.broadcast %cst_10 : f32 to vector<2x128xf32>
      %c0_11 = arith.constant 0 : index
      %c0_12 = arith.constant 0 : index
      %16 = vector.load %arg2[%c0_11, %c0_12] : memref<2x128xf32, #tpu.memory_space<vmem>>, vector<2x128xf32>
      tpu.vector_store %arg2[%c0_11, %c0_12], %15 {strides = array<i32>} : memref<2x128xf32, #tpu.memory_space<vmem>>, vector<2x128xf32>,
    } else {
    }
    %c0 = arith.constant 0 : index
    %c0_1 = arith.constant 0 : index
    %3 = vector.load %arg1[%c0, %c0_1] : memref<32x128xf32, #tpu.memory_space<vmem>>, vector<32x128xf32>
    %c0_2 = arith.constant 0 : index
    %c0_3 = arith.constant 0 : index
    %4 = vector.load %arg2[%c0_2, %c0_3] : memref<2x128xf32, #tpu.memory_space<vmem>>, vector<1x128xf32>
    %cst = arith.constant dense<0.000000e+00> : vector<128xf32>
    %5 = vector.multi_reduction <add>, %3, %cst [0] : vector<32x128xf32> to vector<128xf32>
    %6 = vector.shape_cast %5 : vector<128xf32> to vector<1x128xf32>
    %7 = arith.addf %4, %6 : vector<1x128xf32>
    %c0_4 = arith.constant 0 : index
    %c0_5 = arith.constant 0 : index
    %8 = vector.load %arg2[%c0_4, %c0_5] : memref<2x128xf32, #tpu.memory_space<vmem>>, vector<1x128xf32>
    tpu.vector_store %arg2[%c0_4, %c0_5], %7 {strides = array<i32>} : memref<2x128xf32, #tpu.memory_space<vmem>>, vector<1x128xf32>,
    %c1 = arith.constant 1 : index
    %c0_6 = arith.constant 0 : index
    %9 = vector.load %arg2[%c1, %c0_6] : memref<2x128xf32, #tpu.memory_space<vmem>>, vector<1x128xf32>
    %10 = arith.mulf %3, %3 : vector<32x128xf32>
    %cst_7 = arith.constant dense<0.000000e+00> : vector<128xf32>
    %11 = vector.multi_reduction <add>, %10, %cst_7 [0] : vector<32x128xf32> to vector<128xf32>
    %12 = vector.shape_cast %11 : vector<128xf32> to vector<1x128xf32>
    %13 = arith.addf %9, %12 : vector<1x128xf32>
    %c1_8 = arith.constant 1 : index
    %c0_9 = arith.constant 0 : index
    %14 = vector.load %arg2[%c1_8, %c0_9] : memref<2x128xf32, #tpu.memory_space<vmem>>, vector<1x128xf32>
    tpu.vector_store %arg2[%c1_8, %c0_9], %13 {strides = array<i32>} : memref<2x128xf32, #tpu.memory_space<vmem>>, vector<1x128xf32>,
    return
  }
  func.func @transform_0(%arg0: i32) -> (i32, i32) {
    %c0_i32 = arith.constant 0 : i32
    %c0_i32_0 = arith.constant 0 : i32
    return %arg0, %c0_i32 : i32, i32
  }
  func.func @transform_1(%arg0: i32) -> (i32, i32) {
    %c0_i32 = arith.constant 0 : i32
    %c0_i32_0 = arith.constant 0 : i32
    %c0_i32_1 = arith.constant 0 : i32
    return %c0_i32, %c0_i32_0 : i32, i32
  }
}

module attributes {stable_mosaic.version = 11 : i64} {
  func.func @_matmul_kernel(%arg0: i32, %arg1: i32, %arg2: memref<32x128xbf16, #tpu.memory_space<vmem>>, %arg3: memref<128x256xbf16, #tpu.memory_space<vmem>>, %arg4: memref<32x256xf32, #tpu.memory_space<vmem>>) attributes {dimension_semantics = [#tpu.dimension_semantics<parallel>, #tpu.dimension_semantics<parallel>], iteration_bounds = array<i64: 1, 2>, scalar_prefetch = 0 : i64, scratch_operands = 0 : i64, tpu.core_type = #tpu.core_type<tc>, window_params = [{transform_indices = @transform_0, window_bounds = array<i64: 32, 128>}, {transform_indices = @transform_1, window_bounds = array<i64: 128, 256>}, {transform_indices = @transform_2, window_bounds = array<i64: 32, 256>}]} {
    %c0 = arith.constant 0 : index
    %c0_0 = arith.constant 0 : index
    %0 = vector.load %arg2[%c0, %c0_0] : memref<32x128xbf16, #tpu.memory_space<vmem>>, vector<32x128xbf16>
    %c0_1 = arith.constant 0 : index
    %c0_2 = arith.constant 0 : index
    %1 = vector.load %arg3[%c0_1, %c0_2] : memref<128x256xbf16, #tpu.memory_space<vmem>>, vector<128x256xbf16>
    %cst = arith.constant dense<0.000000e+00> : vector<32x256xf32>
    %2 = tpu.matmul %0, %1, %cst {dimension_numbers = #tpu.dot_dimension_numbers<[1], [0], [0], [1], [0, 0, 1, 1], [], []>} : vector<32x128xbf16>, vector<128x256xbf16>, vector<32x256xf32> -> vector<32x256xf32>
    %c0_3 = arith.constant 0 : index
    %c0_4 = arith.constant 0 : index
    %3 = vector.load %arg4[%c0_3, %c0_4] : memref<32x256xf32, #tpu.memory_space<vmem>>, vector<32x256xf32>
    tpu.vector_store %arg4[%c0_3, %c0_4], %2 {strides = array<i32>} : memref<32x256xf32, #tpu.memory_space<vmem>>, vector<32x256xf32>,
    return
  }
  func.func @transform_0(%arg0: i32, %arg1: i32) -> (i32, i32) {
    %c0_i32 = arith.constant 0 : i32
    %c0_i32_0 = arith.constant 0 : i32
    return %arg0, %c0_i32 : i32, i32
  }
  func.func @transform_1(%arg0: i32, %arg1: i32) -> (i32, i32) {
    %c0_i32 = arith.constant 0 : i32
    %c0_i32_0 = arith.constant 0 : i32
    return %c0_i32, %arg1 : i32, i32
  }
  func.func @transform_2(%arg0: i32, %arg1: i32) -> (i32, i32) {
    %c0_i32 = arith.constant 0 : i32
    return %arg0, %arg1 : i32, i32
  }
}

module attributes {stable_mosaic.version = 11 : i64} {
  func.func @_matmul_kernel(%arg0: i32, %arg1: i32, %arg2: memref<32x512xbf16, #tpu.memory_space<vmem>>, %arg3: memref<512x128xbf16, #tpu.memory_space<vmem>>, %arg4: memref<32x128xf32, #tpu.memory_space<vmem>>) attributes {dimension_semantics = [#tpu.dimension_semantics<parallel>, #tpu.dimension_semantics<parallel>], iteration_bounds = array<i64: 1, 1>, scalar_prefetch = 0 : i64, scratch_operands = 0 : i64, tpu.core_type = #tpu.core_type<tc>, window_params = [{transform_indices = @transform_0, window_bounds = array<i64: 32, 512>}, {transform_indices = @transform_1, window_bounds = array<i64: 512, 128>}, {transform_indices = @transform_2, window_bounds = array<i64: 32, 128>}]} {
    %c0 = arith.constant 0 : index
    %c0_0 = arith.constant 0 : index
    %0 = vector.load %arg2[%c0, %c0_0] : memref<32x512xbf16, #tpu.memory_space<vmem>>, vector<32x512xbf16>
    %c0_1 = arith.constant 0 : index
    %c0_2 = arith.constant 0 : index
    %1 = vector.load %arg3[%c0_1, %c0_2] : memref<512x128xbf16, #tpu.memory_space<vmem>>, vector<512x128xbf16>
    %cst = arith.constant dense<0.000000e+00> : vector<32x128xf32>
    %2 = tpu.matmul %0, %1, %cst {dimension_numbers = #tpu.dot_dimension_numbers<[1], [0], [0], [1], [0, 0, 1, 1], [], []>} : vector<32x512xbf16>, vector<512x128xbf16>, vector<32x128xf32> -> vector<32x128xf32>
    %c0_3 = arith.constant 0 : index
    %c0_4 = arith.constant 0 : index
    %3 = vector.load %arg4[%c0_3, %c0_4] : memref<32x128xf32, #tpu.memory_space<vmem>>, vector<32x128xf32>
    tpu.vector_store %arg4[%c0_3, %c0_4], %2 {strides = array<i32>} : memref<32x128xf32, #tpu.memory_space<vmem>>, vector<32x128xf32>,
    return
  }
  func.func @transform_0(%arg0: i32, %arg1: i32) -> (i32, i32) {
    %c0_i32 = arith.constant 0 : i32
    %c0_i32_0 = arith.constant 0 : i32
    return %arg0, %c0_i32 : i32, i32
  }
  func.func @transform_1(%arg0: i32, %arg1: i32) -> (i32, i32) {
    %c0_i32 = arith.constant 0 : i32
    %c0_i32_0 = arith.constant 0 : i32
    return %c0_i32, %arg1 : i32, i32
  }
  func.func @transform_2(%arg0: i32, %arg1: i32) -> (i32, i32) {
    %c0_i32 = arith.constant 0 : i32
    return %arg0, %arg1 : i32, i32
  }
}

module attributes {stable_mosaic.version = 11 : i64} {
  func.func @_bn_norm_kernel(%arg0: i32, %arg1: memref<32x512xf32, #tpu.memory_space<vmem>>, %arg2: memref<32x512xf32, #tpu.memory_space<vmem>>, %arg3: memref<2x512xf32, #tpu.memory_space<vmem>>, %arg4: memref<1x512xf32, #tpu.memory_space<vmem>>, %arg5: memref<1x512xf32, #tpu.memory_space<vmem>>, %arg6: memref<32x512xf32, #tpu.memory_space<vmem>>) attributes {dimension_semantics = [#tpu.dimension_semantics<parallel>], iteration_bounds = array<i64: 1>, scalar_prefetch = 0 : i64, scratch_operands = 0 : i64, tpu.core_type = #tpu.core_type<tc>, window_params = [{transform_indices = @transform_0, window_bounds = array<i64: 32, 512>}, {transform_indices = @transform_1, window_bounds = array<i64: 32, 512>}, {pipeline_mode = #tpu.pipeline_mode<synchronous>, transform_indices = @transform_2, window_bounds = array<i64: 2, 512>}, {pipeline_mode = #tpu.pipeline_mode<synchronous>, transform_indices = @transform_3, window_bounds = array<i64: 1, 512>}, {pipeline_mode = #tpu.pipeline_mode<synchronous>, transform_indices = @transform_4, window_bounds = array<i64: 1, 512>}, {transform_indices = @transform_5, window_bounds = array<i64: 32, 512>}]} {
    %c0 = arith.constant 0 : index
    %c0_0 = arith.constant 0 : index
    %0 = vector.load %arg3[%c0, %c0_0] : memref<2x512xf32, #tpu.memory_space<vmem>>, vector<2x512xf32>
    %1 = vector.extract_strided_slice %0 {offsets = [0, 0], sizes = [1, 512], strides = [1, 1]} : vector<2x512xf32> to vector<1x512xf32>
    %cst = arith.constant 3.125000e-02 : f32
    %2 = vector.broadcast %cst : f32 to vector<1x512xf32>
    %3 = arith.mulf %1, %2 : vector<1x512xf32>
    %4 = vector.extract_strided_slice %0 {offsets = [1, 0], sizes = [1, 512], strides = [1, 1]} : vector<2x512xf32> to vector<1x512xf32>
    %cst_1 = arith.constant 3.125000e-02 : f32
    %5 = vector.broadcast %cst_1 : f32 to vector<1x512xf32>
    %6 = arith.mulf %4, %5 : vector<1x512xf32>
    %7 = arith.mulf %3, %3 : vector<1x512xf32>
    %8 = arith.subf %6, %7 : vector<1x512xf32>
    %c0_2 = arith.constant 0 : index
    %c0_3 = arith.constant 0 : index
    %9 = vector.load %arg4[%c0_2, %c0_3] : memref<1x512xf32, #tpu.memory_space<vmem>>, vector<1x512xf32>
    %cst_4 = arith.constant 9.99999974E-6 : f32
    %10 = vector.broadcast %cst_4 : f32 to vector<1x512xf32>
    %11 = arith.addf %8, %10 : vector<1x512xf32>
    %12 = math.rsqrt %11 : vector<1x512xf32>
    %13 = arith.mulf %9, %12 : vector<1x512xf32>
    %c0_5 = arith.constant 0 : index
    %c0_6 = arith.constant 0 : index
    %14 = vector.load %arg5[%c0_5, %c0_6] : memref<1x512xf32, #tpu.memory_space<vmem>>, vector<1x512xf32>
    %15 = arith.mulf %3, %13 : vector<1x512xf32>
    %16 = arith.subf %14, %15 : vector<1x512xf32>
    %c0_7 = arith.constant 0 : index
    %c0_8 = arith.constant 0 : index
    %17 = vector.load %arg1[%c0_7, %c0_8] : memref<32x512xf32, #tpu.memory_space<vmem>>, vector<32x512xf32>
    %18 = vector.broadcast %13 : vector<1x512xf32> to vector<32x512xf32>
    %19 = arith.mulf %17, %18 : vector<32x512xf32>
    %20 = vector.broadcast %16 : vector<1x512xf32> to vector<32x512xf32>
    %21 = arith.addf %19, %20 : vector<32x512xf32>
    %c0_9 = arith.constant 0 : index
    %c0_10 = arith.constant 0 : index
    %22 = vector.load %arg2[%c0_9, %c0_10] : memref<32x512xf32, #tpu.memory_space<vmem>>, vector<32x512xf32>
    %23 = arith.addf %21, %22 : vector<32x512xf32>
    %cst_11 = arith.constant 0.000000e+00 : f32
    %24 = vector.broadcast %cst_11 : f32 to vector<32x512xf32>
    %25 = arith.maximumf %23, %24 : vector<32x512xf32>
    %c0_12 = arith.constant 0 : index
    %c0_13 = arith.constant 0 : index
    %26 = vector.load %arg6[%c0_12, %c0_13] : memref<32x512xf32, #tpu.memory_space<vmem>>, vector<32x512xf32>
    tpu.vector_store %arg6[%c0_12, %c0_13], %25 {strides = array<i32>} : memref<32x512xf32, #tpu.memory_space<vmem>>, vector<32x512xf32>,
    return
  }
  func.func @transform_0(%arg0: i32) -> (i32, i32) {
    %c0_i32 = arith.constant 0 : i32
    %c0_i32_0 = arith.constant 0 : i32
    return %arg0, %c0_i32 : i32, i32
  }
  func.func @transform_1(%arg0: i32) -> (i32, i32) {
    %c0_i32 = arith.constant 0 : i32
    %c0_i32_0 = arith.constant 0 : i32
    return %arg0, %c0_i32 : i32, i32
  }
  func.func @transform_2(%arg0: i32) -> (i32, i32) {
    %c0_i32 = arith.constant 0 : i32
    %c0_i32_0 = arith.constant 0 : i32
    %c0_i32_1 = arith.constant 0 : i32
    return %c0_i32, %c0_i32_0 : i32, i32
  }
  func.func @transform_3(%arg0: i32) -> (i32, i32) {
    %c0_i32 = arith.constant 0 : i32
    %c0_i32_0 = arith.constant 0 : i32
    %c0_i32_1 = arith.constant 0 : i32
    return %c0_i32, %c0_i32_0 : i32, i32
  }
  func.func @transform_4(%arg0: i32) -> (i32, i32) {
    %c0_i32 = arith.constant 0 : i32
    %c0_i32_0 = arith.constant 0 : i32
    %c0_i32_1 = arith.constant 0 : i32
    return %c0_i32, %c0_i32_0 : i32, i32
  }
  func.func @transform_5(%arg0: i32) -> (i32, i32) {
    %c0_i32 = arith.constant 0 : i32
    %c0_i32_0 = arith.constant 0 : i32
    return %arg0, %c0_i32 : i32, i32
  }
}

module attributes {stable_mosaic.version = 11 : i64} {
  func.func @_conv3x3_s1_kernel(%arg0: i32, %arg1: memref<1x42x128xf32, #tpu.memory_space<vmem>>, %arg2: memref<1152x128xbf16, #tpu.memory_space<vmem>>, %arg3: memref<1x24x128xf32, #tpu.memory_space<vmem>>) attributes {dimension_semantics = [#tpu.dimension_semantics<parallel>], iteration_bounds = array<i64: 2>, scalar_prefetch = 0 : i64, scratch_operands = 0 : i64, tpu.core_type = #tpu.core_type<tc>, window_params = [{transform_indices = @transform_0, window_bounds = array<i64: 1, 42, 128>}, {pipeline_mode = #tpu.pipeline_mode<synchronous>, transform_indices = @transform_1, window_bounds = array<i64: 1152, 128>}, {transform_indices = @transform_2, window_bounds = array<i64: 1, 24, 128>}]} {
    %c0 = arith.constant 0 : index
    %c0_0 = arith.constant 0 : index
    %c0_1 = arith.constant 0 : index
    %0 = vector.load %arg1[%c0, %c0_0, %c0_1] : memref<1x42x128xf32, #tpu.memory_space<vmem>>, vector<1x24x128xf32>
    %1 = vector.shape_cast %0 : vector<1x24x128xf32> to vector<24x128xf32>
    %2 = arith.truncf %1 : vector<24x128xf32> to vector<24x128xbf16>
    %c0_2 = arith.constant 0 : index
    %c0_3 = arith.constant 0 : index
    %3 = vector.load %arg2[%c0_2, %c0_3] : memref<1152x128xbf16, #tpu.memory_space<vmem>>, vector<128x128xbf16>
    %cst = arith.constant dense<0.000000e+00> : vector<24x128xf32>
    %4 = tpu.matmul %2, %3, %cst {dimension_numbers = #tpu.dot_dimension_numbers<[1], [0], [0], [1], [0, 0, 1, 1], [], []>} : vector<24x128xbf16>, vector<128x128xbf16>, vector<24x128xf32> -> vector<24x128xf32>
    %c0_4 = arith.constant 0 : index
    %c1 = arith.constant 1 : index
    %c0_5 = arith.constant 0 : index
    %5 = vector.load %arg1[%c0_4, %c1, %c0_5] : memref<1x42x128xf32, #tpu.memory_space<vmem>>, vector<1x24x128xf32>
    %6 = vector.shape_cast %5 : vector<1x24x128xf32> to vector<24x128xf32>
    %7 = arith.truncf %6 : vector<24x128xf32> to vector<24x128xbf16>
    %c128 = arith.constant 128 : index
    %c0_6 = arith.constant 0 : index
    %8 = vector.load %arg2[%c128, %c0_6] : memref<1152x128xbf16, #tpu.memory_space<vmem>>, vector<128x128xbf16>
    %cst_7 = arith.constant dense<0.000000e+00> : vector<24x128xf32>
    %9 = tpu.matmul %7, %8, %cst_7 {dimension_numbers = #tpu.dot_dimension_numbers<[1], [0], [0], [1], [0, 0, 1, 1], [], []>} : vector<24x128xbf16>, vector<128x128xbf16>, vector<24x128xf32> -> vector<24x128xf32>
    %10 = arith.addf %4, %9 : vector<24x128xf32>
    %c0_8 = arith.constant 0 : index
    %c2 = arith.constant 2 : index
    %c0_9 = arith.constant 0 : index
    %11 = vector.load %arg1[%c0_8, %c2, %c0_9] : memref<1x42x128xf32, #tpu.memory_space<vmem>>, vector<1x24x128xf32>
    %12 = vector.shape_cast %11 : vector<1x24x128xf32> to vector<24x128xf32>
    %13 = arith.truncf %12 : vector<24x128xf32> to vector<24x128xbf16>
    %c256 = arith.constant 256 : index
    %c0_10 = arith.constant 0 : index
    %14 = vector.load %arg2[%c256, %c0_10] : memref<1152x128xbf16, #tpu.memory_space<vmem>>, vector<128x128xbf16>
    %cst_11 = arith.constant dense<0.000000e+00> : vector<24x128xf32>
    %15 = tpu.matmul %13, %14, %cst_11 {dimension_numbers = #tpu.dot_dimension_numbers<[1], [0], [0], [1], [0, 0, 1, 1], [], []>} : vector<24x128xbf16>, vector<128x128xbf16>, vector<24x128xf32> -> vector<24x128xf32>
    %16 = arith.addf %10, %15 : vector<24x128xf32>
    %c0_12 = arith.constant 0 : index
    %c6 = arith.constant 6 : index
    %c0_13 = arith.constant 0 : index
    %17 = vector.load %arg1[%c0_12, %c6, %c0_13] : memref<1x42x128xf32, #tpu.memory_space<vmem>>, vector<1x24x128xf32>
    %18 = vector.shape_cast %17 : vector<1x24x128xf32> to vector<24x128xf32>
    %19 = arith.truncf %18 : vector<24x128xf32> to vector<24x128xbf16>
    %c384 = arith.constant 384 : index
    %c0_14 = arith.constant 0 : index
    %20 = vector.load %arg2[%c384, %c0_14] : memref<1152x128xbf16, #tpu.memory_space<vmem>>, vector<128x128xbf16>
    %cst_15 = arith.constant dense<0.000000e+00> : vector<24x128xf32>
    %21 = tpu.matmul %19, %20, %cst_15 {dimension_numbers = #tpu.dot_dimension_numbers<[1], [0], [0], [1], [0, 0, 1, 1], [], []>} : vector<24x128xbf16>, vector<128x128xbf16>, vector<24x128xf32> -> vector<24x128xf32>
    %22 = arith.addf %16, %21 : vector<24x128xf32>
    %c0_16 = arith.constant 0 : index
    %c7 = arith.constant 7 : index
    %c0_17 = arith.constant 0 : index
    %23 = vector.load %arg1[%c0_16, %c7, %c0_17] : memref<1x42x128xf32, #tpu.memory_space<vmem>>, vector<1x24x128xf32>
    %24 = vector.shape_cast %23 : vector<1x24x128xf32> to vector<24x128xf32>
    %25 = arith.truncf %24 : vector<24x128xf32> to vector<24x128xbf16>
    %c512 = arith.constant 512 : index
    %c0_18 = arith.constant 0 : index
    %26 = vector.load %arg2[%c512, %c0_18] : memref<1152x128xbf16, #tpu.memory_space<vmem>>, vector<128x128xbf16>
    %cst_19 = arith.constant dense<0.000000e+00> : vector<24x128xf32>
    %27 = tpu.matmul %25, %26, %cst_19 {dimension_numbers = #tpu.dot_dimension_numbers<[1], [0], [0], [1], [0, 0, 1, 1], [], []>} : vector<24x128xbf16>, vector<128x128xbf16>, vector<24x128xf32> -> vector<24x128xf32>
    %28 = arith.addf %22, %27 : vector<24x128xf32>
    %c0_20 = arith.constant 0 : index
    %c8 = arith.constant 8 : index
    %c0_21 = arith.constant 0 : index
    %29 = vector.load %arg1[%c0_20, %c8, %c0_21] : memref<1x42x128xf32, #tpu.memory_space<vmem>>, vector<1x24x128xf32>
    %30 = vector.shape_cast %29 : vector<1x24x128xf32> to vector<24x128xf32>
    %31 = arith.truncf %30 : vector<24x128xf32> to vector<24x128xbf16>
    %c640 = arith.constant 640 : index
    %c0_22 = arith.constant 0 : index
    %32 = vector.load %arg2[%c640, %c0_22] : memref<1152x128xbf16, #tpu.memory_space<vmem>>, vector<128x128xbf16>
    %cst_23 = arith.constant dense<0.000000e+00> : vector<24x128xf32>
    %33 = tpu.matmul %31, %32, %cst_23 {dimension_numbers = #tpu.dot_dimension_numbers<[1], [0], [0], [1], [0, 0, 1, 1], [], []>} : vector<24x128xbf16>, vector<128x128xbf16>, vector<24x128xf32> -> vector<24x128xf32>
    %34 = arith.addf %28, %33 : vector<24x128xf32>
    %c0_24 = arith.constant 0 : index
    %c12 = arith.constant 12 : index
    %c0_25 = arith.constant 0 : index
    %35 = vector.load %arg1[%c0_24, %c12, %c0_25] : memref<1x42x128xf32, #tpu.memory_space<vmem>>, vector<1x24x128xf32>
    %36 = vector.shape_cast %35 : vector<1x24x128xf32> to vector<24x128xf32>
    %37 = arith.truncf %36 : vector<24x128xf32> to vector<24x128xbf16>
    %c768 = arith.constant 768 : index
    %c0_26 = arith.constant 0 : index
    %38 = vector.load %arg2[%c768, %c0_26] : memref<1152x128xbf16, #tpu.memory_space<vmem>>, vector<128x128xbf16>
    %cst_27 = arith.constant dense<0.000000e+00> : vector<24x128xf32>
    %39 = tpu.matmul %37, %38, %cst_27 {dimension_numbers = #tpu.dot_dimension_numbers<[1], [0], [0], [1], [0, 0, 1, 1], [], []>} : vector<24x128xbf16>, vector<128x128xbf16>, vector<24x128xf32> -> vector<24x128xf32>
    %40 = arith.addf %34, %39 : vector<24x128xf32>
    %c0_28 = arith.constant 0 : index
    %c13 = arith.constant 13 : index
    %c0_29 = arith.constant 0 : index
    %41 = vector.load %arg1[%c0_28, %c13, %c0_29] : memref<1x42x128xf32, #tpu.memory_space<vmem>>, vector<1x24x128xf32>
    %42 = vector.shape_cast %41 : vector<1x24x128xf32> to vector<24x128xf32>
    %43 = arith.truncf %42 : vector<24x128xf32> to vector<24x128xbf16>
    %c896 = arith.constant 896 : index
    %c0_30 = arith.constant 0 : index
    %44 = vector.load %arg2[%c896, %c0_30] : memref<1152x128xbf16, #tpu.memory_space<vmem>>, vector<128x128xbf16>
    %cst_31 = arith.constant dense<0.000000e+00> : vector<24x128xf32>
    %45 = tpu.matmul %43, %44, %cst_31 {dimension_numbers = #tpu.dot_dimension_numbers<[1], [0], [0], [1], [0, 0, 1, 1], [], []>} : vector<24x128xbf16>, vector<128x128xbf16>, vector<24x128xf32> -> vector<24x128xf32>
    %46 = arith.addf %40, %45 : vector<24x128xf32>
    %c0_32 = arith.constant 0 : index
    %c14 = arith.constant 14 : index
    %c0_33 = arith.constant 0 : index
    %47 = vector.load %arg1[%c0_32, %c14, %c0_33] : memref<1x42x128xf32, #tpu.memory_space<vmem>>, vector<1x24x128xf32>
    %48 = vector.shape_cast %47 : vector<1x24x128xf32> to vector<24x128xf32>
    %49 = arith.truncf %48 : vector<24x128xf32> to vector<24x128xbf16>
    %c1024 = arith.constant 1024 : index
    %c0_34 = arith.constant 0 : index
    %50 = vector.load %arg2[%c1024, %c0_34] : memref<1152x128xbf16, #tpu.memory_space<vmem>>, vector<128x128xbf16>
    %cst_35 = arith.constant dense<0.000000e+00> : vector<24x128xf32>
    %51 = tpu.matmul %49, %50, %cst_35 {dimension_numbers = #tpu.dot_dimension_numbers<[1], [0], [0], [1], [0, 0, 1, 1], [], []>} : vector<24x128xbf16>, vector<128x128xbf16>, vector<24x128xf32> -> vector<24x128xf32>
    %52 = arith.addf %46, %51 : vector<24x128xf32>
    %c0_36 = arith.constant 0 : index
    %c0_37 = arith.constant 0 : index
    %c0_38 = arith.constant 0 : index
    %53 = vector.load %arg3[%c0_36, %c0_37, %c0_38] : memref<1x24x128xf32, #tpu.memory_space<vmem>>, vector<1x24x128xf32>
    %54 = vector.shape_cast %53 : vector<1x24x128xf32> to vector<24x128xf32>
    %55 = vector.shape_cast %52 : vector<24x128xf32> to vector<1x24x128xf32>
    tpu.vector_store %arg3[%c0_36, %c0_37, %c0_38], %55 {strides = array<i32>} : memref<1x24x128xf32, #tpu.memory_space<vmem>>, vector<1x24x128xf32>,
    return
  }
  func.func @transform_0(%arg0: i32) -> (i32, i32, i32) {
    %c0_i32 = arith.constant 0 : i32
    %c0_i32_0 = arith.constant 0 : i32
    %c0_i32_1 = arith.constant 0 : i32
    return %arg0, %c0_i32, %c0_i32_0 : i32, i32, i32
  }
  func.func @transform_1(%arg0: i32) -> (i32, i32) {
    %c0_i32 = arith.constant 0 : i32
    %c0_i32_0 = arith.constant 0 : i32
    %c0_i32_1 = arith.constant 0 : i32
    return %c0_i32, %c0_i32_0 : i32, i32
  }
  func.func @transform_2(%arg0: i32) -> (i32, i32, i32) {
    %c0_i32 = arith.constant 0 : i32
    %c0_i32_0 = arith.constant 0 : i32
    %c0_i32_1 = arith.constant 0 : i32
    return %arg0, %c0_i32, %c0_i32_0 : i32, i32, i32
  }
}

</mosaic_0001>

<bundles_post_ra>
// kernel: resnet_shard1_forward.74
= control target key start
LH: loop header
LB: loop body
LE: loop exit
PB: predicated region body
PF: predicated region fallthrough
CT: control target
= control target key end

     0   :  { %vm12_vm0 = vcmask 517120   ;;  %vm79_vm1 = vcmask 523264   ;;  %v421_v0 = vmov 0.0   ;;  %vm214_vm2 = vcmask 516096   ;;  %s1301_s0 = inlined_call_operand.vmem [shape: f32[512,64], index: 0, kind: input, shape index: {}]   ;;  %s1302_s1 = inlined_call_operand.vmem [shape: f32[2,64], index: 1, kind: output, shape index: {}]  }
   0x1   :  { %13 = vst.msk [vmem:[%s1302_s1] sm:$0x3] %vm12_vm0, %v421_v0  ;;  %v438_v1 = vld [vmem:[%s1301_s0] sm:$0xff]  ;;  %v443_v2 = vld [vmem:[%s1301_s0 + $0x8] sm:$0xff]  ;;  %v448_v3 = vld [vmem:[%s1301_s0 + $0x10] sm:$0xff] }
   0x2   :  { %v80_v4 = vsel %vm79_vm1, %v438_v1, 0.0  ;;  %v81_v5 = vsel %vm79_vm1, %v443_v2, 0.0  ;;  %v83_v6 = vsel %vm79_vm1, %v448_v3, 0.0  ;;  %v459_v7 = vld [vmem:[%s1301_s0 + $0x18] sm:$0xff]  ;;  %v466_v10 = vld [vmem:[%s1301_s0 + $0x20] sm:$0xff]  ;;  %v473_v13 = vld [vmem:[%s1301_s0 + $0x28] sm:$0xff] }
   0x3   :  { %v82_v8 = vadd.f32 %v81_v5, %v80_v4  ;;  %v85_v9 = vsel %vm79_vm1, %v459_v7, 0.0  ;;  %v87_v12 = vsel %vm79_vm1, %v466_v10, 0.0  ;;  %v89_v15 = vsel %vm79_vm1, %v473_v13, 0.0  ;;  %v480_v16 = vld [vmem:[%s1301_s0 + $0x30] sm:$0xff]  ;;  %v485_v18 = vld [vmem:[%s1301_s0 + $0x38] sm:$0xff]  ;;  %v490_v19 = vld [vmem:[%s1301_s0 + $0x40] sm:$0xff] }
   0x4   :  { %v91_v20 = vsel %vm79_vm1, %v480_v16, 0.0  ;;  %v497_v21 = vld [vmem:[%s1301_s0 + $0x48] sm:$0xff]  ;;  %v502_v22 = vld [vmem:[%s1301_s0 + $0x50] sm:$0xff]  ;;  %v507_v23 = vld [vmem:[%s1301_s0 + $0x58] sm:$0xff]  ;;  %v93_v25 = vsel %vm79_vm1, %v485_v18, 0.0  ;;  %v95_v26 = vsel %vm79_vm1, %v490_v19, 0.0 }
   0x5   :  { %v84_v11 = vadd.f32 %v83_v6, %v82_v8  ;;  %v516_v27 = vld [vmem:[%s1301_s0 + $0x108] sm:$0xff]  ;;  %v521_v28 = vld [vmem:[%s1301_s0 + $0x110] sm:$0xff]  ;;  %v526_v29 = vld [vmem:[%s1301_s0 + $0x118] sm:$0xff]  ;;  %v97_v30 = vsel %vm79_vm1, %v497_v21, 0.0  ;;  %v99_v31 = vsel %vm79_vm1, %v502_v22, 0.0  ;;  %v534_v32 = vsel %vm79_vm1, %v507_v23, 0.0 }
   0x6   :  { %v539_v33 = vld [vmem:[%s1301_s0 + $0x120] sm:$0xff]  ;;  %v544_v34 = vld [vmem:[%s1301_s0 + $0x128] sm:$0xff]  ;;  %v549_v35 = vld [vmem:[%s1301_s0 + $0x130] sm:$0xff]  ;;  %v553_v37 = vsel %vm79_vm1, %v516_v27, 0.0  ;;  %v557_v38 = vsel %vm79_vm1, %v521_v28, 0.0  ;;  %v561_v39 = vsel %vm79_vm1, %v526_v29, 0.0 }
   0x7   :  { %v86_v14 = vadd.f32 %v85_v9, %v84_v11  ;;  %1321 = vst [vmem:[#allocation2_spill] sm:$0xff] %v553_v37  ;;  %1322 = vst [vmem:[#allocation3_spill] sm:$0xff] %v557_v38  ;;  %v566_v40 = vld [vmem:[%s1301_s0 + $0x138] sm:$0xff]  ;;  %v571_v41 = vld [vmem:[%s1301_s0 + $0x140] sm:$0xff]  ;;  %v580_v43 = vsel %vm79_vm1, %v539_v33, 0.0  ;;  %v584_v44 = vsel %vm79_vm1, %v544_v34, 0.0 }
   0x8   :  { %1323 = vst [vmem:[#allocation4_spill] sm:$0xff] %v561_v39  ;;  %v576_v42 = vld [vmem:[%s1301_s0 + $0x148] sm:$0xff]  ;;  %1324 = vst [vmem:[#allocation5_spill] sm:$0xff] %v580_v43  ;;  %v588_v45 = vsel %vm79_vm1, %v549_v35, 0.0  ;;  %v593_v46 = vld [vmem:[%s1301_s0 + $0x150] sm:$0xff]  ;;  %v607_v50 = vsel %vm79_vm1, %v566_v40, 0.0 }
   0x9   :  { %v88_v17 = vadd.f32 %v87_v12, %v86_v14  ;;  %1325 = vst [vmem:[#allocation6_spill] sm:$0xff] %v584_v44  ;;  %1326 = vst [vmem:[#allocation7_spill] sm:$0xff] %v588_v45  ;;  %v598_v47 = vld [vmem:[%s1301_s0 + $0x158] sm:$0xff]  ;;  %v603_v48 = vld [vmem:[%s1301_s0 + $0x160] sm:$0xff]  ;;  %v611_v51 = vsel %vm79_vm1, %v571_v41, 0.0  ;;  %v615_v52 = vsel %vm79_vm1, %v576_v42, 0.0  ;;  %v219_v45 = vmul.f32 %v448_v3, %v448_v3 }
   0xa   :  { %1327 = vst [vmem:[#allocation8_spill] sm:$0xff] %v607_v50  ;;  %1328 = vst [vmem:[#allocation9_spill] sm:$0xff] %v611_v51  ;;  %v620_v53 = vld [vmem:[%s1301_s0 + $0x168] sm:$0xff]  ;;  %v625_v54 = vld [vmem:[%s1301_s0 + $0x170] sm:$0xff]  ;;  %v634_v56 = vsel %vm79_vm1, %v593_v46, 0.0  ;;  %v638_v57 = vsel %vm79_vm1, %v598_v47, 0.0 }
   0xb   :  { %v90_v24 = vadd.f32 %v89_v15, %v88_v17  ;;  %1329 = vst [vmem:[#allocation10_spill] sm:$0xff] %v615_v52  ;;  %v630_v55 = vld [vmem:[%s1301_s0 + $0x178] sm:$0xff]  ;;  %1330 = vst [vmem:[#allocation11_spill] sm:$0xff] %v634_v56  ;;  %v642_v58 = vsel %vm79_vm1, %v603_v48, 0.0  ;;  %v647_v59 = vld [vmem:[%s1301_s0 + $0x180] sm:$0xff]  ;;  %v661_v63 = vsel %vm79_vm1, %v620_v53, 0.0 }
   0xc   :  { %1331 = vst [vmem:[#allocation12_spill] sm:$0xff] %v638_v57  ;;  %1332 = vst [vmem:[#allocation13_spill] sm:$0xff] %v642_v58  ;;  %v652_v60 = vld [vmem:[%s1301_s0 + $0x188] sm:$0xff]  ;;  %v657_v61 = vld [vmem:[%s1301_s0 + $0x190] sm:$0xff]  ;;  %v665_v0 = vsel %vm79_vm1, %v625_v54, 0.0  ;;  %v669_v4 = vsel %vm79_vm1, %v630_v55, 0.0 }
   0xd   :  { %v92_v36 = vadd.f32 %v91_v20, %v90_v24  ;;  %1333 = vst [vmem:[#allocation14_spill] sm:$0xff] %v661_v63  ;;  %1334 = vst [vmem:[#allocation15_spill] sm:$0xff] %v665_v0  ;;  %v674_v5 = vld [vmem:[%s1301_s0 + $0x198] sm:$0xff]  ;;  %v679_v6 = vld [vmem:[%s1301_s0 + $0x1a0] sm:$0xff]  ;;  %v688_v9 = vsel %vm79_vm1, %v647_v59, 0.0  ;;  %v692_v11 = vsel %vm79_vm1, %v652_v60, 0.0 }
   0xe   :  { %1335 = vst [vmem:[#allocation16_spill] sm:$0xff] %v669_v4  ;;  %v684_v8 = vld [vmem:[%s1301_s0 + $0x1a8] sm:$0xff]  ;;  %1336 = vst [vmem:[#allocation17_spill] sm:$0xff] %v688_v9  ;;  %v696_v12 = vsel %vm79_vm1, %v657_v61, 0.0  ;;  %v701_v14 = vld [vmem:[%s1301_s0 + $0x60] sm:$0xff] }
   0xf   :  { %v94_v49 = vadd.f32 %v93_v25, %v92_v36  ;;  %1337 = vst [vmem:[#allocation18_spill] sm:$0xff] %v692_v11  ;;  %1338 = vst [vmem:[#allocation19_spill] sm:$0xff] %v696_v12  ;;  %v706_v15 = vld [vmem:[%s1301_s0 + $0x1b0] sm:$0xff]  ;;  %v711_v17 = vld [vmem:[%s1301_s0 + $0x1b8] sm:$0xff]  ;;  %v720_v25 = vsel %vm79_vm1, %v674_v5, 0.0  ;;  %v728_v36 = vsel %vm79_vm1, %v684_v8, 0.0 }
  0x10   :  { %v716_v20 = vld [vmem:[%s1301_s0 + $0x1c0] sm:$0xff]  ;;  %1339 = vst [vmem:[#allocation20_spill] sm:$0xff] %v720_v25  ;;  %1341 = vst [vmem:[#allocation22_spill] sm:$0xff] %v728_v36  ;;  %v751_v36 = vsel %vm79_vm1, %v711_v17, 0.0  ;;  %v765_v11 = vld [vmem:[%s1301_s0 + $0x1e8] sm:$0xff] }
  0x11   :  { %v96_v62 = vadd.f32 %v95_v26, %v94_v49  ;;  %v724_v26 = vsel %vm79_vm1, %v679_v6, 0.0  ;;  %v733_v49 = vld [vmem:[%s1301_s0 + $0x1c8] sm:$0xff]  ;;  %1343 = vst [vmem:[#allocation24_spill] sm:$0xff] %v751_v36  ;;  %v755_v25 = vsel %vm79_vm1, %v716_v20, 0.0  ;;  %v760_v12 = vld [vmem:[%s1301_s0 + $0x1e0] sm:$0xff]  ;;  %v787_v0 = vld [vmem:[%s1301_s0 + $0x1f8] sm:$0xff] }
  0x12   :  { %1340 = vst [vmem:[#allocation21_spill] sm:$0xff] %v724_v26  ;;  %v747_v26 = vsel %vm79_vm1, %v706_v15, 0.0  ;;  %1344 = vst [vmem:[#allocation25_spill] sm:$0xff] %v755_v25  ;;  %v774_v9 = vsel %vm79_vm1, %v733_v49, 0.0  ;;  %v809_v58 = vsel %vm79_vm1, %v787_v0, 0.0  ;;  %v841_v56 = vld [vmem:[%s1301_s0 + $0x98] sm:$0xff] }
  0x13   :  { %v98_v24 = vadd.f32 %v97_v30, %v96_v62  ;;  %v738_v30 = vld [vmem:[%s1301_s0 + $0x1d0] sm:$0xff]  ;;  %v743_v62 = vld [vmem:[%s1301_s0 + $0x1d8] sm:$0xff]  ;;  %1342 = vst [vmem:[#allocation23_spill] sm:$0xff] %v747_v26  ;;  %1346 = vst [vmem:[#allocation27_spill] sm:$0xff] %v774_v9  ;;  %v797_v9 = vsel %vm79_vm1, %v765_v11, 0.0  ;;  %v117_v3 = vsel %vm79_vm1, %v841_v56, 0.0 }
  0x14   :  { %v770_v26 = vld [vmem:[%s1301_s0 + $0x1f0] sm:$0xff]  ;;  %v778_v25 = vsel %vm79_vm1, %v738_v30, 0.0  ;;  %v782_v4 = vsel %vm79_vm1, %v743_v62, 0.0  ;;  %1349 = vst [vmem:[#allocation30_spill] sm:$0xff] %v787_v0  ;;  %1351 = vst [vmem:[#allocation32_spill] sm:$0xff] %v797_v9  ;;  %v846_v52 = vld [vmem:[%s1301_s0 + $0xa0] sm:$0xff] }
  0x15   :  { %1345 = vst [vmem:[#allocation26_spill] sm:$0xff] %v770_v26  ;;  %v100_v36 = vadd.f32 %v99_v31, %v98_v24  ;;  %1347 = vst [vmem:[#allocation28_spill] sm:$0xff] %v778_v25  ;;  %v103_v31 = vsel %vm79_vm1, %v701_v14, 0.0  ;;  %v793_v24 = vsel %vm79_vm1, %v760_v12, 0.0  ;;  %v801_v25 = vsel %vm79_vm1, %v770_v26, 0.0  ;;  %v28_v9 = vld [vmem:[%s1301_s0 + $0x70] sm:$0xff] }
  0x16   :  { %1348 = vst [vmem:[#allocation29_spill] sm:$0xff] %v782_v4  ;;  %1350 = vst [vmem:[#allocation31_spill] sm:$0xff] %v793_v24  ;;  %v27_v4 = vld [vmem:[%s1301_s0 + $0x68] sm:$0xff]  ;;  %v862_v43 = vld [vmem:[%s1301_s0 + $0xb0] sm:$0xff] }
  0x17   :  { %1352 = vst [vmem:[#allocation33_spill] sm:$0xff] %v801_v25  ;;  %v102_v63 = vadd.f32 %v534_v32, %v100_v36  ;;  %1353 = vst [vmem:[#allocation34_spill] sm:$0xff] %v809_v58  ;;  %v105_v24 = vsel %vm79_vm1, %v27_v4, 0.0  ;;  %v818_v25 = vld [vmem:[%s1301_s0 + $0x78] sm:$0xff]  ;;  %v823_v32 = vld [vmem:[%s1301_s0 + $0x80] sm:$0xff]  ;;  %v107_v58 = vsel %vm79_vm1, %v28_v9, 0.0 }
  0x18   :  { %1354 = vst [vmem:[#allocation35_spill] sm:$0xff] %v818_v25  ;;  %1355 = vst [vmem:[#allocation36_spill] sm:$0xff] %v823_v32  ;;  %v828_v36 = vld [vmem:[%s1301_s0 + $0x88] sm:$0xff]  ;;  %v109_v50 = vsel %vm79_vm1, %v818_v25, 0.0  ;;  %v875_v39 = vld [vmem:[%s1301_s0 + $0xb8] sm:$0xff] }
  0x19   :  { %v104_v57 = vadd.f32 %v103_v31, %v102_v63  ;;  %1356 = vst [vmem:[#allocation37_spill] sm:$0xff] %v828_v36  ;;  %v217_v63 = vmul.f32 %v438_v1, %v438_v1  ;;  %v836_v31 = vld [vmem:[%s1301_s0 + $0x90] sm:$0xff]  ;;  %1358 = vst [vmem:[#allocation39_spill] sm:$0xff] %v841_v56  ;;  %v218_v1 = vmul.f32 %v443_v2, %v443_v2  ;;  %v857_v44 = vld [vmem:[%s1301_s0 + $0xa8] sm:$0xff] }
  0x1a   :  { %1357 = vst [vmem:[#allocation38_spill] sm:$0xff] %v836_v31  ;;  %1359 = vst [vmem:[#allocation40_spill] sm:$0xff] %v846_v52  ;;  %v115_v2 = vsel %vm79_vm1, %v836_v31, 0.0  ;;  %v880_v38 = vld [vmem:[%s1301_s0 + $0xc0] sm:$0xff]  ;;  %v885_v37 = vld [vmem:[%s1301_s0 + $0xc8] sm:$0xff]  ;;  %v119_v31 = vsel %vm79_vm1, %v846_v52, 0.0 }
  0x1b   :  { %v106_v51 = vadd.f32 %v105_v24, %v104_v57  ;;  %1360 = vst [vmem:[#allocation41_spill] sm:$0xff] %v857_v44  ;;  %1361 = vst [vmem:[#allocation42_spill] sm:$0xff] %v862_v43  ;;  %v111_v57 = vsel %vm79_vm1, %v823_v32, 0.0  ;;  %v113_v24 = vsel %vm79_vm1, %v828_v36, 0.0  ;;  %v121_v56 = vsel %vm79_vm1, %v857_v44, 0.0  ;;  %v896_v25 = vld [vmem:[%s1301_s0 + $0xd0] sm:$0xff] }
  0x1c   :  { %1362 = vst [vmem:[#allocation43_spill] sm:$0xff] %v875_v39  ;;  %1363 = vst [vmem:[#allocation44_spill] sm:$0xff] %v880_v38  ;;  %v220_v32 = vmul.f32 %v459_v7, %v459_v7  ;;  %v901_v0 = vld [vmem:[%s1301_s0 + $0xd8] sm:$0xff]  ;;  %v913_v7 = vsel %vm79_vm1, %v880_v38, 0.0  ;;  %v917_v44 = vsel %vm79_vm1, %v885_v37, 0.0  ;;  %v922_v52 = vld [vmem:[%s1301_s0 + $0xe0] sm:$0xff] }
  0x1d   :  { %1364 = vst [vmem:[#allocation45_spill] sm:$0xff] %v885_v37  ;;  %v108_v36 = vadd.f32 %v107_v58, %v106_v51  ;;  %1365 = vst [vmem:[#allocation46_spill] sm:$0xff] %v896_v25  ;;  %v905_v51 = vsel %vm79_vm1, %v862_v43, 0.0  ;;  %v909_v58 = vsel %vm79_vm1, %v875_v39, 0.0  ;;  %v927_v43 = vld [vmem:[%s1301_s0 + $0xe8] sm:$0xff]  ;;  %v932_v39 = vld [vmem:[%s1301_s0 + $0xf0] sm:$0xff] }
  0x1e   :  { %1366 = vst [vmem:[#allocation47_spill] sm:$0xff] %v901_v0  ;;  %1367 = vst [vmem:[#allocation48_spill] sm:$0xff] %v909_v58  ;;  %v936_v37 = vsel %vm79_vm1, %v896_v25, 0.0  ;;  %v946_v58 = vsel %vm79_vm1, %v922_v52, 0.0  ;;  %v950_v26 = vsel %vm79_vm1, %v927_v43, 0.0  ;;  %v223_v25 = vmul.f32 %v480_v16, %v480_v16 }
  0x1f   :  { %1368 = vst [vmem:[#allocation49_spill] sm:$0xff] %v913_v7  ;;  %1369 = vst [vmem:[#allocation50_spill] sm:$0xff] %v917_v44  ;;  %v110_v38 = vadd.f32 %v109_v50, %v108_v36  ;;  %v940_v44 = vsel %vm79_vm1, %v901_v0, 0.0  ;;  %v221_v7 = vmul.f32 %v466_v10, %v466_v10  ;;  %v954_v50 = vsel %vm79_vm1, %v932_v39, 0.0 }
  0x20   :  { %1370 = vst [vmem:[#allocation51_spill] sm:$0xff] %v922_v52  ;;  %1371 = vst [vmem:[#allocation52_spill] sm:$0xff] %v927_v43  ;;  %v222_v36 = vmul.f32 %v473_v13, %v473_v13  ;;  %v224_v10 = vmul.f32 %v485_v18, %v485_v18  ;;  %v225_v52 = vmul.f32 %v490_v19, %v490_v19 }
  0x21   :  { %1372 = vst [vmem:[#allocation53_spill] sm:$0xff] %v932_v39  ;;  %1373 = vst [vmem:[#allocation54_spill] sm:$0xff] %v954_v50  ;;  %v112_v0 = vadd.f32 %v111_v57, %v110_v38  ;;  %v226_v43 = vmul.f32 %v497_v21, %v497_v21  ;;  %v227_v39 = vmul.f32 %v502_v22, %v502_v22 }
  0x22   :  { %v228_v50 = vmul.f32 %v507_v23, %v507_v23  ;;  %v229_v13 = vmul.f32 %v701_v14, %v701_v14  ;;  %v972_v16 = vmul.f32 %v27_v4, %v27_v4  ;;  %v974_v57 = vmul.f32 %v28_v9, %v28_v9 }
  0x23   :  { %v114_v38 = vadd.f32 %v113_v24, %v112_v0  ;;  %v250_v18 = vmul.f32 %v516_v27, %v516_v27  ;;  %v251_v19 = vmul.f32 %v521_v28, %v521_v28  ;;  %v252_v21 = vmul.f32 %v526_v29, %v526_v29 }
  0x24   :  { %v253_v22 = vmul.f32 %v539_v33, %v539_v33  ;;  %v254_v23 = vmul.f32 %v544_v34, %v544_v34  ;;  %v255_v4 = vmul.f32 %v549_v35, %v549_v35  ;;  %v256_v9 = vmul.f32 %v566_v40, %v566_v40 }
  0x25   :  { %v116_v0 = vadd.f32 %v115_v2, %v114_v38  ;;  %v257_v27 = vmul.f32 %v571_v41, %v571_v41  ;;  %v258_v28 = vmul.f32 %v576_v42, %v576_v42  ;;  %v259_v29 = vmul.f32 %v593_v46, %v593_v46  ;;  %v1374_v38 = vld [vmem:[#allocation26_spill] sm:$0xff] }
  0x26   :  { %v260_v33 = vmul.f32 %v598_v47, %v598_v47  ;;  %v281_v34 = vsel %vm79_vm1, %v217_v63, 0.0  ;;  %v261_v35 = vmul.f32 %v603_v48, %v603_v48  ;;  %v282_v40 = vsel %vm79_vm1, %v218_v1, 0.0 }
  0x27   :  { %v118_v14 = vadd.f32 %v117_v3, %v116_v0  ;;  %v284_v24 = vsel %vm79_vm1, %v219_v45, 0.0  ;;  %v262_v41 = vmul.f32 %v620_v53, %v620_v53  ;;  %v263_v42 = vmul.f32 %v625_v54, %v625_v54 }
  0x28   :  { %v264_v46 = vmul.f32 %v630_v55, %v630_v55  ;;  %v283_v47 = vadd.f32 %v282_v40, %v281_v34  ;;  %v265_v63 = vmul.f32 %v647_v59, %v647_v59  ;;  %v266_v48 = vmul.f32 %v652_v60, %v652_v60  ;;  %v1375_v34 = vld [vmem:[#allocation48_spill] sm:$0xff] }
  0x29   :  { %v120_v2 = vadd.f32 %v119_v31, %v118_v14  ;;  %v286_v1 = vsel %vm79_vm1, %v220_v32, 0.0  ;;  %v267_v45 = vmul.f32 %v657_v61, %v657_v61  ;;  %v268_v53 = vmul.f32 %v674_v5, %v674_v5  ;;  %v1376_v14 = vld [vmem:[#allocation30_spill] sm:$0xff] }
  0x2a   :  { %v269_v54 = vmul.f32 %v679_v6, %v679_v6  ;;  %v285_v55 = vadd.f32 %v284_v24, %v283_v47  ;;  %v270_v31 = vmul.f32 %v684_v8, %v684_v8  ;;  %v271_v59 = vmul.f32 %v706_v15, %v706_v15  ;;  %v1377_v47 = vld [vmem:[#allocation49_spill] sm:$0xff] }
  0x2b   :  { %v122_v3 = vadd.f32 %v121_v56, %v120_v2  ;;  %v288_v60 = vsel %vm79_vm1, %v221_v7, 0.0  ;;  %v272_v32 = vmul.f32 %v711_v17, %v711_v17  ;;  %v273_v61 = vmul.f32 %v716_v20, %v716_v20 }
  0x2c   :  { %v274_v5 = vmul.f32 %v733_v49, %v733_v49  ;;  %v287_v6 = vadd.f32 %v286_v1, %v285_v55  ;;  %v275_v8 = vmul.f32 %v738_v30, %v738_v30  ;;  %v276_v15 = vmul.f32 %v743_v62, %v743_v62 }
  0x2d   :  { %v124_v56 = vadd.f32 %v905_v51, %v122_v3  ;;  %v290_v7 = vsel %vm79_vm1, %v222_v36, 0.0  ;;  %v277_v17 = vmul.f32 %v760_v12, %v760_v12  ;;  %v278_v20 = vmul.f32 %v765_v11, %v765_v11 }
  0x2e   :  { %v279_v49 = vmul.f32 %v1374_v38, %v1374_v38  ;;  %v289_v0 = vadd.f32 %v288_v60, %v287_v6  ;;  %v280_v30 = vmul.f32 %v1376_v14, %v1376_v14  ;;  %v292_v40 = vsel %vm79_vm1, %v223_v25, 0.0  ;;  %v1380_v14 = vld [vmem:[#allocation35_spill] sm:$0xff] }
  0x2f   :  { %v126_v51 = vadd.f32 %v1375_v34, %v124_v56  ;;  %v294_v62 = vsel %vm79_vm1, %v224_v10, 0.0  ;;  %v296_v24 = vsel %vm79_vm1, %v225_v52, 0.0  ;;  %v298_v12 = vsel %vm79_vm1, %v226_v43, 0.0  ;;  %v1162_v34 = vld [vmem:[%s1301_s0 + $0x100] sm:$0xff] }
  0x30   :  { %v291_v36 = vadd.f32 %v290_v7, %v289_v0  ;;  %v300_v11 = vsel %vm79_vm1, %v227_v39, 0.0  ;;  %v302_v1 = vsel %vm79_vm1, %v228_v50, 0.0  ;;  %v304_v55 = vsel %vm79_vm1, %v229_v13, 0.0  ;;  %v1378_v39 = vld [vmem:[#allocation50_spill] sm:$0xff] }
  0x31   :  { %v128_v2 = vadd.f32 %v1377_v47, %v126_v51  ;;  %v1055_v3 = vsel %vm79_vm1, %v250_v18, 0.0  ;;  %v1058_v25 = vsel %vm79_vm1, %v251_v19, 0.0  ;;  %v1061_v10 = vsel %vm79_vm1, %v252_v21, 0.0  ;;  %v1379_v51 = vld [vmem:[#allocation54_spill] sm:$0xff] }
  0x32   :  { %v293_v60 = vadd.f32 %v292_v40, %v291_v36  ;;  %v1064_v43 = vsel %vm79_vm1, %v253_v22, 0.0  ;;  %v1068_v6 = vsel %vm79_vm1, %v254_v23, 0.0  ;;  %v1071_v50 = vsel %vm79_vm1, %v255_v4, 0.0  ;;  %v1381_v36 = vld [vmem:[#allocation36_spill] sm:$0xff] }
  0x33   :  { %v130_v52 = vadd.f32 %v1378_v39, %v128_v2  ;;  %v1074_v13 = vsel %vm79_vm1, %v256_v9, 0.0  ;;  %v1077_v19 = vsel %vm79_vm1, %v257_v27, 0.0  ;;  %v1080_v21 = vsel %vm79_vm1, %v258_v28, 0.0  ;;  %v1382_v2 = vld [vmem:[#allocation37_spill] sm:$0xff] }
  0x34   :  { %v295_v18 = vadd.f32 %v294_v62, %v293_v60  ;;  %v1083_v22 = vsel %vm79_vm1, %v259_v29, 0.0  ;;  %v1087_v23 = vsel %vm79_vm1, %v260_v33, 0.0  ;;  %v1090_v4 = vsel %vm79_vm1, %v261_v35, 0.0 }
  0x35   :  { %v132_v56 = vadd.f32 %v936_v37, %v130_v52  ;;  %v1093_v9 = vsel %vm79_vm1, %v262_v41, 0.0  ;;  %v1096_v27 = vsel %vm79_vm1, %v263_v42, 0.0  ;;  %v1099_v28 = vsel %vm79_vm1, %v264_v46, 0.0 }
  0x36   :  { %v297_v7 = vadd.f32 %v296_v24, %v295_v18  ;;  %v1102_v29 = vsel %vm79_vm1, %v265_v63, 0.0  ;;  %v1106_v33 = vsel %vm79_vm1, %v266_v48, 0.0  ;;  %v1109_v35 = vsel %vm79_vm1, %v267_v45, 0.0  ;;  %v1384_v18 = vld [vmem:[#allocation38_spill] sm:$0xff] }
  0x37   :  { %v134_v37 = vadd.f32 %v940_v44, %v132_v56  ;;  %v1112_v41 = vsel %vm79_vm1, %v268_v53, 0.0  ;;  %v1115_v42 = vsel %vm79_vm1, %v269_v54, 0.0  ;;  %v1118_v46 = vsel %vm79_vm1, %v270_v31, 0.0 }
  0x38   :  { %v299_v38 = vadd.f32 %v298_v12, %v297_v7  ;;  %v1121_v63 = vsel %vm79_vm1, %v271_v59, 0.0  ;;  %v1125_v48 = vsel %vm79_vm1, %v272_v32, 0.0  ;;  %v1128_v45 = vsel %vm79_vm1, %v273_v61, 0.0 }
  0x39   :  { %v136_v44 = vadd.f32 %v946_v58, %v134_v37  ;;  %v1131_v53 = vsel %vm79_vm1, %v274_v5, 0.0  ;;  %v1134_v54 = vsel %vm79_vm1, %v275_v8, 0.0  ;;  %v1137_v31 = vsel %vm79_vm1, %v276_v15, 0.0  ;;  %v1145_v58 = vld [vmem:[%s1301_s0 + $0xf8] sm:$0xff]  ;;  %v1385_v37 = vld [vmem:[#allocation3_spill] sm:$0xff] }
  0x3a   :  { %v301_v0 = vadd.f32 %v300_v11, %v299_v38  ;;  %v1140_v59 = vsel %vm79_vm1, %v277_v17, 0.0  ;;  %v1149_v61 = vsel %vm79_vm1, %v278_v20, 0.0  ;;  %v1152_v5 = vsel %vm79_vm1, %v279_v49, 0.0 }
  0x3b   :  { %v138_v32 = vadd.f32 %v950_v26, %v136_v44  ;;  %v1155_v8 = vsel %vm79_vm1, %v280_v30, 0.0  ;;  %v141_v15 = vsel %vm79_vm1, %v1145_v58, 0.0  ;;  %v232_v20 = vmul.f32 %v1380_v14, %v1380_v14  ;;  %v1386_v44 = vld [vmem:[#allocation39_spill] sm:$0xff] }
  0x3c   :  { %v303_v17 = vadd.f32 %v302_v1, %v301_v0  ;;  %v306_v49 = vsel %vm79_vm1, %v972_v16, 0.0  ;;  %v143_v30 = vsel %vm79_vm1, %v1162_v34, 0.0  ;;  %v233_v24 = vmul.f32 %v1381_v36, %v1381_v36  ;;  %v1383_v16 = vld [vmem:[#allocation2_spill] sm:$0xff] }
  0x3d   :  { %v140_v26 = vadd.f32 %v1379_v51, %v138_v32  ;;  %v308_v12 = vsel %vm79_vm1, %v974_v57, 0.0  ;;  %v234_v1 = vmul.f32 %v1382_v2, %v1382_v2  ;;  %v310_v60 = vsel %vm79_vm1, %v232_v20, 0.0  ;;  %v1388_v51 = vld [vmem:[#allocation40_spill] sm:$0xff] }
  0x3e   :  { %v305_v40 = vadd.f32 %v304_v55, %v303_v17  ;;  %v235_v55 = vmul.f32 %v1384_v18, %v1384_v18  ;;  %v312_v56 = vsel %vm79_vm1, %v233_v24, 0.0  ;;  %v236_v57 = vmul.f32 %v1386_v44, %v1386_v44 }
  0x3f   :  { %v142_v62 = vadd.f32 %v141_v15, %v140_v26  ;;  %v314_v0 = vsel %vm79_vm1, %v234_v1, 0.0  ;;  %v1387_v15 = vld [vmem:[#allocation4_spill] sm:$0xff]  ;;  %v237_v26 = vmul.f32 %v1388_v51, %v1388_v51 }
  0x40   :  { %v307_v11 = vadd.f32 %v306_v49, %v305_v40  ;;  %v316_v14 = vsel %vm79_vm1, %v235_v55, 0.0  ;;  %v1389_v49 = vld [vmem:[#allocation5_spill] sm:$0xff]  ;;  %v318_v36 = vsel %vm79_vm1, %v236_v57, 0.0 }
  0x41   :  { %v144_v47 = vadd.f32 %v143_v30, %v142_v62  ;;  %v1390_v40 = vld [vmem:[#allocation41_spill] sm:$0xff]  ;;  %v320_v1 = vsel %vm79_vm1, %v237_v26, 0.0 }
  0x42   :  { %v309_v39 = vadd.f32 %v308_v12, %v307_v11  ;;  %v238_v62 = vmul.f32 %v1390_v40, %v1390_v40  ;;  %v1391_v12 = vld [vmem:[#allocation6_spill] sm:$0xff] }
  0x43   :  { %v146_v52 = vadd.f32 %v1383_v16, %v144_v47  ;;  %v1392_v47 = vld [vmem:[#allocation42_spill] sm:$0xff] }
  0x44   :  { %v311_v7 = vadd.f32 %v310_v60, %v309_v39  ;;  %v239_v2 = vmul.f32 %v1392_v47, %v1392_v47  ;;  %v1393_v39 = vld [vmem:[#allocation7_spill] sm:$0xff]  ;;  %v322_v55 = vsel %vm79_vm1, %v238_v62, 0.0 }
  0x45   :  { %v148_v38 = vadd.f32 %v1385_v37, %v146_v52  ;;  %v1394_v52 = vld [vmem:[#allocation43_spill] sm:$0xff] }
  0x46   :  { %v313_v32 = vadd.f32 %v312_v56, %v311_v7  ;;  %v240_v18 = vmul.f32 %v1394_v52, %v1394_v52  ;;  %v1395_v7 = vld [vmem:[#allocation8_spill] sm:$0xff]  ;;  %v324_v57 = vsel %vm79_vm1, %v239_v2, 0.0 }
  0x47   :  { %v150_v17 = vadd.f32 %v1387_v15, %v148_v38  ;;  %v1396_v38 = vld [vmem:[#allocation44_spill] sm:$0xff] }
  0x48   :  { %v315_v20 = vadd.f32 %v314_v0, %v313_v32  ;;  %v241_v44 = vmul.f32 %v1396_v38, %v1396_v38  ;;  %v1397_v32 = vld [vmem:[#allocation9_spill] sm:$0xff]  ;;  %v326_v26 = vsel %vm79_vm1, %v240_v18, 0.0 }
  0x49   :  { %v152_v30 = vadd.f32 %v1389_v49, %v150_v17  ;;  %v1398_v17 = vld [vmem:[#allocation45_spill] sm:$0xff] }
  0x4a   :  { %v317_v24 = vadd.f32 %v316_v14, %v315_v20  ;;  %v242_v51 = vmul.f32 %v1398_v17, %v1398_v17  ;;  %v1399_v20 = vld [vmem:[#allocation10_spill] sm:$0xff]  ;;  %v328_v62 = vsel %vm79_vm1, %v241_v44, 0.0 }
  0x4b   :  { %v154_v11 = vadd.f32 %v1391_v12, %v152_v30  ;;  %v1400_v30 = vld [vmem:[#allocation46_spill] sm:$0xff] }
  0x4c   :  { %v319_v60 = vadd.f32 %v318_v36, %v317_v24  ;;  %v243_v40 = vmul.f32 %v1400_v30, %v1400_v30  ;;  %v1401_v24 = vld [vmem:[#allocation11_spill] sm:$0xff]  ;;  %v330_v2 = vsel %vm79_vm1, %v242_v51, 0.0 }
  0x4d   :  { %v156_v16 = vadd.f32 %v1393_v39, %v154_v11  ;;  %v1402_v11 = vld [vmem:[#allocation47_spill] sm:$0xff] }
  0x4e   :  { %v321_v56 = vadd.f32 %v320_v1, %v319_v60  ;;  %v244_v47 = vmul.f32 %v1402_v11, %v1402_v11  ;;  %v1403_v60 = vld [vmem:[#allocation12_spill] sm:$0xff]  ;;  %v332_v18 = vsel %vm79_vm1, %v243_v40, 0.0 }
  0x4f   :  { %v158_v37 = vadd.f32 %v1395_v7, %v156_v16  ;;  %v1404_v16 = vld [vmem:[#allocation51_spill] sm:$0xff] }
  0x50   :  { %v323_v0 = vadd.f32 %v322_v55, %v321_v56  ;;  %v245_v52 = vmul.f32 %v1404_v16, %v1404_v16  ;;  %v1405_v56 = vld [vmem:[#allocation13_spill] sm:$0xff]  ;;  %v334_v44 = vsel %vm79_vm1, %v244_v47, 0.0 }
  0x51   :  { %v160_v15 = vadd.f32 %v1397_v32, %v158_v37  ;;  %v1406_v37 = vld [vmem:[#allocation52_spill] sm:$0xff]  ;;  %v1411_v47 = vld [vmem:[#allocation17_spill] sm:$0xff] }
  0x52   :  { %v325_v14 = vadd.f32 %v324_v57, %v323_v0  ;;  %v246_v38 = vmul.f32 %v1406_v37, %v1406_v37  ;;  %v1407_v0 = vld [vmem:[#allocation14_spill] sm:$0xff]  ;;  %v336_v51 = vsel %vm79_vm1, %v245_v52, 0.0 }
  0x53   :  { %v162_v49 = vadd.f32 %v1399_v20, %v160_v15  ;;  %v1408_v15 = vld [vmem:[#allocation53_spill] sm:$0xff] }
  0x54   :  { %v327_v36 = vadd.f32 %v326_v26, %v325_v14  ;;  %v247_v17 = vmul.f32 %v1408_v15, %v1408_v15  ;;  %v1409_v14 = vld [vmem:[#allocation15_spill] sm:$0xff]  ;;  %v338_v30 = vsel %vm79_vm1, %v246_v38, 0.0  ;;  %v1415_v38 = vld [vmem:[#allocation21_spill] sm:$0xff] }
  0x55   :  { %v164_v12 = vadd.f32 %v1401_v24, %v162_v49  ;;  %v248_v49 = vmul.f32 %v1145_v58, %v1145_v58  ;;  %v249_v24 = vmul.f32 %v1162_v34, %v1162_v34 }
  0x56   :  { %v329_v1 = vadd.f32 %v328_v62, %v327_v36  ;;  %v1410_v62 = vld [vmem:[#allocation16_spill] sm:$0xff] }
  0x57   :  { %v166_v39 = vadd.f32 %v1403_v60, %v164_v12  ;;  %v340_v12 = vsel %vm79_vm1, %v247_v17, 0.0  ;;  %v344_v58 = vsel %vm79_vm1, %v249_v24, 0.0  ;;  %v1417_v17 = vld [vmem:[#allocation23_spill] sm:$0xff]  ;;  %v1421_v24 = vld [vmem:[#allocation28_spill] sm:$0xff] }
  0x58   :  { %v331_v55 = vadd.f32 %v330_v2, %v329_v1  ;;  %v342_v1 = vsel %vm79_vm1, %v248_v49, 0.0 }
  0x59   :  { %v168_v7 = vadd.f32 %v1405_v56, %v166_v39  ;;  %v1412_v39 = vld [vmem:[#allocation18_spill] sm:$0xff] }
  0x5a   :  { %v333_v57 = vadd.f32 %v332_v18, %v331_v55  ;;  %v1413_v18 = vld [vmem:[#allocation19_spill] sm:$0xff] }
  0x5b   :  { %v170_v32 = vadd.f32 %v1407_v0, %v168_v7  ;;  %v1414_v7 = vld [vmem:[#allocation20_spill] sm:$0xff]  ;;  %v1416_v0 = vld [vmem:[#allocation22_spill] sm:$0xff] }
  0x5c   :  { %v335_v26 = vadd.f32 %v334_v44, %v333_v57 }
  0x5d   :  { %v172_v20 = vadd.f32 %v1409_v14, %v170_v32  ;;  %v1418_v14 = vld [vmem:[#allocation24_spill] sm:$0xff] }
  0x5e   :  { %v337_v40 = vadd.f32 %v336_v51, %v335_v26 }
  0x5f   :  { %v174_v36 = vadd.f32 %v1410_v62, %v172_v20  ;;  %v1420_v62 = vld [vmem:[#allocation27_spill] sm:$0xff] }
  0x60   :  { %v339_v11 = vadd.f32 %v338_v30, %v337_v40  ;;  %v1419_v30 = vld [vmem:[#allocation25_spill] sm:$0xff] }
  0x61   :  { %v176_v2 = vadd.f32 %v1411_v47, %v174_v36 }
  0x62   :  { %v341_v60 = vadd.f32 %v340_v12, %v339_v11  ;;  %v1422_v11 = vld [vmem:[#allocation29_spill] sm:$0xff] }
  0x63   :  { %v178_v16 = vadd.f32 %v1412_v39, %v176_v2  ;;  %v1423_v2 = vld [vmem:[#allocation31_spill] sm:$0xff] }
  0x64   :  { %v343_v52 = vadd.f32 %v342_v1, %v341_v60  ;;  %v1424_v60 = vld [vmem:[#allocation32_spill] sm:$0xff] }
  0x65   :  { %v180_v55 = vadd.f32 %v1413_v18, %v178_v16  ;;  %v1425_v16 = vld [vmem:[#allocation33_spill] sm:$0xff] }
  0x66   :  { %v345_v56 = vadd.f32 %v344_v58, %v343_v52  ;;  %v1426_v52 = vld [vmem:[#allocation34_spill] sm:$0xff] }
  0x67   :  { %v182_v37 = vadd.f32 %v1414_v7, %v180_v55 }
  0x68   :  { %v347_v34 = vadd.f32 %v1055_v3, %v345_v56 }
  0x69   :  { %v184_v44 = vadd.f32 %v1415_v38, %v182_v37 }
  0x6a   :  { %v349_v57 = vadd.f32 %v1058_v25, %v347_v34 }
  0x6b   :  { %v186_v32 = vadd.f32 %v1416_v0, %v184_v44 }
  0x6c   :  { %v351_v15 = vadd.f32 %v1061_v10, %v349_v57 }
  0x6d   :  { %v188_v51 = vadd.f32 %v1417_v17, %v186_v32 }
  0x6e   :  { %v353_v26 = vadd.f32 %v1064_v43, %v351_v15 }
  0x6f   :  { %v190_v20 = vadd.f32 %v1418_v14, %v188_v51 }
  0x70   :  { %v355_v49 = vadd.f32 %v1068_v6, %v353_v26 }
  0x71   :  { %v192_v40 = vadd.f32 %v1419_v30, %v190_v20 }
  0x72   :  { %v357_v3 = vadd.f32 %v1071_v50, %v355_v49 }
  0x73   :  { %v194_v36 = vadd.f32 %v1420_v62, %v192_v40 }
  0x74   :  { %v359_v25 = vadd.f32 %v1074_v13, %v357_v3 }
  0x75   :  { %v196_v12 = vadd.f32 %v1421_v24, %v194_v36 }
  0x76   :  { %v361_v10 = vadd.f32 %v1077_v19, %v359_v25 }
  0x77   :  { %v198_v47 = vadd.f32 %v1422_v11, %v196_v12 }
  0x78   :  { %v363_v43 = vadd.f32 %v1080_v21, %v361_v10 }
  0x79   :  { %v200_v1 = vadd.f32 %v1423_v2, %v198_v47 }
  0x7a   :  { %v365_v6 = vadd.f32 %v1083_v22, %v363_v43 }
  0x7b   :  { %v202_v39 = vadd.f32 %v1424_v60, %v200_v1 }
  0x7c   :  { %v367_v50 = vadd.f32 %v1087_v23, %v365_v6 }
  0x7d   :  { %v204_v58 = vadd.f32 %v1425_v16, %v202_v39 }
  0x7e   :  { %v369_v13 = vadd.f32 %v1090_v4, %v367_v50  ;;  %v78_v4 = vld [vmem:[%s1302_s1] sm:$0x1] }
  0x7f   :  { %v206_v18 = vadd.f32 %v1426_v52, %v204_v58 }
  0x80   :  { %v371_v19 = vadd.f32 %v1093_v9, %v369_v13 }
  0x81   :  { %v207_v55 = vrot.slane %v206_v18, 4 }
  0x82   :  { %v373_v56 = vadd.f32 %v1096_v27, %v371_v19 }
  0x83   :  { %v208_v21 = vadd.f32 %v207_v55, %v206_v18 }
  0x84   :  { %v375_v7 = vadd.f32 %v1099_v28, %v373_v56 }
  0x85   :  { %v209_v37 = vrot.slane %v208_v21, 2 }
  0x86   :  { %v377_v22 = vadd.f32 %v1102_v29, %v375_v7 }
  0x87   :  { %v210_v34 = vadd.f32 %v209_v37, %v208_v21 }
  0x88   :  { %v379_v23 = vadd.f32 %v1106_v33, %v377_v22 }
  0x89   :  { %v211_v38 = vrot.slane %v210_v34, 1 }
  0x8a   :  { %v381_v44 = vadd.f32 %v1109_v35, %v379_v23 }
  0x8b   :  { %v212_v9 = vadd.f32 %v211_v38, %v210_v34 }
  0x8c   :  { %v383_v27 = vadd.f32 %v1112_v41, %v381_v44 }
  0x8d   :  { %v213_v57 = vadd.f32 %v212_v9, %v78_v4 }
  0x8e   :  { %v385_v28 = vadd.f32 %v1115_v42, %v383_v27 }
  0x8f   :  { %215 = vst.msk [vmem:[%s1302_s1] sm:$0x1] %vm214_vm2, %v213_v57 }
  0x90   :  { %v387_v29 = vadd.f32 %v1118_v46, %v385_v28 }
  0x92   :  { %v389_v33 = vadd.f32 %v1121_v63, %v387_v29 }
  0x94   :  { %v391_v0 = vadd.f32 %v1125_v48, %v389_v33 }
  0x96   :  { %v393_v35 = vadd.f32 %v1128_v45, %v391_v0  ;;  %v216_v45 = vld [vmem:[%s1302_s1 + $0x1] sm:$0x1] }
  0x98   :  { %v395_v32 = vadd.f32 %v1131_v53, %v393_v35 }
  0x9a   :  { %v397_v41 = vadd.f32 %v1134_v54, %v395_v32 }
  0x9c   :  { %v399_v15 = vadd.f32 %v1137_v31, %v397_v41 }
  0x9e   :  { %v401_v42 = vadd.f32 %v1140_v59, %v399_v15 }
  0xa0   :  { %v403_v17 = vadd.f32 %v1149_v61, %v401_v42 }
  0xa2   :  { %v405_v51 = vadd.f32 %v1152_v5, %v403_v17 }
  0xa4   :  { %v407_v46 = vadd.f32 %v1155_v8, %v405_v51 }
  0xa6   :  { %v408_v26 = vrot.slane %v407_v46, 4 }
  0xa8   :  { %v409_v63 = vadd.f32 %v408_v26, %v407_v46 }
  0xaa   :  { %v410_v14 = vrot.slane %v409_v63, 2 }
  0xac   :  { %v411_v48 = vadd.f32 %v410_v14, %v409_v63 }
  0xae   :  { %v412_v20 = vrot.slane %v411_v48, 1 }
  0xb0   :  { %v413_v53 = vadd.f32 %v412_v20, %v411_v48 }
  0xb2   :  { %v414_v54 = vadd.f32 %v413_v53, %v216_v45 }
  0xb4   :  { %415 = vst.msk [vmem:[%s1302_s1 + $0x1] sm:$0x1] %vm214_vm2, %v414_v54 }

// kernel: resnet_shard1_forward.75
= control target key start
LH: loop header
LB: loop body
LE: loop exit
PB: predicated region body
PF: predicated region fallthrough
CT: control target
= control target key end

     0   :  { %v388_v6 = vmov 1966171168   ;;  %v31_v8 = vlaneseq  ;;  %vm316_vm0 = vcmask 523264   ;;  %s1003_s1 = inlined_call_operand.vmem [shape: f32[2,64], index: 1, kind: input, shape index: {}]   ;;  %s1004_s2 = inlined_call_operand.vmem [shape: f32[1,64], index: 2, kind: input, shape index: {}]   ;;  %s1005_s0 = inlined_call_operand.vmem [shape: f32[512,64], index: 0, kind: input, shape index: {}]   ;;  %s1006_s3 = inlined_call_operand.vmem [shape: f32[1,64], index: 3, kind: input, shape index: {}]   ;;  %s1007_s4 = inlined_call_operand.vmem [shape: f32[512,64], index: 4, kind: output, shape index: {}]  }
   0x1   :  { %v17_v0 = vld [vmem:[%s1003_s1] sm:$0x3]  ;;  %v29_v7 = vunpack.c.l.s4 %v388_v6  ;;  %v49_v21 = vld [vmem:[%s1005_s0 + $0x8] sm:$0xff]  ;;  %v50_v22 = vld [vmem:[%s1005_s0 + $0x10] sm:$0xff] }
   0x2   :  { %v18_v1 = vmul.f32 0.001953125, %v17_v0  ;;  %v32_v10 = vshrl.u32 %v31_v8, 7  ;;  %v24_v15 = vld [vmem:[%s1004_s2] sm:$0x1]  ;;  %v51_v23 = vld [vmem:[%s1005_s0 + $0x18] sm:$0xff]  ;;  %v53_v27 = vld [vmem:[%s1005_s0 + $0x28] sm:$0xff] }
   0x3   :  { %v30_v9 = vunpack.c.0.s8 %v29_v7  ;;  %v45_v19 = vld [vmem:[%s1006_s3] sm:$0x1]  ;;  %v54_v28 = vld [vmem:[%s1005_s0 + $0x30] sm:$0xff]  ;;  %v55_v29 = vld [vmem:[%s1005_s0 + $0x38] sm:$0xff] }
   0x4   :  { %v19_v2 = vmul.f32 %v18_v1, %v18_v1  ;;  %v115_v17 = vsub.s32 0, %v32_v10  ;;  %v48_v20 = vld [vmem:[%s1005_s0] sm:$0xff]  ;;  %v57_v31 = vld [vmem:[%s1005_s0 + $0x48] sm:$0xff]  ;;  %v58_v32 = vld [vmem:[%s1005_s0 + $0x50] sm:$0xff] }
   0x5   :  { %v33_v11 = vsub.s32 %v30_v9, %v32_v10  ;;  %v52_v24 = vld [vmem:[%s1005_s0 + $0x20] sm:$0xff]  ;;  %v59_v37 = vld [vmem:[%s1005_s0 + $0x58] sm:$0xff]  ;;  %v61_v39 = vld [vmem:[%s1005_s0 + $0x68] sm:$0xff] }
   0x6   :  { %v21_v3 = vrot.slane %v19_v2, 7  ;;  %v56_v30 = vld [vmem:[%s1005_s0 + $0x40] sm:$0xff]  ;;  %v62_v0 = vld [vmem:[%s1005_s0 + $0x70] sm:$0xff] }
   0x7   :  { %v60_v38 = vld [vmem:[%s1005_s0 + $0x60] sm:$0xff] }
   0x8   :  { %v23_v4 = vsub.f32 %v18_v1, %v21_v3  ;;  %v64_v10 = vld [vmem:[%s1005_s0 + $0x80] sm:$0xff] }
   0xa   :  { %v25_v5 = vadd.f32 1e-05, %v23_v4 }
   0xc   :  { %386 = vrsqrt.f32 %v25_v5 }
  0x19   :  { %v387_v12 = vpop.eup %386 }
  0x1a   :  { %v34_v13 = vrot.slane %v387_v12, %v33_v11 }
  0x1c   :  { %v35_v14 = vcombine.high %v34_v13, %v34_v13 }
  0x1e   :  { %v42_v16 = vrot.slane %v35_v14, %v33_v11 }
  0x20   :  { %v44_v18 = vmul.f32 %v42_v16, %v24_v15  ;;  %v65_v15 = vld [vmem:[%s1005_s0 + $0x88] sm:$0xff]  ;;  %v66_v16 = vld [vmem:[%s1005_s0 + $0x90] sm:$0xff] }
  0x22   :  { %v46_v25 = vmul.f32 %v44_v18, %v18_v1  ;;  %v438_v26 = vrot.slane %v44_v18, %v115_v17  ;;  %v63_v1 = vld [vmem:[%s1005_s0 + $0x78] sm:$0xff] }
  0x24   :  { %v47_v33 = vsub.f32 %v45_v19, %v46_v25  ;;  %v118_v34 = vmul.f32 %v438_v26, %v48_v20  ;;  %v119_v35 = vmul.f32 %v438_v26, %v49_v21  ;;  %v120_v36 = vmul.f32 %v438_v26, %v50_v22  ;;  %v68_v22 = vld [vmem:[%s1005_s0 + $0xa0] sm:$0xff] }
  0x25   :  { %v121_v40 = vmul.f32 %v438_v26, %v51_v23  ;;  %v122_v41 = vmul.f32 %v438_v26, %v52_v24  ;;  %v123_v42 = vmul.f32 %v438_v26, %v53_v27  ;;  %v124_v43 = vmul.f32 %v438_v26, %v54_v28  ;;  %v69_v23 = vld [vmem:[%s1005_s0 + $0xa8] sm:$0xff] }
  0x26   :  { %v474_v44 = vrot.slane %v47_v33, %v115_v17  ;;  %v125_v45 = vmul.f32 %v438_v26, %v55_v29  ;;  %v126_v46 = vmul.f32 %v438_v26, %v56_v30  ;;  %v127_v47 = vmul.f32 %v438_v26, %v57_v31  ;;  %v67_v17 = vld [vmem:[%s1005_s0 + $0x98] sm:$0xff]  ;;  %v70_v33 = vld [vmem:[%s1005_s0 + $0xb0] sm:$0xff] }
  0x27   :  { %v128_v48 = vmul.f32 %v438_v26, %v58_v32  ;;  %v129_v49 = vmul.f32 %v438_v26, %v59_v37  ;;  %v130_v50 = vmul.f32 %v438_v26, %v60_v38  ;;  %v131_v51 = vmul.f32 %v438_v26, %v61_v39 }
  0x28   :  { %v188_v52 = vadd.f32 %v474_v44, %v118_v34  ;;  %v189_v53 = vadd.f32 %v474_v44, %v119_v35  ;;  %v190_v54 = vadd.f32 %v474_v44, %v120_v36  ;;  %v191_v55 = vadd.f32 %v474_v44, %v121_v40  ;;  %v71_v34 = vld [vmem:[%s1005_s0 + $0xb8] sm:$0xff] }
  0x29   :  { %v192_v56 = vadd.f32 %v474_v44, %v122_v41  ;;  %v193_v57 = vadd.f32 %v474_v44, %v123_v42  ;;  %v194_v58 = vadd.f32 %v474_v44, %v124_v43  ;;  %v195_v59 = vadd.f32 %v474_v44, %v125_v45  ;;  %v72_v43 = vld [vmem:[%s1005_s0 + $0xc0] sm:$0xff] }
  0x2a   :  { %v252_v60 = vmax.f32 %v188_v52, 0.0  ;;  %v253_v61 = vmax.f32 %v189_v53, 0.0  ;;  %v254_v62 = vmax.f32 %v190_v54, 0.0  ;;  %v255_v63 = vmax.f32 %v191_v55, 0.0 }
  0x2b   :  { %v256_v2 = vmax.f32 %v192_v56, 0.0  ;;  %v257_v3 = vmax.f32 %v193_v57, 0.0  ;;  %v258_v4 = vmax.f32 %v194_v58, 0.0  ;;  %v259_v5 = vmax.f32 %v195_v59, 0.0  ;;  %v76_v56 = vld [vmem:[%s1005_s0 + $0xe0] sm:$0xff]  ;;  %v77_v57 = vld [vmem:[%s1005_s0 + $0xe8] sm:$0xff] }
  0x2c   :  { %317 = vst.msk [vmem:[%s1007_s4] sm:$0xff] %vm316_vm0, %v252_v60  ;;  %318 = vst.msk [vmem:[%s1007_s4 + $0x8] sm:$0xff] %vm316_vm0, %v253_v61  ;;  %v196_v6 = vadd.f32 %v474_v44, %v126_v46  ;;  %v197_v7 = vadd.f32 %v474_v44, %v127_v47  ;;  %v198_v8 = vadd.f32 %v474_v44, %v128_v48 }
  0x2d   :  { %319 = vst.msk [vmem:[%s1007_s4 + $0x10] sm:$0xff] %vm316_vm0, %v254_v62  ;;  %320 = vst.msk [vmem:[%s1007_s4 + $0x18] sm:$0xff] %vm316_vm0, %v255_v63  ;;  %v199_v9 = vadd.f32 %v474_v44, %v129_v49  ;;  %v200_v11 = vadd.f32 %v474_v44, %v130_v50  ;;  %v201_v12 = vadd.f32 %v474_v44, %v131_v51  ;;  %v73_v49 = vld [vmem:[%s1005_s0 + $0xc8] sm:$0xff]  ;;  %v74_v50 = vld [vmem:[%s1005_s0 + $0xd0] sm:$0xff] }
  0x2e   :  { %321 = vst.msk [vmem:[%s1007_s4 + $0x20] sm:$0xff] %vm316_vm0, %v256_v2  ;;  %322 = vst.msk [vmem:[%s1007_s4 + $0x28] sm:$0xff] %vm316_vm0, %v257_v3  ;;  %v132_v13 = vmul.f32 %v438_v26, %v62_v0  ;;  %v133_v14 = vmul.f32 %v438_v26, %v63_v1  ;;  %v260_v18 = vmax.f32 %v196_v6, 0.0  ;;  %v261_v19 = vmax.f32 %v197_v7, 0.0  ;;  %v75_v51 = vld [vmem:[%s1005_s0 + $0xd8] sm:$0xff]  ;;  %v78_v2 = vld [vmem:[%s1005_s0 + $0xf0] sm:$0xff] }
  0x2f   :  { %323 = vst.msk [vmem:[%s1007_s4 + $0x30] sm:$0xff] %vm316_vm0, %v258_v4  ;;  %324 = vst.msk [vmem:[%s1007_s4 + $0x38] sm:$0xff] %vm316_vm0, %v259_v5  ;;  %v262_v20 = vmax.f32 %v198_v8, 0.0  ;;  %v263_v21 = vmax.f32 %v199_v9, 0.0  ;;  %v264_v24 = vmax.f32 %v200_v11, 0.0  ;;  %v265_v25 = vmax.f32 %v201_v12, 0.0 }
  0x30   :  { %v202_v27 = vadd.f32 %v474_v44, %v132_v13  ;;  %v203_v28 = vadd.f32 %v474_v44, %v133_v14  ;;  %325 = vst.msk [vmem:[%s1007_s4 + $0x40] sm:$0xff] %vm316_vm0, %v260_v18  ;;  %326 = vst.msk [vmem:[%s1007_s4 + $0x48] sm:$0xff] %vm316_vm0, %v261_v19  ;;  %v134_v29 = vmul.f32 %v438_v26, %v64_v10  ;;  %v79_v3 = vld [vmem:[%s1005_s0 + $0xf8] sm:$0xff]  ;;  %v80_v12 = vld [vmem:[%s1005_s0 + $0x100] sm:$0xff] }
  0x31   :  { %327 = vst.msk [vmem:[%s1007_s4 + $0x50] sm:$0xff] %vm316_vm0, %v262_v20  ;;  %328 = vst.msk [vmem:[%s1007_s4 + $0x58] sm:$0xff] %vm316_vm0, %v263_v21  ;;  %v135_v30 = vmul.f32 %v438_v26, %v65_v15  ;;  %v136_v31 = vmul.f32 %v438_v26, %v66_v16  ;;  %v137_v32 = vmul.f32 %v438_v26, %v67_v17  ;;  %v81_v17 = vld [vmem:[%s1005_s0 + $0x108] sm:$0xff]  ;;  %v82_v18 = vld [vmem:[%s1005_s0 + $0x110] sm:$0xff] }
  0x32   :  { %329 = vst.msk [vmem:[%s1007_s4 + $0x60] sm:$0xff] %vm316_vm0, %v264_v24  ;;  %330 = vst.msk [vmem:[%s1007_s4 + $0x68] sm:$0xff] %vm316_vm0, %v265_v25  ;;  %v266_v35 = vmax.f32 %v202_v27, 0.0  ;;  %v267_v36 = vmax.f32 %v203_v28, 0.0  ;;  %v138_v37 = vmul.f32 %v438_v26, %v68_v22  ;;  %v139_v38 = vmul.f32 %v438_v26, %v69_v23  ;;  %v83_v19 = vld [vmem:[%s1005_s0 + $0x118] sm:$0xff]  ;;  %v84_v24 = vld [vmem:[%s1005_s0 + $0x120] sm:$0xff] }
  0x33   :  { %v204_v39 = vadd.f32 %v474_v44, %v134_v29  ;;  %v205_v40 = vadd.f32 %v474_v44, %v135_v30  ;;  %v206_v41 = vadd.f32 %v474_v44, %v136_v31  ;;  %v207_v42 = vadd.f32 %v474_v44, %v137_v32  ;;  %v85_v25 = vld [vmem:[%s1005_s0 + $0x128] sm:$0xff] }
  0x34   :  { %331 = vst.msk [vmem:[%s1007_s4 + $0x70] sm:$0xff] %vm316_vm0, %v266_v35  ;;  %332 = vst.msk [vmem:[%s1007_s4 + $0x78] sm:$0xff] %vm316_vm0, %v267_v36  ;;  %v208_v45 = vadd.f32 %v474_v44, %v138_v37  ;;  %v209_v46 = vadd.f32 %v474_v44, %v139_v38  ;;  %v140_v47 = vmul.f32 %v438_v26, %v70_v33  ;;  %v86_v35 = vld [vmem:[%s1005_s0 + $0x130] sm:$0xff]  ;;  %v87_v36 = vld [vmem:[%s1005_s0 + $0x138] sm:$0xff] }
  0x35   :  { %v141_v48 = vmul.f32 %v438_v26, %v71_v34  ;;  %v268_v52 = vmax.f32 %v204_v39, 0.0  ;;  %v269_v53 = vmax.f32 %v205_v40, 0.0  ;;  %v270_v54 = vmax.f32 %v206_v41, 0.0 }
  0x36   :  { %v271_v55 = vmax.f32 %v207_v42, 0.0  ;;  %v272_v58 = vmax.f32 %v208_v45, 0.0  ;;  %v273_v59 = vmax.f32 %v209_v46, 0.0  ;;  %v210_v60 = vadd.f32 %v474_v44, %v140_v47  ;;  %v88_v46 = vld [vmem:[%s1005_s0 + $0x140] sm:$0xff] }
  0x37   :  { %v211_v61 = vadd.f32 %v474_v44, %v141_v48  ;;  %333 = vst.msk [vmem:[%s1007_s4 + $0x80] sm:$0xff] %vm316_vm0, %v268_v52  ;;  %334 = vst.msk [vmem:[%s1007_s4 + $0x88] sm:$0xff] %vm316_vm0, %v269_v53  ;;  %v142_v62 = vmul.f32 %v438_v26, %v72_v43  ;;  %v143_v63 = vmul.f32 %v438_v26, %v73_v49  ;;  %v90_v52 = vld [vmem:[%s1005_s0 + $0x150] sm:$0xff]  ;;  %v91_v53 = vld [vmem:[%s1005_s0 + $0x158] sm:$0xff] }
  0x38   :  { %335 = vst.msk [vmem:[%s1007_s4 + $0x90] sm:$0xff] %vm316_vm0, %v270_v54  ;;  %336 = vst.msk [vmem:[%s1007_s4 + $0x98] sm:$0xff] %vm316_vm0, %v271_v55  ;;  %v144_v0 = vmul.f32 %v438_v26, %v74_v50  ;;  %v145_v1 = vmul.f32 %v438_v26, %v75_v51  ;;  %v274_v4 = vmax.f32 %v210_v60, 0.0  ;;  %v146_v6 = vmul.f32 %v438_v26, %v76_v56  ;;  %v89_v51 = vld [vmem:[%s1005_s0 + $0x148] sm:$0xff] }
  0x39   :  { %337 = vst.msk [vmem:[%s1007_s4 + $0xa0] sm:$0xff] %vm316_vm0, %v272_v58  ;;  %338 = vst.msk [vmem:[%s1007_s4 + $0xa8] sm:$0xff] %vm316_vm0, %v273_v59  ;;  %v275_v5 = vmax.f32 %v211_v61, 0.0  ;;  %v147_v7 = vmul.f32 %v438_v26, %v77_v57  ;;  %v212_v8 = vadd.f32 %v474_v44, %v142_v62  ;;  %v213_v9 = vadd.f32 %v474_v44, %v143_v63  ;;  %v92_v58 = vld [vmem:[%s1005_s0 + $0x160] sm:$0xff]  ;;  %v93_v59 = vld [vmem:[%s1005_s0 + $0x168] sm:$0xff] }
  0x3a   :  { %v214_v10 = vadd.f32 %v474_v44, %v144_v0  ;;  %v215_v11 = vadd.f32 %v474_v44, %v145_v1  ;;  %339 = vst.msk [vmem:[%s1007_s4 + $0xb0] sm:$0xff] %vm316_vm0, %v274_v4  ;;  %v216_v13 = vadd.f32 %v474_v44, %v146_v6  ;;  %v148_v15 = vmul.f32 %v438_v26, %v78_v2  ;;  %v94_v4 = vld [vmem:[%s1005_s0 + $0x170] sm:$0xff] }
  0x3b   :  { %340 = vst.msk [vmem:[%s1007_s4 + $0xb8] sm:$0xff] %vm316_vm0, %v275_v5  ;;  %v217_v14 = vadd.f32 %v474_v44, %v147_v7  ;;  %v149_v16 = vmul.f32 %v438_v26, %v79_v3  ;;  %v276_v20 = vmax.f32 %v212_v8, 0.0  ;;  %v277_v21 = vmax.f32 %v213_v9, 0.0  ;;  %v95_v5 = vld [vmem:[%s1005_s0 + $0x178] sm:$0xff] }
  0x3c   :  { %v278_v22 = vmax.f32 %v214_v10, 0.0  ;;  %v279_v23 = vmax.f32 %v215_v11, 0.0  ;;  %v280_v27 = vmax.f32 %v216_v13, 0.0  ;;  %v218_v29 = vadd.f32 %v474_v44, %v148_v15 }
  0x3d   :  { %v281_v28 = vmax.f32 %v217_v14, 0.0  ;;  %v219_v30 = vadd.f32 %v474_v44, %v149_v16  ;;  %341 = vst.msk [vmem:[%s1007_s4 + $0xc0] sm:$0xff] %vm316_vm0, %v276_v20  ;;  %342 = vst.msk [vmem:[%s1007_s4 + $0xc8] sm:$0xff] %vm316_vm0, %v277_v21  ;;  %v150_v31 = vmul.f32 %v438_v26, %v80_v12  ;;  %v151_v32 = vmul.f32 %v438_v26, %v81_v17  ;;  %v96_v14 = vld [vmem:[%s1005_s0 + $0x180] sm:$0xff]  ;;  %v98_v20 = vld [vmem:[%s1005_s0 + $0x190] sm:$0xff] }
  0x3e   :  { %343 = vst.msk [vmem:[%s1007_s4 + $0xd0] sm:$0xff] %vm316_vm0, %v278_v22  ;;  %344 = vst.msk [vmem:[%s1007_s4 + $0xd8] sm:$0xff] %vm316_vm0, %v279_v23  ;;  %v152_v33 = vmul.f32 %v438_v26, %v82_v18  ;;  %v153_v34 = vmul.f32 %v438_v26, %v83_v19  ;;  %v282_v37 = vmax.f32 %v218_v29, 0.0  ;;  %v154_v39 = vmul.f32 %v438_v26, %v84_v24  ;;  %v97_v19 = vld [vmem:[%s1005_s0 + $0x188] sm:$0xff]  ;;  %v99_v21 = vld [vmem:[%s1005_s0 + $0x198] sm:$0xff] }
  0x3f   :  { %345 = vst.msk [vmem:[%s1007_s4 + $0xe0] sm:$0xff] %vm316_vm0, %v280_v27  ;;  %346 = vst.msk [vmem:[%s1007_s4 + $0xe8] sm:$0xff] %vm316_vm0, %v281_v28  ;;  %v283_v38 = vmax.f32 %v219_v30, 0.0  ;;  %v155_v40 = vmul.f32 %v438_v26, %v85_v25  ;;  %v220_v41 = vadd.f32 %v474_v44, %v150_v31  ;;  %v221_v42 = vadd.f32 %v474_v44, %v151_v32  ;;  %v100_v27 = vld [vmem:[%s1005_s0 + $0x1a0] sm:$0xff]  ;;  %v101_v28 = vld [vmem:[%s1005_s0 + $0x1a8] sm:$0xff] }
  0x40   :  { %v222_v43 = vadd.f32 %v474_v44, %v152_v33  ;;  %v223_v45 = vadd.f32 %v474_v44, %v153_v34  ;;  %347 = vst.msk [vmem:[%s1007_s4 + $0xf0] sm:$0xff] %vm316_vm0, %v282_v37  ;;  %v224_v47 = vadd.f32 %v474_v44, %v154_v39  ;;  %v156_v49 = vmul.f32 %v438_v26, %v86_v35  ;;  %v102_v37 = vld [vmem:[%s1005_s0 + $0x1b0] sm:$0xff] }
  0x41   :  { %348 = vst.msk [vmem:[%s1007_s4 + $0xf8] sm:$0xff] %vm316_vm0, %v283_v38  ;;  %v225_v48 = vadd.f32 %v474_v44, %v155_v40  ;;  %v157_v50 = vmul.f32 %v438_v26, %v87_v36  ;;  %v284_v54 = vmax.f32 %v220_v41, 0.0  ;;  %v285_v55 = vmax.f32 %v221_v42, 0.0  ;;  %v103_v38 = vld [vmem:[%s1005_s0 + $0x1b8] sm:$0xff] }
  0x42   :  { %v286_v56 = vmax.f32 %v222_v43, 0.0  ;;  %v287_v57 = vmax.f32 %v223_v45, 0.0  ;;  %v288_v60 = vmax.f32 %v224_v47, 0.0  ;;  %v226_v62 = vadd.f32 %v474_v44, %v156_v49 }
  0x43   :  { %v289_v61 = vmax.f32 %v225_v48, 0.0  ;;  %v227_v63 = vadd.f32 %v474_v44, %v157_v50  ;;  %349 = vst.msk [vmem:[%s1007_s4 + $0x100] sm:$0xff] %vm316_vm0, %v284_v54  ;;  %350 = vst.msk [vmem:[%s1007_s4 + $0x108] sm:$0xff] %vm316_vm0, %v285_v55  ;;  %v158_v0 = vmul.f32 %v438_v26, %v88_v46  ;;  %v159_v1 = vmul.f32 %v438_v26, %v89_v51  ;;  %v104_v48 = vld [vmem:[%s1005_s0 + $0x1c0] sm:$0xff]  ;;  %v106_v54 = vld [vmem:[%s1005_s0 + $0x1d0] sm:$0xff] }
  0x44   :  { %351 = vst.msk [vmem:[%s1007_s4 + $0x110] sm:$0xff] %vm316_vm0, %v286_v56  ;;  %352 = vst.msk [vmem:[%s1007_s4 + $0x118] sm:$0xff] %vm316_vm0, %v287_v57  ;;  %v160_v2 = vmul.f32 %v438_v26, %v90_v52  ;;  %v161_v3 = vmul.f32 %v438_v26, %v91_v53  ;;  %v290_v6 = vmax.f32 %v226_v62, 0.0  ;;  %v162_v8 = vmul.f32 %v438_v26, %v92_v58  ;;  %v105_v53 = vld [vmem:[%s1005_s0 + $0x1c8] sm:$0xff]  ;;  %v107_v55 = vld [vmem:[%s1005_s0 + $0x1d8] sm:$0xff] }
  0x45   :  { %353 = vst.msk [vmem:[%s1007_s4 + $0x120] sm:$0xff] %vm316_vm0, %v288_v60  ;;  %354 = vst.msk [vmem:[%s1007_s4 + $0x128] sm:$0xff] %vm316_vm0, %v289_v61  ;;  %v291_v7 = vmax.f32 %v227_v63, 0.0  ;;  %v163_v9 = vmul.f32 %v438_v26, %v93_v59  ;;  %v228_v10 = vadd.f32 %v474_v44, %v158_v0  ;;  %v229_v11 = vadd.f32 %v474_v44, %v159_v1  ;;  %v108_v60 = vld [vmem:[%s1005_s0 + $0x1e0] sm:$0xff]  ;;  %v109_v61 = vld [vmem:[%s1005_s0 + $0x1e8] sm:$0xff] }
  0x46   :  { %v230_v12 = vadd.f32 %v474_v44, %v160_v2  ;;  %v231_v13 = vadd.f32 %v474_v44, %v161_v3  ;;  %355 = vst.msk [vmem:[%s1007_s4 + $0x130] sm:$0xff] %vm316_vm0, %v290_v6  ;;  %v232_v15 = vadd.f32 %v474_v44, %v162_v8  ;;  %v164_v17 = vmul.f32 %v438_v26, %v94_v4  ;;  %v110_v6 = vld [vmem:[%s1005_s0 + $0x1f0] sm:$0xff] }
  0x47   :  { %356 = vst.msk [vmem:[%s1007_s4 + $0x138] sm:$0xff] %vm316_vm0, %v291_v7  ;;  %v233_v16 = vadd.f32 %v474_v44, %v163_v9  ;;  %v165_v18 = vmul.f32 %v438_v26, %v95_v5  ;;  %v292_v22 = vmax.f32 %v228_v10, 0.0  ;;  %v293_v23 = vmax.f32 %v229_v11, 0.0  ;;  %v111_v7 = vld [vmem:[%s1005_s0 + $0x1f8] sm:$0xff] }
  0x48   :  { %v294_v24 = vmax.f32 %v230_v12, 0.0  ;;  %v295_v25 = vmax.f32 %v231_v13, 0.0  ;;  %v296_v29 = vmax.f32 %v232_v15, 0.0  ;;  %v234_v31 = vadd.f32 %v474_v44, %v164_v17 }
  0x49   :  { %v297_v30 = vmax.f32 %v233_v16, 0.0  ;;  %v235_v32 = vadd.f32 %v474_v44, %v165_v18  ;;  %357 = vst.msk [vmem:[%s1007_s4 + $0x140] sm:$0xff] %vm316_vm0, %v292_v22  ;;  %358 = vst.msk [vmem:[%s1007_s4 + $0x148] sm:$0xff] %vm316_vm0, %v293_v23  ;;  %v166_v33 = vmul.f32 %v438_v26, %v96_v14  ;;  %v167_v34 = vmul.f32 %v438_v26, %v97_v19 }
  0x4a   :  { %359 = vst.msk [vmem:[%s1007_s4 + $0x150] sm:$0xff] %vm316_vm0, %v294_v24  ;;  %360 = vst.msk [vmem:[%s1007_s4 + $0x158] sm:$0xff] %vm316_vm0, %v295_v25  ;;  %v168_v35 = vmul.f32 %v438_v26, %v98_v20  ;;  %v169_v36 = vmul.f32 %v438_v26, %v99_v21  ;;  %v298_v39 = vmax.f32 %v234_v31, 0.0  ;;  %v170_v41 = vmul.f32 %v438_v26, %v100_v27 }
  0x4b   :  { %361 = vst.msk [vmem:[%s1007_s4 + $0x160] sm:$0xff] %vm316_vm0, %v296_v29  ;;  %362 = vst.msk [vmem:[%s1007_s4 + $0x168] sm:$0xff] %vm316_vm0, %v297_v30  ;;  %v299_v40 = vmax.f32 %v235_v32, 0.0  ;;  %v171_v42 = vmul.f32 %v438_v26, %v101_v28  ;;  %v236_v43 = vadd.f32 %v474_v44, %v166_v33  ;;  %v237_v45 = vadd.f32 %v474_v44, %v167_v34 }
  0x4c   :  { %v238_v46 = vadd.f32 %v474_v44, %v168_v35  ;;  %v239_v47 = vadd.f32 %v474_v44, %v169_v36  ;;  %363 = vst.msk [vmem:[%s1007_s4 + $0x170] sm:$0xff] %vm316_vm0, %v298_v39  ;;  %v240_v49 = vadd.f32 %v474_v44, %v170_v41  ;;  %v172_v51 = vmul.f32 %v438_v26, %v102_v37 }
  0x4d   :  { %364 = vst.msk [vmem:[%s1007_s4 + $0x178] sm:$0xff] %vm316_vm0, %v299_v40  ;;  %v241_v50 = vadd.f32 %v474_v44, %v171_v42  ;;  %v173_v52 = vmul.f32 %v438_v26, %v103_v38  ;;  %v300_v56 = vmax.f32 %v236_v43, 0.0  ;;  %v301_v57 = vmax.f32 %v237_v45, 0.0 }
  0x4e   :  { %v302_v58 = vmax.f32 %v238_v46, 0.0  ;;  %v303_v59 = vmax.f32 %v239_v47, 0.0  ;;  %v304_v62 = vmax.f32 %v240_v49, 0.0  ;;  %v242_v0 = vadd.f32 %v474_v44, %v172_v51 }
  0x4f   :  { %v305_v63 = vmax.f32 %v241_v50, 0.0  ;;  %v243_v1 = vadd.f32 %v474_v44, %v173_v52  ;;  %365 = vst.msk [vmem:[%s1007_s4 + $0x180] sm:$0xff] %vm316_vm0, %v300_v56  ;;  %366 = vst.msk [vmem:[%s1007_s4 + $0x188] sm:$0xff] %vm316_vm0, %v301_v57  ;;  %v174_v2 = vmul.f32 %v438_v26, %v104_v48  ;;  %v175_v3 = vmul.f32 %v438_v26, %v105_v53 }
  0x50   :  { %367 = vst.msk [vmem:[%s1007_s4 + $0x190] sm:$0xff] %vm316_vm0, %v302_v58  ;;  %368 = vst.msk [vmem:[%s1007_s4 + $0x198] sm:$0xff] %vm316_vm0, %v303_v59  ;;  %v176_v4 = vmul.f32 %v438_v26, %v106_v54  ;;  %v177_v5 = vmul.f32 %v438_v26, %v107_v55  ;;  %v306_v8 = vmax.f32 %v242_v0, 0.0  ;;  %v178_v10 = vmul.f32 %v438_v26, %v108_v60 }
  0x51   :  { %369 = vst.msk [vmem:[%s1007_s4 + $0x1a0] sm:$0xff] %vm316_vm0, %v304_v62  ;;  %370 = vst.msk [vmem:[%s1007_s4 + $0x1a8] sm:$0xff] %vm316_vm0, %v305_v63  ;;  %v307_v9 = vmax.f32 %v243_v1, 0.0  ;;  %v179_v11 = vmul.f32 %v438_v26, %v109_v61  ;;  %v244_v12 = vadd.f32 %v474_v44, %v174_v2  ;;  %v245_v13 = vadd.f32 %v474_v44, %v175_v3 }
  0x52   :  { %v246_v14 = vadd.f32 %v474_v44, %v176_v4  ;;  %v247_v15 = vadd.f32 %v474_v44, %v177_v5  ;;  %371 = vst.msk [vmem:[%s1007_s4 + $0x1b0] sm:$0xff] %vm316_vm0, %v306_v8  ;;  %v248_v16 = vadd.f32 %v474_v44, %v178_v10  ;;  %v180_v18 = vmul.f32 %v438_v26, %v110_v6 }
  0x53   :  { %372 = vst.msk [vmem:[%s1007_s4 + $0x1b8] sm:$0xff] %vm316_vm0, %v307_v9  ;;  %v249_v17 = vadd.f32 %v474_v44, %v179_v11  ;;  %v181_v19 = vmul.f32 %v438_v26, %v111_v7  ;;  %v308_v20 = vmax.f32 %v244_v12, 0.0  ;;  %v309_v21 = vmax.f32 %v245_v13, 0.0 }
  0x54   :  { %v310_v22 = vmax.f32 %v246_v14, 0.0  ;;  %v311_v23 = vmax.f32 %v247_v15, 0.0  ;;  %v312_v24 = vmax.f32 %v248_v16, 0.0  ;;  %v250_v27 = vadd.f32 %v474_v44, %v180_v18 }
  0x55   :  { %v313_v25 = vmax.f32 %v249_v17, 0.0  ;;  %v251_v28 = vadd.f32 %v474_v44, %v181_v19  ;;  %373 = vst.msk [vmem:[%s1007_s4 + $0x1c0] sm:$0xff] %vm316_vm0, %v308_v20  ;;  %374 = vst.msk [vmem:[%s1007_s4 + $0x1c8] sm:$0xff] %vm316_vm0, %v309_v21 }
  0x56   :  { %375 = vst.msk [vmem:[%s1007_s4 + $0x1d0] sm:$0xff] %vm316_vm0, %v310_v22  ;;  %376 = vst.msk [vmem:[%s1007_s4 + $0x1d8] sm:$0xff] %vm316_vm0, %v311_v23  ;;  %v314_v26 = vmax.f32 %v250_v27, 0.0 }
  0x57   :  { %377 = vst.msk [vmem:[%s1007_s4 + $0x1e0] sm:$0xff] %vm316_vm0, %v312_v24  ;;  %378 = vst.msk [vmem:[%s1007_s4 + $0x1e8] sm:$0xff] %vm316_vm0, %v313_v25  ;;  %v315_v44 = vmax.f32 %v251_v28, 0.0 }
  0x58   :  { %379 = vst.msk [vmem:[%s1007_s4 + $0x1f0] sm:$0xff] %vm316_vm0, %v314_v26 }
  0x59   :  { %380 = vst.msk [vmem:[%s1007_s4 + $0x1f8] sm:$0xff] %vm316_vm0, %v315_v44 }

// kernel: resnet_shard1_forward.73
= control target key start
LH: loop header
LB: loop body
LE: loop exit
PB: predicated region body
PF: predicated region fallthrough
CT: control target
= control target key end

     0   :  { %s997_s9 = smov 0   ;;  %s999_s10 = smov 0   ;;  %s1183_s0 = inlined_call_operand.vmem [shape: bf16[512,147], index: 0, kind: input, shape index: {}]   ;;  %s1184_s1 = inlined_call_operand.vmem [shape: bf16[147,64], index: 1, kind: input, shape index: {}]   ;;  %s1185_s2 = inlined_call_operand.vmem [shape: f32[512,64], index: 2, kind: output, shape index: {}]  }
   0x1   :  { %s1001_s11 = smov 0  }
   0x2 LB: > { %s24_s12 = sadd.s32 1, %s974_s10  ;;  %p785_p0 = scmp.ge.s32.totalorder %s978_s11, 1  ;;  %s978_s11 = sphi %s1001_s11, %s12_s11   ;;  %s974_s10 = sphi %s999_s10, %s1187_s10   ;;  %s970_s9 = sphi %s997_s9, %s1186_s9  }
   0x3   : > { %p26_p1 = scmp.ge.s32.totalorder %s24_s12, 2  ;;  %p137_p2 = scmp.lt.s32.totalorder %s978_s11, 3 }
   0x5   : > { %s1189_s12 = smov (%p26_p1, %s24_s12), 0  ;;  %p138_p3 = pnand %p785_p0, %p137_p2 }
   0x6   : > { %s786_s19 = sshll.u32 (!%p138_p3), %s970_s9, 5 }
   0x7   : > { %141 = sbr.rel (%p138_p3) target bundleno = 308 (0x134), region = 28  ;;  %p168_p4 = scmp.lt.s32.totalorder (!%p138_p3), %s786_s19, 63 }
   0xc   : > { %v898_v0 = vld [vmem:[%s1184_s1 + $0x38] sm:$0xff]   ;;  %v980_v1 = vmov 0   ;;  %v899_v2 = vld [vmem:[%s1184_s1 + $0x30] sm:$0xff]   ;;  %v900_v3 = vld [vmem:[%s1184_s1 + $0x28] sm:$0xff]   ;;  %s1191_s19 = smov (!%p168_p4, %s786_s19), 63  ;;  %vm440_vm0 = vcmask 154624  }
   0xd   : > { %496 = vmatprep.subr.bf16.mxu0 %v980_v1  ;;  %852 = vmatprep.subr.bf16.mxu1 %v980_v1  ;;  %v901_v4 = vld [vmem:[%s1184_s1 + $0x20] sm:$0xff]   ;;  %s851_s22 = sshll.u32 %s1191_s19, 3  ;;  %v902_v5 = vld [vmem:[%s1184_s1 + $0x18] sm:$0xff]   ;;  %v903_v8 = vld [vmem:[%s1184_s1 + $0x10] sm:$0xff]   ;;  %vm489_vm1 = vcmask 1040384   ;;  %vm490_vm2 = vcmask 1041408  }
   0xe   : > { %497 = vmatpush1.bf16.msra.mxu0 %v898_v0  ;;  %862 = vmatpush1.bf16.msra.mxu1 %v898_v0  ;;  %s1035_s25 = scalar_lea.vmem %s1183_s0, %s851_s22  ;;  %v904_v9 = vld [vmem:[%s1184_s1 + $0x8] sm:$0xff]   ;;  %v981_v10 = vmov 65535   ;;  %v905_v12 = vld [vmem:[%s1184_s1] sm:$0xff]   ;;  %s1108_s15 = scalar_lea.vmem %s1185_s2, %s851_s22  ;;  %vm657_vm3 = vcmask 523264  }
   0xf   : > { %498 = vmatprep.subr.bf16.mxu0 %v980_v1  ;;  %853 = vmatprep.subr.bf16.mxu1 %v980_v1  ;;  %v910_v6 = vld [vmem:[%s1035_s25 + $0x4] ss:$8 sps:$4 sm:$0xff]   ;;  %v491_v11 = vsel %vm489_vm1, 4294967295, %v981_v10  ;;  %v906_v13 = vld [vmem:[%s1184_s1 + $0x48] ss:$0 sps:$4 sm:$0x33]  }
  0x10   : > { %v913_v7 = vld [vmem:[%s1035_s25 + $0x84] ss:$8 sps:$4 sm:$0xff]   ;;  %833 = vmatprep.mubr.msk.bf16.mxu0 %vm440_vm0, %v910_v6  ;;  %v492_v14 = vsel %vm490_vm2, %v491_v11, 0  ;;  %v908_v17 = vld [vmem:[%s1035_s25] ss:$8 sps:$4 sm:$0xff]  }
  0x11   : > { %841 = vmatprep.mubr.msk.bf16.mxu1 %vm440_vm0, %v913_v7  ;;  %v494_v15 = vand.u32 %v906_v13, %v492_v14  ;;  %v907_v16 = vld [vmem:[%s1184_s1 + $0x40] sm:$0xff]   ;;  %v914_v19 = vld [vmem:[%s1035_s25 + $0x14] ss:$8 sps:$4 sm:$0xff]   ;;  %v918_v21 = vld [vmem:[%s1035_s25 + $0x10] ss:$8 sps:$4 sm:$0xff]  }
  0x12   : > { %499 = vmatpush1.bf16.msra.mxu0 %v899_v2  ;;  %863 = vmatpush1.bf16.msra.mxu1 %v899_v2  ;;  %v911_v18 = vld [vmem:[%s1035_s25 + $0x80] ss:$8 sps:$4 sm:$0xff]   ;;  %v916_v20 = vld [vmem:[%s1035_s25 + $0x94] ss:$8 sps:$4 sm:$0xff]   ;;  %v919_v22 = vld [vmem:[%s1035_s25 + $0x90] ss:$8 sps:$4 sm:$0xff]  }
  0x13   : > { %500 = vmatprep.subr.bf16.mxu0 %v980_v1  ;;  %854 = vmatprep.subr.bf16.mxu1 %v980_v1  ;;  %v920_v23 = vld [vmem:[%s1035_s25 + $0x24] ss:$8 sps:$4 sm:$0xff]   ;;  %v924_v25 = vld [vmem:[%s1035_s25 + $0x20] ss:$8 sps:$4 sm:$0xff]   ;;  %v926_v27 = vld [vmem:[%s1035_s25 + $0x34] ss:$8 sps:$4 sm:$0xff]  }
  0x14   : > { %v922_v24 = vld [vmem:[%s1035_s25 + $0xa4] ss:$8 sps:$4 sm:$0xff]   ;;  %v925_v26 = vld [vmem:[%s1035_s25 + $0xa0] ss:$8 sps:$4 sm:$0xff]   ;;  %v928_v28 = vld [vmem:[%s1035_s25 + $0xb4] ss:$8 sps:$4 sm:$0xff]  }
  0x15   : > { %v930_v29 = vld [vmem:[%s1035_s25 + $0x30] ss:$8 sps:$4 sm:$0xff]   ;;  %v932_v31 = vld [vmem:[%s1035_s25 + $0x44] ss:$8 sps:$4 sm:$0xff]   ;;  %v936_v33 = vld [vmem:[%s1035_s25 + $0x40] ss:$8 sps:$4 sm:$0xff]  }
  0x16   : > { %501 = vmatpush1.bf16.msra.mxu0 %v900_v3  ;;  %864 = vmatpush1.bf16.msra.mxu1 %v900_v3  ;;  %v931_v30 = vld [vmem:[%s1035_s25 + $0xb0] ss:$8 sps:$4 sm:$0xff]   ;;  %v934_v32 = vld [vmem:[%s1035_s25 + $0xc4] ss:$8 sps:$4 sm:$0xff]   ;;  %v937_v34 = vld [vmem:[%s1035_s25 + $0xc0] ss:$8 sps:$4 sm:$0xff]  }
  0x17   : > { %502 = vmatprep.subr.bf16.mxu0 %v980_v1  ;;  %855 = vmatprep.subr.bf16.mxu1 %v980_v1  ;;  %v938_v35 = vld [vmem:[%s1035_s25 + $0x54] ss:$8 sps:$4 sm:$0xff]   ;;  %v942_v37 = vld [vmem:[%s1035_s25 + $0x50] ss:$8 sps:$4 sm:$0xff]   ;;  %v944_v39 = vld [vmem:[%s1035_s25 + $0x64] ss:$8 sps:$4 sm:$0xff]  }
  0x18   : > { %v940_v36 = vld [vmem:[%s1035_s25 + $0xd4] ss:$8 sps:$4 sm:$0xff]   ;;  %v943_v38 = vld [vmem:[%s1035_s25 + $0xd0] ss:$8 sps:$4 sm:$0xff]   ;;  %v946_v40 = vld [vmem:[%s1035_s25 + $0xe4] ss:$8 sps:$4 sm:$0xff]  }
  0x19   : > { %v948_v41 = vld [vmem:[%s1035_s25 + $0x60] ss:$8 sps:$4 sm:$0xff]   ;;  %v950_v43 = vld [vmem:[%s1035_s25 + $0x74] ss:$8 sps:$4 sm:$0xff]   ;;  %v954_v45 = vld [vmem:[%s1035_s25 + $0x70] ss:$8 sps:$4 sm:$0xff]  }
  0x1a   : > { %503 = vmatpush1.bf16.msra.mxu0 %v901_v4  ;;  %865 = vmatpush1.bf16.msra.mxu1 %v901_v4  ;;  %v949_v42 = vld [vmem:[%s1035_s25 + $0xe0] ss:$8 sps:$4 sm:$0xff]   ;;  %v952_v44 = vld [vmem:[%s1035_s25 + $0xf4] ss:$8 sps:$4 sm:$0xff]   ;;  %v955_v46 = vld [vmem:[%s1035_s25 + $0xf0] ss:$8 sps:$4 sm:$0xff]  }
  0x1b   : > { %504 = vmatprep.subr.bf16.mxu0 %v980_v1  ;;  %856 = vmatprep.subr.bf16.mxu1 %v980_v1 }
  0x1e   : > { %505 = vmatpush1.bf16.msra.mxu0 %v902_v5  ;;  %866 = vmatpush1.bf16.msra.mxu1 %v902_v5 }
  0x1f   : > { %506 = vmatprep.subr.bf16.mxu0 %v980_v1  ;;  %857 = vmatprep.subr.bf16.mxu1 %v980_v1 }
  0x22   : > { %507 = vmatpush1.bf16.msra.mxu0 %v903_v8  ;;  %867 = vmatpush1.bf16.msra.mxu1 %v903_v8 }
  0x23   : > { %508 = vmatprep.subr.bf16.mxu0 %v980_v1  ;;  %858 = vmatprep.subr.bf16.mxu1 %v980_v1 }
  0x26   : > { %509 = vmatpush1.bf16.msra.mxu0 %v904_v9  ;;  %868 = vmatpush1.bf16.msra.mxu1 %v904_v9 }
  0x27   : > { %510 = vmatprep.subr.bf16.mxu0 %v980_v1  ;;  %859 = vmatprep.subr.bf16.mxu1 %v980_v1 }
  0x2a   : > { %511 = vmatpush1.bf16.msra.mxu0 %v905_v12  ;;  %869 = vmatpush1.bf16.msra.mxu1 %v905_v12 }
  0x2b   : > { %524 = vmatprep.subr.bf16.mxu0 %v980_v1  ;;  %860 = vmatprep.subr.bf16.mxu1 %v980_v1 }
  0x2e   : > { %525 = vmatpush2.bf16.msra.mxu0 %v494_v15  ;;  %870 = vmatpush2.bf16.msra.mxu1 %v494_v15 }
  0x2f   : > { %526 = vmatprep.subr.bf16.mxu0 %v980_v1  ;;  %861 = vmatprep.subr.bf16.mxu1 %v980_v1 }
  0x32   : > { %527 = vmatpush2.bf16.msra.mxu0 %v907_v16  ;;  %871 = vmatpush2.bf16.msra.mxu1 %v907_v16 }
  0x35   : > { %529 = vmatmul.mubr.bf16.vlgmr.msra.gmra.mxu0 %v908_v17  ;;  %593 = vmatmul.mubr.bf16.vlgmr.msra.gmra.mxu1 %v911_v18 }
  0x36   : > { %834 = vmatprep.mubr.msk.bf16.mxu0 %vm440_vm0, %v914_v19  ;;  %842 = vmatprep.mubr.msk.bf16.mxu1 %vm440_vm0, %v916_v20 }
  0x3d   : > { %537 = vmatmul.mubr.bf16.gmra.mxu0 %v918_v21  ;;  %601 = vmatmul.mubr.bf16.gmra.mxu1 %v919_v22 }
  0x3e   : > { %835 = vmatprep.mubr.msk.bf16.mxu0 %vm440_vm0, %v920_v23  ;;  %843 = vmatprep.mubr.msk.bf16.mxu1 %vm440_vm0, %v922_v24 }
  0x45   : > { %545 = vmatmul.mubr.bf16.gmra.mxu0 %v924_v25  ;;  %609 = vmatmul.mubr.bf16.gmra.mxu1 %v925_v26 }
  0x46   : > { %836 = vmatprep.mubr.msk.bf16.mxu0 %vm440_vm0, %v926_v27  ;;  %844 = vmatprep.mubr.msk.bf16.mxu1 %vm440_vm0, %v928_v28 }
  0x4d   : > { %553 = vmatmul.mubr.bf16.gmra.mxu0 %v930_v29  ;;  %617 = vmatmul.mubr.bf16.gmra.mxu1 %v931_v30 }
  0x4e   : > { %837 = vmatprep.mubr.msk.bf16.mxu0 %vm440_vm0, %v932_v31  ;;  %845 = vmatprep.mubr.msk.bf16.mxu1 %vm440_vm0, %v934_v32 }
  0x55   : > { %561 = vmatmul.mubr.bf16.gmra.mxu0 %v936_v33  ;;  %625 = vmatmul.mubr.bf16.gmra.mxu1 %v937_v34 }
  0x56   : > { %838 = vmatprep.mubr.msk.bf16.mxu0 %vm440_vm0, %v938_v35  ;;  %846 = vmatprep.mubr.msk.bf16.mxu1 %vm440_vm0, %v940_v36 }
  0x5d   : > { %569 = vmatmul.mubr.bf16.gmra.mxu0 %v942_v37  ;;  %633 = vmatmul.mubr.bf16.gmra.mxu1 %v943_v38 }
  0x5e   : > { %839 = vmatprep.mubr.msk.bf16.mxu0 %vm440_vm0, %v944_v39  ;;  %847 = vmatprep.mubr.msk.bf16.mxu1 %vm440_vm0, %v946_v40 }
  0x65   : > { %577 = vmatmul.mubr.bf16.gmra.mxu0 %v948_v41  ;;  %641 = vmatmul.mubr.bf16.gmra.mxu1 %v949_v42 }
  0x66   : > { %840 = vmatprep.mubr.msk.bf16.mxu0 %vm440_vm0, %v950_v43  ;;  %848 = vmatprep.mubr.msk.bf16.mxu1 %vm440_vm0, %v952_v44 }
  0x6d   : > { %585 = vmatmul.mubr.bf16.gmra.mxu0 %v954_v45  ;;  %649 = vmatmul.mubr.bf16.gmra.mxu1 %v955_v46 }
  0xf5   : > { %v530_v47 = vpop.f32.mrf.mxu0  ;;  %v594_v48 = vpop.f32.mrf.mxu1 }
  0xf6   : > { %658 = vst.msk [vmem:[%s1108_s15] sm:$0xff] %vm657_vm3, %v530_v47  ;;  %674 = vst.msk [vmem:[%s1108_s15 + $0x80] sm:$0xff] %vm657_vm3, %v594_v48 }
  0xf7   : > { %v532_v49 = vpop.f32.mrf.mxu0  ;;  %v596_v50 = vpop.f32.mrf.mxu1 }
  0xf9   : > { %v533_v51 = vpop.f32.mrf.mxu0  ;;  %v597_v52 = vpop.f32.mrf.mxu1 }
  0xfa   : > { %659 = vst.msk [vmem:[%s1108_s15 + $0x8] sm:$0xff] %vm657_vm3, %v533_v51  ;;  %675 = vst.msk [vmem:[%s1108_s15 + $0x88] sm:$0xff] %vm657_vm3, %v597_v52 }
  0xfb   : > { %v535_v53 = vpop.f32.mrf.mxu0  ;;  %v599_v54 = vpop.f32.mrf.mxu1 }
  0xfd   : > { %v538_v55 = vpop.f32.mrf.mxu0  ;;  %v602_v56 = vpop.f32.mrf.mxu1 }
  0xfe   : > { %660 = vst.msk [vmem:[%s1108_s15 + $0x10] sm:$0xff] %vm657_vm3, %v538_v55  ;;  %676 = vst.msk [vmem:[%s1108_s15 + $0x90] sm:$0xff] %vm657_vm3, %v602_v56 }
  0xff   : > { %v540_v57 = vpop.f32.mrf.mxu0  ;;  %v604_v58 = vpop.f32.mrf.mxu1 }
 0x101   : > { %v541_v59 = vpop.f32.mrf.mxu0  ;;  %v605_v60 = vpop.f32.mrf.mxu1 }
 0x102   : > { %661 = vst.msk [vmem:[%s1108_s15 + $0x18] sm:$0xff] %vm657_vm3, %v541_v59  ;;  %677 = vst.msk [vmem:[%s1108_s15 + $0x98] sm:$0xff] %vm657_vm3, %v605_v60 }
 0x103   : > { %v543_v61 = vpop.f32.mrf.mxu0  ;;  %v607_v62 = vpop.f32.mrf.mxu1 }
 0x105   : > { %v546_v63 = vpop.f32.mrf.mxu0  ;;  %v610_v0 = vpop.f32.mrf.mxu1 }
 0x106   : > { %662 = vst.msk [vmem:[%s1108_s15 + $0x20] sm:$0xff] %vm657_vm3, %v546_v63  ;;  %678 = vst.msk [vmem:[%s1108_s15 + $0xa0] sm:$0xff] %vm657_vm3, %v610_v0 }
 0x107   : > { %v548_v1 = vpop.f32.mrf.mxu0  ;;  %v612_v2 = vpop.f32.mrf.mxu1 }
 0x109   : > { %v549_v3 = vpop.f32.mrf.mxu0  ;;  %v613_v4 = vpop.f32.mrf.mxu1 }
 0x10a   : > { %663 = vst.msk [vmem:[%s1108_s15 + $0x28] sm:$0xff] %vm657_vm3, %v549_v3  ;;  %679 = vst.msk [vmem:[%s1108_s15 + $0xa8] sm:$0xff] %vm657_vm3, %v613_v4 }
 0x10b   : > { %v551_v5 = vpop.f32.mrf.mxu0  ;;  %v615_v6 = vpop.f32.mrf.mxu1 }
 0x10d   : > { %v554_v7 = vpop.f32.mrf.mxu0  ;;  %v618_v8 = vpop.f32.mrf.mxu1 }
 0x10e   : > { %664 = vst.msk [vmem:[%s1108_s15 + $0x30] sm:$0xff] %vm657_vm3, %v554_v7  ;;  %680 = vst.msk [vmem:[%s1108_s15 + $0xb0] sm:$0xff] %vm657_vm3, %v618_v8 }
 0x10f   : > { %v556_v9 = vpop.f32.mrf.mxu0  ;;  %v620_v10 = vpop.f32.mrf.mxu1 }
 0x111   : > { %v557_v11 = vpop.f32.mrf.mxu0  ;;  %v621_v12 = vpop.f32.mrf.mxu1 }
 0x112   : > { %665 = vst.msk [vmem:[%s1108_s15 + $0x38] sm:$0xff] %vm657_vm3, %v557_v11  ;;  %681 = vst.msk [vmem:[%s1108_s15 + $0xb8] sm:$0xff] %vm657_vm3, %v621_v12 }
 0x113   : > { %v559_v13 = vpop.f32.mrf.mxu0  ;;  %v623_v14 = vpop.f32.mrf.mxu1 }
 0x115   : > { %v562_v15 = vpop.f32.mrf.mxu0  ;;  %v626_v16 = vpop.f32.mrf.mxu1 }
 0x116   : > { %666 = vst.msk [vmem:[%s1108_s15 + $0x40] sm:$0xff] %vm657_vm3, %v562_v15  ;;  %682 = vst.msk [vmem:[%s1108_s15 + $0xc0] sm:$0xff] %vm657_vm3, %v626_v16 }
 0x117   : > { %v564_v17 = vpop.f32.mrf.mxu0  ;;  %v628_v18 = vpop.f32.mrf.mxu1 }
 0x119   : > { %v565_v19 = vpop.f32.mrf.mxu0  ;;  %v629_v20 = vpop.f32.mrf.mxu1 }
 0x11a   : > { %667 = vst.msk [vmem:[%s1108_s15 + $0x48] sm:$0xff] %vm657_vm3, %v565_v19  ;;  %683 = vst.msk [vmem:[%s1108_s15 + $0xc8] sm:$0xff] %vm657_vm3, %v629_v20 }
 0x11b   : > { %v567_v21 = vpop.f32.mrf.mxu0  ;;  %v631_v22 = vpop.f32.mrf.mxu1 }
 0x11d   : > { %v570_v23 = vpop.f32.mrf.mxu0  ;;  %v634_v24 = vpop.f32.mrf.mxu1 }
 0x11e   : > { %668 = vst.msk [vmem:[%s1108_s15 + $0x50] sm:$0xff] %vm657_vm3, %v570_v23  ;;  %684 = vst.msk [vmem:[%s1108_s15 + $0xd0] sm:$0xff] %vm657_vm3, %v634_v24 }
 0x11f   : > { %v572_v25 = vpop.f32.mrf.mxu0  ;;  %v636_v26 = vpop.f32.mrf.mxu1 }
 0x121   : > { %v573_v27 = vpop.f32.mrf.mxu0  ;;  %v637_v28 = vpop.f32.mrf.mxu1 }
 0x122   : > { %669 = vst.msk [vmem:[%s1108_s15 + $0x58] sm:$0xff] %vm657_vm3, %v573_v27  ;;  %685 = vst.msk [vmem:[%s1108_s15 + $0xd8] sm:$0xff] %vm657_vm3, %v637_v28 }
 0x123   : > { %v575_v29 = vpop.f32.mrf.mxu0  ;;  %v639_v30 = vpop.f32.mrf.mxu1 }
 0x125   : > { %v578_v31 = vpop.f32.mrf.mxu0  ;;  %v642_v32 = vpop.f32.mrf.mxu1 }
 0x126   : > { %670 = vst.msk [vmem:[%s1108_s15 + $0x60] sm:$0xff] %vm657_vm3, %v578_v31  ;;  %686 = vst.msk [vmem:[%s1108_s15 + $0xe0] sm:$0xff] %vm657_vm3, %v642_v32 }
 0x127   : > { %v580_v33 = vpop.f32.mrf.mxu0  ;;  %v644_v34 = vpop.f32.mrf.mxu1 }
 0x129   : > { %v581_v35 = vpop.f32.mrf.mxu0  ;;  %v645_v36 = vpop.f32.mrf.mxu1 }
 0x12a   : > { %671 = vst.msk [vmem:[%s1108_s15 + $0x68] sm:$0xff] %vm657_vm3, %v581_v35  ;;  %687 = vst.msk [vmem:[%s1108_s15 + $0xe8] sm:$0xff] %vm657_vm3, %v645_v36 }
 0x12b   : > { %v583_v37 = vpop.f32.mrf.mxu0  ;;  %v647_v38 = vpop.f32.mrf.mxu1 }
 0x12d   : > { %v586_v39 = vpop.f32.mrf.mxu0  ;;  %v650_v40 = vpop.f32.mrf.mxu1 }
 0x12e   : > { %672 = vst.msk [vmem:[%s1108_s15 + $0x70] sm:$0xff] %vm657_vm3, %v586_v39  ;;  %688 = vst.msk [vmem:[%s1108_s15 + $0xf0] sm:$0xff] %vm657_vm3, %v650_v40 }
 0x12f   : > { %v588_v41 = vpop.f32.mrf.mxu0  ;;  %v652_v42 = vpop.f32.mrf.mxu1 }
 0x131   : > { %v589_v43 = vpop.f32.mrf.mxu0  ;;  %v653_v44 = vpop.f32.mrf.mxu1 }
 0x132   : > { %673 = vst.msk [vmem:[%s1108_s15 + $0x78] sm:$0xff] %vm657_vm3, %v589_v43  ;;  %689 = vst.msk [vmem:[%s1108_s15 + $0xf8] sm:$0xff] %vm657_vm3, %v653_v44 }
 0x133   : > { %v591_v45 = vpop.f32.mrf.mxu0  ;;  %v655_v46 = vpop.f32.mrf.mxu1 }
 0x134 PF: > { %s12_s11 = sadd.s32 1, %s978_s11   ;;  %s1186_s9 = smov %s974_s10 }
 0x135   : > { %p9_p5 = scmp.ge.s32.totalorder %s12_s11, 4   ;;  %s1187_s10 = smov %s1189_s12 }
 0x137   :  { %11 = sbr.rel (!%p9_p5) target bundleno = 2 (0x2), region = 61 }

// kernel: resnet_shard1_forward.76
= control target key start
LH: loop header
LB: loop body
LE: loop exit
PB: predicated region body
PF: predicated region fallthrough
CT: control target
= control target key end

     0   :  { %vm304_vm0 = vcmask 523264   ;;  %s871_s0 = inlined_call_operand.vmem [shape: f32[128,64], index: 0, kind: input, shape index: {}]   ;;  %s872_s1 = inlined_call_operand.vmem [shape: f32[128,64], index: 1, kind: input, shape index: {}]   ;;  %s873_s2 = inlined_call_operand.vmem [shape: f32[128,64], index: 2, kind: input, shape index: {}]   ;;  %s874_s3 = inlined_call_operand.vmem [shape: f32[128,64], index: 3, kind: input, shape index: {}]   ;;  %s875_s4 = inlined_call_operand.vmem [shape: f32[128,64], index: 4, kind: input, shape index: {}]   ;;  %s876_s5 = inlined_call_operand.vmem [shape: f32[128,64], index: 5, kind: input, shape index: {}]   ;;  %s877_s6 = inlined_call_operand.vmem [shape: f32[128,64], index: 6, kind: input, shape index: {}]   ;;  %s878_s7 = inlined_call_operand.vmem [shape: f32[128,64], index: 7, kind: input, shape index: {}]   ;;  %s879_s8 = inlined_call_operand.vmem [shape: f32[128,64], index: 8, kind: input, shape index: {}]   ;;  %s880_s9 = inlined_call_operand.vmem [shape: f32[128,64], index: 9, kind: output, shape index: {}]  }
   0x1   :  { %v32_v0 = vld [vmem:[%s871_s0] sm:$0xff]  ;;  %v33_v6 = vld [vmem:[%s871_s0 + $0x8] sm:$0xff]  ;;  %v34_v15 = vld [vmem:[%s871_s0 + $0x10] sm:$0xff] }
   0x2   :  { %v48_v1 = vld [vmem:[%s872_s1] sm:$0xff]  ;;  %v49_v7 = vld [vmem:[%s872_s1 + $0x8] sm:$0xff]  ;;  %v50_v16 = vld [vmem:[%s872_s1 + $0x10] sm:$0xff] }
   0x3   :  { %v80_v2 = vld [vmem:[%s873_s2] sm:$0xff]  ;;  %v64_v3 = vmax.f32 %v32_v0, %v48_v1  ;;  %v81_v8 = vld [vmem:[%s873_s2 + $0x8] sm:$0xff]  ;;  %v65_v10 = vmax.f32 %v33_v6, %v49_v7  ;;  %v82_v17 = vld [vmem:[%s873_s2 + $0x10] sm:$0xff]  ;;  %v66_v20 = vmax.f32 %v34_v15, %v50_v16 }
   0x4   :  { %v112_v4 = vld [vmem:[%s874_s3] sm:$0xff]  ;;  %v113_v13 = vld [vmem:[%s874_s3 + $0x8] sm:$0xff]  ;;  %v114_v24 = vld [vmem:[%s874_s3 + $0x10] sm:$0xff] }
   0x5   :  { %v96_v5 = vmax.f32 %v64_v3, %v80_v2  ;;  %v144_v9 = vld [vmem:[%s875_s4] sm:$0xff]  ;;  %v97_v14 = vmax.f32 %v65_v10, %v81_v8  ;;  %v145_v19 = vld [vmem:[%s875_s4 + $0x8] sm:$0xff]  ;;  %v98_v26 = vmax.f32 %v66_v20, %v82_v17  ;;  %v35_v27 = vld [vmem:[%s871_s0 + $0x18] sm:$0xff] }
   0x6   :  { %v176_v12 = vld [vmem:[%s876_s5] sm:$0xff]  ;;  %v177_v23 = vld [vmem:[%s876_s5 + $0x8] sm:$0xff]  ;;  %v51_v28 = vld [vmem:[%s872_s1 + $0x18] sm:$0xff] }
   0x7   :  { %v128_v11 = vmax.f32 %v96_v5, %v112_v4  ;;  %v208_v21 = vld [vmem:[%s877_s6] sm:$0xff]  ;;  %v129_v22 = vmax.f32 %v97_v14, %v113_v13  ;;  %v83_v29 = vld [vmem:[%s873_s2 + $0x18] sm:$0xff]  ;;  %v146_v33 = vld [vmem:[%s875_s4 + $0x10] sm:$0xff]  ;;  %v67_v34 = vmax.f32 %v35_v27, %v51_v28  ;;  %v130_v37 = vmax.f32 %v98_v26, %v114_v24 }
   0x8   :  { %v240_v30 = vld [vmem:[%s878_s7] sm:$0xff]  ;;  %v209_v36 = vld [vmem:[%s877_s6 + $0x8] sm:$0xff]  ;;  %v178_v38 = vld [vmem:[%s876_s5 + $0x10] sm:$0xff] }
   0x9   :  { %v160_v18 = vmax.f32 %v128_v11, %v144_v9  ;;  %v272_v31 = vld [vmem:[%s879_s8] sm:$0xff]  ;;  %v161_v32 = vmax.f32 %v129_v22, %v145_v19  ;;  %v115_v39 = vld [vmem:[%s874_s3 + $0x18] sm:$0xff]  ;;  %v99_v41 = vmax.f32 %v67_v34, %v83_v29  ;;  %v241_v46 = vld [vmem:[%s878_s7 + $0x8] sm:$0xff]  ;;  %v162_v48 = vmax.f32 %v130_v37, %v146_v33 }
   0xa   :  { %v36_v42 = vld [vmem:[%s871_s0 + $0x20] sm:$0xff]  ;;  %v273_v47 = vld [vmem:[%s879_s8 + $0x8] sm:$0xff]  ;;  %v147_v49 = vld [vmem:[%s875_s4 + $0x18] sm:$0xff] }
   0xb   :  { %v192_v25 = vmax.f32 %v160_v18, %v176_v12  ;;  %v193_v40 = vmax.f32 %v161_v32, %v177_v23  ;;  %v52_v43 = vld [vmem:[%s872_s1 + $0x20] sm:$0xff]  ;;  %v210_v52 = vld [vmem:[%s877_s6 + $0x10] sm:$0xff]  ;;  %v131_v53 = vmax.f32 %v99_v41, %v115_v39  ;;  %v179_v54 = vld [vmem:[%s876_s5 + $0x18] sm:$0xff]  ;;  %v194_v57 = vmax.f32 %v162_v48, %v178_v38 }
   0xc   :  { %v84_v44 = vld [vmem:[%s873_s2 + $0x20] sm:$0xff]  ;;  %v68_v50 = vmax.f32 %v36_v42, %v52_v43  ;;  %v37_v59 = vld [vmem:[%s871_s0 + $0x28] sm:$0xff]  ;;  %v242_v63 = vld [vmem:[%s878_s7 + $0x10] sm:$0xff] }
   0xd   :  { %v224_v35 = vmax.f32 %v192_v25, %v208_v21  ;;  %v225_v51 = vmax.f32 %v193_v40, %v209_v36  ;;  %v116_v55 = vld [vmem:[%s874_s3 + $0x20] sm:$0xff]  ;;  %v53_v60 = vld [vmem:[%s872_s1 + $0x28] sm:$0xff]  ;;  %v274_v0 = vld [vmem:[%s879_s8 + $0x10] sm:$0xff]  ;;  %v163_v1 = vmax.f32 %v131_v53, %v147_v49  ;;  %v226_v4 = vmax.f32 %v194_v57, %v210_v52 }
   0xe   :  { %v100_v58 = vmax.f32 %v68_v50, %v84_v44  ;;  %v85_v61 = vld [vmem:[%s873_s2 + $0x28] sm:$0xff]  ;;  %v148_v2 = vld [vmem:[%s875_s4 + $0x20] sm:$0xff]  ;;  %v69_v3 = vmax.f32 %v37_v59, %v53_v60  ;;  %v211_v5 = vld [vmem:[%s877_s6 + $0x18] sm:$0xff] }
   0xf   :  { %v256_v45 = vmax.f32 %v224_v35, %v240_v30  ;;  %v257_v62 = vmax.f32 %v225_v51, %v241_v46  ;;  %v180_v7 = vld [vmem:[%s876_s5 + $0x20] sm:$0xff]  ;;  %v117_v8 = vld [vmem:[%s874_s3 + $0x28] sm:$0xff]  ;;  %v195_v10 = vmax.f32 %v163_v1, %v179_v54  ;;  %v38_v12 = vld [vmem:[%s871_s0 + $0x30] sm:$0xff]  ;;  %v258_v15 = vmax.f32 %v226_v4, %v242_v63 }
  0x10   :  { %v132_v6 = vmax.f32 %v100_v58, %v116_v55  ;;  %v101_v11 = vmax.f32 %v69_v3, %v85_v61  ;;  %v54_v13 = vld [vmem:[%s872_s1 + $0x30] sm:$0xff]  ;;  %v243_v16 = vld [vmem:[%s878_s7 + $0x18] sm:$0xff]  ;;  %v149_v19 = vld [vmem:[%s875_s4 + $0x28] sm:$0xff] }
  0x11   :  { %v288_v56 = vmax.f32 %v256_v45, %v272_v31  ;;  %v289_v9 = vmax.f32 %v257_v62, %v273_v47  ;;  %v86_v14 = vld [vmem:[%s873_s2 + $0x30] sm:$0xff]  ;;  %v275_v17 = vld [vmem:[%s879_s8 + $0x18] sm:$0xff]  ;;  %v70_v20 = vmax.f32 %v38_v12, %v54_v13  ;;  %v227_v21 = vmax.f32 %v195_v10, %v211_v5  ;;  %v212_v22 = vld [vmem:[%s877_s6 + $0x20] sm:$0xff] }
  0x12   :  { %v164_v18 = vmax.f32 %v132_v6, %v148_v2  ;;  %v133_v23 = vmax.f32 %v101_v11, %v117_v8  ;;  %v181_v24 = vld [vmem:[%s876_s5 + $0x28] sm:$0xff]  ;;  %v118_v25 = vld [vmem:[%s874_s3 + $0x30] sm:$0xff]  ;;  %v290_v26 = vmax.f32 %v258_v15, %v274_v0  ;;  %v39_v29 = vld [vmem:[%s871_s0 + $0x38] sm:$0xff] }
  0x13   :  { %305 = vst.msk [vmem:[%s880_s9] sm:$0xff] %vm304_vm0, %v288_v56  ;;  %306 = vst.msk [vmem:[%s880_s9 + $0x8] sm:$0xff] %vm304_vm0, %v289_v9  ;;  %v102_v28 = vmax.f32 %v70_v20, %v86_v14  ;;  %v55_v30 = vld [vmem:[%s872_s1 + $0x38] sm:$0xff]  ;;  %v259_v32 = vmax.f32 %v227_v21, %v243_v16  ;;  %v244_v33 = vld [vmem:[%s878_s7 + $0x20] sm:$0xff] }
  0x14   :  { %v196_v27 = vmax.f32 %v164_v18, %v180_v7  ;;  %v87_v31 = vld [vmem:[%s873_s2 + $0x38] sm:$0xff]  ;;  %v276_v34 = vld [vmem:[%s879_s8 + $0x20] sm:$0xff]  ;;  %v165_v35 = vmax.f32 %v133_v23, %v149_v19  ;;  %v150_v36 = vld [vmem:[%s875_s4 + $0x30] sm:$0xff]  ;;  %v71_v37 = vmax.f32 %v39_v29, %v55_v30  ;;  %307 = vst.msk [vmem:[%s880_s9 + $0x10] sm:$0xff] %vm304_vm0, %v290_v26 }
  0x15   :  { %v213_v39 = vld [vmem:[%s877_s6 + $0x28] sm:$0xff]  ;;  %v134_v40 = vmax.f32 %v102_v28, %v118_v25  ;;  %v182_v41 = vld [vmem:[%s876_s5 + $0x30] sm:$0xff]  ;;  %v119_v42 = vld [vmem:[%s874_s3 + $0x38] sm:$0xff]  ;;  %v291_v43 = vmax.f32 %v259_v32, %v275_v17 }
  0x16   :  { %v228_v38 = vmax.f32 %v196_v27, %v212_v22  ;;  %v197_v44 = vmax.f32 %v165_v35, %v181_v24  ;;  %v103_v45 = vmax.f32 %v71_v37, %v87_v31  ;;  %v40_v46 = vld [vmem:[%s871_s0 + $0x40] sm:$0xff]  ;;  %v245_v50 = vld [vmem:[%s878_s7 + $0x28] sm:$0xff]  ;;  %v151_v53 = vld [vmem:[%s875_s4 + $0x38] sm:$0xff] }
  0x17   :  { %v56_v47 = vld [vmem:[%s872_s1 + $0x40] sm:$0xff]  ;;  %v277_v51 = vld [vmem:[%s879_s8 + $0x28] sm:$0xff]  ;;  %v166_v52 = vmax.f32 %v134_v40, %v150_v36  ;;  %308 = vst.msk [vmem:[%s880_s9 + $0x18] sm:$0xff] %vm304_vm0, %v291_v43  ;;  %v214_v56 = vld [vmem:[%s877_s6 + $0x30] sm:$0xff] }
  0x18   :  { %v88_v48 = vld [vmem:[%s873_s2 + $0x40] sm:$0xff]  ;;  %v260_v49 = vmax.f32 %v228_v38, %v244_v33  ;;  %v72_v54 = vmax.f32 %v40_v46, %v56_v47  ;;  %v229_v55 = vmax.f32 %v197_v44, %v213_v39  ;;  %v135_v57 = vmax.f32 %v103_v45, %v119_v42  ;;  %v183_v58 = vld [vmem:[%s876_s5 + $0x38] sm:$0xff]  ;;  %v41_v63 = vld [vmem:[%s871_s0 + $0x48] sm:$0xff] }
  0x19   :  { %v120_v59 = vld [vmem:[%s874_s3 + $0x40] sm:$0xff]  ;;  %v198_v61 = vmax.f32 %v166_v52, %v182_v41  ;;  %v57_v0 = vld [vmem:[%s872_s1 + $0x48] sm:$0xff]  ;;  %v246_v3 = vld [vmem:[%s878_s7 + $0x30] sm:$0xff] }
  0x1a   :  { %v292_v60 = vmax.f32 %v260_v49, %v276_v34  ;;  %v104_v62 = vmax.f32 %v72_v54, %v88_v48  ;;  %v89_v1 = vld [vmem:[%s873_s2 + $0x48] sm:$0xff]  ;;  %v261_v2 = vmax.f32 %v229_v55, %v245_v50  ;;  %v278_v4 = vld [vmem:[%s879_s8 + $0x30] sm:$0xff]  ;;  %v167_v5 = vmax.f32 %v135_v57, %v151_v53  ;;  %v152_v6 = vld [vmem:[%s875_s4 + $0x40] sm:$0xff] }
  0x1b   :  { %v73_v7 = vmax.f32 %v41_v63, %v57_v0  ;;  %v230_v8 = vmax.f32 %v198_v61, %v214_v56  ;;  %v215_v9 = vld [vmem:[%s877_s6 + $0x38] sm:$0xff]  ;;  %v184_v11 = vld [vmem:[%s876_s5 + $0x40] sm:$0xff]  ;;  %v121_v12 = vld [vmem:[%s874_s3 + $0x48] sm:$0xff] }
  0x1c   :  { %309 = vst.msk [vmem:[%s880_s9 + $0x20] sm:$0xff] %vm304_vm0, %v292_v60  ;;  %v136_v10 = vmax.f32 %v104_v62, %v120_v59  ;;  %v293_v13 = vmax.f32 %v261_v2, %v277_v51  ;;  %v199_v14 = vmax.f32 %v167_v5, %v183_v58  ;;  %v42_v16 = vld [vmem:[%s871_s0 + $0x50] sm:$0xff]  ;;  %v247_v20 = vld [vmem:[%s878_s7 + $0x38] sm:$0xff]  ;;  %v153_v23 = vld [vmem:[%s875_s4 + $0x48] sm:$0xff] }
  0x1d   :  { %v105_v15 = vmax.f32 %v73_v7, %v89_v1  ;;  %v58_v17 = vld [vmem:[%s872_s1 + $0x50] sm:$0xff]  ;;  %v262_v19 = vmax.f32 %v230_v8, %v246_v3  ;;  %v279_v21 = vld [vmem:[%s879_s8 + $0x38] sm:$0xff]  ;;  %v216_v26 = vld [vmem:[%s877_s6 + $0x40] sm:$0xff] }
  0x1e   :  { %v90_v18 = vld [vmem:[%s873_s2 + $0x50] sm:$0xff]  ;;  %v168_v22 = vmax.f32 %v136_v10, %v152_v6  ;;  %v74_v24 = vmax.f32 %v42_v16, %v58_v17  ;;  %310 = vst.msk [vmem:[%s880_s9 + $0x28] sm:$0xff] %vm304_vm0, %v293_v13  ;;  %v231_v25 = vmax.f32 %v199_v14, %v215_v9  ;;  %v185_v28 = vld [vmem:[%s876_s5 + $0x48] sm:$0xff]  ;;  %v43_v33 = vld [vmem:[%s871_s0 + $0x58] sm:$0xff] }
  0x1f   :  { %v137_v27 = vmax.f32 %v105_v15, %v121_v12  ;;  %v122_v29 = vld [vmem:[%s874_s3 + $0x50] sm:$0xff]  ;;  %v294_v30 = vmax.f32 %v262_v19, %v278_v4  ;;  %v59_v34 = vld [vmem:[%s872_s1 + $0x58] sm:$0xff]  ;;  %v248_v37 = vld [vmem:[%s878_s7 + $0x40] sm:$0xff] }
  0x20   :  { %v200_v31 = vmax.f32 %v168_v22, %v184_v11  ;;  %v106_v32 = vmax.f32 %v74_v24, %v90_v18  ;;  %v91_v35 = vld [vmem:[%s873_s2 + $0x58] sm:$0xff]  ;;  %v263_v36 = vmax.f32 %v231_v25, %v247_v20  ;;  %v280_v38 = vld [vmem:[%s879_s8 + $0x40] sm:$0xff]  ;;  %v154_v40 = vld [vmem:[%s875_s4 + $0x50] sm:$0xff]  ;;  %v75_v41 = vmax.f32 %v43_v33, %v59_v34 }
  0x21   :  { %v169_v39 = vmax.f32 %v137_v27, %v153_v23  ;;  %311 = vst.msk [vmem:[%s880_s9 + $0x30] sm:$0xff] %vm304_vm0, %v294_v30  ;;  %v217_v43 = vld [vmem:[%s877_s6 + $0x48] sm:$0xff]  ;;  %v186_v45 = vld [vmem:[%s876_s5 + $0x50] sm:$0xff]  ;;  %v123_v46 = vld [vmem:[%s874_s3 + $0x58] sm:$0xff] }
  0x22   :  { %v232_v42 = vmax.f32 %v200_v31, %v216_v26  ;;  %v138_v44 = vmax.f32 %v106_v32, %v122_v29  ;;  %v295_v47 = vmax.f32 %v263_v36, %v279_v21  ;;  %v107_v49 = vmax.f32 %v75_v41, %v91_v35  ;;  %v44_v50 = vld [vmem:[%s871_s0 + $0x60] sm:$0xff]  ;;  %v249_v54 = vld [vmem:[%s878_s7 + $0x48] sm:$0xff]  ;;  %v155_v57 = vld [vmem:[%s875_s4 + $0x58] sm:$0xff] }
  0x23   :  { %v201_v48 = vmax.f32 %v169_v39, %v185_v28  ;;  %v60_v51 = vld [vmem:[%s872_s1 + $0x60] sm:$0xff]  ;;  %v281_v55 = vld [vmem:[%s879_s8 + $0x48] sm:$0xff]  ;;  %v218_v60 = vld [vmem:[%s877_s6 + $0x50] sm:$0xff] }
  0x24   :  { %v92_v52 = vld [vmem:[%s873_s2 + $0x60] sm:$0xff]  ;;  %v264_v53 = vmax.f32 %v232_v42, %v248_v37  ;;  %v170_v56 = vmax.f32 %v138_v44, %v154_v40  ;;  %v76_v58 = vmax.f32 %v44_v50, %v60_v51  ;;  %312 = vst.msk [vmem:[%s880_s9 + $0x38] sm:$0xff] %vm304_vm0, %v295_v47  ;;  %v139_v61 = vmax.f32 %v107_v49, %v123_v46  ;;  %v187_v62 = vld [vmem:[%s876_s5 + $0x58] sm:$0xff]  ;;  %v45_v3 = vld [vmem:[%s871_s0 + $0x68] sm:$0xff] }
  0x25   :  { %v233_v59 = vmax.f32 %v201_v48, %v217_v43  ;;  %v124_v63 = vld [vmem:[%s874_s3 + $0x60] sm:$0xff]  ;;  %v61_v4 = vld [vmem:[%s872_s1 + $0x68] sm:$0xff]  ;;  %v250_v7 = vld [vmem:[%s878_s7 + $0x50] sm:$0xff] }
  0x26   :  { %v296_v0 = vmax.f32 %v264_v53, %v280_v38  ;;  %v202_v1 = vmax.f32 %v170_v56, %v186_v45  ;;  %v108_v2 = vmax.f32 %v76_v58, %v92_v52  ;;  %v93_v5 = vld [vmem:[%s873_s2 + $0x68] sm:$0xff]  ;;  %v282_v8 = vld [vmem:[%s879_s8 + $0x50] sm:$0xff]  ;;  %v171_v9 = vmax.f32 %v139_v61, %v155_v57  ;;  %v156_v10 = vld [vmem:[%s875_s4 + $0x60] sm:$0xff] }
  0x27   :  { %v265_v6 = vmax.f32 %v233_v59, %v249_v54  ;;  %v77_v11 = vmax.f32 %v45_v3, %v61_v4  ;;  %v219_v13 = vld [vmem:[%s877_s6 + $0x58] sm:$0xff]  ;;  %v188_v15 = vld [vmem:[%s876_s5 + $0x60] sm:$0xff]  ;;  %v125_v16 = vld [vmem:[%s874_s3 + $0x68] sm:$0xff] }
  0x28   :  { %313 = vst.msk [vmem:[%s880_s9 + $0x40] sm:$0xff] %vm304_vm0, %v296_v0  ;;  %v234_v12 = vmax.f32 %v202_v1, %v218_v60  ;;  %v140_v14 = vmax.f32 %v108_v2, %v124_v63  ;;  %v203_v18 = vmax.f32 %v171_v9, %v187_v62  ;;  %v46_v20 = vld [vmem:[%s871_s0 + $0x70] sm:$0xff]  ;;  %v251_v24 = vld [vmem:[%s878_s7 + $0x58] sm:$0xff]  ;;  %v157_v27 = vld [vmem:[%s875_s4 + $0x68] sm:$0xff] }
  0x29   :  { %v297_v17 = vmax.f32 %v265_v6, %v281_v55  ;;  %v109_v19 = vmax.f32 %v77_v11, %v93_v5  ;;  %v62_v21 = vld [vmem:[%s872_s1 + $0x70] sm:$0xff]  ;;  %v283_v25 = vld [vmem:[%s879_s8 + $0x58] sm:$0xff]  ;;  %v220_v30 = vld [vmem:[%s877_s6 + $0x60] sm:$0xff] }
  0x2a   :  { %v94_v22 = vld [vmem:[%s873_s2 + $0x70] sm:$0xff]  ;;  %v266_v23 = vmax.f32 %v234_v12, %v250_v7  ;;  %v172_v26 = vmax.f32 %v140_v14, %v156_v10  ;;  %v78_v28 = vmax.f32 %v46_v20, %v62_v21  ;;  %v235_v29 = vmax.f32 %v203_v18, %v219_v13  ;;  %v189_v32 = vld [vmem:[%s876_s5 + $0x68] sm:$0xff]  ;;  %v47_v37 = vld [vmem:[%s871_s0 + $0x78] sm:$0xff] }
  0x2b   :  { %314 = vst.msk [vmem:[%s880_s9 + $0x48] sm:$0xff] %vm304_vm0, %v297_v17  ;;  %v141_v31 = vmax.f32 %v109_v19, %v125_v16  ;;  %v126_v33 = vld [vmem:[%s874_s3 + $0x70] sm:$0xff]  ;;  %v63_v38 = vld [vmem:[%s872_s1 + $0x78] sm:$0xff]  ;;  %v252_v41 = vld [vmem:[%s878_s7 + $0x60] sm:$0xff] }
  0x2c   :  { %v298_v34 = vmax.f32 %v266_v23, %v282_v8  ;;  %v204_v35 = vmax.f32 %v172_v26, %v188_v15  ;;  %v110_v36 = vmax.f32 %v78_v28, %v94_v22  ;;  %v95_v39 = vld [vmem:[%s873_s2 + $0x78] sm:$0xff]  ;;  %v267_v40 = vmax.f32 %v235_v29, %v251_v24  ;;  %v158_v43 = vld [vmem:[%s875_s4 + $0x70] sm:$0xff]  ;;  %v221_v46 = vld [vmem:[%s877_s6 + $0x68] sm:$0xff] }
  0x2d   :  { %v173_v42 = vmax.f32 %v141_v31, %v157_v27  ;;  %v79_v44 = vmax.f32 %v47_v37, %v63_v38  ;;  %v127_v48 = vld [vmem:[%s874_s3 + $0x78] sm:$0xff]  ;;  %v284_v50 = vld [vmem:[%s879_s8 + $0x60] sm:$0xff]  ;;  %v190_v52 = vld [vmem:[%s876_s5 + $0x70] sm:$0xff] }
  0x2e   :  { %315 = vst.msk [vmem:[%s880_s9 + $0x50] sm:$0xff] %vm304_vm0, %v298_v34  ;;  %v236_v45 = vmax.f32 %v204_v35, %v220_v30  ;;  %v142_v47 = vmax.f32 %v110_v36, %v126_v33  ;;  %v299_v49 = vmax.f32 %v267_v40, %v283_v25  ;;  %v253_v55 = vld [vmem:[%s878_s7 + $0x68] sm:$0xff]  ;;  %v159_v57 = vld [vmem:[%s875_s4 + $0x78] sm:$0xff]  ;;  %v222_v59 = vld [vmem:[%s877_s6 + $0x70] sm:$0xff] }
  0x2f   :  { %v205_v51 = vmax.f32 %v173_v42, %v189_v32  ;;  %v111_v53 = vmax.f32 %v79_v44, %v95_v39  ;;  %v285_v62 = vld [vmem:[%s879_s8 + $0x68] sm:$0xff]  ;;  %v191_v0 = vld [vmem:[%s876_s5 + $0x78] sm:$0xff]  ;;  %v254_v2 = vld [vmem:[%s878_s7 + $0x70] sm:$0xff] }
  0x30   :  { %v268_v54 = vmax.f32 %v236_v45, %v252_v41  ;;  %v174_v56 = vmax.f32 %v142_v47, %v158_v43  ;;  %316 = vst.msk [vmem:[%s880_s9 + $0x58] sm:$0xff] %vm304_vm0, %v299_v49  ;;  %v223_v5 = vld [vmem:[%s877_s6 + $0x78] sm:$0xff]  ;;  %v286_v7 = vld [vmem:[%s879_s8 + $0x70] sm:$0xff] }
  0x31   :  { %v237_v58 = vmax.f32 %v205_v51, %v221_v46  ;;  %v143_v60 = vmax.f32 %v111_v53, %v127_v48  ;;  %v255_v10 = vld [vmem:[%s878_s7 + $0x78] sm:$0xff] }
  0x32   :  { %v300_v61 = vmax.f32 %v268_v54, %v284_v50  ;;  %v206_v63 = vmax.f32 %v174_v56, %v190_v52  ;;  %v287_v13 = vld [vmem:[%s879_s8 + $0x78] sm:$0xff] }
  0x33   :  { %v269_v1 = vmax.f32 %v237_v58, %v253_v55  ;;  %v175_v3 = vmax.f32 %v143_v60, %v159_v57 }
  0x34   :  { %317 = vst.msk [vmem:[%s880_s9 + $0x60] sm:$0xff] %vm304_vm0, %v300_v61  ;;  %v238_v4 = vmax.f32 %v206_v63, %v222_v59 }
  0x35   :  { %v301_v6 = vmax.f32 %v269_v1, %v285_v62  ;;  %v207_v8 = vmax.f32 %v175_v3, %v191_v0 }
  0x36   :  { %v270_v9 = vmax.f32 %v238_v4, %v254_v2 }
  0x37   :  { %318 = vst.msk [vmem:[%s880_s9 + $0x68] sm:$0xff] %vm304_vm0, %v301_v6  ;;  %v239_v11 = vmax.f32 %v207_v8, %v223_v5 }
  0x38   :  { %v302_v12 = vmax.f32 %v270_v9, %v286_v7 }
  0x39   :  { %v271_v14 = vmax.f32 %v239_v11, %v255_v10 }
  0x3a   :  { %319 = vst.msk [vmem:[%s880_s9 + $0x70] sm:$0xff] %vm304_vm0, %v302_v12 }
  0x3b   :  { %v303_v15 = vmax.f32 %v271_v14, %v287_v13 }
  0x3d   :  { %320 = vst.msk [vmem:[%s880_s9 + $0x78] sm:$0xff] %vm304_vm0, %v303_v15 }

// kernel: resnet_shard1_forward.86
= control target key start
LH: loop header
LB: loop body
LE: loop exit
PB: predicated region body
PF: predicated region fallthrough
CT: control target
= control target key end

     0   :  { %v216_v6 = vmov 1966171168   ;;  %v31_v8 = vlaneseq  ;;  %v217_v11 = vmov 857870592   ;;  %s522_s1 = inlined_call_operand.vmem [shape: f32[2,256], index: 1, kind: input, shape index: {}]   ;;  %s523_s2 = inlined_call_operand.vmem [shape: f32[1,256], index: 2, kind: input, shape index: {}]   ;;  %s524_s0 = inlined_call_operand.vmem [shape: f32[128,256], index: 0, kind: input, shape index: {}]   ;;  %s525_s3 = inlined_call_operand.vmem [shape: f32[1,256], index: 3, kind: input, shape index: {}]   ;;  %s526_s4 = inlined_call_operand.vmem [shape: f32[128,256], index: 4, kind: output, shape index: {}]  }
   0x1   :  { %v17_v0 = vld [vmem:[%s522_s1] sm:$0xf]  ;;  %v29_v7 = vunpack.c.l.s4 %v216_v6  ;;  %v41_v12 = vunpack.c.l.s4 %v217_v11  ;;  %v60_v24 = vld [vmem:[%s524_s0 + $0x8] sm:$0xff]  ;;  %v61_v25 = vld [vmem:[%s524_s0 + $0x10] sm:$0xff] }
   0x2   :  { %v18_v1 = vmul.f32 0.0078125, %v17_v0  ;;  %v246_v10 = vshrl.u32 %v31_v8, 7  ;;  %v24_v17 = vld [vmem:[%s523_s2] sm:$0x3]  ;;  %v62_v26 = vld [vmem:[%s524_s0 + $0x18] sm:$0xff]  ;;  %v64_v28 = vld [vmem:[%s524_s0 + $0x28] sm:$0xff] }
   0x3   :  { %v30_v9 = vunpack.c.0.s8 %v29_v7  ;;  %v42_v14 = vunpack.c.0.s8 %v41_v12  ;;  %v59_v23 = vld [vmem:[%s524_s0] sm:$0xff]  ;;  %v65_v32 = vld [vmem:[%s524_s0 + $0x30] sm:$0xff]  ;;  %v66_v33 = vld [vmem:[%s524_s0 + $0x38] sm:$0xff] }
   0x4   :  { %v19_v2 = vmul.f32 %v18_v1, %v18_v1  ;;  %v93_v20 = vsub.s32 0, %v246_v10  ;;  %v97_v21 = vsub.s32 1, %v246_v10  ;;  %v63_v27 = vld [vmem:[%s524_s0 + $0x20] sm:$0xff]  ;;  %v68_v36 = vld [vmem:[%s524_s0 + $0x48] sm:$0xff]  ;;  %v69_v37 = vld [vmem:[%s524_s0 + $0x50] sm:$0xff] }
   0x5   :  { %v33_v13 = vsub.s32 %v30_v9, %v246_v10  ;;  %v45_v19 = vsub.s32 %v42_v14, %v246_v10  ;;  %v67_v34 = vld [vmem:[%s524_s0 + $0x40] sm:$0xff]  ;;  %v70_v38 = vld [vmem:[%s524_s0 + $0x58] sm:$0xff]  ;;  %v72_v44 = vld [vmem:[%s524_s0 + $0x68] sm:$0xff] }
   0x6   :  { %v21_v3 = vrot.slane %v19_v2, 7  ;;  %v38_v35 = vld [vmem:[%s525_s3] sm:$0x3]  ;;  %v73_v45 = vld [vmem:[%s524_s0 + $0x70] sm:$0xff]  ;;  %v74_v50 = vld [vmem:[%s524_s0 + $0x78] sm:$0xff] }
   0x7   :  { %v71_v43 = vld [vmem:[%s524_s0 + $0x60] sm:$0xff]  ;;  %v76_v52 = vld [vmem:[%s524_s0 + $0x88] sm:$0xff]  ;;  %v77_v57 = vld [vmem:[%s524_s0 + $0x90] sm:$0xff] }
   0x8   :  { %v23_v4 = vsub.f32 %v18_v1, %v21_v3  ;;  %v75_v51 = vld [vmem:[%s524_s0 + $0x80] sm:$0xff]  ;;  %v78_v58 = vld [vmem:[%s524_s0 + $0x98] sm:$0xff]  ;;  %v80_v0 = vld [vmem:[%s524_s0 + $0xa8] sm:$0xff] }
   0x9   :  { %v79_v59 = vld [vmem:[%s524_s0 + $0xa0] sm:$0xff]  ;;  %v82_v2 = vld [vmem:[%s524_s0 + $0xb8] sm:$0xff]  ;;  %v84_v8 = vld [vmem:[%s524_s0 + $0xc8] sm:$0xff] }
   0xa   :  { %v25_v5 = vadd.f32 1e-05, %v23_v4  ;;  %v83_v7 = vld [vmem:[%s524_s0 + $0xc0] sm:$0xff]  ;;  %v85_v9 = vld [vmem:[%s524_s0 + $0xd0] sm:$0xff] }
   0xc   :  { %214 = vrsqrt.f32 %v25_v5 }
  0x19   :  { %v215_v15 = vpop.eup %214 }
  0x1a   :  { %v34_v16 = vrot.slane %v215_v15, %v33_v13 }
  0x1c   :  { %v35_v18 = vcombine.high %v34_v16, %v34_v16 }
  0x1e   :  { %v37_v22 = vmul.f32 %v35_v18, %v24_v17 }
  0x20   :  { %v46_v29 = vrot.slane %v37_v22, %v45_v19  ;;  %v273_v30 = vrot.slane %v37_v22, %v93_v20  ;;  %v275_v31 = vrot.slane %v37_v22, %v97_v21 }
  0x22   :  { %v48_v39 = vmul.f32 %v46_v29, %v18_v1  ;;  %v101_v40 = vmul.f32 %v273_v30, %v59_v23  ;;  %v102_v41 = vmul.f32 %v275_v31, %v60_v24  ;;  %v103_v42 = vmul.f32 %v273_v30, %v61_v25  ;;  %v81_v1 = vld [vmem:[%s524_s0 + $0xb0] sm:$0xff] }
  0x23   :  { %v104_v46 = vmul.f32 %v275_v31, %v62_v26  ;;  %v105_v47 = vmul.f32 %v273_v30, %v63_v27  ;;  %v106_v48 = vmul.f32 %v275_v31, %v64_v28  ;;  %v107_v49 = vmul.f32 %v273_v30, %v65_v32 }
  0x24   :  { %v56_v53 = vrot.slane %v48_v39, %v33_v13  ;;  %v108_v54 = vmul.f32 %v275_v31, %v66_v33  ;;  %v109_v55 = vmul.f32 %v273_v30, %v67_v34  ;;  %v110_v56 = vmul.f32 %v275_v31, %v68_v36 }
  0x25   :  { %v111_v60 = vmul.f32 %v273_v30, %v69_v37  ;;  %v112_v61 = vmul.f32 %v275_v31, %v70_v38  ;;  %v113_v62 = vmul.f32 %v273_v30, %v71_v43  ;;  %v114_v63 = vmul.f32 %v275_v31, %v72_v44 }
  0x26   :  { %v58_v3 = vsub.f32 %v38_v35, %v56_v53  ;;  %v115_v4 = vmul.f32 %v273_v30, %v73_v45  ;;  %v116_v5 = vmul.f32 %v275_v31, %v74_v50  ;;  %v117_v6 = vmul.f32 %v273_v30, %v75_v51 }
  0x27   :  { %v118_v10 = vmul.f32 %v275_v31, %v76_v52  ;;  %v119_v11 = vmul.f32 %v273_v30, %v77_v57  ;;  %v120_v12 = vmul.f32 %v275_v31, %v78_v58  ;;  %v121_v13 = vmul.f32 %v273_v30, %v79_v59 }
  0x28   :  { %v364_v14 = vrot.slane %v58_v3, %v93_v20  ;;  %v366_v15 = vrot.slane %v58_v3, %v97_v21  ;;  %v122_v16 = vmul.f32 %v275_v31, %v80_v0  ;;  %v123_v17 = vmul.f32 %v273_v30, %v81_v1 }
  0x29   :  { %v124_v18 = vmul.f32 %v275_v31, %v82_v2  ;;  %v125_v19 = vmul.f32 %v273_v30, %v83_v7  ;;  %v126_v22 = vmul.f32 %v275_v31, %v84_v8  ;;  %v127_v23 = vmul.f32 %v273_v30, %v85_v9 }
  0x2a   :  { %v144_v24 = vadd.f32 %v364_v14, %v101_v40  ;;  %v145_v25 = vadd.f32 %v366_v15, %v102_v41  ;;  %v146_v20 = vadd.f32 %v364_v14, %v103_v42  ;;  %v147_v21 = vadd.f32 %v366_v15, %v104_v46  ;;  %v86_v40 = vld [vmem:[%s524_s0 + $0xd8] sm:$0xff]  ;;  %v87_v41 = vld [vmem:[%s524_s0 + $0xe0] sm:$0xff]  ;;  %v88_v46 = vld [vmem:[%s524_s0 + $0xe8] sm:$0xff] }
  0x2b   :  { %v148_v26 = vadd.f32 %v364_v14, %v105_v47  ;;  %v149_v27 = vadd.f32 %v366_v15, %v106_v48  ;;  %v150_v28 = vadd.f32 %v364_v14, %v107_v49  ;;  %v151_v29 = vadd.f32 %v366_v15, %v108_v54  ;;  %v89_v47 = vld [vmem:[%s524_s0 + $0xf0] sm:$0xff]  ;;  %v90_v48 = vld [vmem:[%s524_s0 + $0xf8] sm:$0xff] }
  0x2c   :  { %176 = vst [vmem:[%s526_s4] sm:$0xff] %v144_v24  ;;  %177 = vst [vmem:[%s526_s4 + $0x8] sm:$0xff] %v145_v25  ;;  %v152_v32 = vadd.f32 %v364_v14, %v109_v55  ;;  %v153_v33 = vadd.f32 %v366_v15, %v110_v56  ;;  %v154_v34 = vadd.f32 %v364_v14, %v111_v60 }
  0x2d   :  { %178 = vst [vmem:[%s526_s4 + $0x10] sm:$0xff] %v146_v20  ;;  %179 = vst [vmem:[%s526_s4 + $0x18] sm:$0xff] %v147_v21  ;;  %v155_v35 = vadd.f32 %v366_v15, %v112_v61  ;;  %v156_v36 = vadd.f32 %v364_v14, %v113_v62  ;;  %v157_v37 = vadd.f32 %v366_v15, %v114_v63 }
  0x2e   :  { %180 = vst [vmem:[%s526_s4 + $0x20] sm:$0xff] %v148_v26  ;;  %181 = vst [vmem:[%s526_s4 + $0x28] sm:$0xff] %v149_v27  ;;  %v158_v38 = vadd.f32 %v364_v14, %v115_v4  ;;  %v159_v39 = vadd.f32 %v366_v15, %v116_v5  ;;  %v160_v42 = vadd.f32 %v364_v14, %v117_v6 }
  0x2f   :  { %182 = vst [vmem:[%s526_s4 + $0x30] sm:$0xff] %v150_v28  ;;  %183 = vst [vmem:[%s526_s4 + $0x38] sm:$0xff] %v151_v29  ;;  %v161_v43 = vadd.f32 %v366_v15, %v118_v10  ;;  %v162_v44 = vadd.f32 %v364_v14, %v119_v11  ;;  %v163_v45 = vadd.f32 %v366_v15, %v120_v12 }
  0x30   :  { %184 = vst [vmem:[%s526_s4 + $0x40] sm:$0xff] %v152_v32  ;;  %185 = vst [vmem:[%s526_s4 + $0x48] sm:$0xff] %v153_v33  ;;  %v164_v49 = vadd.f32 %v364_v14, %v121_v13  ;;  %v165_v50 = vadd.f32 %v366_v15, %v122_v16  ;;  %v166_v51 = vadd.f32 %v364_v14, %v123_v17 }
  0x31   :  { %186 = vst [vmem:[%s526_s4 + $0x50] sm:$0xff] %v154_v34  ;;  %187 = vst [vmem:[%s526_s4 + $0x58] sm:$0xff] %v155_v35  ;;  %v167_v52 = vadd.f32 %v366_v15, %v124_v18  ;;  %v168_v53 = vadd.f32 %v364_v14, %v125_v19  ;;  %v169_v54 = vadd.f32 %v366_v15, %v126_v22 }
  0x32   :  { %188 = vst [vmem:[%s526_s4 + $0x60] sm:$0xff] %v156_v36  ;;  %189 = vst [vmem:[%s526_s4 + $0x68] sm:$0xff] %v157_v37  ;;  %v170_v55 = vadd.f32 %v364_v14, %v127_v23  ;;  %v128_v56 = vmul.f32 %v275_v31, %v86_v40  ;;  %v129_v57 = vmul.f32 %v273_v30, %v87_v41 }
  0x33   :  { %190 = vst [vmem:[%s526_s4 + $0x70] sm:$0xff] %v158_v38  ;;  %191 = vst [vmem:[%s526_s4 + $0x78] sm:$0xff] %v159_v39  ;;  %v130_v58 = vmul.f32 %v275_v31, %v88_v46  ;;  %v131_v59 = vmul.f32 %v273_v30, %v89_v47  ;;  %v132_v60 = vmul.f32 %v275_v31, %v90_v48 }
  0x34   :  { %192 = vst [vmem:[%s526_s4 + $0x80] sm:$0xff] %v160_v42  ;;  %193 = vst [vmem:[%s526_s4 + $0x88] sm:$0xff] %v161_v43  ;;  %v171_v61 = vadd.f32 %v366_v15, %v128_v56  ;;  %v172_v62 = vadd.f32 %v364_v14, %v129_v57 }
  0x35   :  { %194 = vst [vmem:[%s526_s4 + $0x90] sm:$0xff] %v162_v44  ;;  %195 = vst [vmem:[%s526_s4 + $0x98] sm:$0xff] %v163_v45  ;;  %v173_v30 = vadd.f32 %v366_v15, %v130_v58  ;;  %v174_v31 = vadd.f32 %v364_v14, %v131_v59  ;;  %v175_v63 = vadd.f32 %v366_v15, %v132_v60 }
  0x36   :  { %196 = vst [vmem:[%s526_s4 + $0xa0] sm:$0xff] %v164_v49  ;;  %197 = vst [vmem:[%s526_s4 + $0xa8] sm:$0xff] %v165_v50 }
  0x37   :  { %198 = vst [vmem:[%s526_s4 + $0xb0] sm:$0xff] %v166_v51  ;;  %199 = vst [vmem:[%s526_s4 + $0xb8] sm:$0xff] %v167_v52 }
  0x38   :  { %200 = vst [vmem:[%s526_s4 + $0xc0] sm:$0xff] %v168_v53  ;;  %201 = vst [vmem:[%s526_s4 + $0xc8] sm:$0xff] %v169_v54 }
  0x39   :  { %202 = vst [vmem:[%s526_s4 + $0xd0] sm:$0xff] %v170_v55  ;;  %203 = vst [vmem:[%s526_s4 + $0xd8] sm:$0xff] %v171_v61 }
  0x3a   :  { %204 = vst [vmem:[%s526_s4 + $0xe0] sm:$0xff] %v172_v62  ;;  %205 = vst [vmem:[%s526_s4 + $0xe8] sm:$0xff] %v173_v30 }
  0x3b   :  { %206 = vst [vmem:[%s526_s4 + $0xf0] sm:$0xff] %v174_v31  ;;  %207 = vst [vmem:[%s526_s4 + $0xf8] sm:$0xff] %v175_v63 }

// kernel: resnet_shard1_forward.84
= control target key start
LH: loop header
LB: loop body
LE: loop exit
PB: predicated region body
PF: predicated region fallthrough
CT: control target
= control target key end

     0   :  { %v343_v1 = vmov 0   ;;  %vm116_vm0 = vcmask 523264   ;;  %s511_s1 = inlined_call_operand.vmem [shape: bf16[64,256], index: 1, kind: input, shape index: {}]   ;;  %s512_s0 = inlined_call_operand.vmem [shape: bf16[128,64], index: 0, kind: input, shape index: {}]   ;;  %s513_s2 = inlined_call_operand.vmem [shape: f32[128,256], index: 2, kind: output, shape index: {}]  }
   0x1   :  { %v323_v0 = vld [vmem:[%s511_s1 + $0x34] ss:$8 sps:$4 sm:$0xff]   ;;  %173 = vmatprep.mubr.bf16.mxu0 %v343_v1  ;;  %213 = vmatprep.mubr.bf16.mxu1 %v343_v1  ;;  %v325_v2 = vld [vmem:[%s511_s1 + $0x30] ss:$8 sps:$4 sm:$0xff]   ;;  %v326_v3 = vld [vmem:[%s511_s1 + $0x24] ss:$8 sps:$4 sm:$0xff]  }
   0x2   :  { %149 = vmatprep.subr.bf16.mxu0 %v323_v0  ;;  %314 = vmatprep.subr.bf16.mxu1 %v323_v0  ;;  %v328_v4 = vld [vmem:[%s511_s1 + $0x20] ss:$8 sps:$4 sm:$0xff]   ;;  %v329_v5 = vld [vmem:[%s511_s1 + $0x14] ss:$8 sps:$4 sm:$0xff]   ;;  %v331_v6 = vld [vmem:[%s511_s1 + $0x10] ss:$8 sps:$4 sm:$0xff]  }
   0x3   :  { %150 = vmatpush1.bf16.msra.mxu0 %v325_v2  ;;  %318 = vmatpush1.bf16.msra.mxu1 %v325_v2  ;;  %v332_v7 = vld [vmem:[%s511_s1 + $0x4] ss:$8 sps:$4 sm:$0xff]   ;;  %v334_v8 = vld [vmem:[%s511_s1] ss:$8 sps:$4 sm:$0xff]   ;;  %v339_v13 = vld [vmem:[%s512_s0 + $0x10] sm:$0xff]  }
   0x4   :  { %151 = vmatprep.subr.bf16.mxu0 %v326_v3  ;;  %315 = vmatprep.subr.bf16.mxu1 %v326_v3  ;;  %v335_v9 = vld [vmem:[%s512_s0] sm:$0xff]   ;;  %v337_v11 = vld [vmem:[%s512_s0 + $0x8] sm:$0xff]   ;;  %v340_v14 = vld [vmem:[%s512_s0 + $0x30] sm:$0xff]  }
   0x5   :  { %v336_v10 = vld [vmem:[%s512_s0 + $0x20] sm:$0xff]   ;;  %v338_v12 = vld [vmem:[%s512_s0 + $0x28] sm:$0xff]   ;;  %v341_v15 = vld [vmem:[%s512_s0 + $0x18] sm:$0xff]  }
   0x6   :  { %v342_v16 = vld [vmem:[%s512_s0 + $0x38] sm:$0xff]  }
   0x7   :  { %152 = vmatpush1.bf16.msra.mxu0 %v328_v4  ;;  %319 = vmatpush1.bf16.msra.mxu1 %v328_v4 }
   0x8   :  { %153 = vmatprep.subr.bf16.mxu0 %v329_v5  ;;  %316 = vmatprep.subr.bf16.mxu1 %v329_v5 }
   0xb   :  { %154 = vmatpush1.bf16.msra.mxu0 %v331_v6  ;;  %320 = vmatpush1.bf16.msra.mxu1 %v331_v6 }
   0xc   :  { %155 = vmatprep.subr.bf16.mxu0 %v332_v7  ;;  %317 = vmatprep.subr.bf16.mxu1 %v332_v7 }
   0xf   :  { %156 = vmatpush1.bf16.msra.mxu0 %v334_v8  ;;  %321 = vmatpush1.bf16.msra.mxu1 %v334_v8 }
  0x12   :  { %306 = vmatmul.mubr.msk.bf16.vlgmr.msra.gmra.mxu0 %vm116_vm0, %v335_v9  ;;  %310 = vmatmul.mubr.msk.bf16.vlgmr.msra.gmra.mxu1 %vm116_vm0, %v336_v10 }
  0x13   :  { %183 = vmatprep.mubr.bf16.mxu0 %v343_v1  ;;  %223 = vmatprep.mubr.bf16.mxu1 %v343_v1 }
  0x1a   :  { %307 = vmatmul.mubr.msk.bf16.gmra.mxu0 %vm116_vm0, %v337_v11  ;;  %311 = vmatmul.mubr.msk.bf16.gmra.mxu1 %vm116_vm0, %v338_v12 }
  0x1b   :  { %193 = vmatprep.mubr.bf16.mxu0 %v343_v1  ;;  %233 = vmatprep.mubr.bf16.mxu1 %v343_v1 }
  0x22   :  { %308 = vmatmul.mubr.msk.bf16.gmra.mxu0 %vm116_vm0, %v339_v13  ;;  %312 = vmatmul.mubr.msk.bf16.gmra.mxu1 %vm116_vm0, %v340_v14 }
  0x23   :  { %203 = vmatprep.mubr.bf16.mxu0 %v343_v1  ;;  %243 = vmatprep.mubr.bf16.mxu1 %v343_v1 }
  0x2a   :  { %309 = vmatmul.mubr.msk.bf16.gmra.mxu0 %vm116_vm0, %v341_v15  ;;  %313 = vmatmul.mubr.msk.bf16.gmra.mxu1 %vm116_vm0, %v342_v16 }
  0xd2   :  { %v175_v17 = vpop.f32.mrf.mxu0  ;;  %v215_v18 = vpop.f32.mrf.mxu1 }
  0xd3   :  { %254 = vst [vmem:[%s513_s2] sm:$0xff] %v175_v17  ;;  %270 = vst [vmem:[%s513_s2 + $0x80] sm:$0xff] %v215_v18 }
  0xd4   :  { %v177_v19 = vpop.f32.mrf.mxu0  ;;  %v217_v20 = vpop.f32.mrf.mxu1 }
  0xd5   :  { %255 = vst [vmem:[%s513_s2 + $0x8] sm:$0xff] %v177_v19  ;;  %271 = vst [vmem:[%s513_s2 + $0x88] sm:$0xff] %v217_v20 }
  0xd6   :  { %v179_v21 = vpop.f32.mrf.mxu0  ;;  %v219_v22 = vpop.f32.mrf.mxu1 }
  0xd7   :  { %256 = vst [vmem:[%s513_s2 + $0x10] sm:$0xff] %v179_v21  ;;  %272 = vst [vmem:[%s513_s2 + $0x90] sm:$0xff] %v219_v22 }
  0xd8   :  { %v181_v23 = vpop.f32.mrf.mxu0  ;;  %v221_v24 = vpop.f32.mrf.mxu1 }
  0xd9   :  { %257 = vst [vmem:[%s513_s2 + $0x18] sm:$0xff] %v181_v23  ;;  %273 = vst [vmem:[%s513_s2 + $0x98] sm:$0xff] %v221_v24 }
  0xda   :  { %v185_v25 = vpop.f32.mrf.mxu0  ;;  %v225_v26 = vpop.f32.mrf.mxu1 }
  0xdb   :  { %258 = vst [vmem:[%s513_s2 + $0x20] sm:$0xff] %v185_v25  ;;  %274 = vst [vmem:[%s513_s2 + $0xa0] sm:$0xff] %v225_v26 }
  0xdc   :  { %v187_v27 = vpop.f32.mrf.mxu0  ;;  %v227_v28 = vpop.f32.mrf.mxu1 }
  0xdd   :  { %259 = vst [vmem:[%s513_s2 + $0x28] sm:$0xff] %v187_v27  ;;  %275 = vst [vmem:[%s513_s2 + $0xa8] sm:$0xff] %v227_v28 }
  0xde   :  { %v189_v29 = vpop.f32.mrf.mxu0  ;;  %v229_v30 = vpop.f32.mrf.mxu1 }
  0xdf   :  { %260 = vst [vmem:[%s513_s2 + $0x30] sm:$0xff] %v189_v29  ;;  %276 = vst [vmem:[%s513_s2 + $0xb0] sm:$0xff] %v229_v30 }
  0xe0   :  { %v191_v31 = vpop.f32.mrf.mxu0  ;;  %v231_v32 = vpop.f32.mrf.mxu1 }
  0xe1   :  { %261 = vst [vmem:[%s513_s2 + $0x38] sm:$0xff] %v191_v31  ;;  %277 = vst [vmem:[%s513_s2 + $0xb8] sm:$0xff] %v231_v32 }
  0xe2   :  { %v195_v33 = vpop.f32.mrf.mxu0  ;;  %v235_v34 = vpop.f32.mrf.mxu1 }
  0xe3   :  { %262 = vst [vmem:[%s513_s2 + $0x40] sm:$0xff] %v195_v33  ;;  %278 = vst [vmem:[%s513_s2 + $0xc0] sm:$0xff] %v235_v34 }
  0xe4   :  { %v197_v35 = vpop.f32.mrf.mxu0  ;;  %v237_v36 = vpop.f32.mrf.mxu1 }
  0xe5   :  { %263 = vst [vmem:[%s513_s2 + $0x48] sm:$0xff] %v197_v35  ;;  %279 = vst [vmem:[%s513_s2 + $0xc8] sm:$0xff] %v237_v36 }
  0xe6   :  { %v199_v37 = vpop.f32.mrf.mxu0  ;;  %v239_v38 = vpop.f32.mrf.mxu1 }
  0xe7   :  { %264 = vst [vmem:[%s513_s2 + $0x50] sm:$0xff] %v199_v37  ;;  %280 = vst [vmem:[%s513_s2 + $0xd0] sm:$0xff] %v239_v38 }
  0xe8   :  { %v201_v39 = vpop.f32.mrf.mxu0  ;;  %v241_v40 = vpop.f32.mrf.mxu1 }
  0xe9   :  { %265 = vst [vmem:[%s513_s2 + $0x58] sm:$0xff] %v201_v39  ;;  %281 = vst [vmem:[%s513_s2 + $0xd8] sm:$0xff] %v241_v40 }
  0xea   :  { %v205_v41 = vpop.f32.mrf.mxu0  ;;  %v245_v42 = vpop.f32.mrf.mxu1 }
  0xeb   :  { %266 = vst [vmem:[%s513_s2 + $0x60] sm:$0xff] %v205_v41  ;;  %282 = vst [vmem:[%s513_s2 + $0xe0] sm:$0xff] %v245_v42 }
  0xec   :  { %v207_v43 = vpop.f32.mrf.mxu0  ;;  %v247_v44 = vpop.f32.mrf.mxu1 }
  0xed   :  { %267 = vst [vmem:[%s513_s2 + $0x68] sm:$0xff] %v207_v43  ;;  %283 = vst [vmem:[%s513_s2 + $0xe8] sm:$0xff] %v247_v44 }
  0xee   :  { %v209_v45 = vpop.f32.mrf.mxu0  ;;  %v249_v46 = vpop.f32.mrf.mxu1 }
  0xef   :  { %268 = vst [vmem:[%s513_s2 + $0x70] sm:$0xff] %v209_v45  ;;  %284 = vst [vmem:[%s513_s2 + $0xf0] sm:$0xff] %v249_v46 }
  0xf0   :  { %v211_v47 = vpop.f32.mrf.mxu0  ;;  %v251_v48 = vpop.f32.mrf.mxu1 }
  0xf1   :  { %269 = vst [vmem:[%s513_s2 + $0x78] sm:$0xff] %v211_v47  ;;  %285 = vst [vmem:[%s513_s2 + $0xf8] sm:$0xff] %v251_v48 }

// kernel: resnet_shard1_forward.85
= control target key start
LH: loop header
LB: loop body
LE: loop exit
PB: predicated region body
PF: predicated region fallthrough
CT: control target
= control target key end

     0   :  { %v216_v0 = vmov 0.0   ;;  %s339_s1 = inlined_call_operand.vmem [shape: f32[2,256], index: 1, kind: output, shape index: {}]   ;;  %s340_s0 = inlined_call_operand.vmem [shape: f32[128,256], index: 0, kind: input, shape index: {}]  }
   0x1   :  { %12 = vst [vmem:[%s339_s1] sm:$0xf] %v216_v0  ;;  %v13_v1 = vld [vmem:[%s340_s0] sm:$0xff]  ;;  %v15_v2 = vld [vmem:[%s340_s0 + $0x10] sm:$0xff]  ;;  %v14_v3 = vld [vmem:[%s340_s0 + $0x8] sm:$0xff] }
   0x2   :  { %v16_v4 = vld [vmem:[%s340_s0 + $0x18] sm:$0xff]  ;;  %v46_v5 = vadd.f32 %v15_v2, %v13_v1  ;;  %v17_v6 = vld [vmem:[%s340_s0 + $0x20] sm:$0xff]  ;;  %v18_v8 = vld [vmem:[%s340_s0 + $0x28] sm:$0xff]  ;;  %v114_v20 = vmul.f32 %v13_v1, %v13_v1  ;;  %v115_v23 = vmul.f32 %v14_v3, %v14_v3  ;;  %v116_v24 = vmul.f32 %v15_v2, %v15_v2 }
   0x3   :  { %v67_v7 = vadd.f32 %v16_v4, %v14_v3  ;;  %v19_v10 = vld [vmem:[%s340_s0 + $0x30] sm:$0xff]  ;;  %v20_v12 = vld [vmem:[%s340_s0 + $0x38] sm:$0xff]  ;;  %v21_v14 = vld [vmem:[%s340_s0 + $0x40] sm:$0xff]  ;;  %v117_v25 = vmul.f32 %v16_v4, %v16_v4  ;;  %v118_v30 = vmul.f32 %v17_v6, %v17_v6  ;;  %v119_v31 = vmul.f32 %v18_v8, %v18_v8 }
   0x4   :  { %v47_v9 = vadd.f32 %v46_v5, %v17_v6  ;;  %v22_v16 = vld [vmem:[%s340_s0 + $0x48] sm:$0xff]  ;;  %v23_v18 = vld [vmem:[%s340_s0 + $0x50] sm:$0xff]  ;;  %v24_v21 = vld [vmem:[%s340_s0 + $0x58] sm:$0xff]  ;;  %v120_v34 = vmul.f32 %v19_v10, %v19_v10  ;;  %v121_v37 = vmul.f32 %v20_v12, %v20_v12  ;;  %v146_v38 = vadd.f32 %v116_v24, %v114_v20 }
   0x5   :  { %v68_v11 = vadd.f32 %v67_v7, %v18_v8  ;;  %v25_v26 = vld [vmem:[%s340_s0 + $0x60] sm:$0xff]  ;;  %v26_v28 = vld [vmem:[%s340_s0 + $0x68] sm:$0xff]  ;;  %v27_v32 = vld [vmem:[%s340_s0 + $0x70] sm:$0xff]  ;;  %v167_v39 = vadd.f32 %v117_v25, %v115_v23  ;;  %v122_v42 = vmul.f32 %v21_v14, %v21_v14  ;;  %v123_v45 = vmul.f32 %v22_v16, %v22_v16 }
   0x6   :  { %v48_v13 = vadd.f32 %v47_v9, %v19_v10  ;;  %v28_v35 = vld [vmem:[%s340_s0 + $0x78] sm:$0xff]  ;;  %v29_v40 = vld [vmem:[%s340_s0 + $0x80] sm:$0xff]  ;;  %v30_v43 = vld [vmem:[%s340_s0 + $0x88] sm:$0xff]  ;;  %v147_v46 = vadd.f32 %v146_v38, %v118_v30  ;;  %v124_v50 = vmul.f32 %v23_v18, %v23_v18  ;;  %v125_v53 = vmul.f32 %v24_v21, %v24_v21 }
   0x7   :  { %v69_v15 = vadd.f32 %v68_v11, %v20_v12  ;;  %v168_v47 = vadd.f32 %v167_v39, %v119_v31  ;;  %v31_v48 = vld [vmem:[%s340_s0 + $0x90] sm:$0xff]  ;;  %v32_v51 = vld [vmem:[%s340_s0 + $0x98] sm:$0xff]  ;;  %v33_v56 = vld [vmem:[%s340_s0 + $0xa0] sm:$0xff]  ;;  %v126_v58 = vmul.f32 %v25_v26, %v25_v26  ;;  %v127_v61 = vmul.f32 %v26_v28, %v26_v28 }
   0x8   :  { %v49_v17 = vadd.f32 %v48_v13, %v21_v14  ;;  %v148_v54 = vadd.f32 %v147_v46, %v120_v34  ;;  %v34_v59 = vld [vmem:[%s340_s0 + $0xa8] sm:$0xff]  ;;  %v35_v0 = vld [vmem:[%s340_s0 + $0xb0] sm:$0xff]  ;;  %v128_v2 = vmul.f32 %v27_v32, %v27_v32  ;;  %v36_v3 = vld [vmem:[%s340_s0 + $0xb8] sm:$0xff]  ;;  %v129_v5 = vmul.f32 %v28_v35, %v28_v35 }
   0x9   :  { %v70_v19 = vadd.f32 %v69_v15, %v22_v16  ;;  %v169_v55 = vadd.f32 %v168_v47, %v121_v37  ;;  %v37_v8 = vld [vmem:[%s340_s0 + $0xc0] sm:$0xff]  ;;  %v130_v10 = vmul.f32 %v29_v40, %v29_v40  ;;  %v38_v11 = vld [vmem:[%s340_s0 + $0xc8] sm:$0xff]  ;;  %v131_v13 = vmul.f32 %v30_v43, %v30_v43  ;;  %v39_v16 = vld [vmem:[%s340_s0 + $0xd0] sm:$0xff] }
   0xa   :  { %v50_v22 = vadd.f32 %v49_v17, %v23_v18  ;;  %v149_v62 = vadd.f32 %v148_v54, %v122_v42  ;;  %v132_v18 = vmul.f32 %v31_v48, %v31_v48  ;;  %v41_v24 = vld [vmem:[%s340_s0 + $0xe0] sm:$0xff]  ;;  %v136_v34 = vmul.f32 %v35_v0, %v35_v0 }
   0xb   :  { %v71_v27 = vadd.f32 %v70_v19, %v24_v21  ;;  %v170_v63 = vadd.f32 %v169_v55, %v123_v45  ;;  %v40_v19 = vld [vmem:[%s340_s0 + $0xd8] sm:$0xff]  ;;  %v133_v21 = vmul.f32 %v32_v51, %v32_v51  ;;  %v137_v37 = vmul.f32 %v36_v3, %v36_v3 }
   0xc   :  { %v51_v29 = vadd.f32 %v50_v22, %v25_v26  ;;  %v150_v6 = vadd.f32 %v149_v62, %v124_v50  ;;  %v134_v26 = vmul.f32 %v33_v56, %v33_v56  ;;  %v140_v47 = vmul.f32 %v39_v16, %v39_v16 }
   0xd   :  { %v72_v33 = vadd.f32 %v71_v27, %v26_v28  ;;  %v171_v7 = vadd.f32 %v170_v63, %v125_v53  ;;  %v42_v27 = vld [vmem:[%s340_s0 + $0xe8] sm:$0xff]  ;;  %v217_v53 = vmov 1966171168   ;;  %v94_v55 = vlaneseq }
   0xe   :  { %v52_v36 = vadd.f32 %v51_v29, %v27_v32  ;;  %v151_v14 = vadd.f32 %v150_v6, %v126_v58  ;;  %v135_v29 = vmul.f32 %v34_v59, %v34_v59  ;;  %v43_v32 = vld [vmem:[%s340_s0 + $0xf0] sm:$0xff]  ;;  %v92_v54 = vunpack.c.l.s4 %v217_v53 }
   0xf   :  { %v73_v41 = vadd.f32 %v72_v33, %v28_v35  ;;  %v172_v15 = vadd.f32 %v171_v7, %v127_v61  ;;  %v44_v35 = vld [vmem:[%s340_s0 + $0xf8] sm:$0xff]  ;;  %v143_v58 = vmul.f32 %v42_v27, %v42_v27  ;;  %v144_v62 = vmul.f32 %v43_v32, %v43_v32 }
  0x10   :  { %v53_v44 = vadd.f32 %v52_v36, %v29_v40  ;;  %v152_v22 = vadd.f32 %v151_v14, %v128_v2  ;;  %vm109_vm0 = vcmp.lt.s32.totalorder %v94_v55, 256 }
  0x11   :  { %v74_v49 = vadd.f32 %v73_v41, %v30_v43  ;;  %v173_v23 = vadd.f32 %v172_v15, %v129_v5  ;;  %v138_v41 = vmul.f32 %v37_v8, %v37_v8  ;;  %v139_v43 = vmul.f32 %v38_v11, %v38_v11 }
  0x12   :  { %v54_v52 = vadd.f32 %v53_v44, %v31_v48  ;;  %v153_v30 = vadd.f32 %v152_v22, %v130_v10  ;;  %v95_v5 = vshrl.u32 %v94_v55, 7 }
  0x13   :  { %v75_v57 = vadd.f32 %v74_v49, %v32_v51  ;;  %v174_v31 = vadd.f32 %v173_v23, %v131_v13  ;;  %v141_v49 = vmul.f32 %v40_v19, %v40_v19 }
  0x14   :  { %v55_v60 = vadd.f32 %v54_v52, %v33_v56  ;;  %v154_v38 = vadd.f32 %v153_v30, %v132_v18  ;;  %v142_v56 = vmul.f32 %v41_v24, %v41_v24 }
  0x15   :  { %v76_v1 = vadd.f32 %v75_v57, %v34_v59  ;;  %v175_v39 = vadd.f32 %v174_v31, %v133_v21  ;;  %v45_v21 = vld [vmem:[%s339_s1] ss:$2 sm:$0x3] }
  0x16   :  { %v56_v4 = vadd.f32 %v55_v60, %v35_v0  ;;  %v155_v44 = vadd.f32 %v154_v38, %v134_v26  ;;  %v145_v0 = vmul.f32 %v44_v35, %v44_v35 }
  0x17   :  { %v77_v9 = vadd.f32 %v76_v1, %v36_v3  ;;  %v176_v45 = vadd.f32 %v175_v39, %v135_v29 }
  0x18   :  { %v57_v12 = vadd.f32 %v56_v4, %v37_v8  ;;  %v156_v50 = vadd.f32 %v155_v44, %v136_v34  ;;  %v93_v4 = vunpack.c.0.s8 %v92_v54  ;;  %v212_v34 = vld [vmem:[%s339_s1 + $0x1] ss:$2 sm:$0x3] }
  0x19   :  { %v78_v17 = vadd.f32 %v77_v9, %v38_v11  ;;  %v177_v51 = vadd.f32 %v176_v45, %v137_v37 }
  0x1a   :  { %v58_v20 = vadd.f32 %v57_v12, %v39_v16  ;;  %v157_v59 = vadd.f32 %v156_v50, %v138_v41  ;;  %v96_v14 = vsub.s32 %v93_v4, %v95_v5 }
  0x1b   :  { %v79_v25 = vadd.f32 %v78_v17, %v40_v19  ;;  %v178_v60 = vadd.f32 %v177_v51, %v139_v43 }
  0x1c   :  { %v59_v28 = vadd.f32 %v58_v20, %v41_v24  ;;  %v158_v1 = vadd.f32 %v157_v59, %v140_v47 }
  0x1d   :  { %v80_v33 = vadd.f32 %v79_v25, %v42_v27  ;;  %v179_v2 = vadd.f32 %v178_v60, %v141_v49 }
  0x1e   :  { %v60_v36 = vadd.f32 %v59_v28, %v43_v32  ;;  %v159_v7 = vadd.f32 %v158_v1, %v142_v56 }
  0x1f   :  { %v81_v40 = vadd.f32 %v80_v33, %v44_v35  ;;  %v180_v8 = vadd.f32 %v179_v2, %v143_v58 }
  0x20   :  { %v61_v42 = vrot.slane %v60_v36, 4  ;;  %v160_v11 = vadd.f32 %v159_v7, %v144_v62 }
  0x21   :  { %v82_v46 = vrot.slane %v81_v40, 4  ;;  %v181_v12 = vadd.f32 %v180_v8, %v145_v0 }
  0x22   :  { %v62_v48 = vadd.f32 %v61_v42, %v60_v36  ;;  %v161_v15 = vrot.slane %v160_v11, 4 }
  0x23   :  { %v83_v52 = vadd.f32 %v82_v46, %v81_v40  ;;  %v182_v16 = vrot.slane %v181_v12, 4 }
  0x24   :  { %v63_v57 = vrot.slane %v62_v48, 2  ;;  %v162_v18 = vadd.f32 %v161_v15, %v160_v11 }
  0x25   :  { %v84_v61 = vrot.slane %v83_v52, 2  ;;  %v183_v19 = vadd.f32 %v182_v16, %v181_v12 }
  0x26   :  { %v64_v63 = vadd.f32 %v63_v57, %v62_v48  ;;  %v163_v22 = vrot.slane %v162_v18, 2 }
  0x27   :  { %v85_v3 = vadd.f32 %v84_v61, %v83_v52  ;;  %v184_v23 = vrot.slane %v183_v19, 2 }
  0x28   :  { %v65_v6 = vrot.slane %v64_v63, 1  ;;  %v164_v25 = vadd.f32 %v163_v22, %v162_v18 }
  0x29   :  { %v86_v9 = vrot.slane %v85_v3, 1  ;;  %v185_v26 = vadd.f32 %v184_v23, %v183_v19 }
  0x2a   :  { %v66_v10 = vadd.f32 %v65_v6, %v64_v63  ;;  %v165_v28 = vrot.slane %v164_v25, 1 }
  0x2b   :  { %v87_v13 = vadd.f32 %v86_v9, %v85_v3  ;;  %v186_v29 = vrot.slane %v185_v26, 1 }
  0x2c   :  { %v166_v30 = vadd.f32 %v165_v28, %v164_v25 }
  0x2d   :  { %v90_v17 = vcombine.low %v66_v10, %v87_v13  ;;  %v187_v31 = vadd.f32 %v186_v29, %v185_v26 }
  0x2f   :  { %v97_v20 = vrot.slane %v90_v17, %v96_v14  ;;  %v190_v32 = vcombine.low %v166_v30, %v187_v31 }
  0x31   :  { %v104_v24 = vrot.slane %v97_v20, %v96_v14  ;;  %v197_v33 = vrot.slane %v190_v32, %v96_v14 }
  0x33   :  { %v106_v27 = vadd.f32 %v104_v24, %v45_v21  ;;  %v204_v35 = vrot.slane %v197_v33, %v96_v14 }
  0x35   :  { %111 = vst.msk [vmem:[%s339_s1] ss:$2 sm:$0x3] %vm109_vm0, %v106_v27  ;;  %v206_v36 = vadd.f32 %v212_v34, %v204_v35 }
  0x37   :  { %213 = vst.msk [vmem:[%s339_s1 + $0x1] ss:$2 sm:$0x3] %vm109_vm0, %v206_v36 }

// kernel: resnet_shard1_forward.77
= control target key start
LH: loop header
LB: loop body
LE: loop exit
PB: predicated region body
PF: predicated region fallthrough
CT: control target
= control target key end

     0   :  { %vm100_vm0 = vcmask 523264   ;;  %s441_s1 = inlined_call_operand.vmem [shape: bf16[64,64], index: 1, kind: input, shape index: {}]   ;;  %s442_s0 = inlined_call_operand.vmem [shape: bf16[128,64], index: 0, kind: input, shape index: {}]   ;;  %s443_s2 = inlined_call_operand.vmem [shape: f32[128,64], index: 2, kind: output, shape index: {}]  }
   0x1   :  { %v306_v0 = vld [vmem:[%s441_s1 + $0x18] sm:$0xff]   ;;  %v307_v1 = vld [vmem:[%s441_s1 + $0x10] sm:$0xff]   ;;  %v308_v2 = vld [vmem:[%s441_s1 + $0x8] sm:$0xff]  }
   0x2   :  { %274 = vmatprep.subr.bf16.mxu0 %v306_v0  ;;  %298 = vmatprep.subr.bf16.mxu1 %v306_v0  ;;  %v310_v3 = vld [vmem:[%s442_s0] sm:$0xff]   ;;  %v312_v6 = vld [vmem:[%s442_s0 + $0x8] sm:$0xff]   ;;  %v314_v8 = vld [vmem:[%s442_s0 + $0x10] sm:$0xff]  }
   0x3   :  { %275 = vmatpush3.bf16.msra.mxu0 %v306_v0  ;;  %302 = vmatpush3.bf16.msra.mxu1 %v306_v0  ;;  %v311_v4 = vld [vmem:[%s442_s0 + $0x20] sm:$0xff]   ;;  %v313_v7 = vld [vmem:[%s442_s0 + $0x28] sm:$0xff]   ;;  %v315_v9 = vld [vmem:[%s442_s0 + $0x30] sm:$0xff]  }
   0x4   :  { %276 = vmatprep.subr.bf16.mxu0 %v307_v1  ;;  %299 = vmatprep.subr.bf16.mxu1 %v307_v1  ;;  %v309_v5 = vld [vmem:[%s441_s1] sm:$0xff]   ;;  %v316_v10 = vld [vmem:[%s442_s0 + $0x18] sm:$0xff]  }
   0x5   :  { %282 = vmatprep.mubr.msk.bf16.mxu0 %vm100_vm0, %v310_v3  ;;  %290 = vmatprep.mubr.msk.bf16.mxu1 %vm100_vm0, %v311_v4  ;;  %v317_v11 = vld [vmem:[%s442_s0 + $0x38] sm:$0xff]  }
   0x7   :  { %277 = vmatpush3.bf16.msra.mxu0 %v307_v1  ;;  %303 = vmatpush3.bf16.msra.mxu1 %v307_v1 }
   0x8   :  { %278 = vmatprep.subr.bf16.mxu0 %v308_v2  ;;  %300 = vmatprep.subr.bf16.mxu1 %v308_v2 }
   0xb   :  { %279 = vmatpush3.bf16.msra.mxu0 %v308_v2  ;;  %304 = vmatpush3.bf16.msra.mxu1 %v308_v2 }
   0xc   :  { %280 = vmatprep.subr.bf16.mxu0 %v309_v5  ;;  %301 = vmatprep.subr.bf16.mxu1 %v309_v5 }
   0xf   :  { %281 = vmatpush3.bf16.msra.mxu0 %v309_v5  ;;  %305 = vmatpush3.bf16.msra.mxu1 %v309_v5 }
  0x12   :  { %283 = vmatmul.mubr.msk.bf16.vlgmr.msra.gmra.mxu0 %vm100_vm0, %v312_v6  ;;  %291 = vmatmul.mubr.msk.bf16.vlgmr.msra.gmra.mxu1 %vm100_vm0, %v313_v7 }
  0x13   :  { %286 = vmatprep.mubr.msk.bf16.mxu0 %vm100_vm0, %v314_v8  ;;  %294 = vmatprep.mubr.msk.bf16.mxu1 %vm100_vm0, %v315_v9 }
  0x1a   :  { %287 = vmatmul.mubr.msk.bf16.gmra.mxu0 %vm100_vm0, %v316_v10  ;;  %295 = vmatmul.mubr.msk.bf16.gmra.mxu1 %vm100_vm0, %v317_v11 }
  0xd2   :  { %v284_v12 = vpop.f32.mrf.mxu0  ;;  %v292_v13 = vpop.f32.mrf.mxu1 }
  0xd3   :  { %224 = vst.msk [vmem:[%s443_s2 + $0x10] sm:$0xff] %vm100_vm0, %v284_v12  ;;  %232 = vst.msk [vmem:[%s443_s2 + $0x50] sm:$0xff] %vm100_vm0, %v292_v13 }
  0xd4   :  { %v159_v14 = vpop.f32.mrf.mxu0  ;;  %v191_v15 = vpop.f32.mrf.mxu1 }
  0xd5   :  { %222 = vst.msk [vmem:[%s443_s2] sm:$0xff] %vm100_vm0, %v159_v14  ;;  %230 = vst.msk [vmem:[%s443_s2 + $0x40] sm:$0xff] %vm100_vm0, %v191_v15 }
  0xd6   :  { %v285_v16 = vpop.f32.mrf.mxu0  ;;  %v293_v17 = vpop.f32.mrf.mxu1 }
  0xd7   :  { %225 = vst.msk [vmem:[%s443_s2 + $0x18] sm:$0xff] %vm100_vm0, %v285_v16  ;;  %233 = vst.msk [vmem:[%s443_s2 + $0x58] sm:$0xff] %vm100_vm0, %v293_v17 }
  0xd8   :  { %v162_v18 = vpop.f32.mrf.mxu0  ;;  %v194_v19 = vpop.f32.mrf.mxu1 }
  0xd9   :  { %223 = vst.msk [vmem:[%s443_s2 + $0x8] sm:$0xff] %vm100_vm0, %v162_v18  ;;  %231 = vst.msk [vmem:[%s443_s2 + $0x48] sm:$0xff] %vm100_vm0, %v194_v19 }
  0xda   :  { %v288_v20 = vpop.f32.mrf.mxu0  ;;  %v296_v21 = vpop.f32.mrf.mxu1 }
  0xdb   :  { %228 = vst.msk [vmem:[%s443_s2 + $0x30] sm:$0xff] %vm100_vm0, %v288_v20  ;;  %236 = vst.msk [vmem:[%s443_s2 + $0x70] sm:$0xff] %vm100_vm0, %v296_v21 }
  0xdc   :  { %v175_v22 = vpop.f32.mrf.mxu0  ;;  %v207_v23 = vpop.f32.mrf.mxu1 }
  0xdd   :  { %226 = vst.msk [vmem:[%s443_s2 + $0x20] sm:$0xff] %vm100_vm0, %v175_v22  ;;  %234 = vst.msk [vmem:[%s443_s2 + $0x60] sm:$0xff] %vm100_vm0, %v207_v23 }
  0xde   :  { %v289_v24 = vpop.f32.mrf.mxu0  ;;  %v297_v25 = vpop.f32.mrf.mxu1 }
  0xdf   :  { %229 = vst.msk [vmem:[%s443_s2 + $0x38] sm:$0xff] %vm100_vm0, %v289_v24  ;;  %237 = vst.msk [vmem:[%s443_s2 + $0x78] sm:$0xff] %vm100_vm0, %v297_v25 }
  0xe0   :  { %v178_v26 = vpop.f32.mrf.mxu0  ;;  %v210_v27 = vpop.f32.mrf.mxu1 }
  0xe1   :  { %227 = vst.msk [vmem:[%s443_s2 + $0x28] sm:$0xff] %vm100_vm0, %v178_v26  ;;  %235 = vst.msk [vmem:[%s443_s2 + $0x68] sm:$0xff] %vm100_vm0, %v210_v27 }

// kernel: resnet_shard1_forward.78
= control target key start
LH: loop header
LB: loop body
LE: loop exit
PB: predicated region body
PF: predicated region fallthrough
CT: control target
= control target key end

     0   :  { %vm12_vm0 = vcmask 517120   ;;  %vm31_vm1 = vcmask 523264   ;;  %v133_v0 = vmov 0.0   ;;  %vm70_vm2 = vcmask 516096   ;;  %s239_s1 = inlined_call_operand.vmem [shape: f32[2,64], index: 1, kind: output, shape index: {}]   ;;  %s240_s0 = inlined_call_operand.vmem [shape: f32[128,64], index: 0, kind: input, shape index: {}]  }
   0x1   :  { %13 = vst.msk [vmem:[%s239_s1] sm:$0x3] %vm12_vm0, %v133_v0  ;;  %v14_v1 = vld [vmem:[%s240_s0] sm:$0xff]  ;;  %v15_v2 = vld [vmem:[%s240_s0 + $0x8] sm:$0xff]  ;;  %v16_v3 = vld [vmem:[%s240_s0 + $0x10] sm:$0xff] }
   0x2   :  { %v32_v4 = vsel %vm31_vm1, %v14_v1, 0.0  ;;  %v33_v5 = vsel %vm31_vm1, %v15_v2, 0.0  ;;  %v35_v6 = vsel %vm31_vm1, %v16_v3, 0.0  ;;  %v17_v7 = vld [vmem:[%s240_s0 + $0x18] sm:$0xff]  ;;  %v18_v10 = vld [vmem:[%s240_s0 + $0x20] sm:$0xff]  ;;  %v19_v13 = vld [vmem:[%s240_s0 + $0x28] sm:$0xff]  ;;  %v73_v15 = vmul.f32 %v14_v1, %v14_v1 }
   0x3   :  { %v34_v8 = vadd.f32 %v33_v5, %v32_v4  ;;  %v37_v9 = vsel %vm31_vm1, %v17_v7, 0.0  ;;  %v39_v12 = vsel %vm31_vm1, %v18_v10, 0.0  ;;  %v74_v16 = vmul.f32 %v15_v2, %v15_v2  ;;  %v20_v19 = vld [vmem:[%s240_s0 + $0x30] sm:$0xff]  ;;  %v21_v24 = vld [vmem:[%s240_s0 + $0x38] sm:$0xff]  ;;  %v22_v31 = vld [vmem:[%s240_s0 + $0x40] sm:$0xff] }
   0x4   :  { %v75_v17 = vmul.f32 %v16_v3, %v16_v3  ;;  %v41_v18 = vsel %vm31_vm1, %v19_v13, 0.0  ;;  %v76_v21 = vmul.f32 %v17_v7, %v17_v7  ;;  %v43_v22 = vsel %vm31_vm1, %v20_v19, 0.0  ;;  %v23_v37 = vld [vmem:[%s240_s0 + $0x48] sm:$0xff]  ;;  %v24_v43 = vld [vmem:[%s240_s0 + $0x50] sm:$0xff]  ;;  %v25_v49 = vld [vmem:[%s240_s0 + $0x58] sm:$0xff] }
   0x5   :  { %v36_v11 = vadd.f32 %v35_v6, %v34_v8  ;;  %v77_v23 = vmul.f32 %v18_v10, %v18_v10  ;;  %v89_v26 = vsel %vm31_vm1, %v73_v15, 0.0  ;;  %v90_v27 = vsel %vm31_vm1, %v74_v16, 0.0  ;;  %v26_v55 = vld [vmem:[%s240_s0 + $0x60] sm:$0xff]  ;;  %v27_v61 = vld [vmem:[%s240_s0 + $0x68] sm:$0xff]  ;;  %v28_v3 = vld [vmem:[%s240_s0 + $0x70] sm:$0xff] }
   0x6   :  { %v92_v28 = vsel %vm31_vm1, %v75_v17, 0.0  ;;  %v45_v29 = vsel %vm31_vm1, %v21_v24, 0.0  ;;  %v91_v30 = vadd.f32 %v90_v27, %v89_v26  ;;  %v78_v33 = vmul.f32 %v19_v13, %v19_v13 }
   0x7   :  { %v38_v14 = vadd.f32 %v37_v9, %v36_v11  ;;  %v94_v34 = vsel %vm31_vm1, %v76_v21, 0.0  ;;  %v47_v35 = vsel %vm31_vm1, %v22_v31, 0.0  ;;  %v79_v39 = vmul.f32 %v20_v19, %v20_v19  ;;  %v29_v9 = vld [vmem:[%s240_s0 + $0x78] sm:$0xff] }
   0x8   :  { %v93_v36 = vadd.f32 %v92_v28, %v91_v30  ;;  %v96_v40 = vsel %vm31_vm1, %v77_v23, 0.0  ;;  %v49_v41 = vsel %vm31_vm1, %v23_v37, 0.0  ;;  %v80_v45 = vmul.f32 %v21_v24, %v21_v24 }
   0x9   :  { %v40_v20 = vadd.f32 %v39_v12, %v38_v14  ;;  %v98_v46 = vsel %vm31_vm1, %v78_v33, 0.0  ;;  %v51_v47 = vsel %vm31_vm1, %v24_v43, 0.0  ;;  %v81_v51 = vmul.f32 %v22_v31, %v22_v31 }
   0xa   :  { %v95_v42 = vadd.f32 %v94_v34, %v93_v36  ;;  %v100_v52 = vsel %vm31_vm1, %v79_v39, 0.0  ;;  %v53_v53 = vsel %vm31_vm1, %v25_v49, 0.0  ;;  %v82_v57 = vmul.f32 %v23_v37, %v23_v37  ;;  %v30_v36 = vld [vmem:[%s239_s1] sm:$0x1] }
   0xb   :  { %v42_v25 = vadd.f32 %v41_v18, %v40_v20  ;;  %v102_v58 = vsel %vm31_vm1, %v80_v45, 0.0  ;;  %v55_v59 = vsel %vm31_vm1, %v26_v55, 0.0  ;;  %v83_v63 = vmul.f32 %v24_v43, %v24_v43 }
   0xc   :  { %v97_v48 = vadd.f32 %v96_v40, %v95_v42  ;;  %v104_v0 = vsel %vm31_vm1, %v81_v51, 0.0  ;;  %v57_v1 = vsel %vm31_vm1, %v27_v61, 0.0  ;;  %v84_v5 = vmul.f32 %v25_v49, %v25_v49 }
   0xd   :  { %v44_v32 = vadd.f32 %v43_v22, %v42_v25  ;;  %v106_v6 = vsel %vm31_vm1, %v82_v57, 0.0  ;;  %v59_v7 = vsel %vm31_vm1, %v28_v3, 0.0  ;;  %v85_v11 = vmul.f32 %v26_v55, %v26_v55 }
   0xe   :  { %v99_v54 = vadd.f32 %v98_v46, %v97_v48  ;;  %v108_v12 = vsel %vm31_vm1, %v83_v63, 0.0  ;;  %v61_v13 = vsel %vm31_vm1, %v29_v9, 0.0  ;;  %v86_v16 = vmul.f32 %v27_v61, %v27_v61 }
   0xf   :  { %v46_v38 = vadd.f32 %v45_v29, %v44_v32  ;;  %v110_v17 = vsel %vm31_vm1, %v84_v5, 0.0  ;;  %v87_v20 = vmul.f32 %v28_v3, %v28_v3  ;;  %v112_v21 = vsel %vm31_vm1, %v85_v11, 0.0 }
  0x10   :  { %v101_v60 = vadd.f32 %v100_v52, %v99_v54  ;;  %v88_v24 = vmul.f32 %v29_v9, %v29_v9  ;;  %v114_v25 = vsel %vm31_vm1, %v86_v16, 0.0 }
  0x11   :  { %v48_v44 = vadd.f32 %v47_v35, %v46_v38  ;;  %v116_v28 = vsel %vm31_vm1, %v87_v20, 0.0 }
  0x12   :  { %v103_v2 = vadd.f32 %v102_v58, %v101_v60  ;;  %v118_v31 = vsel %vm31_vm1, %v88_v24, 0.0 }
  0x13   :  { %v50_v50 = vadd.f32 %v49_v41, %v48_v44  ;;  %v72_v44 = vld [vmem:[%s239_s1 + $0x1] sm:$0x1] }
  0x14   :  { %v105_v8 = vadd.f32 %v104_v0, %v103_v2 }
  0x15   :  { %v52_v56 = vadd.f32 %v51_v47, %v50_v50 }
  0x16   :  { %v107_v14 = vadd.f32 %v106_v6, %v105_v8 }
  0x17   :  { %v54_v62 = vadd.f32 %v53_v53, %v52_v56 }
  0x18   :  { %v109_v18 = vadd.f32 %v108_v12, %v107_v14 }
  0x19   :  { %v56_v4 = vadd.f32 %v55_v59, %v54_v62 }
  0x1a   :  { %v111_v22 = vadd.f32 %v110_v17, %v109_v18 }
  0x1b   :  { %v58_v10 = vadd.f32 %v57_v1, %v56_v4 }
  0x1c   :  { %v113_v26 = vadd.f32 %v112_v21, %v111_v22 }
  0x1d   :  { %v60_v15 = vadd.f32 %v59_v7, %v58_v10 }
  0x1e   :  { %v115_v29 = vadd.f32 %v114_v25, %v113_v26 }
  0x1f   :  { %v62_v19 = vadd.f32 %v61_v13, %v60_v15 }
  0x20   :  { %v117_v32 = vadd.f32 %v116_v28, %v115_v29 }
  0x21   :  { %v63_v23 = vrot.slane %v62_v19, 4 }
  0x22   :  { %v119_v34 = vadd.f32 %v118_v31, %v117_v32 }
  0x23   :  { %v64_v27 = vadd.f32 %v63_v23, %v62_v19 }
  0x24   :  { %v120_v37 = vrot.slane %v119_v34, 4 }
  0x25   :  { %v65_v30 = vrot.slane %v64_v27, 2 }
  0x26   :  { %v121_v39 = vadd.f32 %v120_v37, %v119_v34 }
  0x27   :  { %v66_v33 = vadd.f32 %v65_v30, %v64_v27 }
  0x28   :  { %v122_v41 = vrot.slane %v121_v39, 2 }
  0x29   :  { %v67_v35 = vrot.slane %v66_v33, 1 }
  0x2a   :  { %v123_v42 = vadd.f32 %v122_v41, %v121_v39 }
  0x2b   :  { %v68_v38 = vadd.f32 %v67_v35, %v66_v33 }
  0x2c   :  { %v124_v43 = vrot.slane %v123_v42, 1 }
  0x2d   :  { %v69_v40 = vadd.f32 %v68_v38, %v30_v36 }
  0x2e   :  { %v125_v45 = vadd.f32 %v124_v43, %v123_v42 }
  0x2f   :  { %71 = vst.msk [vmem:[%s239_s1] sm:$0x1] %vm70_vm2, %v69_v40 }
  0x30   :  { %v126_v46 = vadd.f32 %v125_v45, %v72_v44 }
  0x32   :  { %127 = vst.msk [vmem:[%s239_s1 + $0x1] sm:$0x1] %vm70_vm2, %v126_v46 }

// kernel: resnet_shard1_forward.79
= control target key start
LH: loop header
LB: loop body
LE: loop exit
PB: predicated region body
PF: predicated region fallthrough
CT: control target
= control target key end

     0   :  { %v148_v6 = vmov 1966171168   ;;  %v31_v8 = vlaneseq  ;;  %vm124_vm0 = vcmask 523264   ;;  %s295_s1 = inlined_call_operand.vmem [shape: f32[2,64], index: 1, kind: input, shape index: {}]   ;;  %s296_s2 = inlined_call_operand.vmem [shape: f32[1,64], index: 2, kind: input, shape index: {}]   ;;  %s297_s0 = inlined_call_operand.vmem [shape: f32[128,64], index: 0, kind: input, shape index: {}]   ;;  %s298_s3 = inlined_call_operand.vmem [shape: f32[1,64], index: 3, kind: input, shape index: {}]   ;;  %s299_s4 = inlined_call_operand.vmem [shape: f32[128,64], index: 4, kind: output, shape index: {}]  }
   0x1   :  { %v17_v0 = vld [vmem:[%s295_s1] sm:$0x3]  ;;  %v29_v7 = vunpack.c.l.s4 %v148_v6  ;;  %v49_v21 = vld [vmem:[%s297_s0 + $0x8] sm:$0xff]  ;;  %v50_v22 = vld [vmem:[%s297_s0 + $0x10] sm:$0xff] }
   0x2   :  { %v18_v1 = vmul.f32 0.0078125, %v17_v0  ;;  %v32_v10 = vshrl.u32 %v31_v8, 7  ;;  %v24_v15 = vld [vmem:[%s296_s2] sm:$0x1]  ;;  %v51_v23 = vld [vmem:[%s297_s0 + $0x18] sm:$0xff]  ;;  %v53_v27 = vld [vmem:[%s297_s0 + $0x28] sm:$0xff] }
   0x3   :  { %v30_v9 = vunpack.c.0.s8 %v29_v7  ;;  %v45_v19 = vld [vmem:[%s298_s3] sm:$0x1]  ;;  %v54_v28 = vld [vmem:[%s297_s0 + $0x30] sm:$0xff]  ;;  %v55_v29 = vld [vmem:[%s297_s0 + $0x38] sm:$0xff] }
   0x4   :  { %v19_v2 = vmul.f32 %v18_v1, %v18_v1  ;;  %v67_v17 = vsub.s32 0, %v32_v10  ;;  %v48_v20 = vld [vmem:[%s297_s0] sm:$0xff]  ;;  %v57_v31 = vld [vmem:[%s297_s0 + $0x48] sm:$0xff]  ;;  %v58_v32 = vld [vmem:[%s297_s0 + $0x50] sm:$0xff] }
   0x5   :  { %v33_v11 = vsub.s32 %v30_v9, %v32_v10  ;;  %v52_v24 = vld [vmem:[%s297_s0 + $0x20] sm:$0xff]  ;;  %v59_v37 = vld [vmem:[%s297_s0 + $0x58] sm:$0xff]  ;;  %v61_v39 = vld [vmem:[%s297_s0 + $0x68] sm:$0xff] }
   0x6   :  { %v21_v3 = vrot.slane %v19_v2, 7  ;;  %v56_v30 = vld [vmem:[%s297_s0 + $0x40] sm:$0xff]  ;;  %v62_v0 = vld [vmem:[%s297_s0 + $0x70] sm:$0xff] }
   0x7   :  { %v60_v38 = vld [vmem:[%s297_s0 + $0x60] sm:$0xff] }
   0x8   :  { %v23_v4 = vsub.f32 %v18_v1, %v21_v3 }
   0xa   :  { %v25_v5 = vadd.f32 1e-05, %v23_v4 }
   0xc   :  { %146 = vrsqrt.f32 %v25_v5 }
  0x19   :  { %v147_v12 = vpop.eup %146 }
  0x1a   :  { %v34_v13 = vrot.slane %v147_v12, %v33_v11 }
  0x1c   :  { %v35_v14 = vcombine.high %v34_v13, %v34_v13 }
  0x1e   :  { %v42_v16 = vrot.slane %v35_v14, %v33_v11 }
  0x20   :  { %v44_v18 = vmul.f32 %v42_v16, %v24_v15 }
  0x22   :  { %v46_v25 = vmul.f32 %v44_v18, %v18_v1  ;;  %v68_v26 = vrot.slane %v44_v18, %v67_v17  ;;  %v63_v1 = vld [vmem:[%s297_s0 + $0x78] sm:$0xff] }
  0x24   :  { %v47_v33 = vsub.f32 %v45_v19, %v46_v25  ;;  %v70_v34 = vmul.f32 %v68_v26, %v48_v20  ;;  %v71_v35 = vmul.f32 %v68_v26, %v49_v21  ;;  %v72_v36 = vmul.f32 %v68_v26, %v50_v22 }
  0x25   :  { %v73_v40 = vmul.f32 %v68_v26, %v51_v23  ;;  %v74_v41 = vmul.f32 %v68_v26, %v52_v24  ;;  %v75_v42 = vmul.f32 %v68_v26, %v53_v27  ;;  %v76_v43 = vmul.f32 %v68_v26, %v54_v28 }
  0x26   :  { %v90_v44 = vrot.slane %v47_v33, %v67_v17  ;;  %v77_v45 = vmul.f32 %v68_v26, %v55_v29  ;;  %v78_v46 = vmul.f32 %v68_v26, %v56_v30  ;;  %v79_v47 = vmul.f32 %v68_v26, %v57_v31 }
  0x27   :  { %v80_v48 = vmul.f32 %v68_v26, %v58_v32  ;;  %v81_v49 = vmul.f32 %v68_v26, %v59_v37  ;;  %v82_v50 = vmul.f32 %v68_v26, %v60_v38  ;;  %v83_v51 = vmul.f32 %v68_v26, %v61_v39 }
  0x28   :  { %v92_v52 = vadd.f32 %v90_v44, %v70_v34  ;;  %v93_v53 = vadd.f32 %v90_v44, %v71_v35  ;;  %v94_v54 = vadd.f32 %v90_v44, %v72_v36  ;;  %v95_v55 = vadd.f32 %v90_v44, %v73_v40 }
  0x29   :  { %v96_v56 = vadd.f32 %v90_v44, %v74_v41  ;;  %v97_v57 = vadd.f32 %v90_v44, %v75_v42  ;;  %v98_v58 = vadd.f32 %v90_v44, %v76_v43  ;;  %v99_v59 = vadd.f32 %v90_v44, %v77_v45 }
  0x2a   :  { %v108_v60 = vmax.f32 %v92_v52, 0.0  ;;  %v109_v61 = vmax.f32 %v93_v53, 0.0  ;;  %v110_v62 = vmax.f32 %v94_v54, 0.0  ;;  %v111_v63 = vmax.f32 %v95_v55, 0.0 }
  0x2b   :  { %v112_v2 = vmax.f32 %v96_v56, 0.0  ;;  %v113_v3 = vmax.f32 %v97_v57, 0.0  ;;  %v114_v4 = vmax.f32 %v98_v58, 0.0  ;;  %v115_v5 = vmax.f32 %v99_v59, 0.0 }
  0x2c   :  { %125 = vst.msk [vmem:[%s299_s4] sm:$0xff] %vm124_vm0, %v108_v60  ;;  %126 = vst.msk [vmem:[%s299_s4 + $0x8] sm:$0xff] %vm124_vm0, %v109_v61  ;;  %v100_v6 = vadd.f32 %v90_v44, %v78_v46  ;;  %v101_v7 = vadd.f32 %v90_v44, %v79_v47  ;;  %v102_v8 = vadd.f32 %v90_v44, %v80_v48 }
  0x2d   :  { %127 = vst.msk [vmem:[%s299_s4 + $0x10] sm:$0xff] %vm124_vm0, %v110_v62  ;;  %128 = vst.msk [vmem:[%s299_s4 + $0x18] sm:$0xff] %vm124_vm0, %v111_v63  ;;  %v103_v9 = vadd.f32 %v90_v44, %v81_v49  ;;  %v104_v10 = vadd.f32 %v90_v44, %v82_v50  ;;  %v105_v11 = vadd.f32 %v90_v44, %v83_v51 }
  0x2e   :  { %129 = vst.msk [vmem:[%s299_s4 + $0x20] sm:$0xff] %vm124_vm0, %v112_v2  ;;  %130 = vst.msk [vmem:[%s299_s4 + $0x28] sm:$0xff] %vm124_vm0, %v113_v3  ;;  %v84_v12 = vmul.f32 %v68_v26, %v62_v0  ;;  %v85_v13 = vmul.f32 %v68_v26, %v63_v1  ;;  %v116_v14 = vmax.f32 %v100_v6, 0.0  ;;  %v117_v15 = vmax.f32 %v101_v7, 0.0 }
  0x2f   :  { %131 = vst.msk [vmem:[%s299_s4 + $0x30] sm:$0xff] %vm124_vm0, %v114_v4  ;;  %132 = vst.msk [vmem:[%s299_s4 + $0x38] sm:$0xff] %vm124_vm0, %v115_v5  ;;  %v118_v16 = vmax.f32 %v102_v8, 0.0  ;;  %v119_v17 = vmax.f32 %v103_v9, 0.0  ;;  %v120_v18 = vmax.f32 %v104_v10, 0.0  ;;  %v121_v19 = vmax.f32 %v105_v11, 0.0 }
  0x30   :  { %v106_v20 = vadd.f32 %v90_v44, %v84_v12  ;;  %v107_v21 = vadd.f32 %v90_v44, %v85_v13  ;;  %133 = vst.msk [vmem:[%s299_s4 + $0x40] sm:$0xff] %vm124_vm0, %v116_v14  ;;  %134 = vst.msk [vmem:[%s299_s4 + $0x48] sm:$0xff] %vm124_vm0, %v117_v15 }
  0x31   :  { %135 = vst.msk [vmem:[%s299_s4 + $0x50] sm:$0xff] %vm124_vm0, %v118_v16  ;;  %136 = vst.msk [vmem:[%s299_s4 + $0x58] sm:$0xff] %vm124_vm0, %v119_v17 }
  0x32   :  { %137 = vst.msk [vmem:[%s299_s4 + $0x60] sm:$0xff] %vm124_vm0, %v120_v18  ;;  %138 = vst.msk [vmem:[%s299_s4 + $0x68] sm:$0xff] %vm124_vm0, %v121_v19  ;;  %v122_v22 = vmax.f32 %v106_v20, 0.0  ;;  %v123_v23 = vmax.f32 %v107_v21, 0.0 }
  0x34   :  { %139 = vst.msk [vmem:[%s299_s4 + $0x70] sm:$0xff] %vm124_vm0, %v122_v22  ;;  %140 = vst.msk [vmem:[%s299_s4 + $0x78] sm:$0xff] %vm124_vm0, %v123_v23 }

// kernel: resnet_shard1_forward.88
= control target key start
LH: loop header
LB: loop body
LE: loop exit
PB: predicated region body
PF: predicated region fallthrough
CT: control target
= control target key end

     0   :  { %v315_v6 = vmov 1966171168   ;;  %v34_v8 = vlaneseq  ;;  %v316_v11 = vmov 857870592   ;;  %s779_s2 = inlined_call_operand.vmem [shape: f32[2,256], index: 2, kind: input, shape index: {}]   ;;  %s780_s3 = inlined_call_operand.vmem [shape: f32[1,256], index: 3, kind: input, shape index: {}]   ;;  %s781_s0 = inlined_call_operand.vmem [shape: f32[128,256], index: 0, kind: input, shape index: {}]   ;;  %s782_s4 = inlined_call_operand.vmem [shape: f32[1,256], index: 4, kind: input, shape index: {}]   ;;  %s783_s1 = inlined_call_operand.vmem [shape: f32[128,256], index: 1, kind: input, shape index: {}]   ;;  %s784_s5 = inlined_call_operand.vmem [shape: f32[128,256], index: 5, kind: output, shape index: {}]  }
   0x1   :  { %v20_v0 = vld [vmem:[%s779_s2] sm:$0xf]  ;;  %v32_v7 = vunpack.c.l.s4 %v315_v6  ;;  %v44_v12 = vunpack.c.l.s4 %v316_v11  ;;  %v63_v24 = vld [vmem:[%s781_s0 + $0x8] sm:$0xff]  ;;  %v64_v25 = vld [vmem:[%s781_s0 + $0x10] sm:$0xff] }
   0x2   :  { %v21_v1 = vmul.f32 0.0078125, %v20_v0  ;;  %v350_v10 = vshrl.u32 %v34_v8, 7  ;;  %v27_v17 = vld [vmem:[%s780_s3] sm:$0x3]  ;;  %v65_v26 = vld [vmem:[%s781_s0 + $0x18] sm:$0xff]  ;;  %v67_v28 = vld [vmem:[%s781_s0 + $0x28] sm:$0xff] }
   0x3   :  { %v33_v9 = vunpack.c.0.s8 %v32_v7  ;;  %v45_v14 = vunpack.c.0.s8 %v44_v12  ;;  %v62_v23 = vld [vmem:[%s781_s0] sm:$0xff]  ;;  %v68_v32 = vld [vmem:[%s781_s0 + $0x30] sm:$0xff]  ;;  %v69_v33 = vld [vmem:[%s781_s0 + $0x38] sm:$0xff] }
   0x4   :  { %v22_v2 = vmul.f32 %v21_v1, %v21_v1  ;;  %v96_v20 = vsub.s32 0, %v350_v10  ;;  %v100_v21 = vsub.s32 1, %v350_v10  ;;  %v66_v27 = vld [vmem:[%s781_s0 + $0x20] sm:$0xff]  ;;  %v71_v36 = vld [vmem:[%s781_s0 + $0x48] sm:$0xff]  ;;  %v72_v37 = vld [vmem:[%s781_s0 + $0x50] sm:$0xff] }
   0x5   :  { %v36_v13 = vsub.s32 %v33_v9, %v350_v10  ;;  %v48_v19 = vsub.s32 %v45_v14, %v350_v10  ;;  %v70_v34 = vld [vmem:[%s781_s0 + $0x40] sm:$0xff]  ;;  %v73_v38 = vld [vmem:[%s781_s0 + $0x58] sm:$0xff]  ;;  %v75_v44 = vld [vmem:[%s781_s0 + $0x68] sm:$0xff] }
   0x6   :  { %v24_v3 = vrot.slane %v22_v2, 7  ;;  %v41_v35 = vld [vmem:[%s782_s4] sm:$0x3]  ;;  %v76_v45 = vld [vmem:[%s781_s0 + $0x70] sm:$0xff]  ;;  %v77_v50 = vld [vmem:[%s781_s0 + $0x78] sm:$0xff] }
   0x7   :  { %v74_v43 = vld [vmem:[%s781_s0 + $0x60] sm:$0xff]  ;;  %v79_v52 = vld [vmem:[%s781_s0 + $0x88] sm:$0xff]  ;;  %v80_v57 = vld [vmem:[%s781_s0 + $0x90] sm:$0xff] }
   0x8   :  { %v26_v4 = vsub.f32 %v21_v1, %v24_v3  ;;  %v78_v51 = vld [vmem:[%s781_s0 + $0x80] sm:$0xff]  ;;  %v81_v58 = vld [vmem:[%s781_s0 + $0x98] sm:$0xff]  ;;  %v83_v0 = vld [vmem:[%s781_s0 + $0xa8] sm:$0xff] }
   0x9   :  { %v82_v59 = vld [vmem:[%s781_s0 + $0xa0] sm:$0xff]  ;;  %v85_v2 = vld [vmem:[%s781_s0 + $0xb8] sm:$0xff]  ;;  %v87_v8 = vld [vmem:[%s781_s0 + $0xc8] sm:$0xff] }
   0xa   :  { %v28_v5 = vadd.f32 1e-05, %v26_v4  ;;  %v86_v7 = vld [vmem:[%s781_s0 + $0xc0] sm:$0xff]  ;;  %v88_v9 = vld [vmem:[%s781_s0 + $0xd0] sm:$0xff] }
   0xc   :  { %313 = vrsqrt.f32 %v28_v5 }
  0x19   :  { %v314_v15 = vpop.eup %313 }
  0x1a   :  { %v37_v16 = vrot.slane %v314_v15, %v36_v13  ;;  %v179_v15 = vld [vmem:[%s783_s1] sm:$0xff] }
  0x1c   :  { %v38_v18 = vcombine.high %v37_v16, %v37_v16 }
  0x1e   :  { %v40_v22 = vmul.f32 %v38_v18, %v27_v17  ;;  %v180_v17 = vld [vmem:[%s783_s1 + $0x8] sm:$0xff] }
  0x20   :  { %v49_v29 = vrot.slane %v40_v22, %v48_v19  ;;  %v377_v30 = vrot.slane %v40_v22, %v96_v20  ;;  %v379_v31 = vrot.slane %v40_v22, %v100_v21  ;;  %v182_v22 = vld [vmem:[%s783_s1 + $0x18] sm:$0xff] }
  0x22   :  { %v51_v39 = vmul.f32 %v49_v29, %v21_v1  ;;  %v104_v40 = vmul.f32 %v377_v30, %v62_v23  ;;  %v105_v41 = vmul.f32 %v379_v31, %v63_v24  ;;  %v106_v42 = vmul.f32 %v377_v30, %v64_v25  ;;  %v84_v1 = vld [vmem:[%s781_s0 + $0xb0] sm:$0xff] }
  0x23   :  { %v107_v46 = vmul.f32 %v379_v31, %v65_v26  ;;  %v108_v47 = vmul.f32 %v377_v30, %v66_v27  ;;  %v109_v48 = vmul.f32 %v379_v31, %v67_v28  ;;  %v110_v49 = vmul.f32 %v377_v30, %v68_v32 }
  0x24   :  { %v59_v53 = vrot.slane %v51_v39, %v36_v13  ;;  %v111_v54 = vmul.f32 %v379_v31, %v69_v33  ;;  %v429_v55 = vmul.f32 %v377_v30, %v70_v34  ;;  %v432_v56 = vmul.f32 %v379_v31, %v71_v36  ;;  %v184_v33 = vld [vmem:[%s783_s1 + $0x28] sm:$0xff]  ;;  %v185_v34 = vld [vmem:[%s783_s1 + $0x30] sm:$0xff] }
  0x25   :  { %v444_v60 = vmul.f32 %v377_v30, %v72_v37  ;;  %v447_v61 = vmul.f32 %v379_v31, %v73_v38  ;;  %v450_v62 = vmul.f32 %v377_v30, %v74_v43  ;;  %v453_v63 = vmul.f32 %v379_v31, %v75_v44 }
  0x26   :  { %v61_v3 = vsub.f32 %v41_v35, %v59_v53  ;;  %v465_v4 = vmul.f32 %v377_v30, %v76_v45  ;;  %v468_v5 = vmul.f32 %v379_v31, %v77_v50  ;;  %v471_v6 = vmul.f32 %v377_v30, %v78_v51  ;;  %v186_v35 = vld [vmem:[%s783_s1 + $0x38] sm:$0xff]  ;;  %v187_v51 = vld [vmem:[%s783_s1 + $0x40] sm:$0xff] }
  0x27   :  { %v483_v10 = vmul.f32 %v379_v31, %v79_v52  ;;  %v486_v11 = vmul.f32 %v377_v30, %v80_v57  ;;  %v489_v12 = vmul.f32 %v379_v31, %v81_v58  ;;  %v492_v13 = vmul.f32 %v377_v30, %v82_v59 }
  0x28   :  { %v494_v14 = vrot.slane %v61_v3, %v96_v20  ;;  %v499_v16 = vrot.slane %v61_v3, %v100_v21  ;;  %v505_v18 = vmul.f32 %v379_v31, %v83_v0  ;;  %v508_v19 = vmul.f32 %v377_v30, %v84_v1  ;;  %v181_v20 = vld [vmem:[%s783_s1 + $0x10] sm:$0xff]  ;;  %v183_v21 = vld [vmem:[%s783_s1 + $0x20] sm:$0xff]  ;;  %v190_v1 = vld [vmem:[%s783_s1 + $0x58] sm:$0xff] }
  0x29   :  { %v520_v23 = vmul.f32 %v379_v31, %v85_v2  ;;  %v523_v24 = vmul.f32 %v377_v30, %v86_v7  ;;  %v526_v25 = vmul.f32 %v379_v31, %v87_v8  ;;  %v529_v26 = vmul.f32 %v377_v30, %v88_v9  ;;  %v191_v2 = vld [vmem:[%s783_s1 + $0x60] sm:$0xff] }
  0x2a   :  { %v147_v27 = vadd.f32 %v494_v14, %v104_v40  ;;  %v148_v28 = vadd.f32 %v499_v16, %v105_v41  ;;  %v149_v29 = vadd.f32 %v494_v14, %v106_v42  ;;  %v150_v32 = vadd.f32 %v499_v16, %v107_v46 }
  0x2b   :  { %v151_v36 = vadd.f32 %v494_v14, %v108_v47  ;;  %v152_v37 = vadd.f32 %v499_v16, %v109_v48  ;;  %v153_v38 = vadd.f32 %v494_v14, %v110_v49  ;;  %v154_v39 = vadd.f32 %v499_v16, %v111_v54  ;;  %v188_v49 = vld [vmem:[%s783_s1 + $0x48] sm:$0xff]  ;;  %v189_v54 = vld [vmem:[%s783_s1 + $0x50] sm:$0xff] }
  0x2c   :  { %v211_v40 = vadd.f32 %v179_v15, %v147_v27  ;;  %v212_v41 = vadd.f32 %v180_v17, %v148_v28  ;;  %v213_v42 = vadd.f32 %v181_v20, %v149_v29  ;;  %v214_v43 = vadd.f32 %v182_v22, %v150_v32  ;;  %v192_v15 = vld [vmem:[%s783_s1 + $0x68] sm:$0xff]  ;;  %v193_v17 = vld [vmem:[%s783_s1 + $0x70] sm:$0xff] }
  0x2d   :  { %v215_v44 = vadd.f32 %v183_v21, %v151_v36  ;;  %v216_v45 = vadd.f32 %v184_v33, %v152_v37  ;;  %v217_v46 = vadd.f32 %v185_v34, %v153_v38  ;;  %v218_v50 = vadd.f32 %v186_v35, %v154_v39 }
  0x2e   :  { %v243_v52 = vmax.f32 %v211_v40, 0.0  ;;  %v244_v47 = vmax.f32 %v212_v41, 0.0  ;;  %v245_v53 = vmax.f32 %v213_v42, 0.0  ;;  %v246_v48 = vmax.f32 %v214_v43, 0.0  ;;  %v198_v42 = vld [vmem:[%s783_s1 + $0x98] sm:$0xff]  ;;  %v199_v43 = vld [vmem:[%s783_s1 + $0xa0] sm:$0xff] }
  0x2f   :  { %v247_v57 = vmax.f32 %v215_v44, 0.0  ;;  %v248_v58 = vmax.f32 %v216_v45, 0.0  ;;  %v249_v59 = vmax.f32 %v217_v46, 0.0  ;;  %v250_v0 = vmax.f32 %v218_v50, 0.0 }
  0x30   :  { %275 = vst [vmem:[%s784_s5] sm:$0xff] %v243_v52  ;;  %276 = vst [vmem:[%s784_s5 + $0x8] sm:$0xff] %v244_v47  ;;  %v155_v3 = vadd.f32 %v494_v14, %v429_v55  ;;  %v156_v7 = vadd.f32 %v499_v16, %v432_v56  ;;  %v157_v8 = vadd.f32 %v494_v14, %v444_v60  ;;  %v194_v55 = vld [vmem:[%s783_s1 + $0x78] sm:$0xff]  ;;  %v201_v52 = vld [vmem:[%s783_s1 + $0xb0] sm:$0xff] }
  0x31   :  { %277 = vst [vmem:[%s784_s5 + $0x10] sm:$0xff] %v245_v53  ;;  %278 = vst [vmem:[%s784_s5 + $0x18] sm:$0xff] %v246_v48  ;;  %v158_v9 = vadd.f32 %v499_v16, %v447_v61  ;;  %v159_v56 = vadd.f32 %v494_v14, %v450_v62  ;;  %v160_v60 = vadd.f32 %v499_v16, %v453_v63  ;;  %v195_v62 = vld [vmem:[%s783_s1 + $0x80] sm:$0xff] }
  0x32   :  { %279 = vst [vmem:[%s784_s5 + $0x20] sm:$0xff] %v247_v57  ;;  %280 = vst [vmem:[%s784_s5 + $0x28] sm:$0xff] %v248_v58  ;;  %v161_v61 = vadd.f32 %v494_v14, %v465_v4  ;;  %v162_v20 = vadd.f32 %v499_v16, %v468_v5  ;;  %v219_v22 = vadd.f32 %v187_v51, %v155_v3  ;;  %v196_v4 = vld [vmem:[%s783_s1 + $0x88] sm:$0xff]  ;;  %v197_v5 = vld [vmem:[%s783_s1 + $0x90] sm:$0xff] }
  0x33   :  { %281 = vst [vmem:[%s784_s5 + $0x30] sm:$0xff] %v249_v59  ;;  %282 = vst [vmem:[%s784_s5 + $0x38] sm:$0xff] %v250_v0  ;;  %v220_v21 = vadd.f32 %v188_v49, %v156_v7  ;;  %v221_v27 = vadd.f32 %v189_v54, %v157_v8  ;;  %v222_v28 = vadd.f32 %v190_v1, %v158_v9  ;;  %v200_v51 = vld [vmem:[%s783_s1 + $0xa8] sm:$0xff]  ;;  %v92_v8 = vld [vmem:[%s781_s0 + $0xf0] sm:$0xff] }
  0x34   :  { %v223_v29 = vadd.f32 %v191_v2, %v159_v56  ;;  %v224_v32 = vadd.f32 %v192_v15, %v160_v60  ;;  %v225_v33 = vadd.f32 %v193_v17, %v161_v61  ;;  %v226_v34 = vadd.f32 %v194_v55, %v162_v20  ;;  %v93_v9 = vld [vmem:[%s781_s0 + $0xf8] sm:$0xff]  ;;  %v204_v60 = vld [vmem:[%s783_s1 + $0xc8] sm:$0xff]  ;;  %v205_v61 = vld [vmem:[%s783_s1 + $0xd0] sm:$0xff] }
  0x35   :  { %v251_v35 = vmax.f32 %v219_v22, 0.0  ;;  %v252_v63 = vmax.f32 %v220_v21, 0.0  ;;  %v253_v36 = vmax.f32 %v221_v27, 0.0  ;;  %v254_v37 = vmax.f32 %v222_v28, 0.0 }
  0x36   :  { %v255_v38 = vmax.f32 %v223_v29, 0.0  ;;  %v256_v39 = vmax.f32 %v224_v32, 0.0  ;;  %v257_v40 = vmax.f32 %v225_v33, 0.0  ;;  %v258_v41 = vmax.f32 %v226_v34, 0.0 }
  0x37   :  { %283 = vst [vmem:[%s784_s5 + $0x40] sm:$0xff] %v251_v35  ;;  %284 = vst [vmem:[%s784_s5 + $0x48] sm:$0xff] %v252_v63  ;;  %v163_v44 = vadd.f32 %v494_v14, %v471_v6  ;;  %v164_v45 = vadd.f32 %v499_v16, %v483_v10  ;;  %v165_v46 = vadd.f32 %v494_v14, %v486_v11  ;;  %v202_v6 = vld [vmem:[%s783_s1 + $0xb8] sm:$0xff]  ;;  %v208_v63 = vld [vmem:[%s783_s1 + $0xe8] sm:$0xff] }
  0x38   :  { %285 = vst [vmem:[%s784_s5 + $0x50] sm:$0xff] %v253_v36  ;;  %286 = vst [vmem:[%s784_s5 + $0x58] sm:$0xff] %v254_v37  ;;  %v166_v50 = vadd.f32 %v499_v16, %v489_v12  ;;  %v167_v10 = vadd.f32 %v494_v14, %v492_v13  ;;  %v168_v11 = vadd.f32 %v499_v16, %v505_v18  ;;  %v203_v13 = vld [vmem:[%s783_s1 + $0xc0] sm:$0xff]  ;;  %v89_v18 = vld [vmem:[%s781_s0 + $0xd8] sm:$0xff] }
  0x39   :  { %287 = vst [vmem:[%s784_s5 + $0x60] sm:$0xff] %v255_v38  ;;  %288 = vst [vmem:[%s784_s5 + $0x68] sm:$0xff] %v256_v39  ;;  %v169_v12 = vadd.f32 %v494_v14, %v508_v19  ;;  %v170_v47 = vadd.f32 %v499_v16, %v520_v23  ;;  %v227_v53 = vadd.f32 %v195_v62, %v163_v44  ;;  %v90_v19 = vld [vmem:[%s781_s0 + $0xe0] sm:$0xff]  ;;  %v91_v23 = vld [vmem:[%s781_s0 + $0xe8] sm:$0xff] }
  0x3a   :  { %289 = vst [vmem:[%s784_s5 + $0x70] sm:$0xff] %v257_v40  ;;  %290 = vst [vmem:[%s784_s5 + $0x78] sm:$0xff] %v258_v41  ;;  %v228_v48 = vadd.f32 %v196_v4, %v164_v45  ;;  %v229_v49 = vadd.f32 %v197_v5, %v165_v46  ;;  %v230_v54 = vadd.f32 %v198_v42, %v166_v50  ;;  %v209_v36 = vld [vmem:[%s783_s1 + $0xf0] sm:$0xff]  ;;  %v210_v37 = vld [vmem:[%s783_s1 + $0xf8] sm:$0xff] }
  0x3b   :  { %v231_v57 = vadd.f32 %v199_v43, %v167_v10  ;;  %v232_v58 = vadd.f32 %v200_v51, %v168_v11  ;;  %v233_v59 = vadd.f32 %v201_v52, %v169_v12  ;;  %v234_v0 = vadd.f32 %v202_v6, %v170_v47 }
  0x3c   :  { %v259_v1 = vmax.f32 %v227_v53, 0.0  ;;  %v260_v2 = vmax.f32 %v228_v48, 0.0  ;;  %v261_v3 = vmax.f32 %v229_v49, 0.0  ;;  %v262_v7 = vmax.f32 %v230_v54, 0.0 }
  0x3d   :  { %v263_v15 = vmax.f32 %v231_v57, 0.0  ;;  %v264_v17 = vmax.f32 %v232_v58, 0.0  ;;  %v265_v55 = vmax.f32 %v233_v59, 0.0  ;;  %v266_v56 = vmax.f32 %v234_v0, 0.0 }
  0x3e   :  { %291 = vst [vmem:[%s784_s5 + $0x80] sm:$0xff] %v259_v1  ;;  %292 = vst [vmem:[%s784_s5 + $0x88] sm:$0xff] %v260_v2  ;;  %v171_v20 = vadd.f32 %v494_v14, %v523_v24  ;;  %v172_v22 = vadd.f32 %v499_v16, %v526_v25  ;;  %v173_v21 = vadd.f32 %v494_v14, %v529_v26  ;;  %v206_v24 = vld [vmem:[%s783_s1 + $0xd8] sm:$0xff]  ;;  %v207_v26 = vld [vmem:[%s783_s1 + $0xe0] sm:$0xff] }
  0x3f   :  { %293 = vst [vmem:[%s784_s5 + $0x90] sm:$0xff] %v261_v3  ;;  %294 = vst [vmem:[%s784_s5 + $0x98] sm:$0xff] %v262_v7  ;;  %v131_v27 = vmul.f32 %v379_v31, %v89_v18  ;;  %v132_v25 = vmul.f32 %v377_v30, %v90_v19  ;;  %v133_v28 = vmul.f32 %v379_v31, %v91_v23 }
  0x40   :  { %295 = vst [vmem:[%s784_s5 + $0xa0] sm:$0xff] %v263_v15  ;;  %296 = vst [vmem:[%s784_s5 + $0xa8] sm:$0xff] %v264_v17  ;;  %v134_v29 = vmul.f32 %v377_v30, %v92_v8  ;;  %v135_v32 = vmul.f32 %v379_v31, %v93_v9  ;;  %v235_v33 = vadd.f32 %v203_v13, %v171_v20 }
  0x41   :  { %297 = vst [vmem:[%s784_s5 + $0xb0] sm:$0xff] %v265_v55  ;;  %298 = vst [vmem:[%s784_s5 + $0xb8] sm:$0xff] %v266_v56  ;;  %v236_v34 = vadd.f32 %v204_v60, %v172_v22  ;;  %v237_v62 = vadd.f32 %v205_v61, %v173_v21  ;;  %v174_v35 = vadd.f32 %v499_v16, %v131_v27 }
  0x42   :  { %v175_v30 = vadd.f32 %v494_v14, %v132_v25  ;;  %v176_v31 = vadd.f32 %v499_v16, %v133_v28  ;;  %v177_v4 = vadd.f32 %v494_v14, %v134_v29  ;;  %v178_v5 = vadd.f32 %v499_v16, %v135_v32 }
  0x43   :  { %v267_v38 = vmax.f32 %v235_v33, 0.0  ;;  %v268_v39 = vmax.f32 %v236_v34, 0.0  ;;  %v269_v40 = vmax.f32 %v237_v62, 0.0  ;;  %v238_v41 = vadd.f32 %v206_v24, %v174_v35 }
  0x44   :  { %v239_v42 = vadd.f32 %v207_v26, %v175_v30  ;;  %v240_v43 = vadd.f32 %v208_v63, %v176_v31  ;;  %v241_v44 = vadd.f32 %v209_v36, %v177_v4  ;;  %v242_v45 = vadd.f32 %v210_v37, %v178_v5 }
  0x45   :  { %299 = vst [vmem:[%s784_s5 + $0xc0] sm:$0xff] %v267_v38  ;;  %300 = vst [vmem:[%s784_s5 + $0xc8] sm:$0xff] %v268_v39  ;;  %v270_v14 = vmax.f32 %v238_v41, 0.0 }
  0x46   :  { %301 = vst [vmem:[%s784_s5 + $0xd0] sm:$0xff] %v269_v40  ;;  %v271_v16 = vmax.f32 %v239_v42, 0.0  ;;  %v272_v46 = vmax.f32 %v240_v43, 0.0  ;;  %v273_v50 = vmax.f32 %v241_v44, 0.0  ;;  %v274_v51 = vmax.f32 %v242_v45, 0.0 }
  0x47   :  { %302 = vst [vmem:[%s784_s5 + $0xd8] sm:$0xff] %v270_v14 }
  0x48   :  { %303 = vst [vmem:[%s784_s5 + $0xe0] sm:$0xff] %v271_v16  ;;  %304 = vst [vmem:[%s784_s5 + $0xe8] sm:$0xff] %v272_v46 }
  0x49   :  { %305 = vst [vmem:[%s784_s5 + $0xf0] sm:$0xff] %v273_v50  ;;  %306 = vst [vmem:[%s784_s5 + $0xf8] sm:$0xff] %v274_v51 }

// kernel: resnet_shard1_forward.89
= control target key start
LH: loop header
LB: loop body
LE: loop exit
PB: predicated region body
PF: predicated region fallthrough
CT: control target
= control target key end

     0   :  { %vm333_vm0 = vcmask 523264   ;;  %s681_s1 = inlined_call_operand.vmem [shape: bf16[256,64], index: 1, kind: input, shape index: {}]   ;;  %s682_s0 = inlined_call_operand.vmem [shape: bf16[128,256], index: 0, kind: input, shape index: {}]   ;;  %s683_s2 = inlined_call_operand.vmem [shape: f32[128,64], index: 2, kind: output, shape index: {}]  }
   0x1   :  { %v466_v0 = vld [vmem:[%s681_s1 + $0x78] sm:$0xff]   ;;  %v468_v2 = vld [vmem:[%s681_s1 + $0x70] sm:$0xff]   ;;  %v470_v4 = vld [vmem:[%s681_s1 + $0x68] sm:$0xff]  }
   0x2   :  { %v467_v1 = vld [vmem:[%s681_s1 + $0x38] sm:$0xff]   ;;  %386 = vmatprep.subr.bf16.mxu0 %v466_v0  ;;  %450 = vmatprep.subr.bf16.mxu1 %v466_v0  ;;  %v469_v3 = vld [vmem:[%s681_s1 + $0x30] sm:$0xff]   ;;  %v471_v5 = vld [vmem:[%s681_s1 + $0x28] sm:$0xff]  }
   0x3   :  { %387 = vmatpush3.bf16.msra.mxu0 %v467_v1  ;;  %458 = vmatpush3.bf16.msra.mxu1 %v467_v1  ;;  %v472_v6 = vld [vmem:[%s681_s1 + $0x60] sm:$0xff]   ;;  %v474_v8 = vld [vmem:[%s681_s1 + $0x58] sm:$0xff]   ;;  %v476_v10 = vld [vmem:[%s681_s1 + $0x50] sm:$0xff]  }
   0x4   :  { %388 = vmatprep.subr.bf16.mxu0 %v468_v2  ;;  %451 = vmatprep.subr.bf16.mxu1 %v468_v2  ;;  %v473_v7 = vld [vmem:[%s681_s1 + $0x20] sm:$0xff]   ;;  %v475_v9 = vld [vmem:[%s681_s1 + $0x18] sm:$0xff]   ;;  %v477_v13 = vld [vmem:[%s681_s1 + $0x10] sm:$0xff]  }
   0x5   :  { %v484_v11 = vld [vmem:[%s682_s0 + $0x4] ss:$8 sps:$4 sm:$0xff]   ;;  %v482_v18 = vld [vmem:[%s682_s0] ss:$8 sps:$4 sm:$0xff]   ;;  %v488_v20 = vld [vmem:[%s682_s0 + $0x14] ss:$8 sps:$4 sm:$0xff]  }
   0x6   :  { %v487_v12 = vld [vmem:[%s682_s0 + $0x44] ss:$8 sps:$4 sm:$0xff]   ;;  %268 = vmatprep.mubr.bf16.mxu0 %v484_v11  ;;  %v485_v19 = vld [vmem:[%s682_s0 + $0x40] ss:$8 sps:$4 sm:$0xff]   ;;  %v490_v21 = vld [vmem:[%s682_s0 + $0x54] ss:$8 sps:$4 sm:$0xff]  }
   0x7   :  { %389 = vmatpush3.bf16.msra.mxu0 %v469_v3  ;;  %459 = vmatpush3.bf16.msra.mxu1 %v469_v3  ;;  %v478_v14 = vld [vmem:[%s681_s1 + $0x48] sm:$0xff]   ;;  %v480_v16 = vld [vmem:[%s681_s1 + $0x40] sm:$0xff]   ;;  %v492_v22 = vld [vmem:[%s682_s0 + $0x10] ss:$8 sps:$4 sm:$0xff]  }
   0x8   :  { %390 = vmatprep.subr.bf16.mxu0 %v470_v4  ;;  %452 = vmatprep.subr.bf16.mxu1 %v470_v4  ;;  %v479_v15 = vld [vmem:[%s681_s1 + $0x8] sm:$0xff]   ;;  %v481_v17 = vld [vmem:[%s681_s1] sm:$0xff]   ;;  %v493_v23 = vld [vmem:[%s682_s0 + $0x50] ss:$8 sps:$4 sm:$0xff]  }
   0x9   :  { %300 = vmatprep.mubr.bf16.mxu1 %v487_v12  ;;  %v494_v24 = vld [vmem:[%s682_s0 + $0x24] ss:$8 sps:$4 sm:$0xff]   ;;  %v498_v26 = vld [vmem:[%s682_s0 + $0x20] ss:$8 sps:$4 sm:$0xff]   ;;  %v500_v28 = vld [vmem:[%s682_s0 + $0x34] ss:$8 sps:$4 sm:$0xff]  }
   0xa   :  { %v496_v25 = vld [vmem:[%s682_s0 + $0x64] ss:$8 sps:$4 sm:$0xff]   ;;  %v499_v27 = vld [vmem:[%s682_s0 + $0x60] ss:$8 sps:$4 sm:$0xff]   ;;  %v502_v29 = vld [vmem:[%s682_s0 + $0x74] ss:$8 sps:$4 sm:$0xff]  }
   0xb   :  { %391 = vmatpush3.bf16.msra.mxu0 %v471_v5  ;;  %460 = vmatpush3.bf16.msra.mxu1 %v471_v5  ;;  %v504_v30 = vld [vmem:[%s682_s0 + $0x30] ss:$8 sps:$4 sm:$0xff]  }
   0xc   :  { %392 = vmatprep.subr.bf16.mxu0 %v472_v6  ;;  %453 = vmatprep.subr.bf16.mxu1 %v472_v6  ;;  %v505_v31 = vld [vmem:[%s682_s0 + $0x70] ss:$8 sps:$4 sm:$0xff]  }
   0xf   :  { %393 = vmatpush3.bf16.msra.mxu0 %v473_v7  ;;  %461 = vmatpush3.bf16.msra.mxu1 %v473_v7 }
  0x10   :  { %394 = vmatprep.subr.bf16.mxu0 %v474_v8  ;;  %454 = vmatprep.subr.bf16.mxu1 %v474_v8 }
  0x13   :  { %395 = vmatpush3.bf16.msra.mxu0 %v475_v9  ;;  %462 = vmatpush3.bf16.msra.mxu1 %v475_v9 }
  0x14   :  { %396 = vmatprep.subr.bf16.mxu0 %v476_v10  ;;  %455 = vmatprep.subr.bf16.mxu1 %v476_v10 }
  0x17   :  { %397 = vmatpush3.bf16.msra.mxu0 %v477_v13  ;;  %463 = vmatpush3.bf16.msra.mxu1 %v477_v13 }
  0x18   :  { %398 = vmatprep.subr.bf16.mxu0 %v478_v14  ;;  %456 = vmatprep.subr.bf16.mxu1 %v478_v14 }
  0x1b   :  { %399 = vmatpush3.bf16.msra.mxu0 %v479_v15  ;;  %464 = vmatpush3.bf16.msra.mxu1 %v479_v15 }
  0x1c   :  { %400 = vmatprep.subr.bf16.mxu0 %v480_v16  ;;  %457 = vmatprep.subr.bf16.mxu1 %v480_v16 }
  0x1f   :  { %401 = vmatpush3.bf16.msra.mxu0 %v481_v17  ;;  %465 = vmatpush3.bf16.msra.mxu1 %v481_v17 }
  0x22   :  { %269 = vmatmul.mubr.bf16.vlgmr.msra.gmra.mxu0 %v482_v18  ;;  %301 = vmatmul.mubr.bf16.vlgmr.msra.gmra.mxu1 %v485_v19 }
  0x23   :  { %276 = vmatprep.mubr.bf16.mxu0 %v488_v20  ;;  %308 = vmatprep.mubr.bf16.mxu1 %v490_v21 }
  0x2a   :  { %277 = vmatmul.mubr.bf16.gmra.mxu0 %v492_v22  ;;  %309 = vmatmul.mubr.bf16.gmra.mxu1 %v493_v23 }
  0x2b   :  { %284 = vmatprep.mubr.bf16.mxu0 %v494_v24  ;;  %316 = vmatprep.mubr.bf16.mxu1 %v496_v25 }
  0x32   :  { %285 = vmatmul.mubr.bf16.gmra.mxu0 %v498_v26  ;;  %317 = vmatmul.mubr.bf16.gmra.mxu1 %v499_v27 }
  0x33   :  { %292 = vmatprep.mubr.bf16.mxu0 %v500_v28  ;;  %324 = vmatprep.mubr.bf16.mxu1 %v502_v29 }
  0x3a   :  { %293 = vmatmul.mubr.bf16.gmra.mxu0 %v504_v30  ;;  %325 = vmatmul.mubr.bf16.gmra.mxu1 %v505_v31 }
  0xe2   :  { %v402_v32 = vpop.f32.mrf.mxu0  ;;  %v426_v33 = vpop.f32.mrf.mxu1 }
  0xe4   :  { %v403_v34 = vpop.f32.mrf.mxu0  ;;  %v427_v35 = vpop.f32.mrf.mxu1 }
  0xe5   :  { %v404_v36 = vadd.f32 %v403_v34, %v402_v32  ;;  %v428_v37 = vadd.f32 %v427_v35, %v426_v33 }
  0xe6   :  { %v405_v38 = vpop.f32.mrf.mxu0  ;;  %v429_v39 = vpop.f32.mrf.mxu1 }
  0xe7   :  { %334 = vst.msk [vmem:[%s683_s2] sm:$0xff] %vm333_vm0, %v404_v36  ;;  %342 = vst.msk [vmem:[%s683_s2 + $0x40] sm:$0xff] %vm333_vm0, %v428_v37 }
  0xe8   :  { %v406_v40 = vpop.f32.mrf.mxu0  ;;  %v430_v41 = vpop.f32.mrf.mxu1 }
  0xe9   :  { %v407_v42 = vadd.f32 %v406_v40, %v405_v38  ;;  %v431_v43 = vadd.f32 %v430_v41, %v429_v39 }
  0xea   :  { %v408_v44 = vpop.f32.mrf.mxu0  ;;  %v432_v45 = vpop.f32.mrf.mxu1 }
  0xeb   :  { %335 = vst.msk [vmem:[%s683_s2 + $0x8] sm:$0xff] %vm333_vm0, %v407_v42  ;;  %343 = vst.msk [vmem:[%s683_s2 + $0x48] sm:$0xff] %vm333_vm0, %v431_v43 }
  0xec   :  { %v409_v46 = vpop.f32.mrf.mxu0  ;;  %v433_v47 = vpop.f32.mrf.mxu1 }
  0xed   :  { %v410_v48 = vadd.f32 %v409_v46, %v408_v44  ;;  %v434_v49 = vadd.f32 %v433_v47, %v432_v45 }
  0xee   :  { %v411_v50 = vpop.f32.mrf.mxu0  ;;  %v435_v51 = vpop.f32.mrf.mxu1 }
  0xef   :  { %336 = vst.msk [vmem:[%s683_s2 + $0x10] sm:$0xff] %vm333_vm0, %v410_v48  ;;  %344 = vst.msk [vmem:[%s683_s2 + $0x50] sm:$0xff] %vm333_vm0, %v434_v49 }
  0xf0   :  { %v412_v52 = vpop.f32.mrf.mxu0  ;;  %v436_v53 = vpop.f32.mrf.mxu1 }
  0xf1   :  { %v413_v54 = vadd.f32 %v412_v52, %v411_v50  ;;  %v437_v55 = vadd.f32 %v436_v53, %v435_v51 }
  0xf2   :  { %v414_v56 = vpop.f32.mrf.mxu0  ;;  %v438_v57 = vpop.f32.mrf.mxu1 }
  0xf3   :  { %337 = vst.msk [vmem:[%s683_s2 + $0x18] sm:$0xff] %vm333_vm0, %v413_v54  ;;  %345 = vst.msk [vmem:[%s683_s2 + $0x58] sm:$0xff] %vm333_vm0, %v437_v55 }
  0xf4   :  { %v415_v58 = vpop.f32.mrf.mxu0  ;;  %v439_v59 = vpop.f32.mrf.mxu1 }
  0xf5   :  { %v416_v60 = vadd.f32 %v415_v58, %v414_v56  ;;  %v440_v61 = vadd.f32 %v439_v59, %v438_v57 }
  0xf6   :  { %v417_v62 = vpop.f32.mrf.mxu0  ;;  %v441_v63 = vpop.f32.mrf.mxu1 }
  0xf7   :  { %338 = vst.msk [vmem:[%s683_s2 + $0x20] sm:$0xff] %vm333_vm0, %v416_v60  ;;  %346 = vst.msk [vmem:[%s683_s2 + $0x60] sm:$0xff] %vm333_vm0, %v440_v61 }
  0xf8   :  { %v418_v0 = vpop.f32.mrf.mxu0  ;;  %v442_v1 = vpop.f32.mrf.mxu1 }
  0xf9   :  { %v419_v2 = vadd.f32 %v418_v0, %v417_v62  ;;  %v443_v3 = vadd.f32 %v442_v1, %v441_v63 }
  0xfa   :  { %v420_v4 = vpop.f32.mrf.mxu0  ;;  %v444_v5 = vpop.f32.mrf.mxu1 }
  0xfb   :  { %339 = vst.msk [vmem:[%s683_s2 + $0x28] sm:$0xff] %vm333_vm0, %v419_v2  ;;  %347 = vst.msk [vmem:[%s683_s2 + $0x68] sm:$0xff] %vm333_vm0, %v443_v3 }
  0xfc   :  { %v421_v6 = vpop.f32.mrf.mxu0  ;;  %v445_v7 = vpop.f32.mrf.mxu1 }
  0xfd   :  { %v422_v8 = vadd.f32 %v421_v6, %v420_v4  ;;  %v446_v9 = vadd.f32 %v445_v7, %v444_v5 }
  0xfe   :  { %v423_v10 = vpop.f32.mrf.mxu0  ;;  %v447_v11 = vpop.f32.mrf.mxu1 }
  0xff   :  { %340 = vst.msk [vmem:[%s683_s2 + $0x30] sm:$0xff] %vm333_vm0, %v422_v8  ;;  %348 = vst.msk [vmem:[%s683_s2 + $0x70] sm:$0xff] %vm333_vm0, %v446_v9 }
 0x100   :  { %v424_v12 = vpop.f32.mrf.mxu0  ;;  %v448_v13 = vpop.f32.mrf.mxu1 }
 0x101   :  { %v425_v14 = vadd.f32 %v424_v12, %v423_v10  ;;  %v449_v15 = vadd.f32 %v448_v13, %v447_v11 }
 0x103   :  { %341 = vst.msk [vmem:[%s683_s2 + $0x38] sm:$0xff] %vm333_vm0, %v425_v14  ;;  %349 = vst.msk [vmem:[%s683_s2 + $0x78] sm:$0xff] %vm333_vm0, %v449_v15 }

// kernel: resnet_shard1_forward.80
= control target key start
LH: loop header
LB: loop body
LE: loop exit
PB: predicated region body
PF: predicated region fallthrough
CT: control target
= control target key end

     0   :  { %s2000_s9 = smov 0   ;;  %s2496_s0 = inlined_call_operand.vmem [shape: f32[2,110,64], index: 0, kind: input, shape index: {}]   ;;  %s2497_s1 = inlined_call_operand.vmem [shape: bf16[576,64], index: 1, kind: input, shape index: {}]   ;;  %s2498_s2 = inlined_call_operand.vmem [shape: f32[2,80,64], index: 2, kind: output, shape index: {}]  }
   0x1 LB: > { %s1496_s10 = sadd.s32 4294967295, %s1981_s9   ;;  %p1500_p0 = scmp.ge.s32.totalorder %s1981_s9, 1  ;;  %s1981_s9 = sphi %s2000_s9, %s12_s9  }
   0x2   : > { %p112_p1 = scmp.lt.s32.totalorder %s1981_s9, 3 }
   0x4   : > { %p113_p2 = pnand %p1500_p0, %p112_p1 }
   0x5   : > { %p134_p3 = scmp.lt.s32.totalorder (!%p113_p2), %s1496_s10, 1 }
   0x6   : > { %116 = sbr.rel (%p113_p2) target bundleno = 406 (0x196), region = 28 }
   0xb   : > { %v1939_v0 = vld [vmem:[%s2497_s1 + $0x38] sm:$0xff]   ;;  %v1983_v1 = vmov 0.0   ;;  %v1940_v2 = vld [vmem:[%s2497_s1 + $0x30] sm:$0xff]   ;;  %vm1984_vm0 = vmmov 0   ;;  %s2500_s10 = smov (!%p134_p3, %s1496_s10), 1  ;;  %v1941_v3 = vld [vmem:[%s2497_s1 + $0x28] sm:$0xff]  }
   0xc   : > { %1919 = vmatprep.subr.bf16.mxu1 %v1983_v1  ;;  %1667 = vmatprep.subr.bf16.mxu0 %v1983_v1  ;;  %s1927_s17 = smul.u32 112, %s2500_s10  ;;  %v1942_v4 = vld [vmem:[%s2497_s1 + $0x20] sm:$0xff]   ;;  %v1943_v10 = vld [vmem:[%s2497_s1 + $0x18] sm:$0xff]   ;;  %vm215_vm1 = vcmask 523264   ;;  %v1945_v13 = vld [vmem:[%s2497_s1 + $0x10] sm:$0xff]  }
   0xd   : > { %1923 = vmatpush3.bf16.msra.mxu1 %v1939_v0  ;;  %1668 = vmatpush3.bf16.msra.mxu0 %v1939_v0  ;;  %v1944_v12 = vld [vmem:[%s2497_s1 + $0x58] sm:$0xff]   ;;  %v1946_v15 = vld [vmem:[%s2497_s1 + $0x50] sm:$0xff]   ;;  %v1947_v21 = vld [vmem:[%s2497_s1 + $0x8] sm:$0xff]  }
   0xe   : > { %1920 = vmatprep.subr.bf16.mxu1 %v1983_v1  ;;  %1669 = vmatprep.subr.bf16.mxu0 %v1983_v1  ;;  %s2033_s20 = scalar_lea.vmem %s2496_s0, %s1927_s17  ;;  %v1948_v22 = vld [vmem:[%s2497_s1 + $0x48] sm:$0xff]   ;;  %v1949_v25 = vld [vmem:[%s2497_s1 + $0x40] sm:$0xff]   ;;  %v1952_v31 = vld [vmem:[%s2497_s1 + $0x98] sm:$0xff]  }
   0xf   : > { %1683 = vmatprep.mubr.msk.bf16.mxu1 %vm1984_vm0, %v1983_v1  ;;  %1675 = vmatprep.mubr.msk.bf16.mxu0 %vm1984_vm0, %v1983_v1  ;;  %v172_v5 = vld [vmem:[%s2033_s20 + $0x21] sm:$0xff]  ;;  %v173_v6 = vld [vmem:[%s2033_s20 + $0x29] sm:$0xff]  ;;  %v174_v14 = vld [vmem:[%s2033_s20 + $0x31] sm:$0xff] }
  0x10   : > { %v168_v7 = vld [vmem:[%s2033_s20 + $0x1] sm:$0xff]  ;;  %v169_v8 = vld [vmem:[%s2033_s20 + $0x9] sm:$0xff]  ;;  %v180_v9 = vpack.c.bf16 %v173_v6, %v172_v5  ;;  %v175_v16 = vld [vmem:[%s2033_s20 + $0x39] sm:$0xff] }
  0x11   : > { %1924 = vmatpush3.bf16.msra.mxu1 %v1940_v2  ;;  %1670 = vmatpush3.bf16.msra.mxu0 %v1940_v2  ;;  %v178_v11 = vpack.c.bf16 %v169_v8, %v168_v7  ;;  %v170_v17 = vld [vmem:[%s2033_s20 + $0x11] sm:$0xff]  ;;  %v171_v18 = vld [vmem:[%s2033_s20 + $0x19] sm:$0xff]  ;;  %v181_v19 = vpack.c.bf16 %v175_v16, %v174_v14  ;;  %v176_v23 = vld [vmem:[%s2033_s20 + $0x41] sm:$0xff] }
  0x12   : > { %1921 = vmatprep.subr.bf16.mxu1 %v1983_v1  ;;  %1671 = vmatprep.subr.bf16.mxu0 %v1983_v1  ;;  %v179_v20 = vpack.c.bf16 %v171_v18, %v170_v17  ;;  %v177_v24 = vld [vmem:[%s2033_s20 + $0x49] sm:$0xff]  ;;  %v1950_v26 = vld [vmem:[%s2497_s1] sm:$0xff]   ;;  %v2111_v34 = vld [vmem:[%s2033_s20 + $0x12] sm:$0xff] }
  0x13   : > { %v416_v27 = vld [vmem:[%s2033_s20 + $0x2] sm:$0xff]  ;;  %v2090_v28 = vld [vmem:[%s2033_s20 + $0xa] sm:$0xff]  ;;  %v182_v29 = vpack.c.bf16 %v177_v24, %v176_v23  ;;  %v2114_v35 = vld [vmem:[%s2033_s20 + $0x1a] sm:$0xff] }
  0x14   : > { %v426_v30 = vpack.c.bf16 %v2090_v28, %v416_v27  ;;  %v145_v32 = vld [vmem:[%s2033_s20] sm:$0xff]  ;;  %v146_v33 = vld [vmem:[%s2033_s20 + $0x8] sm:$0xff]  ;;  %v1954_v36 = vld [vmem:[%s2497_s1 + $0x90] sm:$0xff]   ;;  %v427_v38 = vpack.c.bf16 %v2114_v35, %v2111_v34 }
  0x15   : > { %1925 = vmatpush3.bf16.msra.mxu1 %v1941_v3  ;;  %1672 = vmatpush3.bf16.msra.mxu0 %v1941_v3  ;;  %v155_v37 = vpack.c.bf16 %v146_v33, %v145_v32  ;;  %v1951_v39 = vld [vmem:[%s2497_s1 + $0x78] sm:$0xff]   ;;  %v147_v40 = vld [vmem:[%s2033_s20 + $0x10] sm:$0xff]  ;;  %v1956_v41 = vld [vmem:[%s2497_s1 + $0x88] sm:$0xff]  }
  0x16   : > { %1922 = vmatprep.subr.bf16.mxu1 %v1983_v1  ;;  %1673 = vmatprep.subr.bf16.mxu0 %v1983_v1  ;;  %v148_v42 = vld [vmem:[%s2033_s20 + $0x18] sm:$0xff]  ;;  %v1953_v43 = vld [vmem:[%s2497_s1 + $0x70] sm:$0xff]   ;;  %v2141_v44 = vld [vmem:[%s2033_s20 + $0x22] sm:$0xff] }
  0x17   : > { %v2144_v45 = vld [vmem:[%s2033_s20 + $0x2a] sm:$0xff]  ;;  %v1958_v46 = vld [vmem:[%s2497_s1 + $0x80] sm:$0xff]   ;;  %v156_v47 = vpack.c.bf16 %v148_v42, %v147_v40  ;;  %v2168_v52 = vld [vmem:[%s2033_s20 + $0x32] sm:$0xff]  ;;  %v572_v18 = vpack.c.bf16 %v2141_v44, %v2114_v35 }
  0x18   : > { %v428_v48 = vpack.c.bf16 %v2144_v45, %v2141_v44  ;;  %v1955_v49 = vld [vmem:[%s2497_s1 + $0x68] sm:$0xff]   ;;  %v149_v50 = vld [vmem:[%s2033_s20 + $0x20] sm:$0xff]  ;;  %v151_v57 = vld [vmem:[%s2033_s20 + $0x30] sm:$0xff]  ;;  %v573_v24 = vpack.c.bf16 %v2168_v52, %v2144_v45 }
  0x19   : > { %1926 = vmatpush3.bf16.msra.mxu1 %v1942_v4  ;;  %1674 = vmatpush3.bf16.msra.mxu0 %v1942_v4  ;;  %v150_v51 = vld [vmem:[%s2033_s20 + $0x28] sm:$0xff]  ;;  %v2171_v53 = vld [vmem:[%s2033_s20 + $0x3a] sm:$0xff]  ;;  %v1961_v14 = vld [vmem:[%s2497_s1 + $0xb0] sm:$0xff]  }
  0x1a   : > { %1695 = vmatprep.subr.bf16.mxu1 %v1983_v1  ;;  %1723 = vmatprep.subr.bf16.mxu0 %v1983_v1  ;;  %v1957_v54 = vld [vmem:[%s2497_s1 + $0x60] sm:$0xff]   ;;  %v157_v55 = vpack.c.bf16 %v150_v51, %v149_v50  ;;  %v429_v56 = vpack.c.bf16 %v2171_v53, %v2168_v52  ;;  %v152_v58 = vld [vmem:[%s2033_s20 + $0x38] sm:$0xff]  ;;  %v2193_v60 = vld [vmem:[%s2033_s20 + $0x4a] sm:$0xff] }
  0x1b   : > { %v2190_v59 = vld [vmem:[%s2033_s20 + $0x42] sm:$0xff]  ;;  %v158_v61 = vpack.c.bf16 %v152_v58, %v151_v57  ;;  %v706_v2 = vld [vmem:[%s2033_s20 + $0xb] sm:$0xff]  ;;  %v707_v3 = vld [vmem:[%s2033_s20 + $0x13] sm:$0xff] }
  0x1c   : > { %1684 = vmatmul.mubr.msk.bf16.vlgmr.msra.gmra.mxu1 %vm215_vm1, %v180_v9  ;;  %1676 = vmatmul.mubr.msk.bf16.vlgmr.msra.gmra.mxu0 %vm215_vm1, %v178_v11  ;;  %v430_v62 = vpack.c.bf16 %v2193_v60, %v2190_v59  ;;  %v153_v63 = vld [vmem:[%s2033_s20 + $0x40] sm:$0xff]  ;;  %v154_v0 = vld [vmem:[%s2033_s20 + $0x48] sm:$0xff]  ;;  %v716_v5 = vpack.c.bf16 %v707_v3, %v706_v2  ;;  %v1960_v6 = vld [vmem:[%s2497_s1 + $0xd8] sm:$0xff]  }
  0x1d   : > { %1696 = vmatpush3.bf16.msra.mxu1 %v1943_v10  ;;  %1724 = vmatpush3.bf16.msra.mxu0 %v1944_v12  ;;  %v159_v4 = vpack.c.bf16 %v154_v0, %v153_v63  ;;  %v708_v7 = vld [vmem:[%s2033_s20 + $0x1b] sm:$0xff]  ;;  %v709_v8 = vld [vmem:[%s2033_s20 + $0x23] sm:$0xff]  ;;  %v1962_v9 = vld [vmem:[%s2497_s1 + $0xd0] sm:$0xff]   ;;  %v571_v10 = vpack.c.bf16 %v2111_v34, %v2090_v28  ;;  %v574_v28 = vpack.c.bf16 %v2190_v59, %v2171_v53 }
  0x1e   : > { %1697 = vmatprep.subr.bf16.mxu1 %v1983_v1  ;;  %1687 = vmatprep.mubr.msk.bf16.mxu1 %vm1984_vm0, %v1983_v1  ;;  %v717_v11 = vpack.c.bf16 %v709_v8, %v708_v7  ;;  %v1959_v12 = vld [vmem:[%s2497_s1 + $0xb8] sm:$0xff]   ;;  %v1966_v17 = vld [vmem:[%s2497_s1 + $0xc0] sm:$0xff]   ;;  %v1969_v44 = vld [vmem:[%s2497_s1 + $0xf0] sm:$0xff]  }
  0x1f   : > { %1725 = vmatprep.subr.bf16.mxu0 %v1983_v1  ;;  %1679 = vmatprep.mubr.msk.bf16.mxu0 %vm1984_vm0, %v1983_v1  ;;  %v711_v16 = vld [vmem:[%s2033_s20 + $0x33] sm:$0xff]  ;;  %v1965_v23 = vld [vmem:[%s2497_s1 + $0xa0] sm:$0xff]   ;;  %v1971_v50 = vld [vmem:[%s2497_s1 + $0xe8] sm:$0xff]  }
  0x20   : > { %v715_v27 = vld [vmem:[%s2033_s20 + $0x53] sm:$0xff]  ;;  %v997_v32 = vld [vmem:[%s2033_s20 + $0x1c] sm:$0xff]  ;;  %v1002_v51 = vld [vmem:[%s2033_s20 + $0x44] sm:$0xff] }
  0x21   : > { %1698 = vmatpush3.bf16.msra.mxu1 %v1945_v13  ;;  %1726 = vmatpush3.bf16.msra.mxu0 %v1946_v15  ;;  %v1964_v13 = vld [vmem:[%s2497_s1 + $0xc8] sm:$0xff]   ;;  %v1968_v35 = vld [vmem:[%s2497_s1 + $0x118] sm:$0xff]   ;;  %v1973_v53 = vld [vmem:[%s2497_s1 + $0xe0] sm:$0xff]  }
  0x22   : > { %1699 = vmatprep.subr.bf16.mxu1 %v1983_v1  ;;  %1727 = vmatprep.subr.bf16.mxu0 %v1983_v1  ;;  %v710_v15 = vld [vmem:[%s2033_s20 + $0x2b] sm:$0xff]  ;;  %v1967_v42 = vld [vmem:[%s2497_s1 + $0xf8] sm:$0xff]  }
  0x23   : > { %v1000_v45 = vld [vmem:[%s2033_s20 + $0x34] sm:$0xff]  ;;  %v1003_v52 = vld [vmem:[%s2033_s20 + $0x4c] sm:$0xff]  ;;  %v1005_v57 = vld [vmem:[%s2033_s20 + $0x5c] sm:$0xff] }
  0x24   : > { %1688 = vmatmul.mubr.msk.bf16.gmra.mxu1 %vm215_vm1, %v181_v19  ;;  %1680 = vmatmul.mubr.msk.bf16.gmra.mxu0 %vm215_vm1, %v179_v20  ;;  %v718_v19 = vpack.c.bf16 %v711_v16, %v710_v15  ;;  %v1963_v20 = vld [vmem:[%s2497_s1 + $0xa8] sm:$0xff]   ;;  %v1141_v0 = vld [vmem:[%s2033_s20 + $0x15] sm:$0xff]  ;;  %v1142_v2 = vld [vmem:[%s2033_s20 + $0x1d] sm:$0xff] }
  0x25   : > { %1700 = vmatpush3.bf16.msra.mxu1 %v1947_v21  ;;  %1728 = vmatpush3.bf16.msra.mxu0 %v1948_v22  ;;  %v712_v21 = vld [vmem:[%s2033_s20 + $0x3b] sm:$0xff]  ;;  %v713_v22 = vld [vmem:[%s2033_s20 + $0x43] sm:$0xff]  ;;  %v1144_v8 = vld [vmem:[%s2033_s20 + $0x2d] sm:$0xff] }
  0x26   : > { %1691 = vmatprep.mubr.msk.bf16.mxu1 %vm1984_vm0, %v1983_v1  ;;  %1729 = vmatprep.subr.bf16.mxu0 %v1983_v1  ;;  %v1288_v3 = vld [vmem:[%s2033_s20 + $0x26] sm:$0xff]  ;;  %v1293_v16 = vld [vmem:[%s2033_s20 + $0x4e] sm:$0xff] }
  0x27   : > { %1701 = vmatprep.subr.bf16.mxu1 %v1983_v1  ;;  %1731 = vmatprep.mubr.msk.bf16.mxu0 %vm1984_vm0, %v1983_v1  ;;  %v1143_v7 = vld [vmem:[%s2033_s20 + $0x25] sm:$0xff] }
  0x28   : > { %v1292_v15 = vld [vmem:[%s2033_s20 + $0x46] sm:$0xff] }
  0x29   : > { %1730 = vmatpush3.bf16.msra.mxu0 %v1949_v25  ;;  %1702 = vmatpush3.bf16.msra.mxu1 %v1950_v26  ;;  %v719_v25 = vpack.c.bf16 %v713_v22, %v712_v21  ;;  %v714_v26 = vld [vmem:[%s2033_s20 + $0x4b] sm:$0xff]  ;;  %v1294_v21 = vld [vmem:[%s2033_s20 + $0x56] sm:$0xff]  ;;  %v1295_v22 = vld [vmem:[%s2033_s20 + $0x5e] sm:$0xff] }
  0x2a   : > { %1751 = vmatprep.subr.bf16.mxu1 %v1983_v1  ;;  %1779 = vmatprep.subr.bf16.mxu0 %v1983_v1 }
  0x2c   : > { %1692 = vmatmul.mubr.msk.bf16.gmra.mxu1 %vm215_vm1, %v182_v29  ;;  %1732 = vmatmul.mubr.msk.bf16.vlgmr.msra.gmra.mxu0 %vm215_vm1, %v426_v30  ;;  %v720_v29 = vpack.c.bf16 %v715_v27, %v714_v26  ;;  %v570_v30 = vld [vmem:[%s2033_s20 + $0x52] sm:$0xff]  ;;  %v1150_v26 = vld [vmem:[%s2033_s20 + $0x5d] sm:$0xff] }
  0x2d   : > { %1703 = vmatprep.mubr.msk.bf16.mxu1 %vm1984_vm0, %v1983_v1  ;;  %1780 = vmatpush3.bf16.msra.mxu0 %v1952_v31  ;;  %v996_v31 = vld [vmem:[%s2033_s20 + $0x14] sm:$0xff]  ;;  %v575_v33 = vpack.c.bf16 %v570_v30, %v2193_v60 }
  0x2e   : > { %1735 = vmatprep.mubr.msk.bf16.mxu0 %vm1984_vm0, %v1983_v1  ;;  %1781 = vmatprep.subr.bf16.mxu0 %v1983_v1  ;;  %v1006_v34 = vpack.c.bf16 %v997_v32, %v996_v31  ;;  %v1286_v60 = vld [vmem:[%s2033_s20 + $0x16] sm:$0xff] }
  0x31   : > { %1782 = vmatpush3.bf16.msra.mxu0 %v1954_v36  ;;  %v851_v36 = vld [vmem:[%s2033_s20 + $0xc] sm:$0xff] }
  0x32   : > { %1783 = vmatprep.subr.bf16.mxu0 %v1983_v1  ;;  %v861_v40 = vpack.c.bf16 %v996_v31, %v851_v36 }
  0x34   : > { %1704 = vmatmul.mubr.msk.bf16.vlgmr.msra.gmra.mxu1 %vm215_vm1, %v155_v37  ;;  %1736 = vmatmul.mubr.msk.bf16.gmra.mxu0 %vm215_vm1, %v427_v38  ;;  %v998_v37 = vld [vmem:[%s2033_s20 + $0x24] sm:$0xff]  ;;  %v999_v38 = vld [vmem:[%s2033_s20 + $0x2c] sm:$0xff] }
  0x35   : > { %1752 = vmatpush3.bf16.msra.mxu1 %v1951_v39  ;;  %1707 = vmatprep.mubr.msk.bf16.mxu1 %vm1984_vm0, %v1983_v1  ;;  %v1970_v39 = vld [vmem:[%s2497_s1 + $0x110] sm:$0xff]  }
  0x36   : > { %1753 = vmatprep.subr.bf16.mxu1 %v1983_v1  ;;  %1739 = vmatprep.mubr.msk.bf16.mxu0 %vm1984_vm0, %v1983_v1 }
  0x37   : > { %1784 = vmatpush3.bf16.msra.mxu0 %v1956_v41  ;;  %v1007_v41 = vpack.c.bf16 %v999_v38, %v998_v37 }
  0x38   : > { %1785 = vmatprep.subr.bf16.mxu0 %v1983_v1 }
  0x39   : > { %1754 = vmatpush3.bf16.msra.mxu1 %v1953_v43  ;;  %v1972_v43 = vld [vmem:[%s2497_s1 + $0x108] sm:$0xff]  }
  0x3a   : > { %1755 = vmatprep.subr.bf16.mxu1 %v1983_v1 }
  0x3b   : > { %1786 = vmatpush3.bf16.msra.mxu0 %v1958_v46  ;;  %v1001_v46 = vld [vmem:[%s2033_s20 + $0x3c] sm:$0xff] }
  0x3c   : > { %1708 = vmatmul.mubr.msk.bf16.gmra.mxu1 %vm215_vm1, %v156_v47  ;;  %1740 = vmatmul.mubr.msk.bf16.gmra.mxu0 %vm215_vm1, %v428_v48  ;;  %v1974_v47 = vld [vmem:[%s2497_s1 + $0x100] sm:$0xff]   ;;  %v862_v48 = vpack.c.bf16 %v998_v37, %v997_v32  ;;  %v864_v58 = vpack.c.bf16 %v1002_v51, %v1001_v46 }
  0x3d   : > { %1711 = vmatprep.mubr.msk.bf16.mxu1 %vm1984_vm0, %v1983_v1  ;;  %1743 = vmatprep.mubr.msk.bf16.mxu0 %vm1984_vm0, %v1983_v1 }
  0x3e   : > { %1756 = vmatpush3.bf16.msra.mxu1 %v1955_v49  ;;  %1835 = vmatprep.subr.bf16.mxu0 %v1983_v1  ;;  %v1008_v49 = vpack.c.bf16 %v1001_v46, %v1000_v45 }
  0x3f   : > { %1757 = vmatprep.subr.bf16.mxu1 %v1983_v1 }
  0x42   : > { %1758 = vmatpush3.bf16.msra.mxu1 %v1957_v54  ;;  %v863_v54 = vpack.c.bf16 %v1000_v45, %v999_v38 }
  0x43   : > { %1807 = vmatprep.subr.bf16.mxu1 %v1983_v1 }
  0x44   : > { %1712 = vmatmul.mubr.msk.bf16.gmra.mxu1 %vm215_vm1, %v157_v55  ;;  %1744 = vmatmul.mubr.msk.bf16.gmra.mxu0 %vm215_vm1, %v429_v56  ;;  %v1009_v55 = vpack.c.bf16 %v1003_v52, %v1002_v51  ;;  %v1004_v56 = vld [vmem:[%s2033_s20 + $0x54] sm:$0xff] }
  0x45   : > { %1715 = vmatprep.mubr.msk.bf16.mxu1 %vm1984_vm0, %v1983_v1  ;;  %1747 = vmatprep.mubr.msk.bf16.mxu0 %vm1984_vm0, %v1983_v1  ;;  %v1010_v59 = vpack.c.bf16 %v1005_v57, %v1004_v56 }
  0x4c   : > { %1716 = vmatmul.mubr.msk.bf16.gmra.mxu1 %vm215_vm1, %v158_v61  ;;  %1748 = vmatmul.mubr.msk.bf16.gmra.mxu0 %vm215_vm1, %v430_v62  ;;  %v1287_v61 = vld [vmem:[%s2033_s20 + $0x1e] sm:$0xff]  ;;  %v865_v62 = vpack.c.bf16 %v1004_v56, %v1003_v52 }
  0x4d   : > { %1719 = vmatprep.mubr.msk.bf16.mxu1 %vm1984_vm0, %v1983_v1  ;;  %1787 = vmatprep.mubr.msk.bf16.mxu0 %vm1984_vm0, %v1983_v1  ;;  %v1296_v63 = vpack.c.bf16 %v1287_v61, %v1286_v60 }
  0x54   : > { %1720 = vmatmul.mubr.msk.bf16.gmra.mxu1 %vm215_vm1, %v159_v4  ;;  %1788 = vmatmul.mubr.msk.bf16.vlgmr.msra.gmra.mxu0 %vm215_vm1, %v716_v5  ;;  %v1289_v4 = vld [vmem:[%s2033_s20 + $0x2e] sm:$0xff]  ;;  %v1151_v5 = vpack.c.bf16 %v1142_v2, %v1141_v0 }
  0x55   : > { %1759 = vmatprep.mubr.msk.bf16.mxu1 %vm1984_vm0, %v1983_v1  ;;  %1836 = vmatpush3.bf16.msra.mxu0 %v1960_v6  ;;  %v1297_v6 = vpack.c.bf16 %v1289_v4, %v1288_v3 }
  0x56   : > { %1791 = vmatprep.mubr.msk.bf16.mxu0 %vm1984_vm0, %v1983_v1  ;;  %1837 = vmatprep.subr.bf16.mxu0 %v1983_v1 }
  0x59   : > { %1838 = vmatpush3.bf16.msra.mxu0 %v1962_v9  ;;  %v1290_v9 = vld [vmem:[%s2033_s20 + $0x36] sm:$0xff] }
  0x5a   : > { %1839 = vmatprep.subr.bf16.mxu0 %v1983_v1 }
  0x5c   : > { %1760 = vmatmul.mubr.msk.bf16.vlgmr.msra.gmra.mxu1 %vm215_vm1, %v571_v10  ;;  %1792 = vmatmul.mubr.msk.bf16.gmra.mxu0 %vm215_vm1, %v717_v11  ;;  %v1291_v10 = vld [vmem:[%s2033_s20 + $0x3e] sm:$0xff]  ;;  %v1152_v11 = vpack.c.bf16 %v1144_v8, %v1143_v7 }
  0x5d   : > { %1808 = vmatpush3.bf16.msra.mxu1 %v1959_v12  ;;  %1763 = vmatprep.mubr.msk.bf16.mxu1 %vm1984_vm0, %v1983_v1  ;;  %v1298_v12 = vpack.c.bf16 %v1291_v10, %v1290_v9 }
  0x5e   : > { %1809 = vmatprep.subr.bf16.mxu1 %v1983_v1  ;;  %1795 = vmatprep.mubr.msk.bf16.mxu0 %vm1984_vm0, %v1983_v1 }
  0x5f   : > { %1840 = vmatpush3.bf16.msra.mxu0 %v1964_v13  ;;  %v1145_v13 = vld [vmem:[%s2033_s20 + $0x35] sm:$0xff] }
  0x60   : > { %1841 = vmatprep.subr.bf16.mxu0 %v1983_v1 }
  0x61   : > { %1810 = vmatpush3.bf16.msra.mxu1 %v1961_v14  ;;  %v1146_v14 = vld [vmem:[%s2033_s20 + $0x3d] sm:$0xff] }
  0x62   : > { %1811 = vmatprep.subr.bf16.mxu1 %v1983_v1 }
  0x63   : > { %1842 = vmatpush3.bf16.msra.mxu0 %v1966_v17  ;;  %v1153_v17 = vpack.c.bf16 %v1146_v14, %v1145_v13 }
  0x64   : > { %1764 = vmatmul.mubr.msk.bf16.gmra.mxu1 %vm215_vm1, %v572_v18  ;;  %1796 = vmatmul.mubr.msk.bf16.gmra.mxu0 %vm215_vm1, %v718_v19  ;;  %v1299_v18 = vpack.c.bf16 %v1293_v16, %v1292_v15  ;;  %v1147_v19 = vld [vmem:[%s2033_s20 + $0x45] sm:$0xff] }
  0x65   : > { %1767 = vmatprep.mubr.msk.bf16.mxu1 %vm1984_vm0, %v1983_v1  ;;  %1799 = vmatprep.mubr.msk.bf16.mxu0 %vm1984_vm0, %v1983_v1 }
  0x66   : > { %1812 = vmatpush3.bf16.msra.mxu1 %v1963_v20  ;;  %1891 = vmatprep.subr.bf16.mxu0 %v1983_v1  ;;  %v1148_v20 = vld [vmem:[%s2033_s20 + $0x4d] sm:$0xff] }
  0x67   : > { %1813 = vmatprep.subr.bf16.mxu1 %v1983_v1 }
  0x6a   : > { %1814 = vmatpush3.bf16.msra.mxu1 %v1965_v23  ;;  %v1154_v23 = vpack.c.bf16 %v1148_v20, %v1147_v19 }
  0x6b   : > { %1863 = vmatprep.subr.bf16.mxu1 %v1983_v1 }
  0x6c   : > { %1768 = vmatmul.mubr.msk.bf16.gmra.mxu1 %vm215_vm1, %v573_v24  ;;  %1800 = vmatmul.mubr.msk.bf16.gmra.mxu0 %vm215_vm1, %v719_v25  ;;  %v1300_v24 = vpack.c.bf16 %v1295_v22, %v1294_v21  ;;  %v1149_v25 = vld [vmem:[%s2033_s20 + $0x55] sm:$0xff]  ;;  %s1928_s20 = smul.u32 80, %s2500_s10 }
  0x6d   : > { %1771 = vmatprep.mubr.msk.bf16.mxu1 %vm1984_vm0, %v1983_v1  ;;  %1803 = vmatprep.mubr.msk.bf16.mxu0 %vm1984_vm0, %v1983_v1  ;;  %v1155_v27 = vpack.c.bf16 %v1150_v26, %v1149_v25 }
  0x6e   : > { %s2453_s13 = scalar_lea.vmem %s2498_s2, %s1928_s20 }
  0x74   : > { %1772 = vmatmul.mubr.msk.bf16.gmra.mxu1 %vm215_vm1, %v574_v28  ;;  %1804 = vmatmul.mubr.msk.bf16.gmra.mxu0 %vm215_vm1, %v720_v29 }
  0x75   : > { %1775 = vmatprep.mubr.msk.bf16.mxu1 %vm1984_vm0, %v1983_v1  ;;  %1843 = vmatprep.mubr.msk.bf16.mxu0 %vm1984_vm0, %v1983_v1 }
  0x7c   : > { %1776 = vmatmul.mubr.msk.bf16.gmra.mxu1 %vm215_vm1, %v575_v33  ;;  %1844 = vmatmul.mubr.msk.bf16.vlgmr.msra.gmra.mxu0 %vm215_vm1, %v1006_v34 }
  0x7d   : > { %1815 = vmatprep.mubr.msk.bf16.mxu1 %vm1984_vm0, %v1983_v1  ;;  %1892 = vmatpush3.bf16.msra.mxu0 %v1968_v35 }
  0x7e   : > { %1847 = vmatprep.mubr.msk.bf16.mxu0 %vm1984_vm0, %v1983_v1  ;;  %1893 = vmatprep.subr.bf16.mxu0 %v1983_v1 }
  0x81   : > { %1894 = vmatpush3.bf16.msra.mxu0 %v1970_v39 }
  0x82   : > { %1895 = vmatprep.subr.bf16.mxu0 %v1983_v1 }
  0x84   : > { %1816 = vmatmul.mubr.msk.bf16.vlgmr.msra.gmra.mxu1 %vm215_vm1, %v861_v40  ;;  %1848 = vmatmul.mubr.msk.bf16.gmra.mxu0 %vm215_vm1, %v1007_v41 }
  0x85   : > { %1864 = vmatpush3.bf16.msra.mxu1 %v1967_v42  ;;  %1819 = vmatprep.mubr.msk.bf16.mxu1 %vm1984_vm0, %v1983_v1 }
  0x86   : > { %1865 = vmatprep.subr.bf16.mxu1 %v1983_v1  ;;  %1851 = vmatprep.mubr.msk.bf16.mxu0 %vm1984_vm0, %v1983_v1 }
  0x87   : > { %1896 = vmatpush3.bf16.msra.mxu0 %v1972_v43 }
  0x88   : > { %1897 = vmatprep.subr.bf16.mxu0 %v1983_v1 }
  0x89   : > { %1866 = vmatpush3.bf16.msra.mxu1 %v1969_v44 }
  0x8a   : > { %1867 = vmatprep.subr.bf16.mxu1 %v1983_v1 }
  0x8b   : > { %1898 = vmatpush3.bf16.msra.mxu0 %v1974_v47 }
  0x8c   : > { %1820 = vmatmul.mubr.msk.bf16.gmra.mxu1 %vm215_vm1, %v862_v48  ;;  %1852 = vmatmul.mubr.msk.bf16.gmra.mxu0 %vm215_vm1, %v1008_v49 }
  0x8d   : > { %1823 = vmatprep.mubr.msk.bf16.mxu1 %vm1984_vm0, %v1983_v1  ;;  %1855 = vmatprep.mubr.msk.bf16.mxu0 %vm1984_vm0, %v1983_v1 }
  0x8e   : > { %1868 = vmatpush3.bf16.msra.mxu1 %v1971_v50 }
  0x8f   : > { %1869 = vmatprep.subr.bf16.mxu1 %v1983_v1 }
  0x92   : > { %1870 = vmatpush3.bf16.msra.mxu1 %v1973_v53 }
  0x94   : > { %1824 = vmatmul.mubr.msk.bf16.gmra.mxu1 %vm215_vm1, %v863_v54  ;;  %1856 = vmatmul.mubr.msk.bf16.gmra.mxu0 %vm215_vm1, %v1009_v55 }
  0x95   : > { %1827 = vmatprep.mubr.msk.bf16.mxu1 %vm1984_vm0, %v1983_v1  ;;  %1859 = vmatprep.mubr.msk.bf16.mxu0 %vm1984_vm0, %v1983_v1 }
  0x9c   : > { %1828 = vmatmul.mubr.msk.bf16.gmra.mxu1 %vm215_vm1, %v864_v58  ;;  %1860 = vmatmul.mubr.msk.bf16.gmra.mxu0 %vm215_vm1, %v1010_v59 }
  0x9d   : > { %1831 = vmatprep.mubr.msk.bf16.mxu1 %vm1984_vm0, %v1983_v1  ;;  %1899 = vmatprep.mubr.msk.bf16.mxu0 %vm1984_vm0, %v1983_v1 }
  0xa4   : > { %1832 = vmatmul.mubr.msk.bf16.gmra.mxu1 %vm215_vm1, %v865_v62  ;;  %1900 = vmatmul.mubr.msk.bf16.vlgmr.msra.gmra.mxu0 %vm215_vm1, %v1296_v63 }
  0xa5   : > { %1871 = vmatprep.mubr.msk.bf16.mxu1 %vm1984_vm0, %v1983_v1  ;;  %1903 = vmatprep.mubr.msk.bf16.mxu0 %vm1984_vm0, %v1983_v1 }
  0xac   : > { %1872 = vmatmul.mubr.msk.bf16.vlgmr.msra.gmra.mxu1 %vm215_vm1, %v1151_v5  ;;  %1904 = vmatmul.mubr.msk.bf16.gmra.mxu0 %vm215_vm1, %v1297_v6 }
  0xad   : > { %1875 = vmatprep.mubr.msk.bf16.mxu1 %vm1984_vm0, %v1983_v1  ;;  %1907 = vmatprep.mubr.msk.bf16.mxu0 %vm1984_vm0, %v1983_v1 }
  0xb4   : > { %1876 = vmatmul.mubr.msk.bf16.gmra.mxu1 %vm215_vm1, %v1152_v11  ;;  %1908 = vmatmul.mubr.msk.bf16.gmra.mxu0 %vm215_vm1, %v1298_v12 }
  0xb5   : > { %1879 = vmatprep.mubr.msk.bf16.mxu1 %vm1984_vm0, %v1983_v1  ;;  %1911 = vmatprep.mubr.msk.bf16.mxu0 %vm1984_vm0, %v1983_v1 }
  0xbc   : > { %1880 = vmatmul.mubr.msk.bf16.gmra.mxu1 %vm215_vm1, %v1153_v17  ;;  %1912 = vmatmul.mubr.msk.bf16.gmra.mxu0 %vm215_vm1, %v1299_v18 }
  0xbd   : > { %1883 = vmatprep.mubr.msk.bf16.mxu1 %vm1984_vm0, %v1983_v1  ;;  %1915 = vmatprep.mubr.msk.bf16.mxu0 %vm1984_vm0, %v1983_v1 }
  0xc4   : > { %1884 = vmatmul.mubr.msk.bf16.gmra.mxu1 %vm215_vm1, %v1154_v23  ;;  %1916 = vmatmul.mubr.msk.bf16.gmra.mxu0 %vm215_vm1, %v1300_v24 }
  0xc5   : > { %1887 = vmatprep.mubr.msk.bf16.mxu1 %vm1984_vm0, %v1983_v1 }
  0xcc   : > { %1888 = vmatmul.mubr.msk.bf16.gmra.mxu1 %vm215_vm1, %v1155_v27 }
  0xdc   : > { %v281_v28 = vpop.f32.mrf.mxu1  ;;  %v265_v29 = vpop.f32.mrf.mxu0 }
  0xde   : > { %v1685_v30 = vpop.f32.mrf.mxu1  ;;  %v1677_v31 = vpop.f32.mrf.mxu0 }
  0xe0   : > { %v284_v32 = vpop.f32.mrf.mxu1  ;;  %v268_v33 = vpop.f32.mrf.mxu0 }
  0xe2   : > { %v1686_v34 = vpop.f32.mrf.mxu1  ;;  %v1678_v35 = vpop.f32.mrf.mxu0 }
  0xe4   : > { %v289_v36 = vpop.f32.mrf.mxu1  ;;  %v273_v37 = vpop.f32.mrf.mxu0 }
  0xe6   : > { %v1689_v38 = vpop.f32.mrf.mxu1  ;;  %v1681_v39 = vpop.f32.mrf.mxu0 }
  0xe8   : > { %v292_v40 = vpop.f32.mrf.mxu1  ;;  %v276_v41 = vpop.f32.mrf.mxu0 }
  0xea   : > { %v1690_v1 = vpop.f32.mrf.mxu1  ;;  %v1682_v42 = vpop.f32.mrf.mxu0 }
  0xec   : > { %v297_v43 = vpop.f32.mrf.mxu1  ;;  %v512_v44 = vpop.f32.mrf.mxu0 }
  0xee   : > { %v1693_v45 = vpop.f32.mrf.mxu1  ;;  %v1733_v46 = vpop.f32.mrf.mxu0 }
  0xf0   : > { %v300_v47 = vpop.f32.mrf.mxu1  ;;  %v515_v48 = vpop.f32.mrf.mxu0 }
  0xf2   : > { %v1694_v49 = vpop.f32.mrf.mxu1  ;;  %v1734_v50 = vpop.f32.mrf.mxu0 }
  0xf4   : > { %v377_v51 = vpop.f32.mrf.mxu1  ;;  %v520_v52 = vpop.f32.mrf.mxu0 }
  0xf5   : > { %v378_v53 = vadd.f32 %v377_v51, %v265_v29 }
  0xf6   : > { %v1705_v54 = vpop.f32.mrf.mxu1  ;;  %v1737_v55 = vpop.f32.mrf.mxu0 }
  0xf7   : > { %v551_v56 = vadd.f32 %v512_v44, %v378_v53 }
  0xf8   : > { %v380_v57 = vpop.f32.mrf.mxu1  ;;  %v523_v58 = vpop.f32.mrf.mxu0 }
  0xf9   : > { %v381_v59 = vadd.f32 %v380_v57, %v268_v33 }
  0xfa   : > { %v1706_v60 = vpop.f32.mrf.mxu1  ;;  %v1738_v61 = vpop.f32.mrf.mxu0 }
  0xfb   : > { %v552_v62 = vadd.f32 %v515_v48, %v381_v59 }
  0xfc   : > { %v385_v63 = vpop.f32.mrf.mxu1  ;;  %v528_v0 = vpop.f32.mrf.mxu0 }
  0xfd   : > { %v386_v2 = vadd.f32 %v385_v63, %v273_v37 }
  0xfe   : > { %v1709_v3 = vpop.f32.mrf.mxu1  ;;  %v1741_v4 = vpop.f32.mrf.mxu0 }
  0xff   : > { %v553_v5 = vadd.f32 %v520_v52, %v386_v2 }
 0x100   : > { %v388_v6 = vpop.f32.mrf.mxu1  ;;  %v531_v7 = vpop.f32.mrf.mxu0 }
 0x101   : > { %v389_v8 = vadd.f32 %v388_v6, %v276_v41 }
 0x102   : > { %v1710_v9 = vpop.f32.mrf.mxu1  ;;  %v1742_v10 = vpop.f32.mrf.mxu0 }
 0x103   : > { %v554_v11 = vadd.f32 %v523_v58, %v389_v8 }
 0x104   : > { %v393_v12 = vpop.f32.mrf.mxu1  ;;  %v536_v13 = vpop.f32.mrf.mxu0 }
 0x105   : > { %v394_v14 = vadd.f32 %v393_v12, %v281_v28 }
 0x106   : > { %v1713_v15 = vpop.f32.mrf.mxu1  ;;  %v1745_v16 = vpop.f32.mrf.mxu0 }
 0x107   : > { %v555_v17 = vadd.f32 %v528_v0, %v394_v14 }
 0x108   : > { %v396_v18 = vpop.f32.mrf.mxu1  ;;  %v539_v19 = vpop.f32.mrf.mxu0 }
 0x109   : > { %v397_v20 = vadd.f32 %v396_v18, %v284_v32 }
 0x10a   : > { %v1714_v21 = vpop.f32.mrf.mxu1  ;;  %v1746_v22 = vpop.f32.mrf.mxu0 }
 0x10b   : > { %v556_v23 = vadd.f32 %v531_v7, %v397_v20 }
 0x10c   : > { %v401_v24 = vpop.f32.mrf.mxu1  ;;  %v544_v25 = vpop.f32.mrf.mxu0 }
 0x10d   : > { %v402_v26 = vadd.f32 %v401_v24, %v289_v36 }
 0x10e   : > { %v1717_v27 = vpop.f32.mrf.mxu1  ;;  %v1749_v29 = vpop.f32.mrf.mxu0 }
 0x10f   : > { %v557_v30 = vadd.f32 %v536_v13, %v402_v26 }
 0x110   : > { %v404_v31 = vpop.f32.mrf.mxu1  ;;  %v547_v33 = vpop.f32.mrf.mxu0 }
 0x111   : > { %v405_v34 = vadd.f32 %v404_v31, %v292_v40 }
 0x112   : > { %v1718_v35 = vpop.f32.mrf.mxu1  ;;  %v1750_v28 = vpop.f32.mrf.mxu0 }
 0x113   : > { %v558_v37 = vadd.f32 %v539_v19, %v405_v34 }
 0x114   : > { %v409_v38 = vpop.f32.mrf.mxu1  ;;  %v802_v39 = vpop.f32.mrf.mxu0 }
 0x115   : > { %v410_v41 = vadd.f32 %v409_v38, %v297_v43 }
 0x116   : > { %v1721_v1 = vpop.f32.mrf.mxu1  ;;  %v1789_v32 = vpop.f32.mrf.mxu0 }
 0x117   : > { %v559_v42 = vadd.f32 %v544_v25, %v410_v41 }
 0x118   : > { %v412_v44 = vpop.f32.mrf.mxu1  ;;  %v805_v45 = vpop.f32.mrf.mxu0 }
 0x119   : > { %v413_v46 = vadd.f32 %v412_v44, %v300_v47 }
 0x11a   : > { %v1722_v48 = vpop.f32.mrf.mxu1  ;;  %v1790_v36 = vpop.f32.mrf.mxu0 }
 0x11b   : > { %v560_v49 = vadd.f32 %v547_v33, %v413_v46 }
 0x11c   : > { %v657_v50 = vpop.f32.mrf.mxu1  ;;  %v810_v51 = vpop.f32.mrf.mxu0 }
 0x11d   : > { %v696_v52 = vadd.f32 %v657_v50, %v551_v56 }
 0x11e   : > { %v1761_v53 = vpop.f32.mrf.mxu1  ;;  %v1793_v40 = vpop.f32.mrf.mxu0 }
 0x11f   : > { %v2407_v54 = vadd.f32 %v802_v39, %v696_v52 }
 0x120   : > { %v660_v55 = vpop.f32.mrf.mxu1  ;;  %v813_v57 = vpop.f32.mrf.mxu0 }
 0x121   : > { %v697_v58 = vadd.f32 %v660_v55, %v552_v62 }
 0x122   : > { %v1762_v43 = vpop.f32.mrf.mxu1  ;;  %v1794_v59 = vpop.f32.mrf.mxu0 }
 0x123   : > { %v2409_v60 = vadd.f32 %v805_v45, %v697_v58 }
 0x124   : > { %v665_v61 = vpop.f32.mrf.mxu1  ;;  %v818_v63 = vpop.f32.mrf.mxu0 }
 0x125   : > { %v698_v47 = vadd.f32 %v665_v61, %v553_v5 }
 0x126   : > { %v1765_v0 = vpop.f32.mrf.mxu1  ;;  %v1797_v2 = vpop.f32.mrf.mxu0 }
 0x127   : > { %v2411_v3 = vadd.f32 %v810_v51, %v698_v47 }
 0x128   : > { %v668_v4 = vpop.f32.mrf.mxu1  ;;  %v821_v56 = vpop.f32.mrf.mxu0 }
 0x129   : > { %v699_v6 = vadd.f32 %v668_v4, %v554_v11 }
 0x12a   : > { %v1766_v7 = vpop.f32.mrf.mxu1  ;;  %v1798_v8 = vpop.f32.mrf.mxu0 }
 0x12b   : > { %v2413_v9 = vadd.f32 %v813_v57, %v699_v6 }
 0x12c   : > { %v673_v10 = vpop.f32.mrf.mxu1  ;;  %v826_v62 = vpop.f32.mrf.mxu0 }
 0x12d   : > { %v700_v12 = vadd.f32 %v673_v10, %v555_v17 }
 0x12e   : > { %v1769_v13 = vpop.f32.mrf.mxu1  ;;  %v1801_v14 = vpop.f32.mrf.mxu0 }
 0x12f   : > { %v2415_v15 = vadd.f32 %v818_v63, %v700_v12 }
 0x130   : > { %v676_v16 = vpop.f32.mrf.mxu1  ;;  %v829_v5 = vpop.f32.mrf.mxu0 }
 0x131   : > { %v701_v18 = vadd.f32 %v676_v16, %v556_v23 }
 0x132   : > { %v1770_v19 = vpop.f32.mrf.mxu1  ;;  %v1802_v20 = vpop.f32.mrf.mxu0 }
 0x133   : > { %v2417_v21 = vadd.f32 %v821_v56, %v701_v18 }
 0x134   : > { %v681_v22 = vpop.f32.mrf.mxu1  ;;  %v834_v11 = vpop.f32.mrf.mxu0 }
 0x135   : > { %v702_v24 = vadd.f32 %v681_v22, %v557_v30 }
 0x136   : > { %v1773_v25 = vpop.f32.mrf.mxu1  ;;  %v1805_v26 = vpop.f32.mrf.mxu0 }
 0x137   : > { %v2419_v27 = vadd.f32 %v826_v62, %v702_v24 }
 0x138   : > { %v684_v29 = vpop.f32.mrf.mxu1  ;;  %v837_v17 = vpop.f32.mrf.mxu0 }
 0x139   : > { %v703_v31 = vadd.f32 %v684_v29, %v558_v37 }
 0x13a   : > { %v1774_v33 = vpop.f32.mrf.mxu1  ;;  %v1806_v34 = vpop.f32.mrf.mxu0 }
 0x13b   : > { %v2421_v35 = vadd.f32 %v829_v5, %v703_v31 }
 0x13c   : > { %v689_v28 = vpop.f32.mrf.mxu1  ;;  %v1092_v23 = vpop.f32.mrf.mxu0 }
 0x13d   : > { %v704_v38 = vadd.f32 %v689_v28, %v559_v42 }
 0x13e   : > { %v1777_v39 = vpop.f32.mrf.mxu1  ;;  %v1845_v41 = vpop.f32.mrf.mxu0 }
 0x13f   : > { %v2423_v1 = vadd.f32 %v834_v11, %v704_v38 }
 0x140   : > { %v692_v32 = vpop.f32.mrf.mxu1  ;;  %v1095_v30 = vpop.f32.mrf.mxu0 }
 0x141   : > { %v705_v44 = vadd.f32 %v692_v32, %v560_v49 }
 0x142   : > { %v1778_v45 = vpop.f32.mrf.mxu1  ;;  %v1846_v46 = vpop.f32.mrf.mxu0 }
 0x143   : > { %v2425_v48 = vadd.f32 %v837_v17, %v705_v44 }
 0x144   : > { %v947_v36 = vpop.f32.mrf.mxu1  ;;  %v1100_v37 = vpop.f32.mrf.mxu0 }
 0x145   : > { %v986_v24 = vadd.f32 %v947_v36, %v2407_v54 }
 0x146   : > { %v1817_v50 = vpop.f32.mrf.mxu1  ;;  %v1849_v51 = vpop.f32.mrf.mxu0 }
 0x147   : > { %v1131_v33 = vadd.f32 %v1092_v23, %v986_v24 }
 0x148   : > { %v950_v52 = vpop.f32.mrf.mxu1  ;;  %v2427_v53 = vpop.f32.mrf.mxu0 }
 0x149   : > { %v987_v31 = vadd.f32 %v950_v52, %v2409_v60 }
 0x14a   : > { %v1818_v40 = vpop.f32.mrf.mxu1  ;;  %v1850_v42 = vpop.f32.mrf.mxu0 }
 0x14b   : > { %v1132_v44 = vadd.f32 %v1095_v30, %v987_v31 }
 0x14c   : > { %v955_v55 = vpop.f32.mrf.mxu1  ;;  %v2429_v57 = vpop.f32.mrf.mxu0 }
 0x14d   : > { %v988_v41 = vadd.f32 %v955_v55, %v2411_v3 }
 0x14e   : > { %v1821_v58 = vpop.f32.mrf.mxu1  ;;  %v1853_v43 = vpop.f32.mrf.mxu0 }
 0x14f   : > { %v1133_v52 = vadd.f32 %v1100_v37, %v988_v41 }
 0x150   : > { %v958_v59 = vpop.f32.mrf.mxu1  ;;  %v2431_v49 = vpop.f32.mrf.mxu0 }
 0x151   : > { %v989_v50 = vadd.f32 %v958_v59, %v2413_v9 }
 0x152   : > { %v1822_v61 = vpop.f32.mrf.mxu1  ;;  %v1854_v63 = vpop.f32.mrf.mxu0 }
 0x153   : > { %v1134_v61 = vadd.f32 %v2427_v53, %v989_v50 }
 0x154   : > { %v963_v47 = vpop.f32.mrf.mxu1  ;;  %v2433_v0 = vpop.f32.mrf.mxu0 }
 0x155   : > { %v990_v55 = vadd.f32 %v963_v47, %v2415_v15 }
 0x156   : > { %v1825_v2 = vpop.f32.mrf.mxu1  ;;  %v1857_v4 = vpop.f32.mrf.mxu0 }
 0x158   : > { %v966_v56 = vpop.f32.mrf.mxu1  ;;  %v2435_v6 = vpop.f32.mrf.mxu0 }
 0x159   : > { %v991_v4 = vadd.f32 %v966_v56, %v2417_v21 }
 0x15a   : > { %v1826_v7 = vpop.f32.mrf.mxu1  ;;  %v1858_v8 = vpop.f32.mrf.mxu0 }
 0x15b   : > { %v1135_v8 = vadd.f32 %v2429_v57, %v990_v55 }
 0x15c   : > { %v971_v10 = vpop.f32.mrf.mxu1  ;;  %v2437_v62 = vpop.f32.mrf.mxu0 }
 0x15e   : > { %v1829_v12 = vpop.f32.mrf.mxu1  ;;  %v1861_v13 = vpop.f32.mrf.mxu0 }
 0x160   : > { %v2439_v14 = vpop.f32.mrf.mxu1  ;;  %v2441_v16 = vpop.f32.mrf.mxu0 }
 0x161   : > { %v993_v24 = vadd.f32 %v2439_v14, %v2421_v35 }
 0x162   : > { %v1830_v5 = vpop.f32.mrf.mxu1  ;;  %v1862_v18 = vpop.f32.mrf.mxu0 }
 0x163   : > { %v992_v5 = vadd.f32 %v971_v10, %v2419_v27 }
 0x164   : > { %v2443_v19 = vpop.f32.mrf.mxu1  ;;  %v1382_v20 = vpop.f32.mrf.mxu0 }
 0x166   : > { %v1833_v22 = vpop.f32.mrf.mxu1  ;;  %v1901_v11 = vpop.f32.mrf.mxu0 }
 0x168   : > { %v2446_v25 = vpop.f32.mrf.mxu1  ;;  %v1385_v26 = vpop.f32.mrf.mxu0 }
 0x16a   : > { %v1834_v29 = vpop.f32.mrf.mxu1  ;;  %v1902_v17 = vpop.f32.mrf.mxu0 }
 0x16b   : > { %v1137_v29 = vadd.f32 %v2433_v0, %v992_v5 }
 0x16c   : > { %v1237_v34 = vpop.f32.mrf.mxu1  ;;  %v1390_v28 = vpop.f32.mrf.mxu0 }
 0x16d   : > { %v1276_v38 = vadd.f32 %v1237_v34, %v1131_v33  ;;  %v994_v33 = vadd.f32 %v2443_v19, %v2423_v1 }
 0x16e   : > { %v1873_v39 = vpop.f32.mrf.mxu1  ;;  %v1905_v54 = vpop.f32.mrf.mxu0 }
 0x16f   : > { %v1421_v32 = vadd.f32 %v1382_v20, %v1276_v38  ;;  %v1136_v20 = vadd.f32 %v2431_v49, %v991_v4  ;;  %v995_v54 = vadd.f32 %v2446_v25, %v2425_v48 }
 0x170   : > { %v1240_v45 = vpop.f32.mrf.mxu1  ;;  %v1393_v46 = vpop.f32.mrf.mxu0 }
 0x171   : > { %1431 = vst.msk [vmem:[%s2453_s13] sm:$0xff] %vm215_vm1, %v1421_v32  ;;  %v1277_v60 = vadd.f32 %v1240_v45, %v1132_v44  ;;  %v1139_v32 = vadd.f32 %v2437_v62, %v994_v33  ;;  %v1140_v45 = vadd.f32 %v2441_v16, %v995_v54 }
 0x172   : > { %v1874_v23 = vpop.f32.mrf.mxu1  ;;  %v1906_v36 = vpop.f32.mrf.mxu0 }
 0x173   : > { %v1422_v51 = vadd.f32 %v1385_v26, %v1277_v60 }
 0x174   : > { %v1245_v40 = vpop.f32.mrf.mxu1  ;;  %v1398_v42 = vpop.f32.mrf.mxu0 }
 0x175   : > { %1432 = vst.msk [vmem:[%s2453_s13 + $0x8] sm:$0xff] %vm215_vm1, %v1422_v51  ;;  %v1278_v58 = vadd.f32 %v1245_v40, %v1133_v52 }
 0x176   : > { %v1877_v3 = vpop.f32.mrf.mxu1  ;;  %v1909_v30 = vpop.f32.mrf.mxu0 }
 0x177   : > { %v1423_v43 = vadd.f32 %v1390_v28, %v1278_v58  ;;  %v1138_v28 = vadd.f32 %v2435_v6, %v993_v24 }
 0x178   : > { %v1248_v63 = vpop.f32.mrf.mxu1  ;;  %v1401_v2 = vpop.f32.mrf.mxu0 }
 0x179   : > { %1433 = vst.msk [vmem:[%s2453_s13 + $0x10] sm:$0xff] %vm215_vm1, %v1423_v43  ;;  %v1279_v9 = vadd.f32 %v1248_v63, %v1134_v61 }
 0x17a   : > { %v1878_v59 = vpop.f32.mrf.mxu1  ;;  %v1910_v37 = vpop.f32.mrf.mxu0 }
 0x17b   : > { %v1424_v7 = vadd.f32 %v1393_v46, %v1279_v9 }
 0x17c   : > { %v1253_v12 = vpop.f32.mrf.mxu1  ;;  %v1406_v13 = vpop.f32.mrf.mxu0 }
 0x17d   : > { %1434 = vst.msk [vmem:[%s2453_s13 + $0x18] sm:$0xff] %vm215_vm1, %v1424_v7  ;;  %v1280_v15 = vadd.f32 %v1253_v12, %v1135_v8 }
 0x17e   : > { %v1881_v47 = vpop.f32.mrf.mxu1  ;;  %v1913_v53 = vpop.f32.mrf.mxu0 }
 0x17f   : > { %v1425_v18 = vadd.f32 %v1398_v42, %v1280_v15 }
 0x180   : > { %v1256_v22 = vpop.f32.mrf.mxu1  ;;  %v1409_v11 = vpop.f32.mrf.mxu0 }
 0x181   : > { %1435 = vst.msk [vmem:[%s2453_s13 + $0x20] sm:$0xff] %vm215_vm1, %v1425_v18  ;;  %v1281_v21 = vadd.f32 %v1256_v22, %v1136_v20 }
 0x182   : > { %v1882_v56 = vpop.f32.mrf.mxu1  ;;  %v1914_v57 = vpop.f32.mrf.mxu0 }
 0x183   : > { %v1426_v26 = vadd.f32 %v1401_v2, %v1281_v21 }
 0x184   : > { %v1261_v17 = vpop.f32.mrf.mxu1  ;;  %v1414_v31 = vpop.f32.mrf.mxu0 }
 0x185   : > { %1436 = vst.msk [vmem:[%s2453_s13 + $0x28] sm:$0xff] %vm215_vm1, %v1426_v26  ;;  %v1282_v27 = vadd.f32 %v1261_v17, %v1137_v29 }
 0x186   : > { %v1885_v49 = vpop.f32.mrf.mxu1  ;;  %v1917_v10 = vpop.f32.mrf.mxu0 }
 0x187   : > { %v1427_v34 = vadd.f32 %v1406_v13, %v1282_v27 }
 0x188   : > { %v1264_v38 = vpop.f32.mrf.mxu1  ;;  %v1417_v35 = vpop.f32.mrf.mxu0 }
 0x189   : > { %1437 = vst.msk [vmem:[%s2453_s13 + $0x30] sm:$0xff] %vm215_vm1, %v1427_v34  ;;  %v1283_v0 = vadd.f32 %v1264_v38, %v1138_v28 }
 0x18a   : > { %v1886_v14 = vpop.f32.mrf.mxu1  ;;  %v1918_v39 = vpop.f32.mrf.mxu0 }
 0x18b   : > { %v1428_v41 = vadd.f32 %v1409_v11, %v1283_v0 }
 0x18c   : > { %v1269_v44 = vpop.f32.mrf.mxu1 }
 0x18d   : > { %1438 = vst.msk [vmem:[%s2453_s13 + $0x38] sm:$0xff] %vm215_vm1, %v1428_v41  ;;  %v1284_v1 = vadd.f32 %v1269_v44, %v1139_v32 }
 0x18e   : > { %v1889_v6 = vpop.f32.mrf.mxu1 }
 0x18f   : > { %v1429_v19 = vadd.f32 %v1414_v31, %v1284_v1 }
 0x190   : > { %v1272_v46 = vpop.f32.mrf.mxu1 }
 0x191   : > { %1439 = vst.msk [vmem:[%s2453_s13 + $0x40] sm:$0xff] %vm215_vm1, %v1429_v19  ;;  %v1285_v60 = vadd.f32 %v1272_v46, %v1140_v45 }
 0x192   : > { %v1890_v23 = vpop.f32.mrf.mxu1 }
 0x193   : > { %v1430_v36 = vadd.f32 %v1417_v35, %v1285_v60 }
 0x195   : > { %1440 = vst.msk [vmem:[%s2453_s13 + $0x48] sm:$0xff] %vm215_vm1, %v1430_v36 }
 0x196 PF: > { %s12_s9 = sadd.s32 1, %s1981_s9  }
 0x197   : > { %p9_p4 = scmp.ge.s32.totalorder %s12_s9, 4  }
 0x199   :  { %11 = sbr.rel (!%p9_p4) target bundleno = 1 (0x1), region = 58 }

// kernel: resnet_shard1_forward.114
= control target key start
LH: loop header
LB: loop body
LE: loop exit
PB: predicated region body
PF: predicated region fallthrough
CT: control target
= control target key end

     0   :  { %s979_s9 = smov 0   ;;  %s981_s10 = smov 0   ;;  %s1187_s0 = inlined_call_operand.vmem [shape: bf16[32,256], index: 0, kind: input, shape index: {}]   ;;  %s1188_s1 = inlined_call_operand.vmem [shape: bf16[256,512], index: 1, kind: input, shape index: {}]   ;;  %s1189_s2 = inlined_call_operand.vmem [shape: f32[32,512], index: 2, kind: output, shape index: {}]  }
   0x1   :  { %s983_s11 = smov 0   ;;  %s985_s12 = smov 0  }
   0x2   :  { %s987_s13 = smov 0  }
   0x3 LB: > { %s21_s14 = sadd.s32 1, %s958_s12  ;;  %s744_s15 = sadd.s32 4294967295, %s962_s13   ;;  %s962_s13 = sphi %s987_s13, %s12_s13   ;;  %s958_s12 = sphi %s985_s12, %s1194_s12   ;;  %s954_s11 = sphi %s983_s11, %s1193_s11   ;;  %s950_s10 = sphi %s981_s10, %s1192_s10   ;;  %s946_s9 = sphi %s979_s9, %s1191_s9  }
   0x4   : > { %p22_p0 = scmp.ge.s32.totalorder %s21_s14, 2  ;;  %p64_p1 = scmp.ne.s32.totalorder %s950_s10, %s946_s9 }
   0x5   : > { %p65_p2 = scmp.eq.s32.totalorder %s962_s13, 0  ;;  %p96_p4 = scmp.eq.s32.totalorder %s744_s15, 1 }
   0x6   : > { %s1196_s14 = smov (%p22_p0, %s21_s14), 0  ;;  %s57_s17 = sadd.s32 1, %s950_s10 }
   0x7   : > { %p66_p3 = por %p65_p2, %p64_p1  ;;  %s54_s16 = ssub.s32 %s958_s12, %s1196_s14 }
   0x8   : > { %p55_p5 = scmp.eq.s32.totalorder %s54_s16, 0  ;;  %p1014_p6 = por %p96_p4, %p64_p1 }
   0x9   : > { %p748_p7 = scmp.ge.s32.totalorder %s962_s13, 2 }
   0xa   : > { %s1019_s19 = scalar_select %p55_p5, %s950_s10, %s57_s17  }
   0xb   : > { %128 = sbr.rel (%p748_p7) target bundleno = 36 (0x24), region = 20 }
  0x10   : > { %131 = sbr.rel (!%p66_p3) target bundleno = 36 (0x24), region = 24  ;;  %s133_s20 = sand.u32 (%p66_p3), 1, %s950_s10  }
  0x11   : > { %s796_s21 = sshll.u32 (%p66_p3), %s958_s12, 3  ;;  %s749_s22 = sshll.u32 (%p66_p3), %s133_s20, 8 }
  0x12   : > { %s1027_s25 = scalar_lea.vmem (%p66_p3), %s1188_s1, %s796_s21  ;;  %s1032_s26 = scalar_lea.vmem (%p66_p3), [#allocation2], %s749_s22 }
  0x13   : > { %v229_v0 = vld [vmem:[%s1027_s25] sm:$0xff] (%p66_p3)  ;;  %v231_v1 = vld [vmem:[%s1027_s25 + $0x10] sm:$0xff] (%p66_p3) }
  0x14   : > { %v233_v2 = vld [vmem:[%s1027_s25 + $0x20] sm:$0xff] (%p66_p3)  ;;  %230 = vst [vmem:[%s1032_s26] sm:$0xff] (%p66_p3), %v229_v0  ;;  %232 = vst [vmem:[%s1032_s26 + $0x8] sm:$0xff] (%p66_p3), %v231_v1  ;;  %v235_v3 = vld [vmem:[%s1027_s25 + $0x30] sm:$0xff] (%p66_p3) }
  0x15   : > { %234 = vst [vmem:[%s1032_s26 + $0x10] sm:$0xff] %v233_v2  ;;  %v237_v4 = vld [vmem:[%s1027_s25 + $0x40] sm:$0xff]  ;;  %v239_v5 = vld [vmem:[%s1027_s25 + $0x50] sm:$0xff]  ;;  %236 = vst [vmem:[%s1032_s26 + $0x18] sm:$0xff] %v235_v3 }
  0x16   : > { %238 = vst [vmem:[%s1032_s26 + $0x20] sm:$0xff] %v237_v4  ;;  %240 = vst [vmem:[%s1032_s26 + $0x28] sm:$0xff] %v239_v5  ;;  %v241_v6 = vld [vmem:[%s1027_s25 + $0x60] sm:$0xff]  ;;  %v243_v7 = vld [vmem:[%s1027_s25 + $0x70] sm:$0xff] }
  0x17   : > { %v245_v8 = vld [vmem:[%s1027_s25 + $0x80] sm:$0xff]  ;;  %242 = vst [vmem:[%s1032_s26 + $0x30] sm:$0xff] %v241_v6  ;;  %244 = vst [vmem:[%s1032_s26 + $0x38] sm:$0xff] %v243_v7  ;;  %v247_v9 = vld [vmem:[%s1027_s25 + $0x90] sm:$0xff] }
  0x18   : > { %246 = vst [vmem:[%s1032_s26 + $0x40] sm:$0xff] %v245_v8  ;;  %v249_v10 = vld [vmem:[%s1027_s25 + $0xa0] sm:$0xff]  ;;  %v251_v11 = vld [vmem:[%s1027_s25 + $0xb0] sm:$0xff]  ;;  %248 = vst [vmem:[%s1032_s26 + $0x48] sm:$0xff] %v247_v9 }
  0x19   : > { %250 = vst [vmem:[%s1032_s26 + $0x50] sm:$0xff] %v249_v10  ;;  %252 = vst [vmem:[%s1032_s26 + $0x58] sm:$0xff] %v251_v11  ;;  %v253_v12 = vld [vmem:[%s1027_s25 + $0xc0] sm:$0xff]  ;;  %v255_v13 = vld [vmem:[%s1027_s25 + $0xd0] sm:$0xff] }
  0x1a   : > { %v257_v14 = vld [vmem:[%s1027_s25 + $0xe0] sm:$0xff]  ;;  %254 = vst [vmem:[%s1032_s26 + $0x60] sm:$0xff] %v253_v12  ;;  %256 = vst [vmem:[%s1032_s26 + $0x68] sm:$0xff] %v255_v13  ;;  %v259_v15 = vld [vmem:[%s1027_s25 + $0xf0] sm:$0xff] }
  0x1b   : > { %258 = vst [vmem:[%s1032_s26 + $0x70] sm:$0xff] %v257_v14  ;;  %v261_v16 = vld [vmem:[%s1027_s25 + $0x100] sm:$0xff]  ;;  %v263_v17 = vld [vmem:[%s1027_s25 + $0x110] sm:$0xff]  ;;  %260 = vst [vmem:[%s1032_s26 + $0x78] sm:$0xff] %v259_v15 }
  0x1c   : > { %262 = vst [vmem:[%s1032_s26 + $0x80] sm:$0xff] %v261_v16  ;;  %264 = vst [vmem:[%s1032_s26 + $0x88] sm:$0xff] %v263_v17  ;;  %v265_v18 = vld [vmem:[%s1027_s25 + $0x120] sm:$0xff]  ;;  %v267_v19 = vld [vmem:[%s1027_s25 + $0x130] sm:$0xff] }
  0x1d   : > { %v269_v20 = vld [vmem:[%s1027_s25 + $0x140] sm:$0xff]  ;;  %266 = vst [vmem:[%s1032_s26 + $0x90] sm:$0xff] %v265_v18  ;;  %268 = vst [vmem:[%s1032_s26 + $0x98] sm:$0xff] %v267_v19  ;;  %v271_v21 = vld [vmem:[%s1027_s25 + $0x150] sm:$0xff] }
  0x1e   : > { %270 = vst [vmem:[%s1032_s26 + $0xa0] sm:$0xff] %v269_v20  ;;  %v273_v22 = vld [vmem:[%s1027_s25 + $0x160] sm:$0xff]  ;;  %v275_v23 = vld [vmem:[%s1027_s25 + $0x170] sm:$0xff]  ;;  %272 = vst [vmem:[%s1032_s26 + $0xa8] sm:$0xff] %v271_v21 }
  0x1f   : > { %274 = vst [vmem:[%s1032_s26 + $0xb0] sm:$0xff] %v273_v22  ;;  %276 = vst [vmem:[%s1032_s26 + $0xb8] sm:$0xff] %v275_v23  ;;  %v277_v24 = vld [vmem:[%s1027_s25 + $0x180] sm:$0xff]  ;;  %v279_v25 = vld [vmem:[%s1027_s25 + $0x190] sm:$0xff] }
  0x20   : > { %v281_v26 = vld [vmem:[%s1027_s25 + $0x1a0] sm:$0xff]  ;;  %278 = vst [vmem:[%s1032_s26 + $0xc0] sm:$0xff] %v277_v24  ;;  %280 = vst [vmem:[%s1032_s26 + $0xc8] sm:$0xff] %v279_v25  ;;  %v283_v27 = vld [vmem:[%s1027_s25 + $0x1b0] sm:$0xff] }
  0x21   : > { %282 = vst [vmem:[%s1032_s26 + $0xd0] sm:$0xff] %v281_v26  ;;  %v285_v28 = vld [vmem:[%s1027_s25 + $0x1c0] sm:$0xff]  ;;  %v287_v29 = vld [vmem:[%s1027_s25 + $0x1d0] sm:$0xff]  ;;  %284 = vst [vmem:[%s1032_s26 + $0xd8] sm:$0xff] %v283_v27 }
  0x22   : > { %286 = vst [vmem:[%s1032_s26 + $0xe0] sm:$0xff] %v285_v28  ;;  %288 = vst [vmem:[%s1032_s26 + $0xe8] sm:$0xff] %v287_v29  ;;  %v289_v30 = vld [vmem:[%s1027_s25 + $0x1e0] sm:$0xff]  ;;  %v291_v31 = vld [vmem:[%s1027_s25 + $0x1f0] sm:$0xff] }
  0x23   : > { %290 = vst [vmem:[%s1032_s26 + $0xf0] sm:$0xff] %v289_v30  ;;  %292 = vst [vmem:[%s1032_s26 + $0xf8] sm:$0xff] %v291_v31 }
  0x24 PF: > { %p752_p8 = scmp.ge.s32.totalorder %s962_s13, 1  ;;  %p297_p9 = scmp.lt.s32.totalorder %s962_s13, 3 }
  0x26   : > { %p298_p10 = pnand %p752_p8, %p297_p9 }
  0x27   : > { %s304_s27 = sand.u32 (!%p298_p10), 1, %s946_s9  }
  0x28   : > { %301 = sbr.rel (%p298_p10) target bundleno = 320 (0x140), region = 62  ;;  %s753_s28 = sshll.u32 (!%p298_p10), %s304_s27, 8 }
  0x29   : > { %s1106_s5 = scalar_lea.vmem (!%p298_p10), [#allocation2], %s753_s28  ;;  %s754_s16 = sshll.u32 (!%p298_p10), %s304_s27, 6 }
  0x2a   : > { %s1148_s17 = scalar_lea.vmem (!%p298_p10), [#allocation3], %s754_s16 }
  0x2d   : > { %v920_v32 = vld [vmem:[%s1187_s0 + $0x4] ss:$8 sps:$4 sm:$0xff]   ;;  %v923_v33 = vld [vmem:[%s1187_s0 + $0x14] ss:$8 sps:$4 sm:$0xff]   ;;  %v872_v35 = vld [vmem:[%s1106_s5 + $0x70] ss:$8 sps:$4 sm:$0xff]  }
  0x2e   : > { %v870_v34 = vld [vmem:[%s1106_s5 + $0x74] ss:$8 sps:$4 sm:$0xff]   ;;  %588 = vmatprep.mubr.bf16.mxu0 %v920_v32  ;;  %598 = vmatprep.mubr.bf16.mxu1 %v923_v33  ;;  %v873_v36 = vld [vmem:[%s1106_s5 + $0x64] ss:$8 sps:$4 sm:$0xff]   ;;  %v875_v37 = vld [vmem:[%s1106_s5 + $0x60] ss:$8 sps:$4 sm:$0xff]  }
  0x2f   : > { %556 = vmatprep.subr.bf16.mxu0 %v870_v34  ;;  %798 = vmatprep.subr.bf16.mxu1 %v870_v34  ;;  %v876_v38 = vld [vmem:[%s1106_s5 + $0x54] ss:$8 sps:$4 sm:$0xff]   ;;  %v878_v39 = vld [vmem:[%s1106_s5 + $0x50] ss:$8 sps:$4 sm:$0xff]   ;;  %v879_v40 = vld [vmem:[%s1106_s5 + $0x44] ss:$8 sps:$4 sm:$0xff]  }
  0x30   : > { %557 = vmatpush1.bf16.msra.mxu0 %v872_v35  ;;  %814 = vmatpush1.bf16.msra.mxu1 %v872_v35  ;;  %v881_v41 = vld [vmem:[%s1106_s5 + $0x40] ss:$8 sps:$4 sm:$0xff]   ;;  %v882_v42 = vld [vmem:[%s1106_s5 + $0x34] ss:$8 sps:$4 sm:$0xff]   ;;  %v884_v43 = vld [vmem:[%s1106_s5 + $0x30] ss:$8 sps:$4 sm:$0xff]  }
  0x31   : > { %558 = vmatprep.subr.bf16.mxu0 %v873_v36  ;;  %799 = vmatprep.subr.bf16.mxu1 %v873_v36  ;;  %v885_v44 = vld [vmem:[%s1106_s5 + $0x24] ss:$8 sps:$4 sm:$0xff]   ;;  %v887_v45 = vld [vmem:[%s1106_s5 + $0x20] ss:$8 sps:$4 sm:$0xff]   ;;  %v888_v46 = vld [vmem:[%s1106_s5 + $0x14] ss:$8 sps:$4 sm:$0xff]  }
  0x32   : > { %v890_v47 = vld [vmem:[%s1106_s5 + $0x10] ss:$8 sps:$4 sm:$0xff]   ;;  %v891_v48 = vld [vmem:[%s1106_s5 + $0x4] ss:$8 sps:$4 sm:$0xff]   ;;  %v893_v49 = vld [vmem:[%s1106_s5] ss:$8 sps:$4 sm:$0xff]  }
  0x33   : > { %v894_v50 = vld [vmem:[%s1106_s5 + $0xf4] ss:$8 sps:$4 sm:$0xff]   ;;  %v896_v51 = vld [vmem:[%s1106_s5 + $0xf0] ss:$8 sps:$4 sm:$0xff]   ;;  %v897_v52 = vld [vmem:[%s1106_s5 + $0xe4] ss:$8 sps:$4 sm:$0xff]  }
  0x34   : > { %559 = vmatpush1.bf16.msra.mxu0 %v875_v37  ;;  %815 = vmatpush1.bf16.msra.mxu1 %v875_v37  ;;  %v899_v53 = vld [vmem:[%s1106_s5 + $0xe0] ss:$8 sps:$4 sm:$0xff]   ;;  %v900_v54 = vld [vmem:[%s1106_s5 + $0xd4] ss:$8 sps:$4 sm:$0xff]   ;;  %v902_v55 = vld [vmem:[%s1106_s5 + $0xd0] ss:$8 sps:$4 sm:$0xff]  }
  0x35   : > { %560 = vmatprep.subr.bf16.mxu0 %v876_v38  ;;  %800 = vmatprep.subr.bf16.mxu1 %v876_v38  ;;  %v903_v56 = vld [vmem:[%s1106_s5 + $0xc4] ss:$8 sps:$4 sm:$0xff]   ;;  %v905_v57 = vld [vmem:[%s1106_s5 + $0xc0] ss:$8 sps:$4 sm:$0xff]   ;;  %v906_v58 = vld [vmem:[%s1106_s5 + $0xb4] ss:$8 sps:$4 sm:$0xff]  }
  0x36   : > { %v908_v59 = vld [vmem:[%s1106_s5 + $0xb0] ss:$8 sps:$4 sm:$0xff]   ;;  %v909_v60 = vld [vmem:[%s1106_s5 + $0xa4] ss:$8 sps:$4 sm:$0xff]   ;;  %v911_v61 = vld [vmem:[%s1106_s5 + $0xa0] ss:$8 sps:$4 sm:$0xff]  }
  0x37   : > { %v912_v62 = vld [vmem:[%s1106_s5 + $0x94] ss:$8 sps:$4 sm:$0xff]   ;;  %v914_v63 = vld [vmem:[%s1106_s5 + $0x90] ss:$8 sps:$4 sm:$0xff]   ;;  %v915_v0 = vld [vmem:[%s1106_s5 + $0x84] ss:$8 sps:$4 sm:$0xff]  }
  0x38   : > { %561 = vmatpush1.bf16.msra.mxu0 %v878_v39  ;;  %816 = vmatpush1.bf16.msra.mxu1 %v878_v39  ;;  %v917_v1 = vld [vmem:[%s1106_s5 + $0x80] ss:$8 sps:$4 sm:$0xff]   ;;  %v921_v3 = vld [vmem:[%s1187_s0 + $0x10] ss:$8 sps:$4 sm:$0xff]   ;;  %s797_s9 = sshll.u32 (%p1014_p6), %s954_s11, 4 }
  0x39   : > { %562 = vmatprep.subr.bf16.mxu0 %v879_v40  ;;  %801 = vmatprep.subr.bf16.mxu1 %v879_v40  ;;  %v918_v2 = vld [vmem:[%s1187_s0] ss:$8 sps:$4 sm:$0xff]   ;;  %s629_s22 = scalar_lea.vmem (%p1014_p6), %s1189_s2, %s797_s9 }
  0x3c   : > { %563 = vmatpush1.bf16.msra.mxu0 %v881_v41  ;;  %817 = vmatpush1.bf16.msra.mxu1 %v881_v41 }
  0x3d   : > { %564 = vmatprep.subr.bf16.mxu0 %v882_v42  ;;  %802 = vmatprep.subr.bf16.mxu1 %v882_v42 }
  0x40   : > { %565 = vmatpush1.bf16.msra.mxu0 %v884_v43  ;;  %818 = vmatpush1.bf16.msra.mxu1 %v884_v43 }
  0x41   : > { %566 = vmatprep.subr.bf16.mxu0 %v885_v44  ;;  %803 = vmatprep.subr.bf16.mxu1 %v885_v44 }
  0x44   : > { %567 = vmatpush1.bf16.msra.mxu0 %v887_v45  ;;  %819 = vmatpush1.bf16.msra.mxu1 %v887_v45 }
  0x45   : > { %568 = vmatprep.subr.bf16.mxu0 %v888_v46  ;;  %804 = vmatprep.subr.bf16.mxu1 %v888_v46 }
  0x48   : > { %569 = vmatpush1.bf16.msra.mxu0 %v890_v47  ;;  %820 = vmatpush1.bf16.msra.mxu1 %v890_v47 }
  0x49   : > { %570 = vmatprep.subr.bf16.mxu0 %v891_v48  ;;  %805 = vmatprep.subr.bf16.mxu1 %v891_v48 }
  0x4c   : > { %571 = vmatpush1.bf16.msra.mxu0 %v893_v49  ;;  %821 = vmatpush1.bf16.msra.mxu1 %v893_v49 }
  0x4d   : > { %572 = vmatprep.subr.bf16.mxu0 %v894_v50  ;;  %806 = vmatprep.subr.bf16.mxu1 %v894_v50 }
  0x50   : > { %573 = vmatpush2.bf16.msra.mxu0 %v896_v51  ;;  %822 = vmatpush2.bf16.msra.mxu1 %v896_v51 }
  0x51   : > { %574 = vmatprep.subr.bf16.mxu0 %v897_v52  ;;  %807 = vmatprep.subr.bf16.mxu1 %v897_v52 }
  0x54   : > { %575 = vmatpush2.bf16.msra.mxu0 %v899_v53  ;;  %823 = vmatpush2.bf16.msra.mxu1 %v899_v53 }
  0x55   : > { %576 = vmatprep.subr.bf16.mxu0 %v900_v54  ;;  %808 = vmatprep.subr.bf16.mxu1 %v900_v54 }
  0x58   : > { %577 = vmatpush2.bf16.msra.mxu0 %v902_v55  ;;  %824 = vmatpush2.bf16.msra.mxu1 %v902_v55 }
  0x59   : > { %578 = vmatprep.subr.bf16.mxu0 %v903_v56  ;;  %809 = vmatprep.subr.bf16.mxu1 %v903_v56 }
  0x5c   : > { %579 = vmatpush2.bf16.msra.mxu0 %v905_v57  ;;  %825 = vmatpush2.bf16.msra.mxu1 %v905_v57 }
  0x5d   : > { %580 = vmatprep.subr.bf16.mxu0 %v906_v58  ;;  %810 = vmatprep.subr.bf16.mxu1 %v906_v58 }
  0x60   : > { %581 = vmatpush2.bf16.msra.mxu0 %v908_v59  ;;  %826 = vmatpush2.bf16.msra.mxu1 %v908_v59 }
  0x61   : > { %582 = vmatprep.subr.bf16.mxu0 %v909_v60  ;;  %811 = vmatprep.subr.bf16.mxu1 %v909_v60 }
  0x64   : > { %583 = vmatpush2.bf16.msra.mxu0 %v911_v61  ;;  %827 = vmatpush2.bf16.msra.mxu1 %v911_v61 }
  0x65   : > { %584 = vmatprep.subr.bf16.mxu0 %v912_v62  ;;  %812 = vmatprep.subr.bf16.mxu1 %v912_v62 }
  0x68   : > { %585 = vmatpush2.bf16.msra.mxu0 %v914_v63  ;;  %828 = vmatpush2.bf16.msra.mxu1 %v914_v63 }
  0x69   : > { %586 = vmatprep.subr.bf16.mxu0 %v915_v0  ;;  %813 = vmatprep.subr.bf16.mxu1 %v915_v0 }
  0x6c   : > { %587 = vmatpush2.bf16.msra.mxu0 %v917_v1  ;;  %829 = vmatpush2.bf16.msra.mxu1 %v917_v1 }
  0x6f   : > { %589 = vmatmul.mubr.bf16.vlgmr.msra.gmra.mxu0 %v918_v2  ;;  %599 = vmatmul.mubr.bf16.vlgmr.msra.gmra.mxu1 %v921_v3 }
 0x12f   : > { %v590_v4 = vpop.f32.mrf.mxu0  ;;  %v600_v5 = vpop.f32.mrf.mxu1 }
 0x130   : > { %609 = vst [vmem:[%s1148_s17] sm:$0xff] %v590_v4  ;;  %613 = vst [vmem:[%s1148_s17 + $0x20] sm:$0xff] %v600_v5 }
 0x131   : > { %v592_v6 = vpop.f32.mrf.mxu0  ;;  %v602_v7 = vpop.f32.mrf.mxu1 }
 0x132   : > { %610 = vst [vmem:[%s1148_s17 + $0x8] sm:$0xff] %v592_v6  ;;  %614 = vst [vmem:[%s1148_s17 + $0x28] sm:$0xff] %v602_v7  ;;  %623 = sbr.rel (!%p1014_p6) target bundleno = 320 (0x140), region = 70 }
 0x133   : > { %v594_v8 = vpop.f32.mrf.mxu0  ;;  %v604_v9 = vpop.f32.mrf.mxu1 }
 0x134   : > { %611 = vst [vmem:[%s1148_s17 + $0x10] sm:$0xff] %v594_v8  ;;  %615 = vst [vmem:[%s1148_s17 + $0x30] sm:$0xff] %v604_v9 }
 0x135   : > { %v596_v10 = vpop.f32.mrf.mxu0  ;;  %v606_v11 = vpop.f32.mrf.mxu1 }
 0x136   : > { %612 = vst [vmem:[%s1148_s17 + $0x18] sm:$0xff] %v596_v10  ;;  %616 = vst [vmem:[%s1148_s17 + $0x38] sm:$0xff] %v606_v11 }
 0x137   : > { %v642_v12 = vld [vmem:[%s1148_s17] sm:$0xff] }
 0x138   : > { %v650_v16 = vld [vmem:[%s1148_s17 + $0x20] sm:$0xff]  ;;  %643 = vst [vmem:[%s629_s22] sm:$0xff] %v642_v12 }
 0x139   : > { %v644_v13 = vld [vmem:[%s1148_s17 + $0x8] sm:$0xff]  ;;  %651 = vst [vmem:[%s629_s22 + $0x40] sm:$0xff] %v650_v16 }
 0x13a   : > { %v652_v17 = vld [vmem:[%s1148_s17 + $0x28] sm:$0xff]  ;;  %645 = vst [vmem:[%s629_s22 + $0x8] sm:$0xff] %v644_v13 }
 0x13b   : > { %v646_v14 = vld [vmem:[%s1148_s17 + $0x10] sm:$0xff]  ;;  %653 = vst [vmem:[%s629_s22 + $0x48] sm:$0xff] %v652_v17 }
 0x13c   : > { %647 = vst [vmem:[%s629_s22 + $0x20] sm:$0xff] %v646_v14  ;;  %v654_v18 = vld [vmem:[%s1148_s17 + $0x30] sm:$0xff] }
 0x13d   : > { %v648_v15 = vld [vmem:[%s1148_s17 + $0x18] sm:$0xff]  ;;  %655 = vst [vmem:[%s629_s22 + $0x60] sm:$0xff] %v654_v18 }
 0x13e   : > { %649 = vst [vmem:[%s629_s22 + $0x28] sm:$0xff] %v648_v15  ;;  %v656_v19 = vld [vmem:[%s1148_s17 + $0x38] sm:$0xff] }
 0x13f   : > { %657 = vst [vmem:[%s629_s22 + $0x68] sm:$0xff] %v656_v19 }
 0x140 PF: > { %s12_s13 = sadd.s32 1, %s962_s13   ;;  %s1191_s9 = smov %s950_s10 }
 0x141   : > { %p9_p11 = scmp.ge.s32.totalorder %s12_s13, 4   ;;  %s1192_s10 = smov %s1019_s19 }
 0x142   : > { %s1193_s11 = smov %s958_s12  ;;  %s1194_s12 = smov %s1196_s14 }
 0x143   :  { %11 = sbr.rel (!%p9_p11) target bundleno = 3 (0x3), region = 127 }

// kernel: resnet_shard1_forward.115
= control target key start
LH: loop header
LB: loop body
LE: loop exit
PB: predicated region body
PF: predicated region fallthrough
CT: control target
= control target key end

     0   :  { %v75_v0 = vlaneseq  ;;  %v194_v1 = vmov 0.0   ;;  %v195_v5 = vmov 1966171168   ;;  %s279_s1 = inlined_call_operand.vmem [shape: f32[2,512], index: 1, kind: output, shape index: {}]   ;;  %s280_s0 = inlined_call_operand.vmem [shape: f32[32,512], index: 0, kind: input, shape index: {}]  }
   0x1   :  { %12 = vst [vmem:[%s279_s1] sm:$0xff] %v194_v1  ;;  %v13_v2 = vld [vmem:[%s280_s0] sm:$0xff]  ;;  %v14_v3 = vld [vmem:[%s280_s0 + $0x8] sm:$0xff]  ;;  %v15_v4 = vld [vmem:[%s280_s0 + $0x10] sm:$0xff]  ;;  %v73_v6 = vunpack.c.l.s4 %v195_v5 }
   0x2   :  { %v16_v7 = vld [vmem:[%s280_s0 + $0x18] sm:$0xff]  ;;  %v17_v8 = vld [vmem:[%s280_s0 + $0x20] sm:$0xff]  ;;  %v18_v9 = vld [vmem:[%s280_s0 + $0x28] sm:$0xff]  ;;  %v76_v10 = vshrl.u32 %v75_v0, 7  ;;  %v103_v11 = vmul.f32 %v13_v2, %v13_v2  ;;  %v104_v12 = vmul.f32 %v14_v3, %v14_v3  ;;  %v105_v18 = vmul.f32 %v15_v4, %v15_v4 }
   0x3   :  { %v19_v13 = vld [vmem:[%s280_s0 + $0x30] sm:$0xff]  ;;  %v20_v14 = vld [vmem:[%s280_s0 + $0x38] sm:$0xff]  ;;  %v30_v15 = vadd.f32 %v17_v8, %v13_v2  ;;  %v39_v16 = vadd.f32 %v18_v9, %v14_v3  ;;  %v74_v17 = vunpack.c.0.s8 %v73_v6  ;;  %v21_v19 = vld [vmem:[%s280_s0 + $0x40] sm:$0xff]  ;;  %v106_v23 = vmul.f32 %v16_v7, %v16_v7 }
   0x4   :  { %v22_v20 = vld [vmem:[%s280_s0 + $0x48] sm:$0xff]  ;;  %v48_v21 = vadd.f32 %v19_v13, %v15_v4  ;;  %v57_v22 = vadd.f32 %v20_v14, %v16_v7  ;;  %v107_v24 = vmul.f32 %v17_v8, %v17_v8  ;;  %v23_v25 = vld [vmem:[%s280_s0 + $0x50] sm:$0xff]  ;;  %v24_v26 = vld [vmem:[%s280_s0 + $0x58] sm:$0xff]  ;;  %v108_v30 = vmul.f32 %v18_v9, %v18_v9 }
   0x5   :  { %v31_v27 = vadd.f32 %v30_v15, %v21_v19  ;;  %v40_v28 = vadd.f32 %v39_v16, %v22_v20  ;;  %v246_v29 = vsub.s32 %v74_v17, %v76_v10  ;;  %v25_v31 = vld [vmem:[%s280_s0 + $0x60] sm:$0xff]  ;;  %v26_v32 = vld [vmem:[%s280_s0 + $0x68] sm:$0xff]  ;;  %v109_v35 = vmul.f32 %v19_v13, %v19_v13  ;;  %v27_v37 = vld [vmem:[%s280_s0 + $0x70] sm:$0xff] }
   0x6   :  { %v49_v33 = vadd.f32 %v48_v21, %v23_v25  ;;  %v58_v34 = vadd.f32 %v57_v22, %v24_v26  ;;  %v110_v36 = vmul.f32 %v20_v14, %v20_v14  ;;  %v28_v38 = vld [vmem:[%s280_s0 + $0x78] sm:$0xff]  ;;  %v111_v41 = vmul.f32 %v21_v19, %v21_v19 }
   0x7   :  { %v32_v39 = vadd.f32 %v31_v27, %v25_v31  ;;  %v41_v40 = vadd.f32 %v40_v28, %v26_v32  ;;  %v112_v42 = vmul.f32 %v22_v20, %v22_v20  ;;  %v113_v45 = vmul.f32 %v23_v25, %v23_v25 }
   0x8   :  { %v50_v43 = vadd.f32 %v49_v33, %v27_v37  ;;  %v59_v44 = vadd.f32 %v58_v34, %v28_v38  ;;  %v114_v46 = vmul.f32 %v24_v26, %v24_v26  ;;  %v115_v49 = vmul.f32 %v25_v31, %v25_v31 }
   0x9   :  { %v33_v47 = vrot.slane %v32_v39, 4  ;;  %v42_v48 = vrot.slane %v41_v40, 4  ;;  %v116_v50 = vmul.f32 %v26_v32, %v26_v32  ;;  %v117_v53 = vmul.f32 %v27_v37, %v27_v37 }
   0xa   :  { %v51_v51 = vrot.slane %v50_v43, 4  ;;  %v60_v52 = vrot.slane %v59_v44, 4  ;;  %v118_v54 = vmul.f32 %v28_v38, %v28_v38  ;;  %v119_v57 = vadd.f32 %v107_v24, %v103_v11 }
   0xb   :  { %v34_v55 = vadd.f32 %v33_v47, %v32_v39  ;;  %v43_v56 = vadd.f32 %v42_v48, %v41_v40  ;;  %v128_v58 = vadd.f32 %v108_v30, %v104_v12  ;;  %v137_v61 = vadd.f32 %v109_v35, %v105_v18 }
   0xc   :  { %v52_v59 = vadd.f32 %v51_v51, %v50_v43  ;;  %v61_v60 = vadd.f32 %v60_v52, %v59_v44  ;;  %v146_v62 = vadd.f32 %v110_v36, %v106_v23  ;;  %v120_v2 = vadd.f32 %v119_v57, %v111_v41 }
   0xd   :  { %v35_v63 = vrot.slane %v34_v55, 2  ;;  %v44_v1 = vrot.slane %v43_v56, 2  ;;  %v129_v3 = vadd.f32 %v128_v58, %v112_v42  ;;  %v138_v6 = vadd.f32 %v137_v61, %v113_v45 }
   0xe   :  { %v53_v4 = vrot.slane %v52_v59, 2  ;;  %v62_v5 = vrot.slane %v61_v60, 2  ;;  %v147_v7 = vadd.f32 %v146_v62, %v114_v46  ;;  %v121_v10 = vadd.f32 %v120_v2, %v115_v49  ;;  %v190_v62 = vld [vmem:[%s279_s1 + $0x1] ss:$2 sm:$0xf] }
   0xf   :  { %v36_v8 = vadd.f32 %v35_v63, %v34_v55  ;;  %v45_v9 = vadd.f32 %v44_v1, %v43_v56  ;;  %v130_v13 = vadd.f32 %v129_v3, %v116_v50  ;;  %v139_v11 = vadd.f32 %v138_v6, %v117_v53  ;;  %v29_v50 = vld [vmem:[%s279_s1] ss:$2 sm:$0xf] }
  0x10   :  { %v54_v14 = vadd.f32 %v53_v4, %v52_v59  ;;  %v63_v15 = vadd.f32 %v62_v5, %v61_v60  ;;  %v148_v12 = vadd.f32 %v147_v7, %v118_v54  ;;  %v122_v18 = vrot.slane %v121_v10, 4 }
  0x11   :  { %v37_v16 = vrot.slane %v36_v8, 1  ;;  %v46_v17 = vrot.slane %v45_v9, 1  ;;  %v131_v19 = vrot.slane %v130_v13, 4  ;;  %v140_v22 = vrot.slane %v139_v11, 4 }
  0x12   :  { %v55_v20 = vrot.slane %v54_v14, 1  ;;  %v64_v21 = vrot.slane %v63_v15, 1  ;;  %v149_v23 = vrot.slane %v148_v12, 4  ;;  %v123_v26 = vadd.f32 %v122_v18, %v121_v10 }
  0x13   :  { %v38_v24 = vadd.f32 %v37_v16, %v36_v8  ;;  %v47_v25 = vadd.f32 %v46_v17, %v45_v9  ;;  %v132_v27 = vadd.f32 %v131_v19, %v130_v13  ;;  %v141_v31 = vadd.f32 %v140_v22, %v139_v11 }
  0x14   :  { %v56_v28 = vadd.f32 %v55_v20, %v54_v14  ;;  %v65_v30 = vadd.f32 %v64_v21, %v63_v15  ;;  %v150_v32 = vadd.f32 %v149_v23, %v148_v12  ;;  %v124_v34 = vrot.slane %v123_v26, 2 }
  0x15   :  { %v70_v33 = vcombine.low %v38_v24, %v47_v25  ;;  %v133_v35 = vrot.slane %v132_v27, 2  ;;  %v142_v37 = vrot.slane %v141_v31, 2  ;;  %vm98_vm0 = vcmp.lt.s32.totalorder %v75_v0, 512 }
  0x16   :  { %v71_v36 = vcombine.low %v56_v28, %v65_v30  ;;  %v151_v38 = vrot.slane %v150_v32, 2  ;;  %v125_v40 = vadd.f32 %v124_v34, %v123_v26 }
  0x17   :  { %v78_v39 = vrot.slane %v70_v33, %v246_v29  ;;  %v134_v41 = vadd.f32 %v133_v35, %v132_v27  ;;  %v143_v43 = vadd.f32 %v142_v37, %v141_v31 }
  0x18   :  { %v85_v42 = vrot.slane %v71_v36, %v246_v29  ;;  %v152_v44 = vadd.f32 %v151_v38, %v150_v32  ;;  %v126_v45 = vrot.slane %v125_v40, 1 }
  0x19   :  { %v135_v46 = vrot.slane %v134_v41, 1  ;;  %v144_v48 = vrot.slane %v143_v43, 1 }
  0x1a   :  { %v86_v47 = vcombine.low %v78_v39, %v85_v42  ;;  %v153_v49 = vrot.slane %v152_v44, 1  ;;  %v127_v51 = vadd.f32 %v126_v45, %v125_v40 }
  0x1b   :  { %v136_v52 = vadd.f32 %v135_v46, %v134_v41  ;;  %v145_v54 = vadd.f32 %v144_v48, %v143_v43 }
  0x1c   :  { %v93_v53 = vrot.slane %v86_v47, %v246_v29  ;;  %v154_v55 = vadd.f32 %v153_v49, %v152_v44 }
  0x1d   :  { %v159_v56 = vcombine.low %v127_v51, %v136_v52 }
  0x1e   :  { %v95_v57 = vadd.f32 %v93_v53, %v29_v50  ;;  %v160_v58 = vcombine.low %v145_v54, %v154_v55 }
  0x1f   :  { %v167_v59 = vrot.slane %v159_v56, %v246_v29 }
  0x20   :  { %100 = vst.msk [vmem:[%s279_s1] ss:$2 sm:$0xf] %vm98_vm0, %v95_v57  ;;  %v174_v60 = vrot.slane %v160_v58, %v246_v29 }
  0x22   :  { %v175_v61 = vcombine.low %v167_v59, %v174_v60 }
  0x24   :  { %v182_v63 = vrot.slane %v175_v61, %v246_v29 }
  0x26   :  { %v184_v1 = vadd.f32 %v190_v62, %v182_v63 }
  0x28   :  { %191 = vst.msk [vmem:[%s279_s1 + $0x1] ss:$2 sm:$0xf] %vm98_vm0, %v184_v1 }

// kernel: resnet_shard1_forward.107
= control target key start
LH: loop header
LB: loop body
LE: loop exit
PB: predicated region body
PF: predicated region fallthrough
CT: control target
= control target key end

     0   :  { %s664_s1 = inlined_call_operand.vmem [shape: bf16[256,128], index: 1, kind: input, shape index: {}]   ;;  %s665_s0 = inlined_call_operand.vmem [shape: bf16[128,256], index: 0, kind: input, shape index: {}]   ;;  %s666_s2 = inlined_call_operand.vmem [shape: f32[128,128], index: 2, kind: output, shape index: {}]  }
   0x1   :  { %v465_v0 = vld [vmem:[%s664_s1 + $0x78] sm:$0xff]   ;;  %v467_v2 = vld [vmem:[%s664_s1 + $0x70] sm:$0xff]   ;;  %v469_v4 = vld [vmem:[%s664_s1 + $0x68] sm:$0xff]  }
   0x2   :  { %v466_v1 = vld [vmem:[%s664_s1 + $0x38] sm:$0xff]   ;;  %385 = vmatprep.subr.bf16.mxu0 %v465_v0  ;;  %449 = vmatprep.subr.bf16.mxu1 %v465_v0  ;;  %v468_v3 = vld [vmem:[%s664_s1 + $0x30] sm:$0xff]   ;;  %v470_v5 = vld [vmem:[%s664_s1 + $0x28] sm:$0xff]  }
   0x3   :  { %386 = vmatpush3.bf16.msra.mxu0 %v466_v1  ;;  %457 = vmatpush3.bf16.msra.mxu1 %v466_v1  ;;  %v471_v6 = vld [vmem:[%s664_s1 + $0x60] sm:$0xff]   ;;  %v473_v8 = vld [vmem:[%s664_s1 + $0x58] sm:$0xff]   ;;  %v475_v10 = vld [vmem:[%s664_s1 + $0x50] sm:$0xff]  }
   0x4   :  { %387 = vmatprep.subr.bf16.mxu0 %v467_v2  ;;  %450 = vmatprep.subr.bf16.mxu1 %v467_v2  ;;  %v472_v7 = vld [vmem:[%s664_s1 + $0x20] sm:$0xff]   ;;  %v474_v9 = vld [vmem:[%s664_s1 + $0x18] sm:$0xff]   ;;  %v476_v13 = vld [vmem:[%s664_s1 + $0x10] sm:$0xff]  }
   0x5   :  { %v483_v11 = vld [vmem:[%s665_s0 + $0x4] ss:$8 sps:$4 sm:$0xff]   ;;  %v481_v18 = vld [vmem:[%s665_s0] ss:$8 sps:$4 sm:$0xff]   ;;  %v487_v20 = vld [vmem:[%s665_s0 + $0x14] ss:$8 sps:$4 sm:$0xff]  }
   0x6   :  { %v486_v12 = vld [vmem:[%s665_s0 + $0x44] ss:$8 sps:$4 sm:$0xff]   ;;  %268 = vmatprep.mubr.bf16.mxu0 %v483_v11  ;;  %v484_v19 = vld [vmem:[%s665_s0 + $0x40] ss:$8 sps:$4 sm:$0xff]   ;;  %v489_v21 = vld [vmem:[%s665_s0 + $0x54] ss:$8 sps:$4 sm:$0xff]  }
   0x7   :  { %388 = vmatpush3.bf16.msra.mxu0 %v468_v3  ;;  %458 = vmatpush3.bf16.msra.mxu1 %v468_v3  ;;  %v477_v14 = vld [vmem:[%s664_s1 + $0x48] sm:$0xff]   ;;  %v479_v16 = vld [vmem:[%s664_s1 + $0x40] sm:$0xff]   ;;  %v491_v22 = vld [vmem:[%s665_s0 + $0x10] ss:$8 sps:$4 sm:$0xff]  }
   0x8   :  { %389 = vmatprep.subr.bf16.mxu0 %v469_v4  ;;  %451 = vmatprep.subr.bf16.mxu1 %v469_v4  ;;  %v478_v15 = vld [vmem:[%s664_s1 + $0x8] sm:$0xff]   ;;  %v480_v17 = vld [vmem:[%s664_s1] sm:$0xff]   ;;  %v492_v23 = vld [vmem:[%s665_s0 + $0x50] ss:$8 sps:$4 sm:$0xff]  }
   0x9   :  { %300 = vmatprep.mubr.bf16.mxu1 %v486_v12  ;;  %v493_v24 = vld [vmem:[%s665_s0 + $0x24] ss:$8 sps:$4 sm:$0xff]   ;;  %v497_v26 = vld [vmem:[%s665_s0 + $0x20] ss:$8 sps:$4 sm:$0xff]   ;;  %v499_v28 = vld [vmem:[%s665_s0 + $0x34] ss:$8 sps:$4 sm:$0xff]  }
   0xa   :  { %v495_v25 = vld [vmem:[%s665_s0 + $0x64] ss:$8 sps:$4 sm:$0xff]   ;;  %v498_v27 = vld [vmem:[%s665_s0 + $0x60] ss:$8 sps:$4 sm:$0xff]   ;;  %v501_v29 = vld [vmem:[%s665_s0 + $0x74] ss:$8 sps:$4 sm:$0xff]  }
   0xb   :  { %390 = vmatpush3.bf16.msra.mxu0 %v470_v5  ;;  %459 = vmatpush3.bf16.msra.mxu1 %v470_v5  ;;  %v503_v30 = vld [vmem:[%s665_s0 + $0x30] ss:$8 sps:$4 sm:$0xff]  }
   0xc   :  { %391 = vmatprep.subr.bf16.mxu0 %v471_v6  ;;  %452 = vmatprep.subr.bf16.mxu1 %v471_v6  ;;  %v504_v31 = vld [vmem:[%s665_s0 + $0x70] ss:$8 sps:$4 sm:$0xff]  }
   0xf   :  { %392 = vmatpush3.bf16.msra.mxu0 %v472_v7  ;;  %460 = vmatpush3.bf16.msra.mxu1 %v472_v7 }
  0x10   :  { %393 = vmatprep.subr.bf16.mxu0 %v473_v8  ;;  %453 = vmatprep.subr.bf16.mxu1 %v473_v8 }
  0x13   :  { %394 = vmatpush3.bf16.msra.mxu0 %v474_v9  ;;  %461 = vmatpush3.bf16.msra.mxu1 %v474_v9 }
  0x14   :  { %395 = vmatprep.subr.bf16.mxu0 %v475_v10  ;;  %454 = vmatprep.subr.bf16.mxu1 %v475_v10 }
  0x17   :  { %396 = vmatpush3.bf16.msra.mxu0 %v476_v13  ;;  %462 = vmatpush3.bf16.msra.mxu1 %v476_v13 }
  0x18   :  { %397 = vmatprep.subr.bf16.mxu0 %v477_v14  ;;  %455 = vmatprep.subr.bf16.mxu1 %v477_v14 }
  0x1b   :  { %398 = vmatpush3.bf16.msra.mxu0 %v478_v15  ;;  %463 = vmatpush3.bf16.msra.mxu1 %v478_v15 }
  0x1c   :  { %399 = vmatprep.subr.bf16.mxu0 %v479_v16  ;;  %456 = vmatprep.subr.bf16.mxu1 %v479_v16 }
  0x1f   :  { %400 = vmatpush3.bf16.msra.mxu0 %v480_v17  ;;  %464 = vmatpush3.bf16.msra.mxu1 %v480_v17 }
  0x22   :  { %269 = vmatmul.mubr.bf16.vlgmr.msra.gmra.mxu0 %v481_v18  ;;  %301 = vmatmul.mubr.bf16.vlgmr.msra.gmra.mxu1 %v484_v19 }
  0x23   :  { %276 = vmatprep.mubr.bf16.mxu0 %v487_v20  ;;  %308 = vmatprep.mubr.bf16.mxu1 %v489_v21 }
  0x2a   :  { %277 = vmatmul.mubr.bf16.gmra.mxu0 %v491_v22  ;;  %309 = vmatmul.mubr.bf16.gmra.mxu1 %v492_v23 }
  0x2b   :  { %284 = vmatprep.mubr.bf16.mxu0 %v493_v24  ;;  %316 = vmatprep.mubr.bf16.mxu1 %v495_v25 }
  0x32   :  { %285 = vmatmul.mubr.bf16.gmra.mxu0 %v497_v26  ;;  %317 = vmatmul.mubr.bf16.gmra.mxu1 %v498_v27 }
  0x33   :  { %292 = vmatprep.mubr.bf16.mxu0 %v499_v28  ;;  %324 = vmatprep.mubr.bf16.mxu1 %v501_v29 }
  0x3a   :  { %293 = vmatmul.mubr.bf16.gmra.mxu0 %v503_v30  ;;  %325 = vmatmul.mubr.bf16.gmra.mxu1 %v504_v31 }
  0xe2   :  { %v401_v32 = vpop.f32.mrf.mxu0  ;;  %v425_v33 = vpop.f32.mrf.mxu1 }
  0xe4   :  { %v402_v34 = vpop.f32.mrf.mxu0  ;;  %v426_v35 = vpop.f32.mrf.mxu1 }
  0xe5   :  { %v403_v36 = vadd.f32 %v402_v34, %v401_v32  ;;  %v427_v37 = vadd.f32 %v426_v35, %v425_v33 }
  0xe6   :  { %v404_v38 = vpop.f32.mrf.mxu0  ;;  %v428_v39 = vpop.f32.mrf.mxu1 }
  0xe7   :  { %333 = vst [vmem:[%s666_s2] sm:$0xff] %v403_v36  ;;  %341 = vst [vmem:[%s666_s2 + $0x40] sm:$0xff] %v427_v37 }
  0xe8   :  { %v405_v40 = vpop.f32.mrf.mxu0  ;;  %v429_v41 = vpop.f32.mrf.mxu1 }
  0xe9   :  { %v406_v42 = vadd.f32 %v405_v40, %v404_v38  ;;  %v430_v43 = vadd.f32 %v429_v41, %v428_v39 }
  0xea   :  { %v407_v44 = vpop.f32.mrf.mxu0  ;;  %v431_v45 = vpop.f32.mrf.mxu1 }
  0xeb   :  { %334 = vst [vmem:[%s666_s2 + $0x8] sm:$0xff] %v406_v42  ;;  %342 = vst [vmem:[%s666_s2 + $0x48] sm:$0xff] %v430_v43 }
  0xec   :  { %v408_v46 = vpop.f32.mrf.mxu0  ;;  %v432_v47 = vpop.f32.mrf.mxu1 }
  0xed   :  { %v409_v48 = vadd.f32 %v408_v46, %v407_v44  ;;  %v433_v49 = vadd.f32 %v432_v47, %v431_v45 }
  0xee   :  { %v410_v50 = vpop.f32.mrf.mxu0  ;;  %v434_v51 = vpop.f32.mrf.mxu1 }
  0xef   :  { %335 = vst [vmem:[%s666_s2 + $0x10] sm:$0xff] %v409_v48  ;;  %343 = vst [vmem:[%s666_s2 + $0x50] sm:$0xff] %v433_v49 }
  0xf0   :  { %v411_v52 = vpop.f32.mrf.mxu0  ;;  %v435_v53 = vpop.f32.mrf.mxu1 }
  0xf1   :  { %v412_v54 = vadd.f32 %v411_v52, %v410_v50  ;;  %v436_v55 = vadd.f32 %v435_v53, %v434_v51 }
  0xf2   :  { %v413_v56 = vpop.f32.mrf.mxu0  ;;  %v437_v57 = vpop.f32.mrf.mxu1 }
  0xf3   :  { %336 = vst [vmem:[%s666_s2 + $0x18] sm:$0xff] %v412_v54  ;;  %344 = vst [vmem:[%s666_s2 + $0x58] sm:$0xff] %v436_v55 }
  0xf4   :  { %v414_v58 = vpop.f32.mrf.mxu0  ;;  %v438_v59 = vpop.f32.mrf.mxu1 }
  0xf5   :  { %v415_v60 = vadd.f32 %v414_v58, %v413_v56  ;;  %v439_v61 = vadd.f32 %v438_v59, %v437_v57 }
  0xf6   :  { %v416_v62 = vpop.f32.mrf.mxu0  ;;  %v440_v63 = vpop.f32.mrf.mxu1 }
  0xf7   :  { %337 = vst [vmem:[%s666_s2 + $0x20] sm:$0xff] %v415_v60  ;;  %345 = vst [vmem:[%s666_s2 + $0x60] sm:$0xff] %v439_v61 }
  0xf8   :  { %v417_v0 = vpop.f32.mrf.mxu0  ;;  %v441_v1 = vpop.f32.mrf.mxu1 }
  0xf9   :  { %v418_v2 = vadd.f32 %v417_v0, %v416_v62  ;;  %v442_v3 = vadd.f32 %v441_v1, %v440_v63 }
  0xfa   :  { %v419_v4 = vpop.f32.mrf.mxu0  ;;  %v443_v5 = vpop.f32.mrf.mxu1 }
  0xfb   :  { %338 = vst [vmem:[%s666_s2 + $0x28] sm:$0xff] %v418_v2  ;;  %346 = vst [vmem:[%s666_s2 + $0x68] sm:$0xff] %v442_v3 }
  0xfc   :  { %v420_v6 = vpop.f32.mrf.mxu0  ;;  %v444_v7 = vpop.f32.mrf.mxu1 }
  0xfd   :  { %v421_v8 = vadd.f32 %v420_v6, %v419_v4  ;;  %v445_v9 = vadd.f32 %v444_v7, %v443_v5 }
  0xfe   :  { %v422_v10 = vpop.f32.mrf.mxu0  ;;  %v446_v11 = vpop.f32.mrf.mxu1 }
  0xff   :  { %339 = vst [vmem:[%s666_s2 + $0x30] sm:$0xff] %v421_v8  ;;  %347 = vst [vmem:[%s666_s2 + $0x70] sm:$0xff] %v445_v9 }
 0x100   :  { %v423_v12 = vpop.f32.mrf.mxu0  ;;  %v447_v13 = vpop.f32.mrf.mxu1 }
 0x101   :  { %v424_v14 = vadd.f32 %v423_v12, %v422_v10  ;;  %v448_v15 = vadd.f32 %v447_v13, %v446_v11 }
 0x103   :  { %340 = vst [vmem:[%s666_s2 + $0x38] sm:$0xff] %v424_v14  ;;  %348 = vst [vmem:[%s666_s2 + $0x78] sm:$0xff] %v448_v15 }

// kernel: resnet_shard1_forward.108
= control target key start
LH: loop header
LB: loop body
LE: loop exit
PB: predicated region body
PF: predicated region fallthrough
CT: control target
= control target key end

     0   :  { %v98_v0 = vmov 0.0   ;;  %s172_s1 = inlined_call_operand.vmem [shape: f32[2,128], index: 1, kind: output, shape index: {}]   ;;  %s173_s0 = inlined_call_operand.vmem [shape: f32[128,128], index: 0, kind: input, shape index: {}]  }
   0x1   :  { %12 = vst [vmem:[%s172_s1] sm:$0x3] %v98_v0  ;;  %v13_v1 = vld [vmem:[%s173_s0] sm:$0xff]  ;;  %v14_v2 = vld [vmem:[%s173_s0 + $0x8] sm:$0xff]  ;;  %v15_v3 = vld [vmem:[%s173_s0 + $0x10] sm:$0xff] }
   0x2   :  { %v16_v4 = vld [vmem:[%s173_s0 + $0x18] sm:$0xff]  ;;  %v30_v5 = vadd.f32 %v14_v2, %v13_v1  ;;  %v54_v6 = vmul.f32 %v13_v1, %v13_v1  ;;  %v55_v7 = vmul.f32 %v14_v2, %v14_v2  ;;  %v56_v8 = vmul.f32 %v15_v3, %v15_v3  ;;  %v17_v9 = vld [vmem:[%s173_s0 + $0x20] sm:$0xff]  ;;  %v18_v13 = vld [vmem:[%s173_s0 + $0x28] sm:$0xff] }
   0x3   :  { %v57_v11 = vmul.f32 %v16_v4, %v16_v4  ;;  %v58_v15 = vmul.f32 %v17_v9, %v17_v9  ;;  %v19_v17 = vld [vmem:[%s173_s0 + $0x30] sm:$0xff]  ;;  %v59_v19 = vmul.f32 %v18_v13, %v18_v13  ;;  %v20_v21 = vld [vmem:[%s173_s0 + $0x38] sm:$0xff]  ;;  %v21_v25 = vld [vmem:[%s173_s0 + $0x40] sm:$0xff] }
   0x4   :  { %v31_v10 = vadd.f32 %v30_v5, %v15_v3  ;;  %v70_v12 = vadd.f32 %v55_v7, %v54_v6  ;;  %v60_v23 = vmul.f32 %v19_v17, %v19_v17  ;;  %v61_v27 = vmul.f32 %v20_v21, %v20_v21  ;;  %v22_v29 = vld [vmem:[%s173_s0 + $0x48] sm:$0xff]  ;;  %v23_v33 = vld [vmem:[%s173_s0 + $0x50] sm:$0xff]  ;;  %v24_v37 = vld [vmem:[%s173_s0 + $0x58] sm:$0xff] }
   0x5   :  { %v62_v31 = vmul.f32 %v21_v25, %v21_v25  ;;  %v63_v35 = vmul.f32 %v22_v29, %v22_v29  ;;  %v64_v39 = vmul.f32 %v23_v33, %v23_v33  ;;  %v25_v41 = vld [vmem:[%s173_s0 + $0x60] sm:$0xff]  ;;  %v65_v43 = vmul.f32 %v24_v37, %v24_v37  ;;  %v26_v45 = vld [vmem:[%s173_s0 + $0x68] sm:$0xff]  ;;  %v27_v49 = vld [vmem:[%s173_s0 + $0x70] sm:$0xff] }
   0x6   :  { %v32_v14 = vadd.f32 %v31_v10, %v16_v4  ;;  %v71_v16 = vadd.f32 %v70_v12, %v56_v8  ;;  %v66_v47 = vmul.f32 %v25_v41, %v25_v41  ;;  %v67_v51 = vmul.f32 %v26_v45, %v26_v45  ;;  %v28_v53 = vld [vmem:[%s173_s0 + $0x78] sm:$0xff] }
   0x7   :  { %v68_v55 = vmul.f32 %v27_v49, %v27_v49  ;;  %v69_v58 = vmul.f32 %v28_v53, %v28_v53 }
   0x8   :  { %v33_v18 = vadd.f32 %v32_v14, %v17_v9  ;;  %v72_v20 = vadd.f32 %v71_v16, %v57_v11  ;;  %v29_v7 = vld [vmem:[%s172_s1] sm:$0x1]  ;;  %v53_v12 = vld [vmem:[%s172_s1 + $0x1] sm:$0x1] }
   0xa   :  { %v34_v22 = vadd.f32 %v33_v18, %v18_v13  ;;  %v73_v24 = vadd.f32 %v72_v20, %v58_v15 }
   0xc   :  { %v35_v26 = vadd.f32 %v34_v22, %v19_v17  ;;  %v74_v28 = vadd.f32 %v73_v24, %v59_v19 }
   0xe   :  { %v36_v30 = vadd.f32 %v35_v26, %v20_v21  ;;  %v75_v32 = vadd.f32 %v74_v28, %v60_v23 }
  0x10   :  { %v37_v34 = vadd.f32 %v36_v30, %v21_v25  ;;  %v76_v36 = vadd.f32 %v75_v32, %v61_v27 }
  0x12   :  { %v38_v38 = vadd.f32 %v37_v34, %v22_v29  ;;  %v77_v40 = vadd.f32 %v76_v36, %v62_v31 }
  0x14   :  { %v39_v42 = vadd.f32 %v38_v38, %v23_v33  ;;  %v78_v44 = vadd.f32 %v77_v40, %v63_v35 }
  0x16   :  { %v40_v46 = vadd.f32 %v39_v42, %v24_v37  ;;  %v79_v48 = vadd.f32 %v78_v44, %v64_v39 }
  0x18   :  { %v41_v50 = vadd.f32 %v40_v46, %v25_v41  ;;  %v80_v52 = vadd.f32 %v79_v48, %v65_v43 }
  0x1a   :  { %v42_v54 = vadd.f32 %v41_v50, %v26_v45  ;;  %v81_v56 = vadd.f32 %v80_v52, %v66_v47 }
  0x1c   :  { %v43_v57 = vadd.f32 %v42_v54, %v27_v49  ;;  %v82_v59 = vadd.f32 %v81_v56, %v67_v51 }
  0x1e   :  { %v44_v60 = vadd.f32 %v43_v57, %v28_v53  ;;  %v83_v61 = vadd.f32 %v82_v59, %v68_v55 }
  0x20   :  { %v45_v62 = vrot.slane %v44_v60, 4  ;;  %v84_v63 = vadd.f32 %v83_v61, %v69_v58 }
  0x22   :  { %v46_v0 = vadd.f32 %v45_v62, %v44_v60  ;;  %v85_v1 = vrot.slane %v84_v63, 4 }
  0x24   :  { %v47_v2 = vrot.slane %v46_v0, 2  ;;  %v86_v3 = vadd.f32 %v85_v1, %v84_v63 }
  0x26   :  { %v48_v4 = vadd.f32 %v47_v2, %v46_v0  ;;  %v87_v5 = vrot.slane %v86_v3, 2 }
  0x28   :  { %v49_v6 = vrot.slane %v48_v4, 1  ;;  %v88_v8 = vadd.f32 %v87_v5, %v86_v3 }
  0x2a   :  { %v50_v9 = vadd.f32 %v49_v6, %v48_v4  ;;  %v89_v10 = vrot.slane %v88_v8, 1 }
  0x2c   :  { %v51_v11 = vadd.f32 %v50_v9, %v29_v7  ;;  %v90_v13 = vadd.f32 %v89_v10, %v88_v8 }
  0x2e   :  { %52 = vst [vmem:[%s172_s1] sm:$0x1] %v51_v11  ;;  %v91_v14 = vadd.f32 %v90_v13, %v53_v12 }
  0x30   :  { %92 = vst [vmem:[%s172_s1 + $0x1] sm:$0x1] %v91_v14 }

// kernel: resnet_shard1_forward.116
= control target key start
LH: loop header
LB: loop body
LE: loop exit
PB: predicated region body
PF: predicated region fallthrough
CT: control target
= control target key end

     0   :  { %v172_v6 = vmov 1966171168   ;;  %v31_v8 = vlaneseq  ;;  %v173_v11 = vmov 857870592   ;;  %s304_s1 = inlined_call_operand.vmem [shape: f32[2,512], index: 1, kind: input, shape index: {}]   ;;  %s305_s2 = inlined_call_operand.vmem [shape: f32[1,512], index: 2, kind: input, shape index: {}]   ;;  %s306_s0 = inlined_call_operand.vmem [shape: f32[32,512], index: 0, kind: input, shape index: {}]   ;;  %s307_s3 = inlined_call_operand.vmem [shape: f32[1,512], index: 3, kind: input, shape index: {}]   ;;  %s308_s4 = inlined_call_operand.vmem [shape: f32[32,512], index: 4, kind: output, shape index: {}]  }
   0x1   :  { %v17_v0 = vld [vmem:[%s304_s1] sm:$0xff]  ;;  %v29_v7 = vunpack.c.l.s4 %v172_v6  ;;  %v41_v12 = vunpack.c.l.s4 %v173_v11  ;;  %v60_v29 = vld [vmem:[%s306_s0 + $0x8] sm:$0xff]  ;;  %v61_v31 = vld [vmem:[%s306_s0 + $0x10] sm:$0xff] }
   0x2   :  { %v18_v1 = vmul.f32 0.03125, %v17_v0  ;;  %v32_v10 = vshrl.u32 %v31_v8, 7  ;;  %v24_v17 = vld [vmem:[%s305_s2] sm:$0xf]  ;;  %v62_v35 = vld [vmem:[%s306_s0 + $0x18] sm:$0xff]  ;;  %v64_v37 = vld [vmem:[%s306_s0 + $0x28] sm:$0xff] }
   0x3   :  { %v30_v9 = vunpack.c.0.s8 %v29_v7  ;;  %v42_v14 = vunpack.c.0.s8 %v41_v12  ;;  %v38_v27 = vld [vmem:[%s307_s3] sm:$0xf]  ;;  %v65_v38 = vld [vmem:[%s306_s0 + $0x30] sm:$0xff]  ;;  %v66_v39 = vld [vmem:[%s306_s0 + $0x38] sm:$0xff] }
   0x4   :  { %v19_v2 = vmul.f32 %v18_v1, %v18_v1  ;;  %v77_v20 = vsub.s32 0, %v32_v10  ;;  %v81_v21 = vsub.s32 1, %v32_v10  ;;  %v85_v22 = vsub.s32 2, %v32_v10  ;;  %v59_v28 = vld [vmem:[%s306_s0] sm:$0xff]  ;;  %v68_v43 = vld [vmem:[%s306_s0 + $0x48] sm:$0xff]  ;;  %v69_v44 = vld [vmem:[%s306_s0 + $0x50] sm:$0xff] }
   0x5   :  { %v33_v13 = vsub.s32 %v30_v9, %v32_v10  ;;  %v45_v19 = vsub.s32 %v42_v14, %v32_v10  ;;  %v89_v23 = vsub.s32 3, %v32_v10  ;;  %v63_v36 = vld [vmem:[%s306_s0 + $0x20] sm:$0xff]  ;;  %v70_v45 = vld [vmem:[%s306_s0 + $0x58] sm:$0xff]  ;;  %v72_v55 = vld [vmem:[%s306_s0 + $0x68] sm:$0xff] }
   0x6   :  { %v21_v3 = vrot.slane %v19_v2, 7  ;;  %v67_v40 = vld [vmem:[%s306_s0 + $0x40] sm:$0xff]  ;;  %v73_v56 = vld [vmem:[%s306_s0 + $0x70] sm:$0xff]  ;;  %v74_v57 = vld [vmem:[%s306_s0 + $0x78] sm:$0xff] }
   0x7   :  { %v71_v50 = vld [vmem:[%s306_s0 + $0x60] sm:$0xff] }
   0x8   :  { %v23_v4 = vsub.f32 %v18_v1, %v21_v3 }
   0xa   :  { %v25_v5 = vadd.f32 1e-05, %v23_v4 }
   0xc   :  { %170 = vrsqrt.f32 %v25_v5 }
  0x19   :  { %v171_v15 = vpop.eup %170 }
  0x1a   :  { %v34_v16 = vrot.slane %v171_v15, %v33_v13 }
  0x1c   :  { %v35_v18 = vcombine.high %v34_v16, %v34_v16 }
  0x1e   :  { %v37_v24 = vmul.f32 %v35_v18, %v24_v17 }
  0x20   :  { %v46_v25 = vrot.slane %v37_v24, %v45_v19  ;;  %v78_v26 = vrot.slane %v37_v24, %v77_v20  ;;  %v82_v30 = vrot.slane %v37_v24, %v81_v21  ;;  %v86_v32 = vrot.slane %v37_v24, %v85_v22 }
  0x21   :  { %v90_v33 = vrot.slane %v37_v24, %v89_v23 }
  0x22   :  { %v48_v34 = vmul.f32 %v46_v25, %v18_v1  ;;  %v95_v42 = vmul.f32 %v78_v26, %v59_v28  ;;  %v96_v46 = vmul.f32 %v82_v30, %v60_v29  ;;  %v97_v47 = vmul.f32 %v86_v32, %v61_v31 }
  0x23   :  { %v98_v48 = vmul.f32 %v90_v33, %v62_v35  ;;  %v99_v49 = vmul.f32 %v78_v26, %v63_v36  ;;  %v100_v52 = vmul.f32 %v82_v30, %v64_v37  ;;  %v101_v53 = vmul.f32 %v86_v32, %v65_v38 }
  0x24   :  { %v56_v41 = vrot.slane %v48_v34, %v33_v13  ;;  %v102_v54 = vmul.f32 %v90_v33, %v66_v39  ;;  %v103_v58 = vmul.f32 %v78_v26, %v67_v40  ;;  %v104_v59 = vmul.f32 %v82_v30, %v68_v43 }
  0x25   :  { %v105_v60 = vmul.f32 %v86_v32, %v69_v44  ;;  %v106_v61 = vmul.f32 %v90_v33, %v70_v45  ;;  %v107_v2 = vmul.f32 %v78_v26, %v71_v50  ;;  %v108_v3 = vmul.f32 %v82_v30, %v72_v55 }
  0x26   :  { %v58_v51 = vsub.f32 %v38_v27, %v56_v41  ;;  %v109_v4 = vmul.f32 %v86_v32, %v73_v56  ;;  %v110_v5 = vmul.f32 %v90_v33, %v74_v57 }
  0x28   :  { %v115_v62 = vrot.slane %v58_v51, %v77_v20  ;;  %v119_v63 = vrot.slane %v58_v51, %v81_v21  ;;  %v123_v0 = vrot.slane %v58_v51, %v85_v22  ;;  %v127_v1 = vrot.slane %v58_v51, %v89_v23 }
  0x2a   :  { %v132_v6 = vadd.f32 %v115_v62, %v95_v42  ;;  %v133_v7 = vadd.f32 %v119_v63, %v96_v46  ;;  %v134_v8 = vadd.f32 %v123_v0, %v97_v47  ;;  %v135_v9 = vadd.f32 %v127_v1, %v98_v48 }
  0x2b   :  { %v136_v10 = vadd.f32 %v115_v62, %v99_v49  ;;  %v137_v11 = vadd.f32 %v119_v63, %v100_v52  ;;  %v138_v12 = vadd.f32 %v123_v0, %v101_v53  ;;  %v139_v13 = vadd.f32 %v127_v1, %v102_v54 }
  0x2c   :  { %148 = vst [vmem:[%s308_s4] sm:$0xff] %v132_v6  ;;  %149 = vst [vmem:[%s308_s4 + $0x8] sm:$0xff] %v133_v7  ;;  %v140_v14 = vadd.f32 %v115_v62, %v103_v58  ;;  %v141_v15 = vadd.f32 %v119_v63, %v104_v59  ;;  %v142_v16 = vadd.f32 %v123_v0, %v105_v60 }
  0x2d   :  { %150 = vst [vmem:[%s308_s4 + $0x10] sm:$0xff] %v134_v8  ;;  %151 = vst [vmem:[%s308_s4 + $0x18] sm:$0xff] %v135_v9  ;;  %v143_v17 = vadd.f32 %v127_v1, %v106_v61  ;;  %v144_v18 = vadd.f32 %v115_v62, %v107_v2  ;;  %v145_v19 = vadd.f32 %v119_v63, %v108_v3 }
  0x2e   :  { %152 = vst [vmem:[%s308_s4 + $0x20] sm:$0xff] %v136_v10  ;;  %153 = vst [vmem:[%s308_s4 + $0x28] sm:$0xff] %v137_v11  ;;  %v146_v20 = vadd.f32 %v123_v0, %v109_v4  ;;  %v147_v21 = vadd.f32 %v127_v1, %v110_v5 }
  0x2f   :  { %154 = vst [vmem:[%s308_s4 + $0x30] sm:$0xff] %v138_v12  ;;  %155 = vst [vmem:[%s308_s4 + $0x38] sm:$0xff] %v139_v13 }
  0x30   :  { %156 = vst [vmem:[%s308_s4 + $0x40] sm:$0xff] %v140_v14  ;;  %157 = vst [vmem:[%s308_s4 + $0x48] sm:$0xff] %v141_v15 }
  0x31   :  { %158 = vst [vmem:[%s308_s4 + $0x50] sm:$0xff] %v142_v16  ;;  %159 = vst [vmem:[%s308_s4 + $0x58] sm:$0xff] %v143_v17 }
  0x32   :  { %160 = vst [vmem:[%s308_s4 + $0x60] sm:$0xff] %v144_v18  ;;  %161 = vst [vmem:[%s308_s4 + $0x68] sm:$0xff] %v145_v19 }
  0x33   :  { %162 = vst [vmem:[%s308_s4 + $0x70] sm:$0xff] %v146_v20  ;;  %163 = vst [vmem:[%s308_s4 + $0x78] sm:$0xff] %v147_v21 }

// kernel: resnet_shard1_forward.109
= control target key start
LH: loop header
LB: loop body
LE: loop exit
PB: predicated region body
PF: predicated region fallthrough
CT: control target
= control target key end

     0   :  { %v147_v6 = vmov 1966171168   ;;  %v31_v8 = vlaneseq  ;;  %s278_s1 = inlined_call_operand.vmem [shape: f32[2,128], index: 1, kind: input, shape index: {}]   ;;  %s279_s2 = inlined_call_operand.vmem [shape: f32[1,128], index: 2, kind: input, shape index: {}]   ;;  %s280_s0 = inlined_call_operand.vmem [shape: f32[128,128], index: 0, kind: input, shape index: {}]   ;;  %s281_s3 = inlined_call_operand.vmem [shape: f32[1,128], index: 3, kind: input, shape index: {}]   ;;  %s282_s4 = inlined_call_operand.vmem [shape: f32[128,128], index: 4, kind: output, shape index: {}]  }
   0x1   :  { %v17_v0 = vld [vmem:[%s278_s1] sm:$0x3]  ;;  %v29_v7 = vunpack.c.l.s4 %v147_v6  ;;  %v49_v21 = vld [vmem:[%s280_s0 + $0x8] sm:$0xff]  ;;  %v50_v22 = vld [vmem:[%s280_s0 + $0x10] sm:$0xff] }
   0x2   :  { %v18_v1 = vmul.f32 0.0078125, %v17_v0  ;;  %v32_v10 = vshrl.u32 %v31_v8, 7  ;;  %v24_v15 = vld [vmem:[%s279_s2] sm:$0x1]  ;;  %v51_v23 = vld [vmem:[%s280_s0 + $0x18] sm:$0xff]  ;;  %v53_v27 = vld [vmem:[%s280_s0 + $0x28] sm:$0xff] }
   0x3   :  { %v30_v9 = vunpack.c.0.s8 %v29_v7  ;;  %v45_v19 = vld [vmem:[%s281_s3] sm:$0x1]  ;;  %v54_v28 = vld [vmem:[%s280_s0 + $0x30] sm:$0xff]  ;;  %v55_v29 = vld [vmem:[%s280_s0 + $0x38] sm:$0xff] }
   0x4   :  { %v19_v2 = vmul.f32 %v18_v1, %v18_v1  ;;  %v67_v17 = vsub.s32 0, %v32_v10  ;;  %v48_v20 = vld [vmem:[%s280_s0] sm:$0xff]  ;;  %v57_v31 = vld [vmem:[%s280_s0 + $0x48] sm:$0xff]  ;;  %v58_v32 = vld [vmem:[%s280_s0 + $0x50] sm:$0xff] }
   0x5   :  { %v33_v11 = vsub.s32 %v30_v9, %v32_v10  ;;  %v52_v24 = vld [vmem:[%s280_s0 + $0x20] sm:$0xff]  ;;  %v59_v37 = vld [vmem:[%s280_s0 + $0x58] sm:$0xff]  ;;  %v61_v39 = vld [vmem:[%s280_s0 + $0x68] sm:$0xff] }
   0x6   :  { %v21_v3 = vrot.slane %v19_v2, 7  ;;  %v56_v30 = vld [vmem:[%s280_s0 + $0x40] sm:$0xff]  ;;  %v62_v0 = vld [vmem:[%s280_s0 + $0x70] sm:$0xff] }
   0x7   :  { %v60_v38 = vld [vmem:[%s280_s0 + $0x60] sm:$0xff] }
   0x8   :  { %v23_v4 = vsub.f32 %v18_v1, %v21_v3 }
   0xa   :  { %v25_v5 = vadd.f32 1e-05, %v23_v4 }
   0xc   :  { %145 = vrsqrt.f32 %v25_v5 }
  0x19   :  { %v146_v12 = vpop.eup %145 }
  0x1a   :  { %v34_v13 = vrot.slane %v146_v12, %v33_v11 }
  0x1c   :  { %v35_v14 = vcombine.high %v34_v13, %v34_v13 }
  0x1e   :  { %v42_v16 = vrot.slane %v35_v14, %v33_v11 }
  0x20   :  { %v44_v18 = vmul.f32 %v42_v16, %v24_v15 }
  0x22   :  { %v46_v25 = vmul.f32 %v44_v18, %v18_v1  ;;  %v68_v26 = vrot.slane %v44_v18, %v67_v17  ;;  %v63_v1 = vld [vmem:[%s280_s0 + $0x78] sm:$0xff] }
  0x24   :  { %v47_v33 = vsub.f32 %v45_v19, %v46_v25  ;;  %v70_v34 = vmul.f32 %v68_v26, %v48_v20  ;;  %v71_v35 = vmul.f32 %v68_v26, %v49_v21  ;;  %v72_v36 = vmul.f32 %v68_v26, %v50_v22 }
  0x25   :  { %v73_v40 = vmul.f32 %v68_v26, %v51_v23  ;;  %v74_v41 = vmul.f32 %v68_v26, %v52_v24  ;;  %v75_v42 = vmul.f32 %v68_v26, %v53_v27  ;;  %v76_v43 = vmul.f32 %v68_v26, %v54_v28 }
  0x26   :  { %v90_v44 = vrot.slane %v47_v33, %v67_v17  ;;  %v77_v45 = vmul.f32 %v68_v26, %v55_v29  ;;  %v78_v46 = vmul.f32 %v68_v26, %v56_v30  ;;  %v79_v47 = vmul.f32 %v68_v26, %v57_v31 }
  0x27   :  { %v80_v48 = vmul.f32 %v68_v26, %v58_v32  ;;  %v81_v49 = vmul.f32 %v68_v26, %v59_v37  ;;  %v82_v50 = vmul.f32 %v68_v26, %v60_v38  ;;  %v83_v51 = vmul.f32 %v68_v26, %v61_v39 }
  0x28   :  { %v92_v52 = vadd.f32 %v90_v44, %v70_v34  ;;  %v93_v53 = vadd.f32 %v90_v44, %v71_v35  ;;  %v94_v54 = vadd.f32 %v90_v44, %v72_v36  ;;  %v95_v55 = vadd.f32 %v90_v44, %v73_v40 }
  0x29   :  { %v96_v56 = vadd.f32 %v90_v44, %v74_v41  ;;  %v97_v57 = vadd.f32 %v90_v44, %v75_v42  ;;  %v98_v58 = vadd.f32 %v90_v44, %v76_v43  ;;  %v99_v59 = vadd.f32 %v90_v44, %v77_v45 }
  0x2a   :  { %v108_v60 = vmax.f32 %v92_v52, 0.0  ;;  %v109_v61 = vmax.f32 %v93_v53, 0.0  ;;  %v110_v62 = vmax.f32 %v94_v54, 0.0  ;;  %v111_v63 = vmax.f32 %v95_v55, 0.0 }
  0x2b   :  { %v112_v2 = vmax.f32 %v96_v56, 0.0  ;;  %v113_v3 = vmax.f32 %v97_v57, 0.0  ;;  %v114_v4 = vmax.f32 %v98_v58, 0.0  ;;  %v115_v5 = vmax.f32 %v99_v59, 0.0 }
  0x2c   :  { %124 = vst [vmem:[%s282_s4] sm:$0xff] %v108_v60  ;;  %125 = vst [vmem:[%s282_s4 + $0x8] sm:$0xff] %v109_v61  ;;  %v100_v6 = vadd.f32 %v90_v44, %v78_v46  ;;  %v101_v7 = vadd.f32 %v90_v44, %v79_v47  ;;  %v102_v8 = vadd.f32 %v90_v44, %v80_v48 }
  0x2d   :  { %126 = vst [vmem:[%s282_s4 + $0x10] sm:$0xff] %v110_v62  ;;  %127 = vst [vmem:[%s282_s4 + $0x18] sm:$0xff] %v111_v63  ;;  %v103_v9 = vadd.f32 %v90_v44, %v81_v49  ;;  %v104_v10 = vadd.f32 %v90_v44, %v82_v50  ;;  %v105_v11 = vadd.f32 %v90_v44, %v83_v51 }
  0x2e   :  { %128 = vst [vmem:[%s282_s4 + $0x20] sm:$0xff] %v112_v2  ;;  %129 = vst [vmem:[%s282_s4 + $0x28] sm:$0xff] %v113_v3  ;;  %v84_v12 = vmul.f32 %v68_v26, %v62_v0  ;;  %v85_v13 = vmul.f32 %v68_v26, %v63_v1  ;;  %v116_v14 = vmax.f32 %v100_v6, 0.0  ;;  %v117_v15 = vmax.f32 %v101_v7, 0.0 }
  0x2f   :  { %130 = vst [vmem:[%s282_s4 + $0x30] sm:$0xff] %v114_v4  ;;  %131 = vst [vmem:[%s282_s4 + $0x38] sm:$0xff] %v115_v5  ;;  %v118_v16 = vmax.f32 %v102_v8, 0.0  ;;  %v119_v17 = vmax.f32 %v103_v9, 0.0  ;;  %v120_v18 = vmax.f32 %v104_v10, 0.0  ;;  %v121_v19 = vmax.f32 %v105_v11, 0.0 }
  0x30   :  { %v106_v20 = vadd.f32 %v90_v44, %v84_v12  ;;  %v107_v21 = vadd.f32 %v90_v44, %v85_v13  ;;  %132 = vst [vmem:[%s282_s4 + $0x40] sm:$0xff] %v116_v14  ;;  %133 = vst [vmem:[%s282_s4 + $0x48] sm:$0xff] %v117_v15 }
  0x31   :  { %134 = vst [vmem:[%s282_s4 + $0x50] sm:$0xff] %v118_v16  ;;  %135 = vst [vmem:[%s282_s4 + $0x58] sm:$0xff] %v119_v17 }
  0x32   :  { %136 = vst [vmem:[%s282_s4 + $0x60] sm:$0xff] %v120_v18  ;;  %137 = vst [vmem:[%s282_s4 + $0x68] sm:$0xff] %v121_v19  ;;  %v122_v22 = vmax.f32 %v106_v20, 0.0  ;;  %v123_v23 = vmax.f32 %v107_v21, 0.0 }
  0x34   :  { %138 = vst [vmem:[%s282_s4 + $0x70] sm:$0xff] %v122_v22  ;;  %139 = vst [vmem:[%s282_s4 + $0x78] sm:$0xff] %v123_v23 }

// kernel: resnet_shard1_forward.112
= control target key start
LH: loop header
LB: loop body
LE: loop exit
PB: predicated region body
PF: predicated region fallthrough
CT: control target
= control target key end

     0   :  { %v87_v6 = vmov 1966171168   ;;  %v31_v8 = vlaneseq  ;;  %s146_s1 = inlined_call_operand.vmem [shape: f32[2,128], index: 1, kind: input, shape index: {}]   ;;  %s147_s2 = inlined_call_operand.vmem [shape: f32[1,128], index: 2, kind: input, shape index: {}]   ;;  %s148_s3 = inlined_call_operand.vmem [shape: f32[1,128], index: 3, kind: input, shape index: {}]   ;;  %s149_s0 = inlined_call_operand.vmem [shape: f32[32,128], index: 0, kind: input, shape index: {}]   ;;  %s150_s4 = inlined_call_operand.vmem [shape: f32[32,128], index: 4, kind: output, shape index: {}]  }
   0x1   :  { %v17_v0 = vld [vmem:[%s146_s1] sm:$0x3]  ;;  %v29_v7 = vunpack.c.l.s4 %v87_v6  ;;  %v49_v21 = vld [vmem:[%s149_s0 + $0x8] sm:$0xff]  ;;  %v50_v22 = vld [vmem:[%s149_s0 + $0x10] sm:$0xff] }
   0x2   :  { %v18_v1 = vmul.f32 0.03125, %v17_v0  ;;  %v32_v10 = vshrl.u32 %v31_v8, 7  ;;  %v24_v15 = vld [vmem:[%s147_s2] sm:$0x1]  ;;  %v51_v25 = vld [vmem:[%s149_s0 + $0x18] sm:$0xff] }
   0x3   :  { %v30_v9 = vunpack.c.0.s8 %v29_v7  ;;  %v45_v19 = vld [vmem:[%s148_s3] sm:$0x1] }
   0x4   :  { %v19_v2 = vmul.f32 %v18_v1, %v18_v1  ;;  %v55_v17 = vsub.s32 0, %v32_v10  ;;  %v48_v20 = vld [vmem:[%s149_s0] sm:$0xff] }
   0x5   :  { %v33_v11 = vsub.s32 %v30_v9, %v32_v10 }
   0x6   :  { %v21_v3 = vrot.slane %v19_v2, 7 }
   0x8   :  { %v23_v4 = vsub.f32 %v18_v1, %v21_v3 }
   0xa   :  { %v25_v5 = vadd.f32 1e-05, %v23_v4 }
   0xc   :  { %85 = vrsqrt.f32 %v25_v5 }
  0x19   :  { %v86_v12 = vpop.eup %85 }
  0x1a   :  { %v34_v13 = vrot.slane %v86_v12, %v33_v11 }
  0x1c   :  { %v35_v14 = vcombine.high %v34_v13, %v34_v13 }
  0x1e   :  { %v42_v16 = vrot.slane %v35_v14, %v33_v11 }
  0x20   :  { %v44_v18 = vmul.f32 %v42_v16, %v24_v15 }
  0x22   :  { %v46_v23 = vmul.f32 %v44_v18, %v18_v1  ;;  %v56_v24 = vrot.slane %v44_v18, %v55_v17 }
  0x24   :  { %v47_v26 = vsub.f32 %v45_v19, %v46_v23  ;;  %v58_v27 = vmul.f32 %v56_v24, %v48_v20  ;;  %v59_v28 = vmul.f32 %v56_v24, %v49_v21  ;;  %v60_v29 = vmul.f32 %v56_v24, %v50_v22 }
  0x25   :  { %v61_v30 = vmul.f32 %v56_v24, %v51_v25 }
  0x26   :  { %v66_v31 = vrot.slane %v47_v26, %v55_v17 }
  0x28   :  { %v68_v32 = vadd.f32 %v66_v31, %v58_v27  ;;  %v69_v33 = vadd.f32 %v66_v31, %v59_v28  ;;  %v70_v34 = vadd.f32 %v66_v31, %v60_v29  ;;  %v71_v35 = vadd.f32 %v66_v31, %v61_v30 }
  0x2a   :  { %v72_v36 = vmax.f32 %v68_v32, 0.0  ;;  %v73_v37 = vmax.f32 %v69_v33, 0.0  ;;  %v74_v38 = vmax.f32 %v70_v34, 0.0  ;;  %v75_v39 = vmax.f32 %v71_v35, 0.0 }
  0x2c   :  { %76 = vst [vmem:[%s150_s4] sm:$0xff] %v72_v36  ;;  %77 = vst [vmem:[%s150_s4 + $0x8] sm:$0xff] %v73_v37 }
  0x2d   :  { %78 = vst [vmem:[%s150_s4 + $0x10] sm:$0xff] %v74_v38  ;;  %79 = vst [vmem:[%s150_s4 + $0x18] sm:$0xff] %v75_v39 }

// kernel: resnet_shard1_forward.111
= control target key start
LH: loop header
LB: loop body
LE: loop exit
PB: predicated region body
PF: predicated region fallthrough
CT: control target
= control target key end

     0   :  { %v50_v0 = vmov 0.0   ;;  %s88_s1 = inlined_call_operand.vmem [shape: f32[2,128], index: 1, kind: output, shape index: {}]   ;;  %s89_s0 = inlined_call_operand.vmem [shape: f32[32,128], index: 0, kind: input, shape index: {}]  }
   0x1   :  { %12 = vst [vmem:[%s88_s1] sm:$0x3] %v50_v0  ;;  %v13_v1 = vld [vmem:[%s89_s0] sm:$0xff]  ;;  %v14_v2 = vld [vmem:[%s89_s0 + $0x8] sm:$0xff]  ;;  %v15_v3 = vld [vmem:[%s89_s0 + $0x10] sm:$0xff] }
   0x2   :  { %v16_v4 = vld [vmem:[%s89_s0 + $0x18] sm:$0xff]  ;;  %v18_v5 = vadd.f32 %v14_v2, %v13_v1  ;;  %v30_v6 = vmul.f32 %v13_v1, %v13_v1  ;;  %v31_v7 = vmul.f32 %v14_v2, %v14_v2  ;;  %v32_v8 = vmul.f32 %v15_v3, %v15_v3 }
   0x3   :  { %v33_v10 = vmul.f32 %v16_v4, %v16_v4 }
   0x4   :  { %v19_v9 = vadd.f32 %v18_v5, %v15_v3  ;;  %v34_v11 = vadd.f32 %v31_v7, %v30_v6 }
   0x6   :  { %v20_v12 = vadd.f32 %v19_v9, %v16_v4  ;;  %v35_v13 = vadd.f32 %v34_v11, %v32_v8 }
   0x8   :  { %v21_v14 = vrot.slane %v20_v12, 4  ;;  %v36_v15 = vadd.f32 %v35_v13, %v33_v10  ;;  %v17_v24 = vld [vmem:[%s88_s1] sm:$0x1]  ;;  %v29_v27 = vld [vmem:[%s88_s1 + $0x1] sm:$0x1] }
   0xa   :  { %v22_v16 = vadd.f32 %v21_v14, %v20_v12  ;;  %v37_v17 = vrot.slane %v36_v15, 4 }
   0xc   :  { %v23_v18 = vrot.slane %v22_v16, 2  ;;  %v38_v19 = vadd.f32 %v37_v17, %v36_v15 }
   0xe   :  { %v24_v20 = vadd.f32 %v23_v18, %v22_v16  ;;  %v39_v21 = vrot.slane %v38_v19, 2 }
  0x10   :  { %v25_v22 = vrot.slane %v24_v20, 1  ;;  %v40_v23 = vadd.f32 %v39_v21, %v38_v19 }
  0x12   :  { %v26_v25 = vadd.f32 %v25_v22, %v24_v20  ;;  %v41_v26 = vrot.slane %v40_v23, 1 }
  0x14   :  { %v27_v28 = vadd.f32 %v26_v25, %v17_v24  ;;  %v42_v29 = vadd.f32 %v41_v26, %v40_v23 }
  0x16   :  { %28 = vst [vmem:[%s88_s1] sm:$0x1] %v27_v28  ;;  %v43_v30 = vadd.f32 %v42_v29, %v29_v27 }
  0x18   :  { %44 = vst [vmem:[%s88_s1 + $0x1] sm:$0x1] %v43_v30 }

// kernel: resnet_shard1_forward.110
= control target key start
LH: loop header
LB: loop body
LE: loop exit
PB: predicated region body
PF: predicated region fallthrough
CT: control target
= control target key end

     0   :  { %s1580_s1 = inlined_call_operand.vmem [shape: bf16[1152,128], index: 1, kind: input, shape index: {}]   ;;  %s1581_s0 = inlined_call_operand.vmem [shape: bf16[32,1152], index: 0, kind: input, shape index: {}]   ;;  %s1582_s2 = inlined_call_operand.vmem [shape: f32[32,128], index: 2, kind: output, shape index: {}]  }
   0x1   :  { %v1185_v0 = vld [vmem:[%s1580_s1 + $0x78] sm:$0xff]   ;;  %v1189_v4 = vld [vmem:[%s1580_s1 + $0x70] sm:$0xff]   ;;  %v1193_v8 = vld [vmem:[%s1580_s1 + $0x68] sm:$0xff]  }
   0x2   :  { %v1186_v1 = vld [vmem:[%s1580_s1 + $0xf8] sm:$0xff]   ;;  %1043 = vmatprep.subr.bf16.mxu0 %v1185_v0  ;;  %v1190_v5 = vld [vmem:[%s1580_s1 + $0xf0] sm:$0xff]   ;;  %v1194_v9 = vld [vmem:[%s1580_s1 + $0xe8] sm:$0xff]  }
   0x3   :  { %v1187_v2 = vld [vmem:[%s1580_s1 + $0x38] sm:$0xff]   ;;  %1071 = vmatprep.subr.bf16.mxu1 %v1186_v1  ;;  %v1191_v6 = vld [vmem:[%s1580_s1 + $0x30] sm:$0xff]   ;;  %v1195_v10 = vld [vmem:[%s1580_s1 + $0x28] sm:$0xff]  }
   0x4   :  { %v1188_v3 = vld [vmem:[%s1580_s1 + $0xb8] sm:$0xff]   ;;  %1044 = vmatpush3.bf16.msra.mxu0 %v1187_v2  ;;  %v1192_v7 = vld [vmem:[%s1580_s1 + $0xb0] sm:$0xff]   ;;  %v1196_v11 = vld [vmem:[%s1580_s1 + $0xa8] sm:$0xff]  }
   0x5   :  { %1072 = vmatpush3.bf16.msra.mxu1 %v1188_v3  ;;  %1045 = vmatprep.subr.bf16.mxu0 %v1189_v4  ;;  %v1197_v12 = vld [vmem:[%s1580_s1 + $0x60] sm:$0xff]   ;;  %v1201_v16 = vld [vmem:[%s1580_s1 + $0x58] sm:$0xff]   ;;  %v1205_v20 = vld [vmem:[%s1580_s1 + $0x50] sm:$0xff]  }
   0x6   :  { %1073 = vmatprep.subr.bf16.mxu1 %v1190_v5  ;;  %v1198_v13 = vld [vmem:[%s1580_s1 + $0xe0] sm:$0xff]   ;;  %v1202_v17 = vld [vmem:[%s1580_s1 + $0xd8] sm:$0xff]   ;;  %v1206_v21 = vld [vmem:[%s1580_s1 + $0xd0] sm:$0xff]  }
   0x7   :  { %v1199_v14 = vld [vmem:[%s1580_s1 + $0x20] sm:$0xff]   ;;  %v1203_v18 = vld [vmem:[%s1580_s1 + $0x18] sm:$0xff]   ;;  %v1207_v22 = vld [vmem:[%s1580_s1 + $0x10] sm:$0xff]  }
   0x8   :  { %1046 = vmatpush3.bf16.msra.mxu0 %v1191_v6  ;;  %v1200_v15 = vld [vmem:[%s1580_s1 + $0xa0] sm:$0xff]   ;;  %v1204_v19 = vld [vmem:[%s1580_s1 + $0x98] sm:$0xff]   ;;  %v1208_v23 = vld [vmem:[%s1580_s1 + $0x90] sm:$0xff]  }
   0x9   :  { %1074 = vmatpush3.bf16.msra.mxu1 %v1192_v7  ;;  %1047 = vmatprep.subr.bf16.mxu0 %v1193_v8  ;;  %v1209_v24 = vld [vmem:[%s1580_s1 + $0x48] sm:$0xff]   ;;  %v1213_v28 = vld [vmem:[%s1580_s1 + $0x40] sm:$0xff]   ;;  %v1223_v36 = vld [vmem:[%s1580_s1 + $0x178] sm:$0xff]  }
   0xa   :  { %1075 = vmatprep.subr.bf16.mxu1 %v1194_v9  ;;  %v1210_v25 = vld [vmem:[%s1580_s1 + $0xc8] sm:$0xff]   ;;  %v1214_v29 = vld [vmem:[%s1580_s1 + $0xc0] sm:$0xff]   ;;  %v1224_v37 = vld [vmem:[%s1580_s1 + $0x138] sm:$0xff]  }
   0xb   :  { %v1211_v26 = vld [vmem:[%s1580_s1 + $0x8] sm:$0xff]   ;;  %v1215_v30 = vld [vmem:[%s1580_s1] sm:$0xff]   ;;  %v1225_v38 = vld [vmem:[%s1580_s1 + $0x1f8] sm:$0xff]  }
   0xc   :  { %1048 = vmatpush3.bf16.msra.mxu0 %v1195_v10  ;;  %v1212_v27 = vld [vmem:[%s1580_s1 + $0x88] sm:$0xff]   ;;  %v1216_v31 = vld [vmem:[%s1580_s1 + $0x80] sm:$0xff]   ;;  %v1226_v39 = vld [vmem:[%s1580_s1 + $0x1b8] sm:$0xff]  }
   0xd   :  { %1076 = vmatpush3.bf16.msra.mxu1 %v1196_v11  ;;  %1049 = vmatprep.subr.bf16.mxu0 %v1197_v12  ;;  %v1217_v32 = vld [vmem:[%s1581_s0] ss:$36 sps:$4 sm:$0xff]   ;;  %v1220_v34 = vld [vmem:[%s1581_s0 + $0x8] ss:$36 sps:$4 sm:$0xff]   ;;  %v1227_v40 = vld [vmem:[%s1580_s1 + $0x170] sm:$0xff]  }
   0xe   :  { %1077 = vmatprep.subr.bf16.mxu1 %v1198_v13  ;;  %v1219_v33 = vld [vmem:[%s1581_s0 + $0x4] ss:$36 sps:$4 sm:$0xff]   ;;  %v1222_v35 = vld [vmem:[%s1581_s0 + $0xc] ss:$36 sps:$4 sm:$0xff]   ;;  %v1239_v52 = vld [vmem:[%s1580_s1 + $0x158] sm:$0xff]  }
   0xf   :  { %732 = vmatprep.mubr.bf16.mxu0 %v1219_v33  ;;  %781 = vmatprep.mubr.bf16.mxu1 %v1222_v35  ;;  %v1228_v41 = vld [vmem:[%s1580_s1 + $0x130] sm:$0xff]   ;;  %v1231_v44 = vld [vmem:[%s1580_s1 + $0x168] sm:$0xff]   ;;  %v1235_v48 = vld [vmem:[%s1580_s1 + $0x160] sm:$0xff]  }
  0x10   :  { %1050 = vmatpush3.bf16.msra.mxu0 %v1199_v14  ;;  %v1229_v42 = vld [vmem:[%s1580_s1 + $0x1f0] sm:$0xff]   ;;  %v1232_v45 = vld [vmem:[%s1580_s1 + $0x128] sm:$0xff]   ;;  %v1236_v49 = vld [vmem:[%s1580_s1 + $0x120] sm:$0xff]  }
  0x11   :  { %1078 = vmatpush3.bf16.msra.mxu1 %v1200_v15  ;;  %1051 = vmatprep.subr.bf16.mxu0 %v1201_v16  ;;  %v1230_v43 = vld [vmem:[%s1580_s1 + $0x1b0] sm:$0xff]   ;;  %v1233_v46 = vld [vmem:[%s1580_s1 + $0x1e8] sm:$0xff]   ;;  %v1237_v50 = vld [vmem:[%s1580_s1 + $0x1e0] sm:$0xff]  }
  0x12   :  { %1079 = vmatprep.subr.bf16.mxu1 %v1202_v17  ;;  %v1234_v47 = vld [vmem:[%s1580_s1 + $0x1a8] sm:$0xff]   ;;  %v1238_v51 = vld [vmem:[%s1580_s1 + $0x1a0] sm:$0xff]   ;;  %v1240_v53 = vld [vmem:[%s1580_s1 + $0x118] sm:$0xff]  }
  0x13   :  { %v1241_v54 = vld [vmem:[%s1581_s0 + $0x4c] ss:$36 sps:$4 sm:$0xff]   ;;  %v1243_v55 = vld [vmem:[%s1581_s0 + $0x54] ss:$36 sps:$4 sm:$0xff]   ;;  %v1257_v4 = vld [vmem:[%s1580_s1 + $0x140] sm:$0xff]  }
  0x14   :  { %1052 = vmatpush3.bf16.msra.mxu0 %v1203_v18  ;;  %v1245_v56 = vld [vmem:[%s1580_s1 + $0x1d8] sm:$0xff]   ;;  %v1246_v57 = vld [vmem:[%s1581_s0 + $0x48] ss:$36 sps:$4 sm:$0xff]   ;;  %v1247_v58 = vld [vmem:[%s1581_s0 + $0x50] ss:$36 sps:$4 sm:$0xff]  }
  0x15   :  { %1080 = vmatpush3.bf16.msra.mxu1 %v1204_v19  ;;  %1053 = vmatprep.subr.bf16.mxu0 %v1205_v20  ;;  %v1248_v59 = vld [vmem:[%s1580_s1 + $0x198] sm:$0xff]   ;;  %v1249_v60 = vld [vmem:[%s1580_s1 + $0x150] sm:$0xff]   ;;  %v1253_v0 = vld [vmem:[%s1580_s1 + $0x148] sm:$0xff]  }
  0x16   :  { %1081 = vmatprep.subr.bf16.mxu1 %v1206_v21  ;;  %v1250_v61 = vld [vmem:[%s1580_s1 + $0x110] sm:$0xff]   ;;  %v1254_v1 = vld [vmem:[%s1580_s1 + $0x108] sm:$0xff]   ;;  %v1258_v5 = vld [vmem:[%s1580_s1 + $0x100] sm:$0xff]  }
  0x17   :  { %v1251_v62 = vld [vmem:[%s1580_s1 + $0x1d0] sm:$0xff]   ;;  %v1255_v2 = vld [vmem:[%s1580_s1 + $0x1c8] sm:$0xff]   ;;  %v1259_v6 = vld [vmem:[%s1580_s1 + $0x1c0] sm:$0xff]  }
  0x18   :  { %1054 = vmatpush3.bf16.msra.mxu0 %v1207_v22  ;;  %v1252_v63 = vld [vmem:[%s1580_s1 + $0x190] sm:$0xff]   ;;  %v1256_v3 = vld [vmem:[%s1580_s1 + $0x188] sm:$0xff]   ;;  %v1263_v9 = vld [vmem:[%s1580_s1 + $0x180] sm:$0xff]  }
  0x19   :  { %1082 = vmatpush3.bf16.msra.mxu1 %v1208_v23  ;;  %1055 = vmatprep.subr.bf16.mxu0 %v1209_v24  ;;  %v1260_v7 = vld [vmem:[%s1581_s0 + $0x10] ss:$36 sps:$4 sm:$0xff]   ;;  %v1264_v10 = vld [vmem:[%s1580_s1 + $0x238] sm:$0xff]   ;;  %v1272_v16 = vld [vmem:[%s1580_s1 + $0x228] sm:$0xff]  }
  0x1a   :  { %1083 = vmatprep.subr.bf16.mxu1 %v1210_v25  ;;  %v1262_v8 = vld [vmem:[%s1581_s0 + $0x14] ss:$36 sps:$4 sm:$0xff]   ;;  %v1267_v12 = vld [vmem:[%s1581_s0 + $0x1c] ss:$36 sps:$4 sm:$0xff]   ;;  %v1273_v17 = vld [vmem:[%s1581_s0 + $0x64] ss:$36 sps:$4 sm:$0xff]  }
  0x1b   :  { %v1265_v11 = vld [vmem:[%s1581_s0 + $0x18] ss:$36 sps:$4 sm:$0xff]   ;;  %v1268_v13 = vld [vmem:[%s1580_s1 + $0x230] sm:$0xff]   ;;  %v1275_v18 = vld [vmem:[%s1581_s0 + $0x60] ss:$36 sps:$4 sm:$0xff]  }
  0x1c   :  { %1056 = vmatpush3.bf16.msra.mxu0 %v1211_v26  ;;  %v1269_v14 = vld [vmem:[%s1581_s0 + $0x5c] ss:$36 sps:$4 sm:$0xff]   ;;  %v1278_v22 = vld [vmem:[%s1580_s1 + $0x210] sm:$0xff]   ;;  %v1279_v23 = vld [vmem:[%s1580_s1 + $0x208] sm:$0xff]  }
  0x1d   :  { %1084 = vmatpush3.bf16.msra.mxu1 %v1212_v27  ;;  %1057 = vmatprep.subr.bf16.mxu0 %v1213_v28  ;;  %v1271_v15 = vld [vmem:[%s1581_s0 + $0x58] ss:$36 sps:$4 sm:$0xff]   ;;  %v1276_v19 = vld [vmem:[%s1580_s1 + $0x220] sm:$0xff]   ;;  %v1282_v25 = vld [vmem:[%s1581_s0 + $0x68] ss:$36 sps:$4 sm:$0xff]  }
  0x1e   :  { %1085 = vmatprep.subr.bf16.mxu1 %v1214_v29  ;;  %v1277_v20 = vld [vmem:[%s1580_s1 + $0x218] sm:$0xff]   ;;  %v1281_v21 = vld [vmem:[%s1581_s0 + $0x20] ss:$36 sps:$4 sm:$0xff]  }
  0x1f   :  { %v1280_v24 = vld [vmem:[%s1580_s1 + $0x200] sm:$0xff]  }
  0x20   :  { %1058 = vmatpush3.bf16.msra.mxu0 %v1215_v30 }
  0x21   :  { %1086 = vmatpush3.bf16.msra.mxu1 %v1216_v31  ;;  %1099 = vmatprep.subr.bf16.mxu0 %v1223_v36 }
  0x22   :  { %1127 = vmatprep.subr.bf16.mxu1 %v1225_v38 }
  0x23   :  { %733 = vmatmul.mubr.bf16.vlgmr.msra.gmra.mxu0 %v1217_v32 }
  0x24   :  { %782 = vmatmul.mubr.bf16.vlgmr.msra.gmra.mxu1 %v1220_v34  ;;  %1100 = vmatpush3.bf16.msra.mxu0 %v1224_v37 }
  0x25   :  { %1128 = vmatpush3.bf16.msra.mxu1 %v1226_v39  ;;  %1101 = vmatprep.subr.bf16.mxu0 %v1227_v40 }
  0x26   :  { %1129 = vmatprep.subr.bf16.mxu1 %v1229_v42  ;;  %740 = vmatprep.mubr.bf16.mxu0 %v1241_v54 }
  0x27   :  { %789 = vmatprep.mubr.bf16.mxu1 %v1243_v55 }
  0x28   :  { %1102 = vmatpush3.bf16.msra.mxu0 %v1228_v41 }
  0x29   :  { %1130 = vmatpush3.bf16.msra.mxu1 %v1230_v43  ;;  %1103 = vmatprep.subr.bf16.mxu0 %v1231_v44 }
  0x2a   :  { %1131 = vmatprep.subr.bf16.mxu1 %v1233_v46 }
  0x2b   :  { %741 = vmatmul.mubr.bf16.gmra.mxu0 %v1246_v57 }
  0x2c   :  { %1104 = vmatpush3.bf16.msra.mxu0 %v1232_v45  ;;  %790 = vmatmul.mubr.bf16.gmra.mxu1 %v1247_v58 }
  0x2d   :  { %1132 = vmatpush3.bf16.msra.mxu1 %v1234_v47  ;;  %1105 = vmatprep.subr.bf16.mxu0 %v1235_v48 }
  0x2e   :  { %1133 = vmatprep.subr.bf16.mxu1 %v1237_v50  ;;  %830 = vmatprep.mubr.bf16.mxu0 %v1262_v8 }
  0x2f   :  { %879 = vmatprep.mubr.bf16.mxu1 %v1267_v12 }
  0x30   :  { %1106 = vmatpush3.bf16.msra.mxu0 %v1236_v49 }
  0x31   :  { %1134 = vmatpush3.bf16.msra.mxu1 %v1238_v51  ;;  %1107 = vmatprep.subr.bf16.mxu0 %v1239_v52 }
  0x32   :  { %1135 = vmatprep.subr.bf16.mxu1 %v1245_v56 }
  0x34   :  { %1108 = vmatpush3.bf16.msra.mxu0 %v1240_v53 }
  0x35   :  { %1136 = vmatpush3.bf16.msra.mxu1 %v1248_v59  ;;  %1109 = vmatprep.subr.bf16.mxu0 %v1249_v60 }
  0x36   :  { %1137 = vmatprep.subr.bf16.mxu1 %v1251_v62 }
  0x38   :  { %1110 = vmatpush3.bf16.msra.mxu0 %v1250_v61 }
  0x39   :  { %1138 = vmatpush3.bf16.msra.mxu1 %v1252_v63  ;;  %1111 = vmatprep.subr.bf16.mxu0 %v1253_v0 }
  0x3a   :  { %1139 = vmatprep.subr.bf16.mxu1 %v1255_v2 }
  0x3c   :  { %1112 = vmatpush3.bf16.msra.mxu0 %v1254_v1 }
  0x3d   :  { %1140 = vmatpush3.bf16.msra.mxu1 %v1256_v3  ;;  %1113 = vmatprep.subr.bf16.mxu0 %v1257_v4 }
  0x3e   :  { %1141 = vmatprep.subr.bf16.mxu1 %v1259_v6 }
  0x40   :  { %1114 = vmatpush3.bf16.msra.mxu0 %v1258_v5 }
  0x41   :  { %1142 = vmatpush3.bf16.msra.mxu1 %v1263_v9  ;;  %1165 = vmatprep.subr.bf16.mxu0 %v1264_v10 }
  0x43   :  { %831 = vmatmul.mubr.bf16.vlgmr.msra.gmra.mxu0 %v1260_v7 }
  0x44   :  { %1166 = vmatpush3.bf16.msra.mxu0 %v1264_v10  ;;  %880 = vmatmul.mubr.bf16.vlgmr.msra.gmra.mxu1 %v1265_v11 }
  0x45   :  { %1167 = vmatprep.subr.bf16.mxu0 %v1268_v13  ;;  %838 = vmatprep.mubr.bf16.mxu0 %v1269_v14 }
  0x46   :  { %887 = vmatprep.mubr.bf16.mxu1 %v1273_v17 }
  0x48   :  { %1168 = vmatpush3.bf16.msra.mxu0 %v1268_v13 }
  0x49   :  { %1169 = vmatprep.subr.bf16.mxu0 %v1272_v16 }
  0x4b   :  { %839 = vmatmul.mubr.bf16.gmra.mxu0 %v1271_v15 }
  0x4c   :  { %1170 = vmatpush3.bf16.msra.mxu0 %v1272_v16  ;;  %888 = vmatmul.mubr.bf16.gmra.mxu1 %v1275_v18 }
  0x4d   :  { %1171 = vmatprep.subr.bf16.mxu0 %v1276_v19  ;;  %1181 = vmatprep.mubr.bf16.mxu0 %v1281_v21 }
  0x50   :  { %1172 = vmatpush3.bf16.msra.mxu0 %v1276_v19 }
  0x51   :  { %1173 = vmatprep.subr.bf16.mxu0 %v1277_v20 }
  0x54   :  { %1174 = vmatpush3.bf16.msra.mxu0 %v1277_v20 }
  0x55   :  { %1175 = vmatprep.subr.bf16.mxu0 %v1278_v22 }
  0x58   :  { %1176 = vmatpush3.bf16.msra.mxu0 %v1278_v22 }
  0x59   :  { %1177 = vmatprep.subr.bf16.mxu0 %v1279_v23 }
  0x5c   :  { %1178 = vmatpush3.bf16.msra.mxu0 %v1279_v23 }
  0x5d   :  { %1179 = vmatprep.subr.bf16.mxu0 %v1280_v24 }
  0x60   :  { %1180 = vmatpush3.bf16.msra.mxu0 %v1280_v24 }
  0x63   :  { %1182 = vmatmul.mubr.bf16.vlgmr.msra.gmra.mxu0 %v1282_v25 }
  0xe3   :  { %v1059_v26 = vpop.f32.mrf.mxu0 }
  0xe4   :  { %v1087_v27 = vpop.f32.mrf.mxu1 }
  0xe5   :  { %v1060_v28 = vpop.f32.mrf.mxu0 }
  0xe6   :  { %v1088_v29 = vpop.f32.mrf.mxu1  ;;  %v1061_v57 = vadd.f32 %v1060_v28, %v1059_v26 }
  0xe7   :  { %v1062_v30 = vpop.f32.mrf.mxu0  ;;  %v1089_v58 = vadd.f32 %v1088_v29, %v1087_v27 }
  0xe8   :  { %v1090_v31 = vpop.f32.mrf.mxu1 }
  0xe9   :  { %v1063_v32 = vpop.f32.mrf.mxu0  ;;  %v784_v2 = vadd.f32 %v1089_v58, %v1061_v57 }
  0xea   :  { %v1091_v34 = vpop.f32.mrf.mxu1  ;;  %v1064_v3 = vadd.f32 %v1063_v32, %v1062_v30 }
  0xeb   :  { %v1065_v33 = vpop.f32.mrf.mxu0  ;;  %v1092_v4 = vadd.f32 %v1091_v34, %v1090_v31 }
  0xec   :  { %v1093_v35 = vpop.f32.mrf.mxu1 }
  0xed   :  { %v1066_v36 = vpop.f32.mrf.mxu0  ;;  %v787_v13 = vadd.f32 %v1092_v4, %v1064_v3 }
  0xee   :  { %v1094_v37 = vpop.f32.mrf.mxu1  ;;  %v1067_v55 = vadd.f32 %v1066_v36, %v1065_v33 }
  0xef   :  { %v1068_v38 = vpop.f32.mrf.mxu0  ;;  %v1095_v56 = vadd.f32 %v1094_v37, %v1093_v35 }
  0xf0   :  { %v1096_v39 = vpop.f32.mrf.mxu1 }
  0xf1   :  { %v1069_v40 = vpop.f32.mrf.mxu0  ;;  %v792_v62 = vadd.f32 %v1095_v56, %v1067_v55 }
  0xf2   :  { %v1097_v42 = vpop.f32.mrf.mxu1  ;;  %v1070_v63 = vadd.f32 %v1069_v40, %v1068_v38 }
  0xf3   :  { %v1098_v0 = vadd.f32 %v1097_v42, %v1096_v39 }
  0xf5   :  { %v795_v9 = vadd.f32 %v1098_v0, %v1070_v63 }
 0x103   :  { %v1115_v41 = vpop.f32.mrf.mxu0 }
 0x104   :  { %v1143_v44 = vpop.f32.mrf.mxu1 }
 0x105   :  { %v1116_v43 = vpop.f32.mrf.mxu0 }
 0x106   :  { %v1144_v46 = vpop.f32.mrf.mxu1  ;;  %v1117_v1 = vadd.f32 %v1116_v43, %v1115_v41 }
 0x107   :  { %v1118_v45 = vpop.f32.mrf.mxu0  ;;  %v1145_v11 = vadd.f32 %v1144_v46, %v1143_v44 }
 0x108   :  { %v1146_v48 = vpop.f32.mrf.mxu1  ;;  %v833_v10 = vadd.f32 %v1117_v1, %v784_v2 }
 0x109   :  { %v1119_v47 = vpop.f32.mrf.mxu0 }
 0x10a   :  { %v1147_v50 = vpop.f32.mrf.mxu1  ;;  %v1120_v12 = vadd.f32 %v1119_v47, %v1118_v45  ;;  %v882_v21 = vadd.f32 %v1145_v11, %v833_v10 }
 0x10b   :  { %v1121_v49 = vpop.f32.mrf.mxu0  ;;  %v1148_v19 = vadd.f32 %v1147_v50, %v1146_v48 }
 0x10c   :  { %v1149_v52 = vpop.f32.mrf.mxu1  ;;  %v836_v18 = vadd.f32 %v1120_v12, %v787_v13 }
 0x10d   :  { %v1122_v51 = vpop.f32.mrf.mxu0 }
 0x10e   :  { %v1150_v54 = vpop.f32.mrf.mxu1  ;;  %v1123_v59 = vadd.f32 %v1122_v51, %v1121_v49  ;;  %v885_v27 = vadd.f32 %v1148_v19, %v836_v18 }
 0x10f   :  { %v1124_v53 = vpop.f32.mrf.mxu0  ;;  %v1151_v6 = vadd.f32 %v1150_v54, %v1149_v52 }
 0x110   :  { %v1152_v61 = vpop.f32.mrf.mxu1  ;;  %v841_v5 = vadd.f32 %v1123_v59, %v792_v62 }
 0x111   :  { %v1125_v60 = vpop.f32.mrf.mxu0 }
 0x112   :  { %v1126_v7 = vadd.f32 %v1125_v60, %v1124_v53  ;;  %v1153_v8 = vpop.f32.mrf.mxu1  ;;  %v890_v16 = vadd.f32 %v1151_v6, %v841_v5 }
 0x113   :  { %v1154_v15 = vadd.f32 %v1153_v8, %v1152_v61 }
 0x114   :  { %v844_v14 = vadd.f32 %v1126_v7, %v795_v9 }
 0x116   :  { %v893_v24 = vadd.f32 %v1154_v15, %v844_v14 }
 0x123   :  { %v1183_v17 = vpop.f32.mrf.mxu0 }
 0x124   :  { %v939_v20 = vadd.f32 %v1183_v17, %v890_v16 }
 0x125   :  { %v930_v22 = vpop.f32.mrf.mxu0 }
 0x126   :  { %947 = vst [vmem:[%s1582_s2 + $0x10] sm:$0xff] %v939_v20  ;;  %v931_v23 = vadd.f32 %v930_v22, %v882_v21 }
 0x127   :  { %v1184_v25 = vpop.f32.mrf.mxu0 }
 0x128   :  { %945 = vst [vmem:[%s1582_s2] sm:$0xff] %v931_v23  ;;  %v942_v26 = vadd.f32 %v1184_v25, %v893_v24 }
 0x129   :  { %v933_v28 = vpop.f32.mrf.mxu0 }
 0x12a   :  { %948 = vst [vmem:[%s1582_s2 + $0x18] sm:$0xff] %v942_v26  ;;  %v934_v29 = vadd.f32 %v933_v28, %v885_v27 }
 0x12c   :  { %946 = vst [vmem:[%s1582_s2 + $0x8] sm:$0xff] %v934_v29 }

// kernel: resnet_shard1_forward.113
= control target key start
LH: loop header
LB: loop body
LE: loop exit
PB: predicated region body
PF: predicated region fallthrough
CT: control target
= control target key end

     0   :  { %s749_s9 = smov 0   ;;  %s751_s10 = smov 0   ;;  %s885_s0 = inlined_call_operand.vmem [shape: bf16[32,128], index: 0, kind: input, shape index: {}]   ;;  %s886_s1 = inlined_call_operand.vmem [shape: bf16[128,512], index: 1, kind: input, shape index: {}]   ;;  %s887_s2 = inlined_call_operand.vmem [shape: f32[32,512], index: 2, kind: output, shape index: {}]  }
   0x1   :  { %s753_s11 = smov 0   ;;  %s755_s12 = smov 0  }
   0x2   :  { %s757_s13 = smov 0  }
   0x3 LB: > { %s21_s14 = sadd.s32 1, %s727_s12  ;;  %s574_s15 = sadd.s32 4294967295, %s731_s13   ;;  %s731_s13 = sphi %s757_s13, %s12_s13   ;;  %s727_s12 = sphi %s755_s12, %s892_s12   ;;  %s723_s11 = sphi %s753_s11, %s891_s11   ;;  %s719_s10 = sphi %s751_s10, %s890_s10   ;;  %s715_s9 = sphi %s749_s9, %s889_s9  }
   0x4   : > { %p22_p0 = scmp.ge.s32.totalorder %s21_s14, 2  ;;  %p64_p1 = scmp.ne.s32.totalorder %s719_s10, %s715_s9 }
   0x5   : > { %p65_p2 = scmp.eq.s32.totalorder %s731_s13, 0  ;;  %p96_p4 = scmp.eq.s32.totalorder %s574_s15, 1 }
   0x6   : > { %s894_s14 = smov (%p22_p0, %s21_s14), 0  ;;  %s57_s17 = sadd.s32 1, %s719_s10 }
   0x7   : > { %p66_p3 = por %p65_p2, %p64_p1  ;;  %s54_s16 = ssub.s32 %s727_s12, %s894_s14 }
   0x8   : > { %p55_p5 = scmp.eq.s32.totalorder %s54_s16, 0  ;;  %p784_p6 = por %p96_p4, %p64_p1 }
   0x9   : > { %p578_p7 = scmp.ge.s32.totalorder %s731_s13, 2 }
   0xa   : > { %s789_s19 = scalar_select %p55_p5, %s719_s10, %s57_s17  }
   0xb   : > { %127 = sbr.rel (%p578_p7) target bundleno = 28 (0x1c), region = 20 }
  0x10   : > { %130 = sbr.rel (!%p66_p3) target bundleno = 28 (0x1c), region = 24  ;;  %s132_s20 = sand.u32 (%p66_p3), 1, %s719_s10  }
  0x11   : > { %s608_s21 = sshll.u32 (%p66_p3), %s727_s12, 3  ;;  %s579_s22 = sshll.u32 (%p66_p3), %s132_s20, 7 }
  0x12   : > { %s797_s25 = scalar_lea.vmem (%p66_p3), %s886_s1, %s608_s21  ;;  %s134_s26 = scalar_lea.vmem (%p66_p3), [#allocation2], %s579_s22 }
  0x13   : > { %v196_v0 = vld [vmem:[%s797_s25] sm:$0xff] (%p66_p3)  ;;  %v198_v1 = vld [vmem:[%s797_s25 + $0x10] sm:$0xff] (%p66_p3) }
  0x14   : > { %v200_v2 = vld [vmem:[%s797_s25 + $0x20] sm:$0xff] (%p66_p3)  ;;  %197 = vst [vmem:[%s134_s26] sm:$0xff] (%p66_p3), %v196_v0  ;;  %199 = vst [vmem:[%s134_s26 + $0x8] sm:$0xff] (%p66_p3), %v198_v1  ;;  %v202_v3 = vld [vmem:[%s797_s25 + $0x30] sm:$0xff] (%p66_p3) }
  0x15   : > { %201 = vst [vmem:[%s134_s26 + $0x10] sm:$0xff] %v200_v2  ;;  %v204_v4 = vld [vmem:[%s797_s25 + $0x40] sm:$0xff]  ;;  %v206_v5 = vld [vmem:[%s797_s25 + $0x50] sm:$0xff]  ;;  %203 = vst [vmem:[%s134_s26 + $0x18] sm:$0xff] %v202_v3 }
  0x16   : > { %205 = vst [vmem:[%s134_s26 + $0x20] sm:$0xff] %v204_v4  ;;  %207 = vst [vmem:[%s134_s26 + $0x28] sm:$0xff] %v206_v5  ;;  %v208_v6 = vld [vmem:[%s797_s25 + $0x60] sm:$0xff]  ;;  %v210_v7 = vld [vmem:[%s797_s25 + $0x70] sm:$0xff] }
  0x17   : > { %v212_v8 = vld [vmem:[%s797_s25 + $0x80] sm:$0xff]  ;;  %209 = vst [vmem:[%s134_s26 + $0x30] sm:$0xff] %v208_v6  ;;  %211 = vst [vmem:[%s134_s26 + $0x38] sm:$0xff] %v210_v7  ;;  %v214_v9 = vld [vmem:[%s797_s25 + $0x90] sm:$0xff] }
  0x18   : > { %213 = vst [vmem:[%s134_s26 + $0x40] sm:$0xff] %v212_v8  ;;  %v216_v10 = vld [vmem:[%s797_s25 + $0xa0] sm:$0xff]  ;;  %v218_v11 = vld [vmem:[%s797_s25 + $0xb0] sm:$0xff]  ;;  %215 = vst [vmem:[%s134_s26 + $0x48] sm:$0xff] %v214_v9 }
  0x19   : > { %217 = vst [vmem:[%s134_s26 + $0x50] sm:$0xff] %v216_v10  ;;  %219 = vst [vmem:[%s134_s26 + $0x58] sm:$0xff] %v218_v11  ;;  %v220_v12 = vld [vmem:[%s797_s25 + $0xc0] sm:$0xff]  ;;  %v222_v13 = vld [vmem:[%s797_s25 + $0xd0] sm:$0xff] }
  0x1a   : > { %v224_v14 = vld [vmem:[%s797_s25 + $0xe0] sm:$0xff]  ;;  %221 = vst [vmem:[%s134_s26 + $0x60] sm:$0xff] %v220_v12  ;;  %223 = vst [vmem:[%s134_s26 + $0x68] sm:$0xff] %v222_v13  ;;  %v226_v15 = vld [vmem:[%s797_s25 + $0xf0] sm:$0xff] }
  0x1b   : > { %225 = vst [vmem:[%s134_s26 + $0x70] sm:$0xff] %v224_v14  ;;  %227 = vst [vmem:[%s134_s26 + $0x78] sm:$0xff] %v226_v15 }
  0x1c PF: > { %p582_p8 = scmp.ge.s32.totalorder %s731_s13, 1  ;;  %p232_p9 = scmp.lt.s32.totalorder %s731_s13, 3 }
  0x1e   : > { %p233_p10 = pnand %p582_p8, %p232_p9 }
  0x1f   : > { %s239_s27 = sand.u32 (!%p233_p10), 1, %s715_s9  }
  0x20   : > { %236 = sbr.rel (%p233_p10) target bundleno = 280 (0x118), region = 62  ;;  %s583_s28 = sshll.u32 (!%p233_p10), %s239_s27, 7 }
  0x21   : > { %s820_s29 = scalar_lea.vmem (!%p233_p10), [#allocation2], %s583_s28  ;;  %s584_s6 = sshll.u32 (!%p233_p10), %s239_s27, 6 }
  0x22   : > { %s846_s7 = scalar_lea.vmem (!%p233_p10), [#allocation3], %s584_s6 }
  0x25   : > { %v733_v16 = vmov 0   ;;  %v667_v17 = vld [vmem:[%s820_s29 + $0x74] ss:$8 sps:$4 sm:$0xff]   ;;  %v669_v18 = vld [vmem:[%s820_s29 + $0x70] ss:$8 sps:$4 sm:$0xff]   ;;  %v691_v33 = vld [vmem:[%s885_s0] sm:$0xff]  }
  0x26   : > { %418 = vmatprep.mubr.bf16.mxu0 %v733_v16  ;;  %428 = vmatprep.mubr.bf16.mxu1 %v733_v16  ;;  %v670_v19 = vld [vmem:[%s820_s29 + $0x64] ss:$8 sps:$4 sm:$0xff]   ;;  %v672_v20 = vld [vmem:[%s820_s29 + $0x60] ss:$8 sps:$4 sm:$0xff]   ;;  %v673_v21 = vld [vmem:[%s820_s29 + $0x54] ss:$8 sps:$4 sm:$0xff]  }
  0x27   : > { %386 = vmatprep.subr.bf16.mxu0 %v667_v17  ;;  %610 = vmatprep.subr.bf16.mxu1 %v667_v17  ;;  %v675_v22 = vld [vmem:[%s820_s29 + $0x50] ss:$8 sps:$4 sm:$0xff]   ;;  %v676_v23 = vld [vmem:[%s820_s29 + $0x44] ss:$8 sps:$4 sm:$0xff]   ;;  %v678_v24 = vld [vmem:[%s820_s29 + $0x40] ss:$8 sps:$4 sm:$0xff]  }
  0x28   : > { %387 = vmatpush1.bf16.msra.mxu0 %v669_v18  ;;  %618 = vmatpush1.bf16.msra.mxu1 %v669_v18  ;;  %v679_v25 = vld [vmem:[%s820_s29 + $0x34] ss:$8 sps:$4 sm:$0xff]   ;;  %v681_v26 = vld [vmem:[%s820_s29 + $0x30] ss:$8 sps:$4 sm:$0xff]   ;;  %v682_v27 = vld [vmem:[%s820_s29 + $0x24] ss:$8 sps:$4 sm:$0xff]  }
  0x29   : > { %388 = vmatprep.subr.bf16.mxu0 %v670_v19  ;;  %611 = vmatprep.subr.bf16.mxu1 %v670_v19  ;;  %v684_v28 = vld [vmem:[%s820_s29 + $0x20] ss:$8 sps:$4 sm:$0xff]   ;;  %v685_v29 = vld [vmem:[%s820_s29 + $0x14] ss:$8 sps:$4 sm:$0xff]   ;;  %v687_v30 = vld [vmem:[%s820_s29 + $0x10] ss:$8 sps:$4 sm:$0xff]  }
  0x2a   : > { %v688_v31 = vld [vmem:[%s820_s29 + $0x4] ss:$8 sps:$4 sm:$0xff]   ;;  %v690_v32 = vld [vmem:[%s820_s29] ss:$8 sps:$4 sm:$0xff]   ;;  %s609_s8 = sshll.u32 (%p784_p6), %s723_s11, 4 }
  0x2b   : > { %v692_v34 = vld [vmem:[%s885_s0 + $0x8] sm:$0xff]   ;;  %s459_s16 = scalar_lea.vmem (%p784_p6), %s887_s2, %s609_s8 }
  0x2c   : > { %389 = vmatpush1.bf16.msra.mxu0 %v672_v20  ;;  %619 = vmatpush1.bf16.msra.mxu1 %v672_v20 }
  0x2d   : > { %390 = vmatprep.subr.bf16.mxu0 %v673_v21  ;;  %612 = vmatprep.subr.bf16.mxu1 %v673_v21 }
  0x30   : > { %391 = vmatpush1.bf16.msra.mxu0 %v675_v22  ;;  %620 = vmatpush1.bf16.msra.mxu1 %v675_v22 }
  0x31   : > { %392 = vmatprep.subr.bf16.mxu0 %v676_v23  ;;  %613 = vmatprep.subr.bf16.mxu1 %v676_v23 }
  0x34   : > { %393 = vmatpush1.bf16.msra.mxu0 %v678_v24  ;;  %621 = vmatpush1.bf16.msra.mxu1 %v678_v24 }
  0x35   : > { %394 = vmatprep.subr.bf16.mxu0 %v679_v25  ;;  %614 = vmatprep.subr.bf16.mxu1 %v679_v25 }
  0x38   : > { %395 = vmatpush1.bf16.msra.mxu0 %v681_v26  ;;  %622 = vmatpush1.bf16.msra.mxu1 %v681_v26 }
  0x39   : > { %396 = vmatprep.subr.bf16.mxu0 %v682_v27  ;;  %615 = vmatprep.subr.bf16.mxu1 %v682_v27 }
  0x3c   : > { %397 = vmatpush1.bf16.msra.mxu0 %v684_v28  ;;  %623 = vmatpush1.bf16.msra.mxu1 %v684_v28 }
  0x3d   : > { %398 = vmatprep.subr.bf16.mxu0 %v685_v29  ;;  %616 = vmatprep.subr.bf16.mxu1 %v685_v29 }
  0x40   : > { %399 = vmatpush1.bf16.msra.mxu0 %v687_v30  ;;  %624 = vmatpush1.bf16.msra.mxu1 %v687_v30 }
  0x41   : > { %400 = vmatprep.subr.bf16.mxu0 %v688_v31  ;;  %617 = vmatprep.subr.bf16.mxu1 %v688_v31 }
  0x44   : > { %401 = vmatpush1.bf16.msra.mxu0 %v690_v32  ;;  %625 = vmatpush1.bf16.msra.mxu1 %v690_v32 }
  0x47   : > { %419 = vmatmul.mubr.bf16.vlgmr.msra.gmra.mxu0 %v691_v33  ;;  %429 = vmatmul.mubr.bf16.vlgmr.msra.gmra.mxu1 %v692_v34 }
 0x107   : > { %v420_v35 = vpop.f32.mrf.mxu0  ;;  %v430_v36 = vpop.f32.mrf.mxu1 }
 0x108   : > { %439 = vst [vmem:[%s846_s7] sm:$0xff] %v420_v35  ;;  %443 = vst [vmem:[%s846_s7 + $0x20] sm:$0xff] %v430_v36 }
 0x109   : > { %v422_v37 = vpop.f32.mrf.mxu0  ;;  %v432_v38 = vpop.f32.mrf.mxu1 }
 0x10a   : > { %440 = vst [vmem:[%s846_s7 + $0x8] sm:$0xff] %v422_v37  ;;  %444 = vst [vmem:[%s846_s7 + $0x28] sm:$0xff] %v432_v38  ;;  %453 = sbr.rel (!%p784_p6) target bundleno = 280 (0x118), region = 70 }
 0x10b   : > { %v424_v39 = vpop.f32.mrf.mxu0  ;;  %v434_v40 = vpop.f32.mrf.mxu1 }
 0x10c   : > { %441 = vst [vmem:[%s846_s7 + $0x10] sm:$0xff] %v424_v39  ;;  %445 = vst [vmem:[%s846_s7 + $0x30] sm:$0xff] %v434_v40 }
 0x10d   : > { %v426_v41 = vpop.f32.mrf.mxu0  ;;  %v436_v42 = vpop.f32.mrf.mxu1 }
 0x10e   : > { %442 = vst [vmem:[%s846_s7 + $0x18] sm:$0xff] %v426_v41  ;;  %446 = vst [vmem:[%s846_s7 + $0x38] sm:$0xff] %v436_v42 }
 0x10f   : > { %v472_v43 = vld [vmem:[%s846_s7] sm:$0xff] }
 0x110   : > { %v480_v47 = vld [vmem:[%s846_s7 + $0x20] sm:$0xff]  ;;  %473 = vst [vmem:[%s459_s16] sm:$0xff] %v472_v43 }
 0x111   : > { %v474_v44 = vld [vmem:[%s846_s7 + $0x8] sm:$0xff]  ;;  %481 = vst [vmem:[%s459_s16 + $0x40] sm:$0xff] %v480_v47 }
 0x112   : > { %v482_v48 = vld [vmem:[%s846_s7 + $0x28] sm:$0xff]  ;;  %475 = vst [vmem:[%s459_s16 + $0x8] sm:$0xff] %v474_v44 }
 0x113   : > { %v476_v45 = vld [vmem:[%s846_s7 + $0x10] sm:$0xff]  ;;  %483 = vst [vmem:[%s459_s16 + $0x48] sm:$0xff] %v482_v48 }
 0x114   : > { %477 = vst [vmem:[%s459_s16 + $0x20] sm:$0xff] %v476_v45  ;;  %v484_v49 = vld [vmem:[%s846_s7 + $0x30] sm:$0xff] }
 0x115   : > { %v478_v46 = vld [vmem:[%s846_s7 + $0x18] sm:$0xff]  ;;  %485 = vst [vmem:[%s459_s16 + $0x60] sm:$0xff] %v484_v49 }
 0x116   : > { %479 = vst [vmem:[%s459_s16 + $0x28] sm:$0xff] %v478_v46  ;;  %v486_v50 = vld [vmem:[%s846_s7 + $0x38] sm:$0xff] }
 0x117   : > { %487 = vst [vmem:[%s459_s16 + $0x68] sm:$0xff] %v486_v50 }
 0x118 PF: > { %s12_s13 = sadd.s32 1, %s731_s13   ;;  %s889_s9 = smov %s719_s10 }
 0x119   : > { %p9_p11 = scmp.ge.s32.totalorder %s12_s13, 4   ;;  %s890_s10 = smov %s789_s19 }
 0x11a   : > { %s891_s11 = smov %s727_s12  ;;  %s892_s12 = smov %s894_s14 }
 0x11b   :  { %11 = sbr.rel (!%p9_p11) target bundleno = 3 (0x3), region = 127 }

// kernel: resnet_shard1_forward.118
= control target key start
LH: loop header
LB: loop body
LE: loop exit
PB: predicated region body
PF: predicated region fallthrough
CT: control target
= control target key end

     0   :  { %v223_v6 = vmov 1966171168   ;;  %v34_v8 = vlaneseq  ;;  %v224_v11 = vmov 857870592   ;;  %s408_s2 = inlined_call_operand.vmem [shape: f32[2,512], index: 2, kind: input, shape index: {}]   ;;  %s409_s3 = inlined_call_operand.vmem [shape: f32[1,512], index: 3, kind: input, shape index: {}]   ;;  %s410_s0 = inlined_call_operand.vmem [shape: f32[32,512], index: 0, kind: input, shape index: {}]   ;;  %s411_s4 = inlined_call_operand.vmem [shape: f32[1,512], index: 4, kind: input, shape index: {}]   ;;  %s412_s1 = inlined_call_operand.vmem [shape: f32[32,512], index: 1, kind: input, shape index: {}]   ;;  %s413_s5 = inlined_call_operand.vmem [shape: f32[32,512], index: 5, kind: output, shape index: {}]  }
   0x1   :  { %v20_v0 = vld [vmem:[%s408_s2] sm:$0xff]  ;;  %v32_v7 = vunpack.c.l.s4 %v223_v6  ;;  %v44_v12 = vunpack.c.l.s4 %v224_v11  ;;  %v63_v29 = vld [vmem:[%s410_s0 + $0x8] sm:$0xff]  ;;  %v64_v31 = vld [vmem:[%s410_s0 + $0x10] sm:$0xff] }
   0x2   :  { %v21_v1 = vmul.f32 0.03125, %v20_v0  ;;  %v35_v10 = vshrl.u32 %v34_v8, 7  ;;  %v27_v17 = vld [vmem:[%s409_s3] sm:$0xf]  ;;  %v65_v35 = vld [vmem:[%s410_s0 + $0x18] sm:$0xff]  ;;  %v67_v37 = vld [vmem:[%s410_s0 + $0x28] sm:$0xff] }
   0x3   :  { %v33_v9 = vunpack.c.0.s8 %v32_v7  ;;  %v45_v14 = vunpack.c.0.s8 %v44_v12  ;;  %v41_v27 = vld [vmem:[%s411_s4] sm:$0xf]  ;;  %v68_v38 = vld [vmem:[%s410_s0 + $0x30] sm:$0xff]  ;;  %v69_v39 = vld [vmem:[%s410_s0 + $0x38] sm:$0xff] }
   0x4   :  { %v22_v2 = vmul.f32 %v21_v1, %v21_v1  ;;  %v80_v20 = vsub.s32 0, %v35_v10  ;;  %v84_v21 = vsub.s32 1, %v35_v10  ;;  %v88_v22 = vsub.s32 2, %v35_v10  ;;  %v62_v28 = vld [vmem:[%s410_s0] sm:$0xff]  ;;  %v71_v43 = vld [vmem:[%s410_s0 + $0x48] sm:$0xff]  ;;  %v72_v44 = vld [vmem:[%s410_s0 + $0x50] sm:$0xff] }
   0x5   :  { %v36_v13 = vsub.s32 %v33_v9, %v35_v10  ;;  %v48_v19 = vsub.s32 %v45_v14, %v35_v10  ;;  %v92_v23 = vsub.s32 3, %v35_v10  ;;  %v66_v36 = vld [vmem:[%s410_s0 + $0x20] sm:$0xff]  ;;  %v73_v45 = vld [vmem:[%s410_s0 + $0x58] sm:$0xff]  ;;  %v75_v55 = vld [vmem:[%s410_s0 + $0x68] sm:$0xff] }
   0x6   :  { %v24_v3 = vrot.slane %v22_v2, 7  ;;  %v70_v40 = vld [vmem:[%s410_s0 + $0x40] sm:$0xff]  ;;  %v76_v56 = vld [vmem:[%s410_s0 + $0x70] sm:$0xff]  ;;  %v77_v57 = vld [vmem:[%s410_s0 + $0x78] sm:$0xff] }
   0x7   :  { %v74_v50 = vld [vmem:[%s410_s0 + $0x60] sm:$0xff] }
   0x8   :  { %v26_v4 = vsub.f32 %v21_v1, %v24_v3  ;;  %v151_v63 = vld [vmem:[%s412_s1] sm:$0xff] }
   0x9   :  { %v155_v6 = vld [vmem:[%s412_s1 + $0x20] sm:$0xff] }
   0xa   :  { %v28_v5 = vadd.f32 1e-05, %v26_v4  ;;  %v153_v4 = vld [vmem:[%s412_s1 + $0x10] sm:$0xff] }
   0xc   :  { %221 = vrsqrt.f32 %v28_v5  ;;  %v154_v5 = vld [vmem:[%s412_s1 + $0x18] sm:$0xff] }
  0x19   :  { %v222_v15 = vpop.eup %221 }
  0x1a   :  { %v37_v16 = vrot.slane %v222_v15, %v36_v13  ;;  %v156_v15 = vld [vmem:[%s412_s1 + $0x28] sm:$0xff] }
  0x1c   :  { %v38_v18 = vcombine.high %v37_v16, %v37_v16  ;;  %v157_v16 = vld [vmem:[%s412_s1 + $0x30] sm:$0xff] }
  0x1e   :  { %v40_v24 = vmul.f32 %v38_v18, %v27_v17  ;;  %v158_v17 = vld [vmem:[%s412_s1 + $0x38] sm:$0xff] }
  0x20   :  { %v49_v25 = vrot.slane %v40_v24, %v48_v19  ;;  %v81_v26 = vrot.slane %v40_v24, %v80_v20  ;;  %v85_v30 = vrot.slane %v40_v24, %v84_v21  ;;  %v89_v32 = vrot.slane %v40_v24, %v88_v22 }
  0x21   :  { %v93_v33 = vrot.slane %v40_v24, %v92_v23 }
  0x22   :  { %v51_v34 = vmul.f32 %v49_v25, %v21_v1  ;;  %v98_v42 = vmul.f32 %v81_v26, %v62_v28  ;;  %v99_v46 = vmul.f32 %v85_v30, %v63_v29  ;;  %v100_v47 = vmul.f32 %v89_v32, %v64_v31  ;;  %v152_v1 = vld [vmem:[%s412_s1 + $0x8] sm:$0xff] }
  0x23   :  { %v101_v48 = vmul.f32 %v93_v33, %v65_v35  ;;  %v102_v49 = vmul.f32 %v81_v26, %v66_v36  ;;  %v103_v52 = vmul.f32 %v85_v30, %v67_v37  ;;  %v104_v53 = vmul.f32 %v89_v32, %v68_v38  ;;  %v160_v35 = vld [vmem:[%s412_s1 + $0x48] sm:$0xff]  ;;  %v161_v36 = vld [vmem:[%s412_s1 + $0x50] sm:$0xff] }
  0x24   :  { %v59_v41 = vrot.slane %v51_v34, %v36_v13  ;;  %v105_v54 = vmul.f32 %v93_v33, %v69_v39  ;;  %v106_v58 = vmul.f32 %v81_v26, %v70_v40  ;;  %v107_v59 = vmul.f32 %v85_v30, %v71_v43 }
  0x25   :  { %v108_v60 = vmul.f32 %v89_v32, %v72_v44  ;;  %v109_v61 = vmul.f32 %v93_v33, %v73_v45  ;;  %v110_v7 = vmul.f32 %v81_v26, %v74_v50  ;;  %v111_v8 = vmul.f32 %v85_v30, %v75_v55  ;;  %v159_v30 = vld [vmem:[%s412_s1 + $0x40] sm:$0xff] }
  0x26   :  { %v61_v51 = vsub.f32 %v41_v27, %v59_v41  ;;  %v112_v9 = vmul.f32 %v89_v32, %v76_v56  ;;  %v113_v10 = vmul.f32 %v93_v33, %v77_v57  ;;  %v162_v41 = vld [vmem:[%s412_s1 + $0x58] sm:$0xff] }
  0x28   :  { %v118_v62 = vrot.slane %v61_v51, %v80_v20  ;;  %v122_v0 = vrot.slane %v61_v51, %v84_v21  ;;  %v126_v2 = vrot.slane %v61_v51, %v88_v22  ;;  %v130_v3 = vrot.slane %v61_v51, %v92_v23 }
  0x2a   :  { %v135_v11 = vadd.f32 %v118_v62, %v98_v42  ;;  %v136_v12 = vadd.f32 %v122_v0, %v99_v46  ;;  %v137_v13 = vadd.f32 %v126_v2, %v100_v47  ;;  %v138_v14 = vadd.f32 %v130_v3, %v101_v48  ;;  %v163_v42 = vld [vmem:[%s412_s1 + $0x60] sm:$0xff]  ;;  %v164_v47 = vld [vmem:[%s412_s1 + $0x68] sm:$0xff]  ;;  %v165_v48 = vld [vmem:[%s412_s1 + $0x70] sm:$0xff] }
  0x2b   :  { %v139_v18 = vadd.f32 %v118_v62, %v102_v49  ;;  %v140_v19 = vadd.f32 %v122_v0, %v103_v52  ;;  %v141_v20 = vadd.f32 %v126_v2, %v104_v53  ;;  %v142_v21 = vadd.f32 %v130_v3, %v105_v54  ;;  %v166_v49 = vld [vmem:[%s412_s1 + $0x78] sm:$0xff] }
  0x2c   :  { %v167_v22 = vadd.f32 %v151_v63, %v135_v11  ;;  %v168_v23 = vadd.f32 %v152_v1, %v136_v12  ;;  %v169_v24 = vadd.f32 %v153_v4, %v137_v13  ;;  %v170_v25 = vadd.f32 %v154_v5, %v138_v14 }
  0x2d   :  { %v171_v26 = vadd.f32 %v155_v6, %v139_v18  ;;  %v172_v27 = vadd.f32 %v156_v15, %v140_v19  ;;  %v173_v28 = vadd.f32 %v157_v16, %v141_v20  ;;  %v174_v29 = vadd.f32 %v158_v17, %v142_v21 }
  0x2e   :  { %v183_v31 = vmax.f32 %v167_v22, 0.0  ;;  %v184_v32 = vmax.f32 %v168_v23, 0.0  ;;  %v185_v33 = vmax.f32 %v169_v24, 0.0  ;;  %v186_v34 = vmax.f32 %v170_v25, 0.0 }
  0x2f   :  { %v187_v37 = vmax.f32 %v171_v26, 0.0  ;;  %v188_v38 = vmax.f32 %v172_v27, 0.0  ;;  %v189_v39 = vmax.f32 %v173_v28, 0.0  ;;  %v190_v40 = vmax.f32 %v174_v29, 0.0 }
  0x30   :  { %199 = vst [vmem:[%s413_s5] sm:$0xff] %v183_v31  ;;  %200 = vst [vmem:[%s413_s5 + $0x8] sm:$0xff] %v184_v32  ;;  %v143_v43 = vadd.f32 %v118_v62, %v106_v58  ;;  %v144_v44 = vadd.f32 %v122_v0, %v107_v59  ;;  %v145_v45 = vadd.f32 %v126_v2, %v108_v60 }
  0x31   :  { %201 = vst [vmem:[%s413_s5 + $0x10] sm:$0xff] %v185_v33  ;;  %202 = vst [vmem:[%s413_s5 + $0x18] sm:$0xff] %v186_v34  ;;  %v146_v46 = vadd.f32 %v130_v3, %v109_v61  ;;  %v147_v50 = vadd.f32 %v118_v62, %v110_v7  ;;  %v148_v51 = vadd.f32 %v122_v0, %v111_v8 }
  0x32   :  { %203 = vst [vmem:[%s413_s5 + $0x20] sm:$0xff] %v187_v37  ;;  %204 = vst [vmem:[%s413_s5 + $0x28] sm:$0xff] %v188_v38  ;;  %v149_v52 = vadd.f32 %v126_v2, %v112_v9  ;;  %v150_v53 = vadd.f32 %v130_v3, %v113_v10  ;;  %v175_v54 = vadd.f32 %v159_v30, %v143_v43 }
  0x33   :  { %205 = vst [vmem:[%s413_s5 + $0x30] sm:$0xff] %v189_v39  ;;  %206 = vst [vmem:[%s413_s5 + $0x38] sm:$0xff] %v190_v40  ;;  %v176_v55 = vadd.f32 %v160_v35, %v144_v44  ;;  %v177_v56 = vadd.f32 %v161_v36, %v145_v45  ;;  %v178_v57 = vadd.f32 %v162_v41, %v146_v46 }
  0x34   :  { %v179_v58 = vadd.f32 %v163_v42, %v147_v50  ;;  %v180_v59 = vadd.f32 %v164_v47, %v148_v51  ;;  %v181_v60 = vadd.f32 %v165_v48, %v149_v52  ;;  %v182_v61 = vadd.f32 %v166_v49, %v150_v53 }
  0x35   :  { %v191_v63 = vmax.f32 %v175_v54, 0.0  ;;  %v192_v1 = vmax.f32 %v176_v55, 0.0  ;;  %v193_v4 = vmax.f32 %v177_v56, 0.0  ;;  %v194_v5 = vmax.f32 %v178_v57, 0.0 }
  0x36   :  { %v195_v6 = vmax.f32 %v179_v58, 0.0  ;;  %v196_v11 = vmax.f32 %v180_v59, 0.0  ;;  %v197_v12 = vmax.f32 %v181_v60, 0.0  ;;  %v198_v13 = vmax.f32 %v182_v61, 0.0 }
  0x37   :  { %207 = vst [vmem:[%s413_s5 + $0x40] sm:$0xff] %v191_v63  ;;  %208 = vst [vmem:[%s413_s5 + $0x48] sm:$0xff] %v192_v1 }
  0x38   :  { %209 = vst [vmem:[%s413_s5 + $0x50] sm:$0xff] %v193_v4  ;;  %210 = vst [vmem:[%s413_s5 + $0x58] sm:$0xff] %v194_v5 }
  0x39   :  { %211 = vst [vmem:[%s413_s5 + $0x60] sm:$0xff] %v195_v6  ;;  %212 = vst [vmem:[%s413_s5 + $0x68] sm:$0xff] %v196_v11 }
  0x3a   :  { %213 = vst [vmem:[%s413_s5 + $0x70] sm:$0xff] %v197_v12  ;;  %214 = vst [vmem:[%s413_s5 + $0x78] sm:$0xff] %v198_v13 }

// kernel: resnet_shard1_forward.119
= control target key start
LH: loop header
LB: loop body
LE: loop exit
PB: predicated region body
PF: predicated region fallthrough
CT: control target
= control target key end

     0   :  { %s709_s1 = inlined_call_operand.vmem [shape: bf16[512,128], index: 1, kind: input, shape index: {}]   ;;  %s710_s0 = inlined_call_operand.vmem [shape: bf16[32,512], index: 0, kind: input, shape index: {}]   ;;  %s711_s2 = inlined_call_operand.vmem [shape: f32[32,128], index: 2, kind: output, shape index: {}]  }
   0x1   :  { %v518_v0 = vld [vmem:[%s709_s1 + $0x78] sm:$0xff]   ;;  %v522_v4 = vld [vmem:[%s709_s1 + $0x70] sm:$0xff]   ;;  %v526_v8 = vld [vmem:[%s709_s1 + $0x68] sm:$0xff]  }
   0x2   :  { %v519_v1 = vld [vmem:[%s709_s1 + $0xf8] sm:$0xff]   ;;  %462 = vmatprep.subr.bf16.mxu0 %v518_v0  ;;  %v523_v5 = vld [vmem:[%s709_s1 + $0xf0] sm:$0xff]   ;;  %v527_v9 = vld [vmem:[%s709_s1 + $0xe8] sm:$0xff]  }
   0x3   :  { %v520_v2 = vld [vmem:[%s709_s1 + $0x38] sm:$0xff]   ;;  %490 = vmatprep.subr.bf16.mxu1 %v519_v1  ;;  %v524_v6 = vld [vmem:[%s709_s1 + $0x30] sm:$0xff]   ;;  %v528_v10 = vld [vmem:[%s709_s1 + $0x28] sm:$0xff]  }
   0x4   :  { %v521_v3 = vld [vmem:[%s709_s1 + $0xb8] sm:$0xff]   ;;  %463 = vmatpush3.bf16.msra.mxu0 %v520_v2  ;;  %v525_v7 = vld [vmem:[%s709_s1 + $0xb0] sm:$0xff]   ;;  %v529_v11 = vld [vmem:[%s709_s1 + $0xa8] sm:$0xff]  }
   0x5   :  { %491 = vmatpush3.bf16.msra.mxu1 %v521_v3  ;;  %464 = vmatprep.subr.bf16.mxu0 %v522_v4  ;;  %v530_v12 = vld [vmem:[%s709_s1 + $0x60] sm:$0xff]   ;;  %v534_v16 = vld [vmem:[%s709_s1 + $0x58] sm:$0xff]   ;;  %v538_v20 = vld [vmem:[%s709_s1 + $0x50] sm:$0xff]  }
   0x6   :  { %492 = vmatprep.subr.bf16.mxu1 %v523_v5  ;;  %v531_v13 = vld [vmem:[%s709_s1 + $0xe0] sm:$0xff]   ;;  %v535_v17 = vld [vmem:[%s709_s1 + $0xd8] sm:$0xff]   ;;  %v539_v21 = vld [vmem:[%s709_s1 + $0xd0] sm:$0xff]  }
   0x7   :  { %v532_v14 = vld [vmem:[%s709_s1 + $0x20] sm:$0xff]   ;;  %v536_v18 = vld [vmem:[%s709_s1 + $0x18] sm:$0xff]   ;;  %v540_v22 = vld [vmem:[%s709_s1 + $0x10] sm:$0xff]  }
   0x8   :  { %465 = vmatpush3.bf16.msra.mxu0 %v524_v6  ;;  %v533_v15 = vld [vmem:[%s709_s1 + $0xa0] sm:$0xff]   ;;  %v537_v19 = vld [vmem:[%s709_s1 + $0x98] sm:$0xff]   ;;  %v541_v23 = vld [vmem:[%s709_s1 + $0x90] sm:$0xff]  }
   0x9   :  { %493 = vmatpush3.bf16.msra.mxu1 %v525_v7  ;;  %466 = vmatprep.subr.bf16.mxu0 %v526_v8  ;;  %v542_v24 = vld [vmem:[%s709_s1 + $0x48] sm:$0xff]   ;;  %v546_v28 = vld [vmem:[%s709_s1 + $0x40] sm:$0xff]  }
   0xa   :  { %494 = vmatprep.subr.bf16.mxu1 %v527_v9  ;;  %v543_v25 = vld [vmem:[%s709_s1 + $0xc8] sm:$0xff]   ;;  %v547_v29 = vld [vmem:[%s709_s1 + $0xc0] sm:$0xff]  }
   0xb   :  { %v544_v26 = vld [vmem:[%s709_s1 + $0x8] sm:$0xff]   ;;  %v548_v30 = vld [vmem:[%s709_s1] sm:$0xff]  }
   0xc   :  { %467 = vmatpush3.bf16.msra.mxu0 %v528_v10  ;;  %v545_v27 = vld [vmem:[%s709_s1 + $0x88] sm:$0xff]   ;;  %v549_v31 = vld [vmem:[%s709_s1 + $0x80] sm:$0xff]  }
   0xd   :  { %495 = vmatpush3.bf16.msra.mxu1 %v529_v11  ;;  %468 = vmatprep.subr.bf16.mxu0 %v530_v12  ;;  %v550_v32 = vld [vmem:[%s710_s0] ss:$16 sps:$4 sm:$0xff]   ;;  %v552_v33 = vld [vmem:[%s710_s0 + $0x4] ss:$16 sps:$4 sm:$0xff]   ;;  %v553_v34 = vld [vmem:[%s710_s0 + $0x8] ss:$16 sps:$4 sm:$0xff]  }
   0xe   :  { %496 = vmatprep.subr.bf16.mxu1 %v531_v13  ;;  %v555_v35 = vld [vmem:[%s710_s0 + $0xc] ss:$16 sps:$4 sm:$0xff]   ;;  %348 = vmatprep.mubr.bf16.mxu0 %v552_v33  ;;  %v556_v36 = vld [vmem:[%s710_s0 + $0x24] ss:$16 sps:$4 sm:$0xff]   ;;  %v560_v38 = vld [vmem:[%s710_s0 + $0x20] ss:$16 sps:$4 sm:$0xff]  }
   0xf   :  { %397 = vmatprep.mubr.bf16.mxu1 %v555_v35  ;;  %v558_v37 = vld [vmem:[%s710_s0 + $0x2c] ss:$16 sps:$4 sm:$0xff]   ;;  %v561_v39 = vld [vmem:[%s710_s0 + $0x28] ss:$16 sps:$4 sm:$0xff]  }
  0x10   :  { %469 = vmatpush3.bf16.msra.mxu0 %v532_v14 }
  0x11   :  { %497 = vmatpush3.bf16.msra.mxu1 %v533_v15  ;;  %470 = vmatprep.subr.bf16.mxu0 %v534_v16 }
  0x12   :  { %498 = vmatprep.subr.bf16.mxu1 %v535_v17 }
  0x14   :  { %471 = vmatpush3.bf16.msra.mxu0 %v536_v18 }
  0x15   :  { %499 = vmatpush3.bf16.msra.mxu1 %v537_v19  ;;  %472 = vmatprep.subr.bf16.mxu0 %v538_v20 }
  0x16   :  { %500 = vmatprep.subr.bf16.mxu1 %v539_v21 }
  0x18   :  { %473 = vmatpush3.bf16.msra.mxu0 %v540_v22 }
  0x19   :  { %501 = vmatpush3.bf16.msra.mxu1 %v541_v23  ;;  %474 = vmatprep.subr.bf16.mxu0 %v542_v24 }
  0x1a   :  { %502 = vmatprep.subr.bf16.mxu1 %v543_v25 }
  0x1c   :  { %475 = vmatpush3.bf16.msra.mxu0 %v544_v26 }
  0x1d   :  { %503 = vmatpush3.bf16.msra.mxu1 %v545_v27  ;;  %476 = vmatprep.subr.bf16.mxu0 %v546_v28 }
  0x1e   :  { %504 = vmatprep.subr.bf16.mxu1 %v547_v29 }
  0x20   :  { %477 = vmatpush3.bf16.msra.mxu0 %v548_v30 }
  0x21   :  { %505 = vmatpush3.bf16.msra.mxu1 %v549_v31 }
  0x23   :  { %349 = vmatmul.mubr.bf16.vlgmr.msra.gmra.mxu0 %v550_v32 }
  0x24   :  { %398 = vmatmul.mubr.bf16.vlgmr.msra.gmra.mxu1 %v553_v34  ;;  %356 = vmatprep.mubr.bf16.mxu0 %v556_v36 }
  0x25   :  { %405 = vmatprep.mubr.bf16.mxu1 %v558_v37 }
  0x2b   :  { %357 = vmatmul.mubr.bf16.gmra.mxu0 %v560_v38 }
  0x2c   :  { %406 = vmatmul.mubr.bf16.gmra.mxu1 %v561_v39 }
  0xe3   :  { %v478_v40 = vpop.f32.mrf.mxu0 }
  0xe4   :  { %v506_v41 = vpop.f32.mrf.mxu1 }
  0xe5   :  { %v479_v42 = vpop.f32.mrf.mxu0 }
  0xe6   :  { %v480_v43 = vadd.f32 %v479_v42, %v478_v40  ;;  %v507_v44 = vpop.f32.mrf.mxu1 }
  0xe7   :  { %v508_v45 = vadd.f32 %v507_v44, %v506_v41  ;;  %v481_v46 = vpop.f32.mrf.mxu0 }
  0xe8   :  { %v509_v47 = vpop.f32.mrf.mxu1 }
  0xe9   :  { %v400_v48 = vadd.f32 %v508_v45, %v480_v43  ;;  %v482_v49 = vpop.f32.mrf.mxu0 }
  0xea   :  { %v483_v50 = vadd.f32 %v482_v49, %v481_v46  ;;  %v510_v51 = vpop.f32.mrf.mxu1 }
  0xeb   :  { %414 = vst [vmem:[%s711_s2] sm:$0xff] %v400_v48  ;;  %v511_v52 = vadd.f32 %v510_v51, %v509_v47  ;;  %v484_v53 = vpop.f32.mrf.mxu0 }
  0xec   :  { %v512_v54 = vpop.f32.mrf.mxu1 }
  0xed   :  { %v403_v55 = vadd.f32 %v511_v52, %v483_v50  ;;  %v485_v56 = vpop.f32.mrf.mxu0 }
  0xee   :  { %v486_v57 = vadd.f32 %v485_v56, %v484_v53  ;;  %v513_v58 = vpop.f32.mrf.mxu1 }
  0xef   :  { %415 = vst [vmem:[%s711_s2 + $0x8] sm:$0xff] %v403_v55  ;;  %v514_v59 = vadd.f32 %v513_v58, %v512_v54  ;;  %v487_v60 = vpop.f32.mrf.mxu0 }
  0xf0   :  { %v515_v61 = vpop.f32.mrf.mxu1 }
  0xf1   :  { %v408_v62 = vadd.f32 %v514_v59, %v486_v57  ;;  %v488_v63 = vpop.f32.mrf.mxu0 }
  0xf2   :  { %v489_v0 = vadd.f32 %v488_v63, %v487_v60  ;;  %v516_v1 = vpop.f32.mrf.mxu1 }
  0xf3   :  { %416 = vst [vmem:[%s711_s2 + $0x10] sm:$0xff] %v408_v62  ;;  %v517_v2 = vadd.f32 %v516_v1, %v515_v61 }
  0xf5   :  { %v411_v3 = vadd.f32 %v517_v2, %v489_v0 }
  0xf7   :  { %417 = vst [vmem:[%s711_s2 + $0x18] sm:$0xff] %v411_v3 }

// kernel: resnet_shard1_forward.122
= control target key start
LH: loop header
LB: loop body
LE: loop exit
PB: predicated region body
PF: predicated region fallthrough
CT: control target
= control target key end

     0   :  { %s1733_s9 = smov 0   ;;  %s2016_s0 = inlined_call_operand.vmem [shape: f32[2,42,128], index: 0, kind: input, shape index: {}]   ;;  %s2017_s1 = inlined_call_operand.vmem [shape: bf16[1152,128], index: 1, kind: input, shape index: {}]   ;;  %s2018_s2 = inlined_call_operand.vmem [shape: f32[2,24,128], index: 2, kind: output, shape index: {}]  }
   0x1 LB: > { %s1277_s10 = sadd.s32 4294967295, %s1716_s9   ;;  %p1281_p0 = scmp.ge.s32.totalorder %s1716_s9, 1  ;;  %s1716_s9 = sphi %s1733_s9, %s12_s9  }
   0x2   : > { %p112_p1 = scmp.lt.s32.totalorder %s1716_s9, 3 }
   0x4   : > { %p113_p2 = pnand %p1281_p0, %p112_p1 }
   0x5   : > { %p134_p3 = scmp.lt.s32.totalorder (!%p113_p2), %s1277_s10, 1 }
   0x6   : > { %116 = sbr.rel (%p113_p2) target bundleno = 374 (0x176), region = 28 }
   0xb   : > { %v1638_v0 = vld [vmem:[%s2017_s1 + $0x78] sm:$0xff]   ;;  %v1640_v2 = vld [vmem:[%s2017_s1 + $0x70] sm:$0xff]   ;;  %v1642_v4 = vld [vmem:[%s2017_s1 + $0x68] sm:$0xff]   ;;  %s2020_s10 = smov (!%p134_p3, %s1277_s10), 1 }
   0xc   : > { %v1639_v1 = vld [vmem:[%s2017_s1 + $0x38] sm:$0xff]   ;;  %1448 = vmatprep.subr.bf16.mxu0 %v1638_v0  ;;  %v1641_v3 = vld [vmem:[%s2017_s1 + $0x30] sm:$0xff]   ;;  %v1643_v5 = vld [vmem:[%s2017_s1 + $0x28] sm:$0xff]   ;;  %s1628_s27 = smul.u32 48, %s2020_s10 }
   0xd   : > { %1468 = vmatprep.subr.bf16.mxu1 %v1639_v1  ;;  %1449 = vmatpush3.bf16.msra.mxu0 %v1638_v0  ;;  %v1644_v6 = vld [vmem:[%s2017_s1 + $0x60] sm:$0xff]   ;;  %v1646_v8 = vld [vmem:[%s2017_s1 + $0x58] sm:$0xff]   ;;  %v1648_v10 = vld [vmem:[%s2017_s1 + $0x50] sm:$0xff]  }
   0xe   : > { %1469 = vmatpush3.bf16.msra.mxu1 %v1639_v1  ;;  %1450 = vmatprep.subr.bf16.mxu0 %v1640_v2  ;;  %v1645_v7 = vld [vmem:[%s2017_s1 + $0x20] sm:$0xff]   ;;  %v1647_v9 = vld [vmem:[%s2017_s1 + $0x18] sm:$0xff]   ;;  %s1777_s6 = scalar_lea.vmem %s2016_s0, %s1628_s27  ;;  %v1649_v14 = vld [vmem:[%s2017_s1 + $0x10] sm:$0xff]  }
   0xf   : > { %1470 = vmatprep.subr.bf16.mxu1 %v1641_v3  ;;  %v166_v11 = vld [vmem:[%s1777_s6 + $0x1] sm:$0xff]  ;;  %v167_v12 = vld [vmem:[%s1777_s6 + $0x9] sm:$0xff]  ;;  %v168_v22 = vld [vmem:[%s1777_s6 + $0x11] sm:$0xff] }
  0x10   : > { %v145_v13 = vld [vmem:[%s1777_s6] sm:$0xff]  ;;  %v169_v15 = vpack.c.bf16 %v167_v12, %v166_v11  ;;  %v1789_v16 = vld [vmem:[%s1777_s6 + $0x8] sm:$0xff]  ;;  %v1806_v23 = vld [vmem:[%s1777_s6 + $0x10] sm:$0xff]  ;;  %v170_v26 = vpack.c.bf16 %v168_v22, %v168_v22 }
  0x11   : > { %1451 = vmatpush3.bf16.msra.mxu0 %v1640_v2  ;;  %v148_v17 = vpack.c.bf16 %v1789_v16, %v145_v13  ;;  %v1650_v18 = vld [vmem:[%s2017_s1 + $0x48] sm:$0xff]   ;;  %v1652_v20 = vld [vmem:[%s2017_s1 + $0x40] sm:$0xff]   ;;  %v1654_v24 = vld [vmem:[%s2017_s1 + $0xb8] sm:$0xff]   ;;  %v149_v27 = vpack.c.bf16 %v1806_v23, %v1806_v23  ;;  %v742_v60 = vpack.c.bf16 %v1806_v23, %v1789_v16 }
  0x12   : > { %1471 = vmatpush3.bf16.msra.mxu1 %v1641_v3  ;;  %1452 = vmatprep.subr.bf16.mxu0 %v1642_v4  ;;  %v1651_v19 = vld [vmem:[%s2017_s1 + $0x8] sm:$0xff]   ;;  %v1653_v21 = vld [vmem:[%s2017_s1] sm:$0xff]   ;;  %v1655_v25 = vld [vmem:[%s2017_s1 + $0xf8] sm:$0xff]  }
  0x13   : > { %1472 = vmatprep.subr.bf16.mxu1 %v1643_v5  ;;  %1464 = vmatprep.mubr.bf16.mxu0 %v169_v15  ;;  %v1656_v28 = vld [vmem:[%s2017_s1 + $0xb0] sm:$0xff]   ;;  %v379_v30 = vld [vmem:[%s1777_s6 + $0x2] sm:$0xff]  ;;  %v1662_v42 = vld [vmem:[%s2017_s1 + $0x98] sm:$0xff]  }
  0x14   : > { %1484 = vmatprep.mubr.bf16.mxu1 %v148_v17  ;;  %v1657_v29 = vld [vmem:[%s2017_s1 + $0xf0] sm:$0xff]   ;;  %v1658_v32 = vld [vmem:[%s2017_s1 + $0xa8] sm:$0xff]   ;;  %v1660_v40 = vld [vmem:[%s2017_s1 + $0xa0] sm:$0xff]  }
  0x15   : > { %1453 = vmatpush3.bf16.msra.mxu0 %v1642_v4  ;;  %v380_v31 = vld [vmem:[%s1777_s6 + $0xa] sm:$0xff]  ;;  %v1832_v36 = vld [vmem:[%s1777_s6 + $0x16] sm:$0xff]  ;;  %v1661_v41 = vld [vmem:[%s2017_s1 + $0xe0] sm:$0xff]  }
  0x16   : > { %1473 = vmatpush3.bf16.msra.mxu1 %v1643_v5  ;;  %1454 = vmatprep.subr.bf16.mxu0 %v1644_v6  ;;  %v382_v33 = vpack.c.bf16 %v380_v31, %v379_v30  ;;  %v499_v34 = vld [vmem:[%s1777_s6 + $0x6] sm:$0xff]  ;;  %v1829_v35 = vld [vmem:[%s1777_s6 + $0xe] sm:$0xff]  ;;  %v1663_v43 = vld [vmem:[%s2017_s1 + $0xd8] sm:$0xff]   ;;  %v503_v56 = vpack.c.bf16 %v1832_v36, %v1832_v36 }
  0x17   : > { %1474 = vmatprep.subr.bf16.mxu1 %v1645_v7  ;;  %v1659_v37 = vld [vmem:[%s2017_s1 + $0xe8] sm:$0xff]   ;;  %v502_v38 = vpack.c.bf16 %v1829_v35, %v499_v34  ;;  %v1102_v39 = vpack.c.bf16 %v1832_v36, %v1829_v35  ;;  %v1664_v44 = vld [vmem:[%s2017_s1 + $0x90] sm:$0xff]   ;;  %v1668_v48 = vld [vmem:[%s2017_s1 + $0x80] sm:$0xff]  }
  0x18   : > { %v1665_v45 = vld [vmem:[%s2017_s1 + $0xd0] sm:$0xff]   ;;  %v1666_v46 = vld [vmem:[%s2017_s1 + $0x88] sm:$0xff]   ;;  %v1669_v49 = vld [vmem:[%s2017_s1 + $0xc0] sm:$0xff]  }
  0x19   : > { %1455 = vmatpush3.bf16.msra.mxu0 %v1644_v6  ;;  %v1667_v47 = vld [vmem:[%s2017_s1 + $0xc8] sm:$0xff]   ;;  %v381_v50 = vld [vmem:[%s1777_s6 + $0x12] sm:$0xff]  ;;  %v1676_v63 = vld [vmem:[%s2017_s1 + $0x120] sm:$0xff]  }
  0x1a   : > { %1475 = vmatpush3.bf16.msra.mxu1 %v1645_v7  ;;  %1456 = vmatprep.subr.bf16.mxu0 %v1646_v8  ;;  %v1670_v51 = vld [vmem:[%s2017_s1 + $0x138] sm:$0xff]   ;;  %v619_v53 = vld [vmem:[%s1777_s6 + $0x7] sm:$0xff]  ;;  %v383_v54 = vpack.c.bf16 %v381_v50, %v381_v50  ;;  %v620_v55 = vld [vmem:[%s1777_s6 + $0xf] sm:$0xff] }
  0x1b   : > { %1476 = vmatprep.subr.bf16.mxu1 %v1647_v9  ;;  %v1671_v52 = vld [vmem:[%s2017_s1 + $0x178] sm:$0xff]   ;;  %v1672_v57 = vld [vmem:[%s2017_s1 + $0x130] sm:$0xff]   ;;  %v622_v59 = vpack.c.bf16 %v620_v55, %v619_v53  ;;  %v1674_v61 = vld [vmem:[%s2017_s1 + $0x128] sm:$0xff]  }
  0x1c   : > { %v1673_v58 = vld [vmem:[%s2017_s1 + $0x170] sm:$0xff]   ;;  %v1675_v62 = vld [vmem:[%s2017_s1 + $0x168] sm:$0xff]   ;;  %v1677_v0 = vld [vmem:[%s2017_s1 + $0x160] sm:$0xff]  }
  0x1d   : > { %1457 = vmatpush3.bf16.msra.mxu0 %v1646_v8  ;;  %v1678_v1 = vld [vmem:[%s2017_s1 + $0x118] sm:$0xff]   ;;  %v1680_v3 = vld [vmem:[%s2017_s1 + $0x110] sm:$0xff]   ;;  %v1682_v5 = vld [vmem:[%s2017_s1 + $0x108] sm:$0xff]  }
  0x1e   : > { %1477 = vmatpush3.bf16.msra.mxu1 %v1647_v9  ;;  %1458 = vmatprep.subr.bf16.mxu0 %v1648_v10  ;;  %v1679_v2 = vld [vmem:[%s2017_s1 + $0x158] sm:$0xff]   ;;  %v1681_v4 = vld [vmem:[%s2017_s1 + $0x150] sm:$0xff]   ;;  %v1683_v6 = vld [vmem:[%s2017_s1 + $0x148] sm:$0xff]  }
  0x1f   : > { %1478 = vmatprep.subr.bf16.mxu1 %v1649_v14  ;;  %v1684_v7 = vld [vmem:[%s2017_s1 + $0x100] sm:$0xff]   ;;  %v621_v9 = vld [vmem:[%s1777_s6 + $0x17] sm:$0xff]  ;;  %v979_v17 = vld [vmem:[%s1777_s6 + $0xd] sm:$0xff] }
  0x20   : > { %v1685_v8 = vld [vmem:[%s2017_s1 + $0x140] sm:$0xff]   ;;  %v741_v11 = vld [vmem:[%s1777_s6 + $0x18] sm:$0xff]  ;;  %v623_v13 = vpack.c.bf16 %v621_v9, %v621_v9  ;;  %v1690_v23 = vld [vmem:[%s2017_s1 + $0x1a8] sm:$0xff]  }
  0x21   : > { %1459 = vmatpush3.bf16.msra.mxu0 %v1648_v10  ;;  %v1686_v10 = vld [vmem:[%s2017_s1 + $0x1b8] sm:$0xff]   ;;  %v743_v16 = vpack.c.bf16 %v741_v11, %v741_v11  ;;  %v1697_v30 = vld [vmem:[%s2017_s1 + $0x1d0] sm:$0xff]   ;;  %v1698_v31 = vld [vmem:[%s2017_s1 + $0x188] sm:$0xff]  }
  0x22   : > { %1479 = vmatpush3.bf16.msra.mxu1 %v1649_v14  ;;  %1460 = vmatprep.subr.bf16.mxu0 %v1650_v18  ;;  %v1687_v12 = vld [vmem:[%s2017_s1 + $0x1f8] sm:$0xff]   ;;  %v859_v14 = vld [vmem:[%s1777_s6 + $0xc] sm:$0xff]  ;;  %v1701_v34 = vld [vmem:[%s2017_s1 + $0x1c0] sm:$0xff]  }
  0x23   : > { %1480 = vmatprep.subr.bf16.mxu1 %v1651_v19  ;;  %v860_v15 = vld [vmem:[%s1777_s6 + $0x14] sm:$0xff]  ;;  %v1708_v36 = vld [vmem:[%s2017_s1 + $0x208] sm:$0xff]  }
  0x24   : > { %v1707_v35 = vld [vmem:[%s2017_s1 + $0x210] sm:$0xff]  }
  0x25   : > { %1461 = vmatpush3.bf16.msra.mxu0 %v1650_v18  ;;  %v980_v18 = vld [vmem:[%s1777_s6 + $0x15] sm:$0xff] }
  0x26   : > { %1481 = vmatpush3.bf16.msra.mxu1 %v1651_v19  ;;  %1462 = vmatprep.subr.bf16.mxu0 %v1652_v20  ;;  %v1688_v19 = vld [vmem:[%s2017_s1 + $0x1b0] sm:$0xff]   ;;  %v982_v22 = vpack.c.bf16 %v980_v18, %v979_v17 }
  0x27   : > { %1482 = vmatprep.subr.bf16.mxu1 %v1653_v21 }
  0x29   : > { %1463 = vmatpush3.bf16.msra.mxu0 %v1652_v20  ;;  %v1689_v20 = vld [vmem:[%s2017_s1 + $0x1f0] sm:$0xff]  }
  0x2a   : > { %1483 = vmatpush3.bf16.msra.mxu1 %v1653_v21  ;;  %1488 = vmatprep.subr.bf16.mxu0 %v1654_v24  ;;  %v862_v21 = vpack.c.bf16 %v860_v15, %v859_v14 }
  0x2b   : > { %1508 = vmatprep.subr.bf16.mxu1 %v1655_v25 }
  0x2c   : > { %1465 = vmatmul.mubr.bf16.vlgmr.msra.gmra.mxu0 %v170_v26  ;;  %v1693_v26 = vld [vmem:[%s2017_s1 + $0x1e0] sm:$0xff]  }
  0x2d   : > { %1485 = vmatmul.mubr.bf16.vlgmr.msra.gmra.mxu1 %v149_v27  ;;  %1489 = vmatpush3.bf16.msra.mxu0 %v1654_v24  ;;  %v1691_v24 = vld [vmem:[%s2017_s1 + $0x1e8] sm:$0xff]   ;;  %v1694_v27 = vld [vmem:[%s2017_s1 + $0x198] sm:$0xff]  }
  0x2e   : > { %1509 = vmatpush3.bf16.msra.mxu1 %v1655_v25  ;;  %1490 = vmatprep.subr.bf16.mxu0 %v1656_v28  ;;  %v1692_v25 = vld [vmem:[%s2017_s1 + $0x1a0] sm:$0xff]  }
  0x2f   : > { %1510 = vmatprep.subr.bf16.mxu1 %v1657_v29  ;;  %1504 = vmatprep.mubr.bf16.mxu0 %v382_v33  ;;  %v1700_v33 = vld [vmem:[%s2017_s1 + $0x180] sm:$0xff]  }
  0x30   : > { %1524 = vmatprep.mubr.bf16.mxu1 %v502_v38  ;;  %v1702_v38 = vld [vmem:[%s2017_s1 + $0x238] sm:$0xff]  }
  0x31   : > { %1491 = vmatpush3.bf16.msra.mxu0 %v1656_v28  ;;  %v1695_v28 = vld [vmem:[%s2017_s1 + $0x1d8] sm:$0xff]  }
  0x32   : > { %1511 = vmatpush3.bf16.msra.mxu1 %v1657_v29  ;;  %1492 = vmatprep.subr.bf16.mxu0 %v1658_v32  ;;  %v1696_v29 = vld [vmem:[%s2017_s1 + $0x190] sm:$0xff]  }
  0x33   : > { %1512 = vmatprep.subr.bf16.mxu1 %v1659_v37 }
  0x35   : > { %1493 = vmatpush3.bf16.msra.mxu0 %v1658_v32  ;;  %v1699_v32 = vld [vmem:[%s2017_s1 + $0x1c8] sm:$0xff]  }
  0x36   : > { %1513 = vmatpush3.bf16.msra.mxu1 %v1659_v37  ;;  %1494 = vmatprep.subr.bf16.mxu0 %v1660_v40  ;;  %v861_v37 = vld [vmem:[%s1777_s6 + $0x1c] sm:$0xff] }
  0x37   : > { %1514 = vmatprep.subr.bf16.mxu1 %v1661_v41 }
  0x39   : > { %1495 = vmatpush3.bf16.msra.mxu0 %v1660_v40  ;;  %v981_v40 = vld [vmem:[%s1777_s6 + $0x1d] sm:$0xff] }
  0x3a   : > { %1515 = vmatpush3.bf16.msra.mxu1 %v1661_v41  ;;  %1496 = vmatprep.subr.bf16.mxu0 %v1662_v42  ;;  %v863_v41 = vpack.c.bf16 %v861_v37, %v861_v37 }
  0x3b   : > { %1516 = vmatprep.subr.bf16.mxu1 %v1663_v43 }
  0x3d   : > { %1497 = vmatpush3.bf16.msra.mxu0 %v1662_v42  ;;  %v983_v42 = vpack.c.bf16 %v981_v40, %v981_v40 }
  0x3e   : > { %1517 = vmatpush3.bf16.msra.mxu1 %v1663_v43  ;;  %1498 = vmatprep.subr.bf16.mxu0 %v1664_v44  ;;  %v1703_v43 = vld [vmem:[%s2017_s1 + $0x230] sm:$0xff]  }
  0x3f   : > { %1518 = vmatprep.subr.bf16.mxu1 %v1665_v45 }
  0x41   : > { %1499 = vmatpush3.bf16.msra.mxu0 %v1664_v44  ;;  %v1704_v44 = vld [vmem:[%s2017_s1 + $0x228] sm:$0xff]  }
  0x42   : > { %1519 = vmatpush3.bf16.msra.mxu1 %v1665_v45  ;;  %1500 = vmatprep.subr.bf16.mxu0 %v1666_v46  ;;  %v1705_v45 = vld [vmem:[%s2017_s1 + $0x220] sm:$0xff]  }
  0x43   : > { %1520 = vmatprep.subr.bf16.mxu1 %v1667_v47 }
  0x45   : > { %1501 = vmatpush3.bf16.msra.mxu0 %v1666_v46  ;;  %v1706_v46 = vld [vmem:[%s2017_s1 + $0x218] sm:$0xff]  }
  0x46   : > { %1521 = vmatpush3.bf16.msra.mxu1 %v1667_v47  ;;  %1502 = vmatprep.subr.bf16.mxu0 %v1668_v48  ;;  %v1101_v47 = vld [vmem:[%s1777_s6 + $0x1e] sm:$0xff]  ;;  %s1629_s6 = smul.u32 24, %s2020_s10 }
  0x47   : > { %1522 = vmatprep.subr.bf16.mxu1 %v1669_v49 }
  0x48   : > { %s143_s8 = scalar_lea.vmem %s2018_s2, %s1629_s6 }
  0x49   : > { %1503 = vmatpush3.bf16.msra.mxu0 %v1668_v48  ;;  %v1103_v48 = vpack.c.bf16 %v1101_v47, %v1101_v47 }
  0x4a   : > { %1523 = vmatpush3.bf16.msra.mxu1 %v1669_v49  ;;  %1528 = vmatprep.subr.bf16.mxu0 %v1670_v51 }
  0x4b   : > { %1548 = vmatprep.subr.bf16.mxu1 %v1671_v52 }
  0x4c   : > { %1505 = vmatmul.mubr.bf16.vlgmr.msra.gmra.mxu0 %v383_v54 }
  0x4d   : > { %1529 = vmatpush3.bf16.msra.mxu0 %v1670_v51  ;;  %1525 = vmatmul.mubr.bf16.vlgmr.msra.gmra.mxu1 %v503_v56 }
  0x4e   : > { %1549 = vmatpush3.bf16.msra.mxu1 %v1671_v52  ;;  %1530 = vmatprep.subr.bf16.mxu0 %v1672_v57 }
  0x4f   : > { %1550 = vmatprep.subr.bf16.mxu1 %v1673_v58  ;;  %1544 = vmatprep.mubr.bf16.mxu0 %v622_v59 }
  0x50   : > { %1564 = vmatprep.mubr.bf16.mxu1 %v742_v60 }
  0x51   : > { %1531 = vmatpush3.bf16.msra.mxu0 %v1672_v57 }
  0x52   : > { %1551 = vmatpush3.bf16.msra.mxu1 %v1673_v58  ;;  %1532 = vmatprep.subr.bf16.mxu0 %v1674_v61 }
  0x53   : > { %1552 = vmatprep.subr.bf16.mxu1 %v1675_v62 }
  0x55   : > { %1533 = vmatpush3.bf16.msra.mxu0 %v1674_v61 }
  0x56   : > { %1553 = vmatpush3.bf16.msra.mxu1 %v1675_v62  ;;  %1534 = vmatprep.subr.bf16.mxu0 %v1676_v63 }
  0x57   : > { %1554 = vmatprep.subr.bf16.mxu1 %v1677_v0 }
  0x59   : > { %1535 = vmatpush3.bf16.msra.mxu0 %v1676_v63 }
  0x5a   : > { %1555 = vmatpush3.bf16.msra.mxu1 %v1677_v0  ;;  %1536 = vmatprep.subr.bf16.mxu0 %v1678_v1 }
  0x5b   : > { %1556 = vmatprep.subr.bf16.mxu1 %v1679_v2 }
  0x5d   : > { %1537 = vmatpush3.bf16.msra.mxu0 %v1678_v1 }
  0x5e   : > { %1557 = vmatpush3.bf16.msra.mxu1 %v1679_v2  ;;  %1538 = vmatprep.subr.bf16.mxu0 %v1680_v3 }
  0x5f   : > { %1558 = vmatprep.subr.bf16.mxu1 %v1681_v4 }
  0x61   : > { %1539 = vmatpush3.bf16.msra.mxu0 %v1680_v3 }
  0x62   : > { %1559 = vmatpush3.bf16.msra.mxu1 %v1681_v4  ;;  %1540 = vmatprep.subr.bf16.mxu0 %v1682_v5 }
  0x63   : > { %1560 = vmatprep.subr.bf16.mxu1 %v1683_v6 }
  0x65   : > { %1541 = vmatpush3.bf16.msra.mxu0 %v1682_v5 }
  0x66   : > { %1561 = vmatpush3.bf16.msra.mxu1 %v1683_v6  ;;  %1542 = vmatprep.subr.bf16.mxu0 %v1684_v7 }
  0x67   : > { %1562 = vmatprep.subr.bf16.mxu1 %v1685_v8 }
  0x69   : > { %1543 = vmatpush3.bf16.msra.mxu0 %v1684_v7 }
  0x6a   : > { %1563 = vmatpush3.bf16.msra.mxu1 %v1685_v8  ;;  %1568 = vmatprep.subr.bf16.mxu0 %v1686_v10 }
  0x6b   : > { %1588 = vmatprep.subr.bf16.mxu1 %v1687_v12 }
  0x6c   : > { %1545 = vmatmul.mubr.bf16.vlgmr.msra.gmra.mxu0 %v623_v13 }
  0x6d   : > { %1569 = vmatpush3.bf16.msra.mxu0 %v1686_v10  ;;  %1565 = vmatmul.mubr.bf16.vlgmr.msra.gmra.mxu1 %v743_v16 }
  0x6e   : > { %1589 = vmatpush3.bf16.msra.mxu1 %v1687_v12  ;;  %1570 = vmatprep.subr.bf16.mxu0 %v1688_v19 }
  0x6f   : > { %1590 = vmatprep.subr.bf16.mxu1 %v1689_v20  ;;  %1584 = vmatprep.mubr.bf16.mxu0 %v862_v21 }
  0x70   : > { %1604 = vmatprep.mubr.bf16.mxu1 %v982_v22 }
  0x71   : > { %1571 = vmatpush3.bf16.msra.mxu0 %v1688_v19 }
  0x72   : > { %1591 = vmatpush3.bf16.msra.mxu1 %v1689_v20  ;;  %1572 = vmatprep.subr.bf16.mxu0 %v1690_v23 }
  0x73   : > { %1592 = vmatprep.subr.bf16.mxu1 %v1691_v24 }
  0x75   : > { %1573 = vmatpush3.bf16.msra.mxu0 %v1690_v23 }
  0x76   : > { %1593 = vmatpush3.bf16.msra.mxu1 %v1691_v24  ;;  %1574 = vmatprep.subr.bf16.mxu0 %v1692_v25 }
  0x77   : > { %1594 = vmatprep.subr.bf16.mxu1 %v1693_v26 }
  0x79   : > { %1575 = vmatpush3.bf16.msra.mxu0 %v1692_v25 }
  0x7a   : > { %1595 = vmatpush3.bf16.msra.mxu1 %v1693_v26  ;;  %1576 = vmatprep.subr.bf16.mxu0 %v1694_v27 }
  0x7b   : > { %1596 = vmatprep.subr.bf16.mxu1 %v1695_v28 }
  0x7d   : > { %1577 = vmatpush3.bf16.msra.mxu0 %v1694_v27 }
  0x7e   : > { %1597 = vmatpush3.bf16.msra.mxu1 %v1695_v28  ;;  %1578 = vmatprep.subr.bf16.mxu0 %v1696_v29 }
  0x7f   : > { %1598 = vmatprep.subr.bf16.mxu1 %v1697_v30 }
  0x81   : > { %1579 = vmatpush3.bf16.msra.mxu0 %v1696_v29 }
  0x82   : > { %1599 = vmatpush3.bf16.msra.mxu1 %v1697_v30  ;;  %1580 = vmatprep.subr.bf16.mxu0 %v1698_v31 }
  0x83   : > { %1600 = vmatprep.subr.bf16.mxu1 %v1699_v32 }
  0x85   : > { %1581 = vmatpush3.bf16.msra.mxu0 %v1698_v31 }
  0x86   : > { %1601 = vmatpush3.bf16.msra.mxu1 %v1699_v32  ;;  %1582 = vmatprep.subr.bf16.mxu0 %v1700_v33 }
  0x87   : > { %1602 = vmatprep.subr.bf16.mxu1 %v1701_v34 }
  0x89   : > { %1583 = vmatpush3.bf16.msra.mxu0 %v1700_v33 }
  0x8a   : > { %1603 = vmatpush3.bf16.msra.mxu1 %v1701_v34  ;;  %1608 = vmatprep.subr.bf16.mxu0 %v1702_v38 }
  0x8c   : > { %1585 = vmatmul.mubr.bf16.vlgmr.msra.gmra.mxu0 %v863_v41 }
  0x8d   : > { %1609 = vmatpush3.bf16.msra.mxu0 %v1702_v38  ;;  %1605 = vmatmul.mubr.bf16.vlgmr.msra.gmra.mxu1 %v983_v42 }
  0x8e   : > { %1610 = vmatprep.subr.bf16.mxu0 %v1703_v43  ;;  %1624 = vmatprep.mubr.bf16.mxu0 %v1102_v39  ;;  %v1709_v39 = vld [vmem:[%s2017_s1 + $0x200] sm:$0xff]  }
  0x91   : > { %1611 = vmatpush3.bf16.msra.mxu0 %v1703_v43 }
  0x92   : > { %1612 = vmatprep.subr.bf16.mxu0 %v1704_v44 }
  0x95   : > { %1613 = vmatpush3.bf16.msra.mxu0 %v1704_v44 }
  0x96   : > { %1614 = vmatprep.subr.bf16.mxu0 %v1705_v45 }
  0x99   : > { %1615 = vmatpush3.bf16.msra.mxu0 %v1705_v45 }
  0x9a   : > { %1616 = vmatprep.subr.bf16.mxu0 %v1706_v46 }
  0x9d   : > { %1617 = vmatpush3.bf16.msra.mxu0 %v1706_v46 }
  0x9e   : > { %1618 = vmatprep.subr.bf16.mxu0 %v1707_v35 }
  0xa1   : > { %1619 = vmatpush3.bf16.msra.mxu0 %v1707_v35 }
  0xa2   : > { %1620 = vmatprep.subr.bf16.mxu0 %v1708_v36 }
  0xa5   : > { %1621 = vmatpush3.bf16.msra.mxu0 %v1708_v36 }
  0xa6   : > { %1622 = vmatprep.subr.bf16.mxu0 %v1709_v39 }
  0xa9   : > { %1623 = vmatpush3.bf16.msra.mxu0 %v1709_v39 }
  0xac   : > { %1625 = vmatmul.mubr.bf16.vlgmr.msra.gmra.mxu0 %v1103_v48 }
  0xec   : > { %v1466_v49 = vpop.f32.mrf.mxu0 }
  0xed   : > { %v1486_v50 = vpop.f32.mrf.mxu1 }
  0xee   : > { %v374_v51 = vadd.f32 %v1486_v50, %v1466_v49  ;;  %v269_v52 = vpop.f32.mrf.mxu0 }
  0xef   : > { %v365_v53 = vpop.f32.mrf.mxu1 }
  0xf0   : > { %v366_v54 = vadd.f32 %v365_v53, %v269_v52  ;;  %v1467_v55 = vpop.f32.mrf.mxu0 }
  0xf1   : > { %v1487_v56 = vpop.f32.mrf.mxu1 }
  0xf2   : > { %v272_v57 = vpop.f32.mrf.mxu0 }
  0xf3   : > { %v368_v58 = vpop.f32.mrf.mxu1 }
  0xf4   : > { %v369_v59 = vadd.f32 %v368_v58, %v272_v57 }
 0x10c   : > { %v1506_v60 = vpop.f32.mrf.mxu0 }
 0x10d   : > { %v498_v61 = vadd.f32 %v1506_v60, %v374_v51  ;;  %v1526_v62 = vpop.f32.mrf.mxu1 }
 0x10e   : > { %v482_v63 = vpop.f32.mrf.mxu0 }
 0x10f   : > { %v496_v0 = vadd.f32 %v482_v63, %v366_v54  ;;  %v618_v1 = vadd.f32 %v1526_v62, %v498_v61  ;;  %v602_v2 = vpop.f32.mrf.mxu1 }
 0x110   : > { %v1507_v3 = vpop.f32.mrf.mxu0 }
 0x111   : > { %v616_v4 = vadd.f32 %v602_v2, %v496_v0  ;;  %v1527_v5 = vpop.f32.mrf.mxu1 }
 0x112   : > { %v485_v6 = vpop.f32.mrf.mxu0 }
 0x113   : > { %v605_v7 = vpop.f32.mrf.mxu1  ;;  %v497_v22 = vadd.f32 %v485_v6, %v369_v59 }
 0x115   : > { %v617_v25 = vadd.f32 %v605_v7, %v497_v22 }
 0x12c   : > { %v1546_v8 = vpop.f32.mrf.mxu0 }
 0x12d   : > { %v1566_v9 = vpop.f32.mrf.mxu1  ;;  %v738_v23 = vadd.f32 %v1546_v8, %v618_v1 }
 0x12e   : > { %v722_v10 = vpop.f32.mrf.mxu0 }
 0x12f   : > { %v842_v11 = vpop.f32.mrf.mxu1  ;;  %v736_v24 = vadd.f32 %v722_v10, %v616_v4  ;;  %v858_v26 = vadd.f32 %v1566_v9, %v738_v23 }
 0x130   : > { %v1547_v12 = vpop.f32.mrf.mxu0 }
 0x131   : > { %v1567_v13 = vpop.f32.mrf.mxu1  ;;  %v856_v27 = vadd.f32 %v842_v11, %v736_v24 }
 0x132   : > { %v725_v14 = vpop.f32.mrf.mxu0 }
 0x133   : > { %v845_v15 = vpop.f32.mrf.mxu1  ;;  %v737_v28 = vadd.f32 %v725_v14, %v617_v25 }
 0x135   : > { %v857_v32 = vadd.f32 %v845_v15, %v737_v28 }
 0x14c   : > { %v1586_v16 = vpop.f32.mrf.mxu0 }
 0x14d   : > { %v1606_v17 = vpop.f32.mrf.mxu1  ;;  %v978_v29 = vadd.f32 %v1586_v16, %v858_v26 }
 0x14e   : > { %v962_v18 = vpop.f32.mrf.mxu0 }
 0x14f   : > { %v1082_v19 = vpop.f32.mrf.mxu1  ;;  %v976_v30 = vadd.f32 %v962_v18, %v856_v27  ;;  %v1098_v33 = vadd.f32 %v1606_v17, %v978_v29 }
 0x150   : > { %v1587_v20 = vpop.f32.mrf.mxu0 }
 0x151   : > { %v1607_v21 = vpop.f32.mrf.mxu1  ;;  %v1096_v37 = vadd.f32 %v1082_v19, %v976_v30 }
 0x152   : > { %v965_v31 = vpop.f32.mrf.mxu0 }
 0x153   : > { %v977_v38 = vadd.f32 %v965_v31, %v857_v32  ;;  %v1085_v41 = vpop.f32.mrf.mxu1 }
 0x155   : > { %v1097_v45 = vadd.f32 %v1085_v41, %v977_v38 }
 0x16c   : > { %v1626_v34 = vpop.f32.mrf.mxu0 }
 0x16d   : > { %v1218_v40 = vadd.f32 %v1626_v34, %v1098_v33 }
 0x16e   : > { %v1202_v42 = vpop.f32.mrf.mxu0 }
 0x16f   : > { %1221 = vst [vmem:[%s143_s8 + $0x10] sm:$0xff] %v1218_v40  ;;  %v1216_v43 = vadd.f32 %v1202_v42, %v1096_v37 }
 0x170   : > { %v1627_v44 = vpop.f32.mrf.mxu0 }
 0x171   : > { %1219 = vst [vmem:[%s143_s8] sm:$0xff] %v1216_v43 }
 0x172   : > { %v1205_v46 = vpop.f32.mrf.mxu0 }
 0x173   : > { %v1217_v35 = vadd.f32 %v1205_v46, %v1097_v45 }
 0x175   : > { %1220 = vst [vmem:[%s143_s8 + $0x8] sm:$0xff] %v1217_v35 }
 0x176 PF: > { %s12_s9 = sadd.s32 1, %s1716_s9  }
 0x177   : > { %p9_p4 = scmp.ge.s32.totalorder %s12_s9, 4  }
 0x179   :  { %11 = sbr.rel (!%p9_p4) target bundleno = 1 (0x1), region = 58 }

</bundles_post_ra>
